<compile_context>
chip_gen: v6e
topology: v6e:2x2x1
jax: 0.10.0
libtpu: 0.0.40
codegen_flags: <defaults>
</compile_context>

<pallas_src>
import functools

import jax
import jax.numpy as jnp
from jax.experimental import pallas as pl
from jax.experimental.pallas import tpu as pltpu


def _round_up(x, m):
    return (x + m - 1) // m * m


def _tensorcores_per_chip():
    """2 TensorCores only on v7x; v5e/v6e are single-TC.  Fail safe to 1."""
    try:
        kind = jax.devices()[0].device_kind.lower()
    except Exception:
        return 1
    return 2 if ("v7" in kind or "7x" in kind) else 1


_NUM_TC = _tensorcores_per_chip()


def _choose_split(m):
    """(num_blocks, block_cols) for the lane/M axis.

    Single block on single-TC chips (v5e/v6e): no parallelism to gain, the
    extra grid step is pure overhead.  On v7x, split 2-way into 128-aligned
    blocks only when there is enough work (M >= 512) for both cores.
    """
    if _NUM_TC >= 2 and m >= 512:
        tm = _round_up((m + 1) // 2, 128)
        return 2, tm
    return 1, m


def _epilogue(acc_f32, bias_f32, act):
    y = acc_f32 + bias_f32            # f32 on purpose (v5e has no bf16 VPU/EUP)
    if act == "relu":
        y = jnp.maximum(y, 0.0)
    elif act == "gelu":
        y = jax.nn.gelu(y)            # tanh approx (exact-erf differs slightly)
    return y


# ----------------------------------------------------------------------------
# Pallas kernel 1: transposed GEMM with fused bias + activation.
#   out[Cout, M] = act(W^T[Cout, K] @ patches[K, M] + bias)
# Used by the backbone patch convs (non-overlapping windows => no im2col blowup).
# ----------------------------------------------------------------------------
def _gemm_kernel(w_ref, x_ref, b_ref, o_ref, *, act):
    acc = jnp.dot(w_ref[...], x_ref[...], preferred_element_type=jnp.float32)
    o_ref[...] = _epilogue(acc, b_ref[...], act).astype(o_ref.dtype)


def _gemm_bias_act(wt, patches, bias, act, out_dtype=jnp.bfloat16):
    """wt:[Cout,K] bf16, patches:[K,M] bf16, bias:[Cout] f32 -> [Cout,M]."""
    Cout, K = wt.shape
    K2, M = patches.shape
    assert K == K2
    G, tm = _choose_split(M)
    Mpad = G * tm
    if Mpad != M:
        patches = jnp.pad(patches, ((0, 0), (0, Mpad - M)))
    bias2d = bias.astype(jnp.float32).reshape(Cout, 1)

    flops = 2 * Cout * K * Mpad
    transc = Cout * Mpad if act == "gelu" else 0
    bytes_acc = wt.size * 2 + patches.size * 2 + Cout * 4 + Cout * Mpad * 2

    out = pl.pallas_call(
        functools.partial(_gemm_kernel, act=act),
        out_shape=jax.ShapeDtypeStruct((Cout, Mpad), out_dtype),
        grid=(G,),
        in_specs=[
            pl.BlockSpec((Cout, K), lambda i: (0, 0)),   # whole weight matrix
            pl.BlockSpec((K, tm), lambda i: (0, i)),     # M-tile of patches
            pl.BlockSpec((Cout, 1), lambda i: (0, 0)),   # bias column
        ],
        out_specs=pl.BlockSpec((Cout, tm), lambda i: (0, i)),
        compiler_params=pltpu.CompilerParams(dimension_semantics=("parallel",)),
        cost_estimate=pl.CostEstimate(flops=flops, transcendentals=transc,
                                      bytes_accessed=bytes_acc),
    )(wt, patches, bias2d)
    return out[:, :M] if Mpad != M else out


# ----------------------------------------------------------------------------
# Pallas kernel 2: fused-im2col 3x3 / stride-1 / pad-1 conv.
# The padded activation is passed flat ([Cin, B*Hp*Wp]); each of the 9 taps is
# a static lane-offset slice of that single VMEM operand and contributes one
# small MXU matmul into an f32 accumulator.  Output columns are flat padded
# positions; the wrapper slices out the valid H x W window afterwards.
# ----------------------------------------------------------------------------
def _tap_conv_kernel(x_ref, w_ref, b_ref, o_ref, *, taps, tm, split, act):
    base = pl.program_id(0) * tm if split else 0
    acc = None
    for t, off in enumerate(taps):                      # 9 static taps, unrolled
        part = jnp.dot(w_ref[t], x_ref[:, pl.ds(base + off, tm)],
                       preferred_element_type=jnp.float32)
        acc = part if acc is None else acc + part
    o_ref[...] = _epilogue(acc, b_ref[...], act).astype(o_ref.dtype)


def conv3x3_same(x, wt, b, act="relu", out_dtype=jnp.bfloat16):
    """x:[Cin,B,H,W], wt:[9,Cout,Cin] (tap-major, transposed), b:[Cout].

    Returns [Cout,B,H,W].  im2col is fused in-kernel (no patch tensor in HBM).
    """
    Cin, B, H, W = x.shape
    KK, Cout, Cin2 = wt.shape
    assert KK == 9 and Cin2 == Cin
    Hp, Wp = H + 2, W + 2
    xp = jnp.pad(x.astype(jnp.bfloat16), ((0, 0), (0, 0), (1, 1), (1, 1)))
    L = B * Hp * Wp
    taps = tuple(i * Wp + j for i in range(3) for j in range(3))
    max_off = taps[-1]
    M = L - max_off                       # covers every valid flat output position
    G, tm = _choose_split(M)
    Mpad = G * tm
    Lneed = Mpad + max_off
    x_flat = xp.reshape(Cin, L)
    if Lneed > L:
        x_flat = jnp.pad(x_flat, ((0, 0), (0, Lneed - L)))
    bias2d = b.astype(jnp.float32).reshape(Cout, 1)

    flops = 2 * Cout * Cin * Mpad * 9
    bytes_acc = x_flat.size * 2 + wt.size * 2 + Cout * 4 + Cout * Mpad * 2

    out_flat = pl.pallas_call(
        functools.partial(_tap_conv_kernel, taps=taps, tm=tm,
                          split=(G > 1), act=act),
        out_shape=jax.ShapeDtypeStruct((Cout, Mpad), out_dtype),
        grid=(G,),
        in_specs=[
            pl.BlockSpec((Cin, Lneed), lambda i: (0, 0)),      # whole activation
            pl.BlockSpec((KK, Cout, Cin), lambda i: (0, 0, 0)),  # all tap weights
            pl.BlockSpec((Cout, 1), lambda i: (0, 0)),         # bias column
        ],
        out_specs=pl.BlockSpec((Cout, tm), lambda i: (0, i)),
        compiler_params=pltpu.CompilerParams(dimension_semantics=("parallel",)),
        cost_estimate=pl.CostEstimate(flops=flops, transcendentals=0,
                                      bytes_accessed=bytes_acc),
    )(x_flat, wt, bias2d)

    # Flat padded positions -> [Cout, B, Hp, Wp]; keep the valid H x W window
    # (columns past the valid region mix pixels across row/image seams).
    out_full = jnp.pad(out_flat[:, :M], ((0, 0), (0, max_off)))
    return out_full.reshape(Cout, B, Hp, Wp)[:, :, :H, :W]


# ----------------------------------------------------------------------------
# Backbone patch conv (kxk, stride k, pad 0): non-overlapping windows, so the
# "im2col" is a reshape/transpose with no data expansion, then one GEMM call.
# ----------------------------------------------------------------------------
def conv_patch(x, p, k, act="gelu"):
    Cin, B, H, W = x.shape
    Ho, Wo = H // k, W // k
    wt, b = p["wt"], p["b"]
    Cout, K = wt.shape
    assert K == k * k * Cin
    x = x.astype(jnp.bfloat16)
    patches = x.reshape(Cin, B, Ho, k, Wo, k)
    patches = jnp.transpose(patches, (3, 5, 0, 1, 2, 4)).reshape(K, B * Ho * Wo)
    out = _gemm_bias_act(wt, patches, b, act=act)
    return out.reshape(Cout, B, Ho, Wo)


def pixel_shuffle_cbhw(x, r):
    """PixelShuffle in [C,B,H,W] layout (matches torch channel ordering)."""
    C, B, H, W = x.shape
    c = C // (r * r)
    x = x.reshape(c, r, r, B, H, W)
    x = jnp.transpose(x, (0, 3, 4, 1, 5, 2))
    return x.reshape(c, B, H * r, W * r)


# ----------------------------------------------------------------------------
# Encoder blocks (layout [C, B, H, W] throughout)
# ----------------------------------------------------------------------------
def up_block(x, p, r):
    # conv3x3 -> PixelShuffle -> (eval-mode BN == identity) -> ReLU.
    # ReLU commutes with the shuffle permutation, so it is fused in the kernel.
    x = conv3x3_same(x, p["wt"], p["b"], act="relu")
    return pixel_shuffle_cbhw(x, r)


def blend_block(x, feat, p):
    x = up_block(x, p["up"], r=2)
    x = jnp.concatenate([x, feat.astype(x.dtype)], axis=0)
    return conv3x3_same(x, p["wt"], p["b"], act="relu")


def backbone(x, params):
    feats = []
    ks = (4,) + (2,) * (len(params) - 1)     # stem /4 then /2 downsamples
    for p, k in zip(params, ks):
        x = conv_patch(x, p, k, act="gelu")
        feats.append(x)
    return feats


def encoder_forward(x_nchw, params):
    """Mirrors Encoder.forward: returns ([encoder_features], out), NCHW f32."""
    x = jnp.transpose(x_nchw, (1, 0, 2, 3)).astype(jnp.bfloat16)   # NCHW -> CBHW
    backbone_features = backbone(x, params["backbone"])
    x = backbone_features.pop()
    encoder_features = []
    for blend_params in params["blend_blocks"]:
        x = blend_block(x, backbone_features.pop(), blend_params)
        encoder_features.append(x)
    out = up_block(x, params["out"], r=4)       # _UpBlock(..., 4, normalize=False)
    to_nchw = lambda t: jnp.transpose(t, (1, 0, 2, 3)).astype(jnp.float32)
    return [to_nchw(f) for f in encoder_features], to_nchw(out)


# ----------------------------------------------------------------------------
# Deterministic parameter construction (synthetic, no checkpoint loading).
# Weights are stored pre-transposed into the kernel orientation (bf16);
# biases are f32.
# ----------------------------------------------------------------------------
def _conv3_params(key, cin, cout):
    kw_, kb_ = jax.random.split(key)
    w = 0.05 * jax.random.normal(kw_, (3, 3, cin, cout), jnp.float32)
    wt = jnp.transpose(w, (0, 1, 3, 2)).reshape(9, cout, cin).astype(jnp.bfloat16)
    b = 0.01 * jax.random.normal(kb_, (cout,), jnp.float32)
    return {"wt": wt, "b": b}


def _patch_conv_params(key, k, cin, cout):
    kw_, kb_ = jax.random.split(key)
    w = 0.05 * jax.random.normal(kw_, (k, k, cin, cout), jnp.float32)
    wt = jnp.transpose(w.reshape(k * k * cin, cout)).astype(jnp.bfloat16)
    b = 0.01 * jax.random.normal(kb_, (cout,), jnp.float32)
    return {"wt": wt, "b": b}


def init_params(key, backbone_chs, features_dim):
    keys = iter(jax.random.split(key, 64))
    # Synthetic frozen backbone: stem /4 then three /2 downsamples.
    bb = [_patch_conv_params(next(keys), 4, 3, backbone_chs[0])]
    for cin, cout in zip(backbone_chs[:-1], backbone_chs[1:]):
        bb.append(_patch_conv_params(next(keys), 2, cin, cout))

    # Blend blocks, mirroring Encoder.__init__.
    feat_dims = list(backbone_chs)
    in_channels = feat_dims.pop()                       # deepest feature chans
    blends = []
    for out_channels, in_channels_feature in zip(features_dim, reversed(feat_dims)):
        blends.append({
            "up": _conv3_params(next(keys), in_channels, out_channels * 4),
            **_conv3_params(next(keys), out_channels + in_channels_feature,
                            out_channels),
        })
        in_channels = out_channels

    out_p = _conv3_params(next(keys), in_channels, features_dim[-1] * 16)
    return {"backbone": bb, "blend_blocks": blends, "out": out_p}


if __name__ == "__main__":
    # Small deterministic config: input [2, 3, 64, 64] (NCHW, like PyTorch),
    # reduced backbone channels [8, 16, 32, 64], features_dim = [32, 16, 8].
    backbone_chs = [8, 16, 32, 64]
    features_dim = [32, 16, 8]

    x = jax.random.normal(jax.random.PRNGKey(0), (2, 3, 64, 64), jnp.float32)
    params = init_params(jax.random.PRNGKey(42), backbone_chs, features_dim)

    fwd = jax.jit(encoder_forward)
    encoder_features, out = fwd(x, params)
    jax.block_until_ready(out)
    for f in encoder_features:
        jax.block_until_ready(f)

    # Shape sanity (matches the reference decoder pyramid): /16, /8, /4, /1.
    assert [f.shape for f in encoder_features] == [
        (2, 32, 4, 4), (2, 16, 8, 8), (2, 8, 16, 16)]
    assert out.shape == (2, 8, 64, 64)
    assert all(bool(jnp.all(jnp.isfinite(f))) for f in encoder_features)
    assert bool(jnp.all(jnp.isfinite(out)))
    print("KERNEL_OK")
</pallas_src>

<mosaic_0001>
module attributes {stable_mosaic.version = 11 : i64} {
  func.func @_gemm_kernel(%arg0: i32, %arg1: memref<8x48xbf16, #tpu.memory_space<vmem>>, %arg2: memref<48x512xbf16, #tpu.memory_space<vmem>>, %arg3: memref<8x1xf32, #tpu.memory_space<vmem>>, %arg4: memref<8x512xbf16, #tpu.memory_space<vmem>>) attributes {dimension_semantics = [#tpu.dimension_semantics<parallel>], iteration_bounds = array<i64: 1>, scalar_prefetch = 0 : i64, scratch_operands = 0 : i64, tpu.core_type = #tpu.core_type<tc>, window_params = [{pipeline_mode = #tpu.pipeline_mode<synchronous>, transform_indices = @transform_0, window_bounds = array<i64: 8, 48>}, {transform_indices = @transform_1, window_bounds = array<i64: 48, 512>}, {pipeline_mode = #tpu.pipeline_mode<synchronous>, transform_indices = @transform_2, window_bounds = array<i64: 8, 1>}, {transform_indices = @transform_3, window_bounds = array<i64: 8, 512>}]} {
    %c0 = arith.constant 0 : index
    %c0_0 = arith.constant 0 : index
    %0 = vector.load %arg1[%c0, %c0_0] : memref<8x48xbf16, #tpu.memory_space<vmem>>, vector<8x48xbf16>
    %c0_1 = arith.constant 0 : index
    %c0_2 = arith.constant 0 : index
    %1 = vector.load %arg2[%c0_1, %c0_2] : memref<48x512xbf16, #tpu.memory_space<vmem>>, vector<48x512xbf16>
    %cst = arith.constant dense<0.000000e+00> : vector<8x512xf32>
    %2 = tpu.matmul %0, %1, %cst {dimension_numbers = #tpu.dot_dimension_numbers<[1], [0], [0], [1], [0, 0, 1, 1], [], []>} : vector<8x48xbf16>, vector<48x512xbf16>, vector<8x512xf32> -> vector<8x512xf32>
    %c0_3 = arith.constant 0 : index
    %c0_4 = arith.constant 0 : index
    %3 = vector.load %arg3[%c0_3, %c0_4] : memref<8x1xf32, #tpu.memory_space<vmem>>, vector<8x1xf32>
    %4 = vector.broadcast %3 : vector<8x1xf32> to vector<8x512xf32>
    %5 = arith.addf %2, %4 : vector<8x512xf32>
    %6 = arith.mulf %5, %5 : vector<8x512xf32>
    %7 = arith.mulf %5, %6 : vector<8x512xf32>
    %cst_5 = arith.constant 4.471500e-02 : f32
    %8 = vector.broadcast %cst_5 : f32 to vector<8x512xf32>
    %9 = arith.mulf %8, %7 : vector<8x512xf32>
    %10 = arith.addf %5, %9 : vector<8x512xf32>
    %cst_6 = arith.constant 0.797884583 : f32
    %11 = vector.broadcast %cst_6 : f32 to vector<8x512xf32>
    %12 = arith.mulf %11, %10 : vector<8x512xf32>
    %13 = math.tanh %12 : vector<8x512xf32>
    %cst_7 = arith.constant 1.000000e+00 : f32
    %14 = vector.broadcast %cst_7 : f32 to vector<8x512xf32>
    %15 = arith.addf %14, %13 : vector<8x512xf32>
    %cst_8 = arith.constant 5.000000e-01 : f32
    %16 = vector.broadcast %cst_8 : f32 to vector<8x512xf32>
    %17 = arith.mulf %16, %15 : vector<8x512xf32>
    %18 = arith.mulf %5, %17 : vector<8x512xf32>
    %19 = arith.truncf %18 : vector<8x512xf32> to vector<8x512xbf16>
    %c0_9 = arith.constant 0 : index
    %c0_10 = arith.constant 0 : index
    %20 = vector.load %arg4[%c0_9, %c0_10] : memref<8x512xbf16, #tpu.memory_space<vmem>>, vector<8x512xbf16>
    tpu.vector_store %arg4[%c0_9, %c0_10], %19 {strides = array<i32>} : memref<8x512xbf16, #tpu.memory_space<vmem>>, vector<8x512xbf16>,
    return
  }
  func.func @transform_0(%arg0: i32) -> (i32, i32) {
    %c0_i32 = arith.constant 0 : i32
    %c0_i32_0 = arith.constant 0 : i32
    %c0_i32_1 = arith.constant 0 : i32
    return %c0_i32, %c0_i32_0 : i32, i32
  }
  func.func @transform_1(%arg0: i32) -> (i32, i32) {
    %c0_i32 = arith.constant 0 : i32
    %c0_i32_0 = arith.constant 0 : i32
    return %c0_i32, %arg0 : i32, i32
  }
  func.func @transform_2(%arg0: i32) -> (i32, i32) {
    %c0_i32 = arith.constant 0 : i32
    %c0_i32_0 = arith.constant 0 : i32
    %c0_i32_1 = arith.constant 0 : i32
    return %c0_i32, %c0_i32_0 : i32, i32
  }
  func.func @transform_3(%arg0: i32) -> (i32, i32) {
    %c0_i32 = arith.constant 0 : i32
    %c0_i32_0 = arith.constant 0 : i32
    return %c0_i32, %arg0 : i32, i32
  }
}

module attributes {stable_mosaic.version = 11 : i64} {
  func.func @_gemm_kernel(%arg0: i32, %arg1: memref<16x32xbf16, #tpu.memory_space<vmem>>, %arg2: memref<32x128xbf16, #tpu.memory_space<vmem>>, %arg3: memref<16x1xf32, #tpu.memory_space<vmem>>, %arg4: memref<16x128xbf16, #tpu.memory_space<vmem>>) attributes {dimension_semantics = [#tpu.dimension_semantics<parallel>], iteration_bounds = array<i64: 1>, scalar_prefetch = 0 : i64, scratch_operands = 0 : i64, tpu.core_type = #tpu.core_type<tc>, window_params = [{pipeline_mode = #tpu.pipeline_mode<synchronous>, transform_indices = @transform_0, window_bounds = array<i64: 16, 32>}, {transform_indices = @transform_1, window_bounds = array<i64: 32, 128>}, {pipeline_mode = #tpu.pipeline_mode<synchronous>, transform_indices = @transform_2, window_bounds = array<i64: 16, 1>}, {transform_indices = @transform_3, window_bounds = array<i64: 16, 128>}]} {
    %c0 = arith.constant 0 : index
    %c0_0 = arith.constant 0 : index
    %0 = vector.load %arg1[%c0, %c0_0] : memref<16x32xbf16, #tpu.memory_space<vmem>>, vector<16x32xbf16>
    %c0_1 = arith.constant 0 : index
    %c0_2 = arith.constant 0 : index
    %1 = vector.load %arg2[%c0_1, %c0_2] : memref<32x128xbf16, #tpu.memory_space<vmem>>, vector<32x128xbf16>
    %cst = arith.constant dense<0.000000e+00> : vector<16x128xf32>
    %2 = tpu.matmul %0, %1, %cst {dimension_numbers = #tpu.dot_dimension_numbers<[1], [0], [0], [1], [0, 0, 1, 1], [], []>} : vector<16x32xbf16>, vector<32x128xbf16>, vector<16x128xf32> -> vector<16x128xf32>
    %c0_3 = arith.constant 0 : index
    %c0_4 = arith.constant 0 : index
    %3 = vector.load %arg3[%c0_3, %c0_4] : memref<16x1xf32, #tpu.memory_space<vmem>>, vector<16x1xf32>
    %4 = vector.broadcast %3 : vector<16x1xf32> to vector<16x128xf32>
    %5 = arith.addf %2, %4 : vector<16x128xf32>
    %6 = arith.mulf %5, %5 : vector<16x128xf32>
    %7 = arith.mulf %5, %6 : vector<16x128xf32>
    %cst_5 = arith.constant 4.471500e-02 : f32
    %8 = vector.broadcast %cst_5 : f32 to vector<16x128xf32>
    %9 = arith.mulf %8, %7 : vector<16x128xf32>
    %10 = arith.addf %5, %9 : vector<16x128xf32>
    %cst_6 = arith.constant 0.797884583 : f32
    %11 = vector.broadcast %cst_6 : f32 to vector<16x128xf32>
    %12 = arith.mulf %11, %10 : vector<16x128xf32>
    %13 = math.tanh %12 : vector<16x128xf32>
    %cst_7 = arith.constant 1.000000e+00 : f32
    %14 = vector.broadcast %cst_7 : f32 to vector<16x128xf32>
    %15 = arith.addf %14, %13 : vector<16x128xf32>
    %cst_8 = arith.constant 5.000000e-01 : f32
    %16 = vector.broadcast %cst_8 : f32 to vector<16x128xf32>
    %17 = arith.mulf %16, %15 : vector<16x128xf32>
    %18 = arith.mulf %5, %17 : vector<16x128xf32>
    %19 = arith.truncf %18 : vector<16x128xf32> to vector<16x128xbf16>
    %c0_9 = arith.constant 0 : index
    %c0_10 = arith.constant 0 : index
    %20 = vector.load %arg4[%c0_9, %c0_10] : memref<16x128xbf16, #tpu.memory_space<vmem>>, vector<16x128xbf16>
    tpu.vector_store %arg4[%c0_9, %c0_10], %19 {strides = array<i32>} : memref<16x128xbf16, #tpu.memory_space<vmem>>, vector<16x128xbf16>,
    return
  }
  func.func @transform_0(%arg0: i32) -> (i32, i32) {
    %c0_i32 = arith.constant 0 : i32
    %c0_i32_0 = arith.constant 0 : i32
    %c0_i32_1 = arith.constant 0 : i32
    return %c0_i32, %c0_i32_0 : i32, i32
  }
  func.func @transform_1(%arg0: i32) -> (i32, i32) {
    %c0_i32 = arith.constant 0 : i32
    %c0_i32_0 = arith.constant 0 : i32
    return %c0_i32, %arg0 : i32, i32
  }
  func.func @transform_2(%arg0: i32) -> (i32, i32) {
    %c0_i32 = arith.constant 0 : i32
    %c0_i32_0 = arith.constant 0 : i32
    %c0_i32_1 = arith.constant 0 : i32
    return %c0_i32, %c0_i32_0 : i32, i32
  }
  func.func @transform_3(%arg0: i32) -> (i32, i32) {
    %c0_i32 = arith.constant 0 : i32
    %c0_i32_0 = arith.constant 0 : i32
    return %c0_i32, %arg0 : i32, i32
  }
}

module attributes {stable_mosaic.version = 11 : i64} {
  func.func @_gemm_kernel(%arg0: i32, %arg1: memref<32x64xbf16, #tpu.memory_space<vmem>>, %arg2: memref<64x32xbf16, #tpu.memory_space<vmem>>, %arg3: memref<32x1xf32, #tpu.memory_space<vmem>>, %arg4: memref<32x32xbf16, #tpu.memory_space<vmem>>) attributes {dimension_semantics = [#tpu.dimension_semantics<parallel>], iteration_bounds = array<i64: 1>, scalar_prefetch = 0 : i64, scratch_operands = 0 : i64, tpu.core_type = #tpu.core_type<tc>, window_params = [{pipeline_mode = #tpu.pipeline_mode<synchronous>, transform_indices = @transform_0, window_bounds = array<i64: 32, 64>}, {transform_indices = @transform_1, window_bounds = array<i64: 64, 32>}, {pipeline_mode = #tpu.pipeline_mode<synchronous>, transform_indices = @transform_2, window_bounds = array<i64: 32, 1>}, {transform_indices = @transform_3, window_bounds = array<i64: 32, 32>}]} {
    %c0 = arith.constant 0 : index
    %c0_0 = arith.constant 0 : index
    %0 = vector.load %arg1[%c0, %c0_0] : memref<32x64xbf16, #tpu.memory_space<vmem>>, vector<32x64xbf16>
    %c0_1 = arith.constant 0 : index
    %c0_2 = arith.constant 0 : index
    %1 = vector.load %arg2[%c0_1, %c0_2] : memref<64x32xbf16, #tpu.memory_space<vmem>>, vector<64x32xbf16>
    %cst = arith.constant dense<0.000000e+00> : vector<32x32xf32>
    %2 = tpu.matmul %0, %1, %cst {dimension_numbers = #tpu.dot_dimension_numbers<[1], [0], [0], [1], [0, 0, 1, 1], [], []>} : vector<32x64xbf16>, vector<64x32xbf16>, vector<32x32xf32> -> vector<32x32xf32>
    %c0_3 = arith.constant 0 : index
    %c0_4 = arith.constant 0 : index
    %3 = vector.load %arg3[%c0_3, %c0_4] : memref<32x1xf32, #tpu.memory_space<vmem>>, vector<32x1xf32>
    %4 = vector.broadcast %3 : vector<32x1xf32> to vector<32x32xf32>
    %5 = arith.addf %2, %4 : vector<32x32xf32>
    %6 = arith.mulf %5, %5 : vector<32x32xf32>
    %7 = arith.mulf %5, %6 : vector<32x32xf32>
    %cst_5 = arith.constant 4.471500e-02 : f32
    %8 = vector.broadcast %cst_5 : f32 to vector<32x32xf32>
    %9 = arith.mulf %8, %7 : vector<32x32xf32>
    %10 = arith.addf %5, %9 : vector<32x32xf32>
    %cst_6 = arith.constant 0.797884583 : f32
    %11 = vector.broadcast %cst_6 : f32 to vector<32x32xf32>
    %12 = arith.mulf %11, %10 : vector<32x32xf32>
    %13 = math.tanh %12 : vector<32x32xf32>
    %cst_7 = arith.constant 1.000000e+00 : f32
    %14 = vector.broadcast %cst_7 : f32 to vector<32x32xf32>
    %15 = arith.addf %14, %13 : vector<32x32xf32>
    %cst_8 = arith.constant 5.000000e-01 : f32
    %16 = vector.broadcast %cst_8 : f32 to vector<32x32xf32>
    %17 = arith.mulf %16, %15 : vector<32x32xf32>
    %18 = arith.mulf %5, %17 : vector<32x32xf32>
    %19 = arith.truncf %18 : vector<32x32xf32> to vector<32x32xbf16>
    %c0_9 = arith.constant 0 : index
    %c0_10 = arith.constant 0 : index
    %20 = vector.load %arg4[%c0_9, %c0_10] : memref<32x32xbf16, #tpu.memory_space<vmem>>, vector<32x32xbf16>
    tpu.vector_store %arg4[%c0_9, %c0_10], %19 {strides = array<i32>} : memref<32x32xbf16, #tpu.memory_space<vmem>>, vector<32x32xbf16>,
    return
  }
  func.func @transform_0(%arg0: i32) -> (i32, i32) {
    %c0_i32 = arith.constant 0 : i32
    %c0_i32_0 = arith.constant 0 : i32
    %c0_i32_1 = arith.constant 0 : i32
    return %c0_i32, %c0_i32_0 : i32, i32
  }
  func.func @transform_1(%arg0: i32) -> (i32, i32) {
    %c0_i32 = arith.constant 0 : i32
    %c0_i32_0 = arith.constant 0 : i32
    return %c0_i32, %arg0 : i32, i32
  }
  func.func @transform_2(%arg0: i32) -> (i32, i32) {
    %c0_i32 = arith.constant 0 : i32
    %c0_i32_0 = arith.constant 0 : i32
    %c0_i32_1 = arith.constant 0 : i32
    return %c0_i32, %c0_i32_0 : i32, i32
  }
  func.func @transform_3(%arg0: i32) -> (i32, i32) {
    %c0_i32 = arith.constant 0 : i32
    %c0_i32_0 = arith.constant 0 : i32
    return %c0_i32, %arg0 : i32, i32
  }
}

module attributes {stable_mosaic.version = 11 : i64} {
  func.func @_gemm_kernel(%arg0: i32, %arg1: memref<64x128xbf16, #tpu.memory_space<vmem>>, %arg2: memref<128x8xbf16, #tpu.memory_space<vmem>>, %arg3: memref<64x1xf32, #tpu.memory_space<vmem>>, %arg4: memref<64x8xbf16, #tpu.memory_space<vmem>>) attributes {dimension_semantics = [#tpu.dimension_semantics<parallel>], iteration_bounds = array<i64: 1>, scalar_prefetch = 0 : i64, scratch_operands = 0 : i64, tpu.core_type = #tpu.core_type<tc>, window_params = [{pipeline_mode = #tpu.pipeline_mode<synchronous>, transform_indices = @transform_0, window_bounds = array<i64: 64, 128>}, {transform_indices = @transform_1, window_bounds = array<i64: 128, 8>}, {pipeline_mode = #tpu.pipeline_mode<synchronous>, transform_indices = @transform_2, window_bounds = array<i64: 64, 1>}, {transform_indices = @transform_3, window_bounds = array<i64: 64, 8>}]} {
    %c0 = arith.constant 0 : index
    %c0_0 = arith.constant 0 : index
    %0 = vector.load %arg1[%c0, %c0_0] : memref<64x128xbf16, #tpu.memory_space<vmem>>, vector<64x128xbf16>
    %c0_1 = arith.constant 0 : index
    %c0_2 = arith.constant 0 : index
    %1 = vector.load %arg2[%c0_1, %c0_2] : memref<128x8xbf16, #tpu.memory_space<vmem>>, vector<128x8xbf16>
    %cst = arith.constant dense<0.000000e+00> : vector<64x8xf32>
    %2 = tpu.matmul %0, %1, %cst {dimension_numbers = #tpu.dot_dimension_numbers<[1], [0], [0], [1], [0, 0, 1, 1], [], []>} : vector<64x128xbf16>, vector<128x8xbf16>, vector<64x8xf32> -> vector<64x8xf32>
    %c0_3 = arith.constant 0 : index
    %c0_4 = arith.constant 0 : index
    %3 = vector.load %arg3[%c0_3, %c0_4] : memref<64x1xf32, #tpu.memory_space<vmem>>, vector<64x1xf32>
    %4 = vector.broadcast %3 : vector<64x1xf32> to vector<64x8xf32>
    %5 = arith.addf %2, %4 : vector<64x8xf32>
    %6 = arith.mulf %5, %5 : vector<64x8xf32>
    %7 = arith.mulf %5, %6 : vector<64x8xf32>
    %cst_5 = arith.constant 4.471500e-02 : f32
    %8 = vector.broadcast %cst_5 : f32 to vector<64x8xf32>
    %9 = arith.mulf %8, %7 : vector<64x8xf32>
    %10 = arith.addf %5, %9 : vector<64x8xf32>
    %cst_6 = arith.constant 0.797884583 : f32
    %11 = vector.broadcast %cst_6 : f32 to vector<64x8xf32>
    %12 = arith.mulf %11, %10 : vector<64x8xf32>
    %13 = math.tanh %12 : vector<64x8xf32>
    %cst_7 = arith.constant 1.000000e+00 : f32
    %14 = vector.broadcast %cst_7 : f32 to vector<64x8xf32>
    %15 = arith.addf %14, %13 : vector<64x8xf32>
    %cst_8 = arith.constant 5.000000e-01 : f32
    %16 = vector.broadcast %cst_8 : f32 to vector<64x8xf32>
    %17 = arith.mulf %16, %15 : vector<64x8xf32>
    %18 = arith.mulf %5, %17 : vector<64x8xf32>
    %19 = arith.truncf %18 : vector<64x8xf32> to vector<64x8xbf16>
    %c0_9 = arith.constant 0 : index
    %c0_10 = arith.constant 0 : index
    %20 = vector.load %arg4[%c0_9, %c0_10] : memref<64x8xbf16, #tpu.memory_space<vmem>>, vector<64x8xbf16>
    tpu.vector_store %arg4[%c0_9, %c0_10], %19 {strides = array<i32>} : memref<64x8xbf16, #tpu.memory_space<vmem>>, vector<64x8xbf16>,
    return
  }
  func.func @transform_0(%arg0: i32) -> (i32, i32) {
    %c0_i32 = arith.constant 0 : i32
    %c0_i32_0 = arith.constant 0 : i32
    %c0_i32_1 = arith.constant 0 : i32
    return %c0_i32, %c0_i32_0 : i32, i32
  }
  func.func @transform_1(%arg0: i32) -> (i32, i32) {
    %c0_i32 = arith.constant 0 : i32
    %c0_i32_0 = arith.constant 0 : i32
    return %c0_i32, %arg0 : i32, i32
  }
  func.func @transform_2(%arg0: i32) -> (i32, i32) {
    %c0_i32 = arith.constant 0 : i32
    %c0_i32_0 = arith.constant 0 : i32
    %c0_i32_1 = arith.constant 0 : i32
    return %c0_i32, %c0_i32_0 : i32, i32
  }
  func.func @transform_3(%arg0: i32) -> (i32, i32) {
    %c0_i32 = arith.constant 0 : i32
    %c0_i32_0 = arith.constant 0 : i32
    return %c0_i32, %arg0 : i32, i32
  }
}

module attributes {stable_mosaic.version = 11 : i64} {
  func.func @_tap_conv_kernel(%arg0: i32, %arg1: memref<64x32xbf16, #tpu.memory_space<vmem>>, %arg2: memref<9x128x64xbf16, #tpu.memory_space<vmem>>, %arg3: memref<128x1xf32, #tpu.memory_space<vmem>>, %arg4: memref<128x22xbf16, #tpu.memory_space<vmem>>) attributes {dimension_semantics = [#tpu.dimension_semantics<parallel>], iteration_bounds = array<i64: 1>, scalar_prefetch = 0 : i64, scratch_operands = 0 : i64, tpu.core_type = #tpu.core_type<tc>, window_params = [{pipeline_mode = #tpu.pipeline_mode<synchronous>, transform_indices = @transform_0, window_bounds = array<i64: 64, 32>}, {pipeline_mode = #tpu.pipeline_mode<synchronous>, transform_indices = @transform_1, window_bounds = array<i64: 9, 128, 64>}, {pipeline_mode = #tpu.pipeline_mode<synchronous>, transform_indices = @transform_2, window_bounds = array<i64: 128, 1>}, {transform_indices = @transform_3, window_bounds = array<i64: 128, 22>}]} {
    %c0 = arith.constant 0 : index
    %c0_0 = arith.constant 0 : index
    %c0_1 = arith.constant 0 : index
    %0 = vector.load %arg2[%c0, %c0_0, %c0_1] : memref<9x128x64xbf16, #tpu.memory_space<vmem>>, vector<1x128x64xbf16>
    %1 = vector.shape_cast %0 : vector<1x128x64xbf16> to vector<128x64xbf16>
    %c0_2 = arith.constant 0 : index
    %c0_3 = arith.constant 0 : index
    %2 = vector.load %arg1[%c0_2, %c0_3] : memref<64x32xbf16, #tpu.memory_space<vmem>>, vector<64x22xbf16>
    %cst = arith.constant dense<0.000000e+00> : vector<128x22xf32>
    %3 = tpu.matmul %1, %2, %cst {dimension_numbers = #tpu.dot_dimension_numbers<[1], [0], [0], [1], [0, 0, 1, 1], [], []>} : vector<128x64xbf16>, vector<64x22xbf16>, vector<128x22xf32> -> vector<128x22xf32>
    %c1 = arith.constant 1 : index
    %c0_4 = arith.constant 0 : index
    %c0_5 = arith.constant 0 : index
    %4 = vector.load %arg2[%c1, %c0_4, %c0_5] : memref<9x128x64xbf16, #tpu.memory_space<vmem>>, vector<1x128x64xbf16>
    %5 = vector.shape_cast %4 : vector<1x128x64xbf16> to vector<128x64xbf16>
    %c0_6 = arith.constant 0 : index
    %c1_7 = arith.constant 1 : index
    %6 = vector.load %arg1[%c0_6, %c1_7] : memref<64x32xbf16, #tpu.memory_space<vmem>>, vector<64x22xbf16>
    %cst_8 = arith.constant dense<0.000000e+00> : vector<128x22xf32>
    %7 = tpu.matmul %5, %6, %cst_8 {dimension_numbers = #tpu.dot_dimension_numbers<[1], [0], [0], [1], [0, 0, 1, 1], [], []>} : vector<128x64xbf16>, vector<64x22xbf16>, vector<128x22xf32> -> vector<128x22xf32>
    %8 = arith.addf %3, %7 : vector<128x22xf32>
    %c2 = arith.constant 2 : index
    %c0_9 = arith.constant 0 : index
    %c0_10 = arith.constant 0 : index
    %9 = vector.load %arg2[%c2, %c0_9, %c0_10] : memref<9x128x64xbf16, #tpu.memory_space<vmem>>, vector<1x128x64xbf16>
    %10 = vector.shape_cast %9 : vector<1x128x64xbf16> to vector<128x64xbf16>
    %c0_11 = arith.constant 0 : index
    %c2_12 = arith.constant 2 : index
    %11 = vector.load %arg1[%c0_11, %c2_12] : memref<64x32xbf16, #tpu.memory_space<vmem>>, vector<64x22xbf16>
    %cst_13 = arith.constant dense<0.000000e+00> : vector<128x22xf32>
    %12 = tpu.matmul %10, %11, %cst_13 {dimension_numbers = #tpu.dot_dimension_numbers<[1], [0], [0], [1], [0, 0, 1, 1], [], []>} : vector<128x64xbf16>, vector<64x22xbf16>, vector<128x22xf32> -> vector<128x22xf32>
    %13 = arith.addf %8, %12 : vector<128x22xf32>
    %c3 = arith.constant 3 : index
    %c0_14 = arith.constant 0 : index
    %c0_15 = arith.constant 0 : index
    %14 = vector.load %arg2[%c3, %c0_14, %c0_15] : memref<9x128x64xbf16, #tpu.memory_space<vmem>>, vector<1x128x64xbf16>
    %15 = vector.shape_cast %14 : vector<1x128x64xbf16> to vector<128x64xbf16>
    %c0_16 = arith.constant 0 : index
    %c4 = arith.constant 4 : index
    %16 = vector.load %arg1[%c0_16, %c4] : memref<64x32xbf16, #tpu.memory_space<vmem>>, vector<64x22xbf16>
    %cst_17 = arith.constant dense<0.000000e+00> : vector<128x22xf32>
    %17 = tpu.matmul %15, %16, %cst_17 {dimension_numbers = #tpu.dot_dimension_numbers<[1], [0], [0], [1], [0, 0, 1, 1], [], []>} : vector<128x64xbf16>, vector<64x22xbf16>, vector<128x22xf32> -> vector<128x22xf32>
    %18 = arith.addf %13, %17 : vector<128x22xf32>
    %c4_18 = arith.constant 4 : index
    %c0_19 = arith.constant 0 : index
    %c0_20 = arith.constant 0 : index
    %19 = vector.load %arg2[%c4_18, %c0_19, %c0_20] : memref<9x128x64xbf16, #tpu.memory_space<vmem>>, vector<1x128x64xbf16>
    %20 = vector.shape_cast %19 : vector<1x128x64xbf16> to vector<128x64xbf16>
    %c0_21 = arith.constant 0 : index
    %c5 = arith.constant 5 : index
    %21 = vector.load %arg1[%c0_21, %c5] : memref<64x32xbf16, #tpu.memory_space<vmem>>, vector<64x22xbf16>
    %cst_22 = arith.constant dense<0.000000e+00> : vector<128x22xf32>
    %22 = tpu.matmul %20, %21, %cst_22 {dimension_numbers = #tpu.dot_dimension_numbers<[1], [0], [0], [1], [0, 0, 1, 1], [], []>} : vector<128x64xbf16>, vector<64x22xbf16>, vector<128x22xf32> -> vector<128x22xf32>
    %23 = arith.addf %18, %22 : vector<128x22xf32>
    %c5_23 = arith.constant 5 : index
    %c0_24 = arith.constant 0 : index
    %c0_25 = arith.constant 0 : index
    %24 = vector.load %arg2[%c5_23, %c0_24, %c0_25] : memref<9x128x64xbf16, #tpu.memory_space<vmem>>, vector<1x128x64xbf16>
    %25 = vector.shape_cast %24 : vector<1x128x64xbf16> to vector<128x64xbf16>
    %c0_26 = arith.constant 0 : index
    %c6 = arith.constant 6 : index
    %26 = vector.load %arg1[%c0_26, %c6] : memref<64x32xbf16, #tpu.memory_space<vmem>>, vector<64x22xbf16>
    %cst_27 = arith.constant dense<0.000000e+00> : vector<128x22xf32>
    %27 = tpu.matmul %25, %26, %cst_27 {dimension_numbers = #tpu.dot_dimension_numbers<[1], [0], [0], [1], [0, 0, 1, 1], [], []>} : vector<128x64xbf16>, vector<64x22xbf16>, vector<128x22xf32> -> vector<128x22xf32>
    %28 = arith.addf %23, %27 : vector<128x22xf32>
    %c6_28 = arith.constant 6 : index
    %c0_29 = arith.constant 0 : index
    %c0_30 = arith.constant 0 : index
    %29 = vector.load %arg2[%c6_28, %c0_29, %c0_30] : memref<9x128x64xbf16, #tpu.memory_space<vmem>>, vector<1x128x64xbf16>
    %30 = vector.shape_cast %29 : vector<1x128x64xbf16> to vector<128x64xbf16>
    %c0_31 = arith.constant 0 : index
    %c8 = arith.constant 8 : index
    %31 = vector.load %arg1[%c0_31, %c8] : memref<64x32xbf16, #tpu.memory_space<vmem>>, vector<64x22xbf16>
    %cst_32 = arith.constant dense<0.000000e+00> : vector<128x22xf32>
    %32 = tpu.matmul %30, %31, %cst_32 {dimension_numbers = #tpu.dot_dimension_numbers<[1], [0], [0], [1], [0, 0, 1, 1], [], []>} : vector<128x64xbf16>, vector<64x22xbf16>, vector<128x22xf32> -> vector<128x22xf32>
    %33 = arith.addf %28, %32 : vector<128x22xf32>
    %c7 = arith.constant 7 : index
    %c0_33 = arith.constant 0 : index
    %c0_34 = arith.constant 0 : index
    %34 = vector.load %arg2[%c7, %c0_33, %c0_34] : memref<9x128x64xbf16, #tpu.memory_space<vmem>>, vector<1x128x64xbf16>
    %35 = vector.shape_cast %34 : vector<1x128x64xbf16> to vector<128x64xbf16>
    %c0_35 = arith.constant 0 : index
    %c9 = arith.constant 9 : index
    %36 = vector.load %arg1[%c0_35, %c9] : memref<64x32xbf16, #tpu.memory_space<vmem>>, vector<64x22xbf16>
    %cst_36 = arith.constant dense<0.000000e+00> : vector<128x22xf32>
    %37 = tpu.matmul %35, %36, %cst_36 {dimension_numbers = #tpu.dot_dimension_numbers<[1], [0], [0], [1], [0, 0, 1, 1], [], []>} : vector<128x64xbf16>, vector<64x22xbf16>, vector<128x22xf32> -> vector<128x22xf32>
    %38 = arith.addf %33, %37 : vector<128x22xf32>
    %c8_37 = arith.constant 8 : index
    %c0_38 = arith.constant 0 : index
    %c0_39 = arith.constant 0 : index
    %39 = vector.load %arg2[%c8_37, %c0_38, %c0_39] : memref<9x128x64xbf16, #tpu.memory_space<vmem>>, vector<1x128x64xbf16>
    %40 = vector.shape_cast %39 : vector<1x128x64xbf16> to vector<128x64xbf16>
    %c0_40 = arith.constant 0 : index
    %c10 = arith.constant 10 : index
    %41 = vector.load %arg1[%c0_40, %c10] : memref<64x32xbf16, #tpu.memory_space<vmem>>, vector<64x22xbf16>
    %cst_41 = arith.constant dense<0.000000e+00> : vector<128x22xf32>
    %42 = tpu.matmul %40, %41, %cst_41 {dimension_numbers = #tpu.dot_dimension_numbers<[1], [0], [0], [1], [0, 0, 1, 1], [], []>} : vector<128x64xbf16>, vector<64x22xbf16>, vector<128x22xf32> -> vector<128x22xf32>
    %43 = arith.addf %38, %42 : vector<128x22xf32>
    %c0_42 = arith.constant 0 : index
    %c0_43 = arith.constant 0 : index
    %44 = vector.load %arg3[%c0_42, %c0_43] : memref<128x1xf32, #tpu.memory_space<vmem>>, vector<128x1xf32>
    %45 = vector.broadcast %44 : vector<128x1xf32> to vector<128x22xf32>
    %46 = arith.addf %43, %45 : vector<128x22xf32>
    %cst_44 = arith.constant 0.000000e+00 : f32
    %47 = vector.broadcast %cst_44 : f32 to vector<128x22xf32>
    %48 = arith.maximumf %46, %47 : vector<128x22xf32>
    %49 = arith.truncf %48 : vector<128x22xf32> to vector<128x22xbf16>
    %c0_45 = arith.constant 0 : index
    %c0_46 = arith.constant 0 : index
    %50 = vector.load %arg4[%c0_45, %c0_46] : memref<128x22xbf16, #tpu.memory_space<vmem>>, vector<128x22xbf16>
    tpu.vector_store %arg4[%c0_45, %c0_46], %49 {strides = array<i32>} : memref<128x22xbf16, #tpu.memory_space<vmem>>, vector<128x22xbf16>,
    return
  }
  func.func @transform_0(%arg0: i32) -> (i32, i32) {
    %c0_i32 = arith.constant 0 : i32
    %c0_i32_0 = arith.constant 0 : i32
    %c0_i32_1 = arith.constant 0 : i32
    return %c0_i32, %c0_i32_0 : i32, i32
  }
  func.func @transform_1(%arg0: i32) -> (i32, i32, i32) {
    %c0_i32 = arith.constant 0 : i32
    %c0_i32_0 = arith.constant 0 : i32
    %c0_i32_1 = arith.constant 0 : i32
    %c0_i32_2 = arith.constant 0 : i32
    return %c0_i32, %c0_i32_0, %c0_i32_1 : i32, i32, i32
  }
  func.func @transform_2(%arg0: i32) -> (i32, i32) {
    %c0_i32 = arith.constant 0 : i32
    %c0_i32_0 = arith.constant 0 : i32
    %c0_i32_1 = arith.constant 0 : i32
    return %c0_i32, %c0_i32_0 : i32, i32
  }
  func.func @transform_3(%arg0: i32) -> (i32, i32) {
    %c0_i32 = arith.constant 0 : i32
    %c0_i32_0 = arith.constant 0 : i32
    return %c0_i32, %arg0 : i32, i32
  }
}

module attributes {stable_mosaic.version = 11 : i64} {
  func.func @_tap_conv_kernel(%arg0: i32, %arg1: memref<64x72xbf16, #tpu.memory_space<vmem>>, %arg2: memref<9x32x64xbf16, #tpu.memory_space<vmem>>, %arg3: memref<32x1xf32, #tpu.memory_space<vmem>>, %arg4: memref<32x58xbf16, #tpu.memory_space<vmem>>) attributes {dimension_semantics = [#tpu.dimension_semantics<parallel>], iteration_bounds = array<i64: 1>, scalar_prefetch = 0 : i64, scratch_operands = 0 : i64, tpu.core_type = #tpu.core_type<tc>, window_params = [{pipeline_mode = #tpu.pipeline_mode<synchronous>, transform_indices = @transform_0, window_bounds = array<i64: 64, 72>}, {pipeline_mode = #tpu.pipeline_mode<synchronous>, transform_indices = @transform_1, window_bounds = array<i64: 9, 32, 64>}, {pipeline_mode = #tpu.pipeline_mode<synchronous>, transform_indices = @transform_2, window_bounds = array<i64: 32, 1>}, {transform_indices = @transform_3, window_bounds = array<i64: 32, 58>}]} {
    %c0 = arith.constant 0 : index
    %c0_0 = arith.constant 0 : index
    %c0_1 = arith.constant 0 : index
    %0 = vector.load %arg2[%c0, %c0_0, %c0_1] : memref<9x32x64xbf16, #tpu.memory_space<vmem>>, vector<1x32x64xbf16>
    %1 = vector.shape_cast %0 : vector<1x32x64xbf16> to vector<32x64xbf16>
    %c0_2 = arith.constant 0 : index
    %c0_3 = arith.constant 0 : index
    %2 = vector.load %arg1[%c0_2, %c0_3] : memref<64x72xbf16, #tpu.memory_space<vmem>>, vector<64x58xbf16>
    %cst = arith.constant dense<0.000000e+00> : vector<32x58xf32>
    %3 = tpu.matmul %1, %2, %cst {dimension_numbers = #tpu.dot_dimension_numbers<[1], [0], [0], [1], [0, 0, 1, 1], [], []>} : vector<32x64xbf16>, vector<64x58xbf16>, vector<32x58xf32> -> vector<32x58xf32>
    %c1 = arith.constant 1 : index
    %c0_4 = arith.constant 0 : index
    %c0_5 = arith.constant 0 : index
    %4 = vector.load %arg2[%c1, %c0_4, %c0_5] : memref<9x32x64xbf16, #tpu.memory_space<vmem>>, vector<1x32x64xbf16>
    %5 = vector.shape_cast %4 : vector<1x32x64xbf16> to vector<32x64xbf16>
    %c0_6 = arith.constant 0 : index
    %c1_7 = arith.constant 1 : index
    %6 = vector.load %arg1[%c0_6, %c1_7] : memref<64x72xbf16, #tpu.memory_space<vmem>>, vector<64x58xbf16>
    %cst_8 = arith.constant dense<0.000000e+00> : vector<32x58xf32>
    %7 = tpu.matmul %5, %6, %cst_8 {dimension_numbers = #tpu.dot_dimension_numbers<[1], [0], [0], [1], [0, 0, 1, 1], [], []>} : vector<32x64xbf16>, vector<64x58xbf16>, vector<32x58xf32> -> vector<32x58xf32>
    %8 = arith.addf %3, %7 : vector<32x58xf32>
    %c2 = arith.constant 2 : index
    %c0_9 = arith.constant 0 : index
    %c0_10 = arith.constant 0 : index
    %9 = vector.load %arg2[%c2, %c0_9, %c0_10] : memref<9x32x64xbf16, #tpu.memory_space<vmem>>, vector<1x32x64xbf16>
    %10 = vector.shape_cast %9 : vector<1x32x64xbf16> to vector<32x64xbf16>
    %c0_11 = arith.constant 0 : index
    %c2_12 = arith.constant 2 : index
    %11 = vector.load %arg1[%c0_11, %c2_12] : memref<64x72xbf16, #tpu.memory_space<vmem>>, vector<64x58xbf16>
    %cst_13 = arith.constant dense<0.000000e+00> : vector<32x58xf32>
    %12 = tpu.matmul %10, %11, %cst_13 {dimension_numbers = #tpu.dot_dimension_numbers<[1], [0], [0], [1], [0, 0, 1, 1], [], []>} : vector<32x64xbf16>, vector<64x58xbf16>, vector<32x58xf32> -> vector<32x58xf32>
    %13 = arith.addf %8, %12 : vector<32x58xf32>
    %c3 = arith.constant 3 : index
    %c0_14 = arith.constant 0 : index
    %c0_15 = arith.constant 0 : index
    %14 = vector.load %arg2[%c3, %c0_14, %c0_15] : memref<9x32x64xbf16, #tpu.memory_space<vmem>>, vector<1x32x64xbf16>
    %15 = vector.shape_cast %14 : vector<1x32x64xbf16> to vector<32x64xbf16>
    %c0_16 = arith.constant 0 : index
    %c6 = arith.constant 6 : index
    %16 = vector.load %arg1[%c0_16, %c6] : memref<64x72xbf16, #tpu.memory_space<vmem>>, vector<64x58xbf16>
    %cst_17 = arith.constant dense<0.000000e+00> : vector<32x58xf32>
    %17 = tpu.matmul %15, %16, %cst_17 {dimension_numbers = #tpu.dot_dimension_numbers<[1], [0], [0], [1], [0, 0, 1, 1], [], []>} : vector<32x64xbf16>, vector<64x58xbf16>, vector<32x58xf32> -> vector<32x58xf32>
    %18 = arith.addf %13, %17 : vector<32x58xf32>
    %c4 = arith.constant 4 : index
    %c0_18 = arith.constant 0 : index
    %c0_19 = arith.constant 0 : index
    %19 = vector.load %arg2[%c4, %c0_18, %c0_19] : memref<9x32x64xbf16, #tpu.memory_space<vmem>>, vector<1x32x64xbf16>
    %20 = vector.shape_cast %19 : vector<1x32x64xbf16> to vector<32x64xbf16>
    %c0_20 = arith.constant 0 : index
    %c7 = arith.constant 7 : index
    %21 = vector.load %arg1[%c0_20, %c7] : memref<64x72xbf16, #tpu.memory_space<vmem>>, vector<64x58xbf16>
    %cst_21 = arith.constant dense<0.000000e+00> : vector<32x58xf32>
    %22 = tpu.matmul %20, %21, %cst_21 {dimension_numbers = #tpu.dot_dimension_numbers<[1], [0], [0], [1], [0, 0, 1, 1], [], []>} : vector<32x64xbf16>, vector<64x58xbf16>, vector<32x58xf32> -> vector<32x58xf32>
    %23 = arith.addf %18, %22 : vector<32x58xf32>
    %c5 = arith.constant 5 : index
    %c0_22 = arith.constant 0 : index
    %c0_23 = arith.constant 0 : index
    %24 = vector.load %arg2[%c5, %c0_22, %c0_23] : memref<9x32x64xbf16, #tpu.memory_space<vmem>>, vector<1x32x64xbf16>
    %25 = vector.shape_cast %24 : vector<1x32x64xbf16> to vector<32x64xbf16>
    %c0_24 = arith.constant 0 : index
    %c8 = arith.constant 8 : index
    %26 = vector.load %arg1[%c0_24, %c8] : memref<64x72xbf16, #tpu.memory_space<vmem>>, vector<64x58xbf16>
    %cst_25 = arith.constant dense<0.000000e+00> : vector<32x58xf32>
    %27 = tpu.matmul %25, %26, %cst_25 {dimension_numbers = #tpu.dot_dimension_numbers<[1], [0], [0], [1], [0, 0, 1, 1], [], []>} : vector<32x64xbf16>, vector<64x58xbf16>, vector<32x58xf32> -> vector<32x58xf32>
    %28 = arith.addf %23, %27 : vector<32x58xf32>
    %c6_26 = arith.constant 6 : index
    %c0_27 = arith.constant 0 : index
    %c0_28 = arith.constant 0 : index
    %29 = vector.load %arg2[%c6_26, %c0_27, %c0_28] : memref<9x32x64xbf16, #tpu.memory_space<vmem>>, vector<1x32x64xbf16>
    %30 = vector.shape_cast %29 : vector<1x32x64xbf16> to vector<32x64xbf16>
    %c0_29 = arith.constant 0 : index
    %c12 = arith.constant 12 : index
    %31 = vector.load %arg1[%c0_29, %c12] : memref<64x72xbf16, #tpu.memory_space<vmem>>, vector<64x58xbf16>
    %cst_30 = arith.constant dense<0.000000e+00> : vector<32x58xf32>
    %32 = tpu.matmul %30, %31, %cst_30 {dimension_numbers = #tpu.dot_dimension_numbers<[1], [0], [0], [1], [0, 0, 1, 1], [], []>} : vector<32x64xbf16>, vector<64x58xbf16>, vector<32x58xf32> -> vector<32x58xf32>
    %33 = arith.addf %28, %32 : vector<32x58xf32>
    %c7_31 = arith.constant 7 : index
    %c0_32 = arith.constant 0 : index
    %c0_33 = arith.constant 0 : index
    %34 = vector.load %arg2[%c7_31, %c0_32, %c0_33] : memref<9x32x64xbf16, #tpu.memory_space<vmem>>, vector<1x32x64xbf16>
    %35 = vector.shape_cast %34 : vector<1x32x64xbf16> to vector<32x64xbf16>
    %c0_34 = arith.constant 0 : index
    %c13 = arith.constant 13 : index
    %36 = vector.load %arg1[%c0_34, %c13] : memref<64x72xbf16, #tpu.memory_space<vmem>>, vector<64x58xbf16>
    %cst_35 = arith.constant dense<0.000000e+00> : vector<32x58xf32>
    %37 = tpu.matmul %35, %36, %cst_35 {dimension_numbers = #tpu.dot_dimension_numbers<[1], [0], [0], [1], [0, 0, 1, 1], [], []>} : vector<32x64xbf16>, vector<64x58xbf16>, vector<32x58xf32> -> vector<32x58xf32>
    %38 = arith.addf %33, %37 : vector<32x58xf32>
    %c8_36 = arith.constant 8 : index
    %c0_37 = arith.constant 0 : index
    %c0_38 = arith.constant 0 : index
    %39 = vector.load %arg2[%c8_36, %c0_37, %c0_38] : memref<9x32x64xbf16, #tpu.memory_space<vmem>>, vector<1x32x64xbf16>
    %40 = vector.shape_cast %39 : vector<1x32x64xbf16> to vector<32x64xbf16>
    %c0_39 = arith.constant 0 : index
    %c14 = arith.constant 14 : index
    %41 = vector.load %arg1[%c0_39, %c14] : memref<64x72xbf16, #tpu.memory_space<vmem>>, vector<64x58xbf16>
    %cst_40 = arith.constant dense<0.000000e+00> : vector<32x58xf32>
    %42 = tpu.matmul %40, %41, %cst_40 {dimension_numbers = #tpu.dot_dimension_numbers<[1], [0], [0], [1], [0, 0, 1, 1], [], []>} : vector<32x64xbf16>, vector<64x58xbf16>, vector<32x58xf32> -> vector<32x58xf32>
    %43 = arith.addf %38, %42 : vector<32x58xf32>
    %c0_41 = arith.constant 0 : index
    %c0_42 = arith.constant 0 : index
    %44 = vector.load %arg3[%c0_41, %c0_42] : memref<32x1xf32, #tpu.memory_space<vmem>>, vector<32x1xf32>
    %45 = vector.broadcast %44 : vector<32x1xf32> to vector<32x58xf32>
    %46 = arith.addf %43, %45 : vector<32x58xf32>
    %cst_43 = arith.constant 0.000000e+00 : f32
    %47 = vector.broadcast %cst_43 : f32 to vector<32x58xf32>
    %48 = arith.maximumf %46, %47 : vector<32x58xf32>
    %49 = arith.truncf %48 : vector<32x58xf32> to vector<32x58xbf16>
    %c0_44 = arith.constant 0 : index
    %c0_45 = arith.constant 0 : index
    %50 = vector.load %arg4[%c0_44, %c0_45] : memref<32x58xbf16, #tpu.memory_space<vmem>>, vector<32x58xbf16>
    tpu.vector_store %arg4[%c0_44, %c0_45], %49 {strides = array<i32>} : memref<32x58xbf16, #tpu.memory_space<vmem>>, vector<32x58xbf16>,
    return
  }
  func.func @transform_0(%arg0: i32) -> (i32, i32) {
    %c0_i32 = arith.constant 0 : i32
    %c0_i32_0 = arith.constant 0 : i32
    %c0_i32_1 = arith.constant 0 : i32
    return %c0_i32, %c0_i32_0 : i32, i32
  }
  func.func @transform_1(%arg0: i32) -> (i32, i32, i32) {
    %c0_i32 = arith.constant 0 : i32
    %c0_i32_0 = arith.constant 0 : i32
    %c0_i32_1 = arith.constant 0 : i32
    %c0_i32_2 = arith.constant 0 : i32
    return %c0_i32, %c0_i32_0, %c0_i32_1 : i32, i32, i32
  }
  func.func @transform_2(%arg0: i32) -> (i32, i32) {
    %c0_i32 = arith.constant 0 : i32
    %c0_i32_0 = arith.constant 0 : i32
    %c0_i32_1 = arith.constant 0 : i32
    return %c0_i32, %c0_i32_0 : i32, i32
  }
  func.func @transform_3(%arg0: i32) -> (i32, i32) {
    %c0_i32 = arith.constant 0 : i32
    %c0_i32_0 = arith.constant 0 : i32
    return %c0_i32, %arg0 : i32, i32
  }
}

module attributes {stable_mosaic.version = 11 : i64} {
  func.func @_tap_conv_kernel(%arg0: i32, %arg1: memref<32x72xbf16, #tpu.memory_space<vmem>>, %arg2: memref<9x64x32xbf16, #tpu.memory_space<vmem>>, %arg3: memref<64x1xf32, #tpu.memory_space<vmem>>, %arg4: memref<64x58xbf16, #tpu.memory_space<vmem>>) attributes {dimension_semantics = [#tpu.dimension_semantics<parallel>], iteration_bounds = array<i64: 1>, scalar_prefetch = 0 : i64, scratch_operands = 0 : i64, tpu.core_type = #tpu.core_type<tc>, window_params = [{pipeline_mode = #tpu.pipeline_mode<synchronous>, transform_indices = @transform_0, window_bounds = array<i64: 32, 72>}, {pipeline_mode = #tpu.pipeline_mode<synchronous>, transform_indices = @transform_1, window_bounds = array<i64: 9, 64, 32>}, {pipeline_mode = #tpu.pipeline_mode<synchronous>, transform_indices = @transform_2, window_bounds = array<i64: 64, 1>}, {transform_indices = @transform_3, window_bounds = array<i64: 64, 58>}]} {
    %c0 = arith.constant 0 : index
    %c0_0 = arith.constant 0 : index
    %c0_1 = arith.constant 0 : index
    %0 = vector.load %arg2[%c0, %c0_0, %c0_1] : memref<9x64x32xbf16, #tpu.memory_space<vmem>>, vector<1x64x32xbf16>
    %1 = vector.shape_cast %0 : vector<1x64x32xbf16> to vector<64x32xbf16>
    %c0_2 = arith.constant 0 : index
    %c0_3 = arith.constant 0 : index
    %2 = vector.load %arg1[%c0_2, %c0_3] : memref<32x72xbf16, #tpu.memory_space<vmem>>, vector<32x58xbf16>
    %cst = arith.constant dense<0.000000e+00> : vector<64x58xf32>
    %3 = tpu.matmul %1, %2, %cst {dimension_numbers = #tpu.dot_dimension_numbers<[1], [0], [0], [1], [0, 0, 1, 1], [], []>} : vector<64x32xbf16>, vector<32x58xbf16>, vector<64x58xf32> -> vector<64x58xf32>
    %c1 = arith.constant 1 : index
    %c0_4 = arith.constant 0 : index
    %c0_5 = arith.constant 0 : index
    %4 = vector.load %arg2[%c1, %c0_4, %c0_5] : memref<9x64x32xbf16, #tpu.memory_space<vmem>>, vector<1x64x32xbf16>
    %5 = vector.shape_cast %4 : vector<1x64x32xbf16> to vector<64x32xbf16>
    %c0_6 = arith.constant 0 : index
    %c1_7 = arith.constant 1 : index
    %6 = vector.load %arg1[%c0_6, %c1_7] : memref<32x72xbf16, #tpu.memory_space<vmem>>, vector<32x58xbf16>
    %cst_8 = arith.constant dense<0.000000e+00> : vector<64x58xf32>
    %7 = tpu.matmul %5, %6, %cst_8 {dimension_numbers = #tpu.dot_dimension_numbers<[1], [0], [0], [1], [0, 0, 1, 1], [], []>} : vector<64x32xbf16>, vector<32x58xbf16>, vector<64x58xf32> -> vector<64x58xf32>
    %8 = arith.addf %3, %7 : vector<64x58xf32>
    %c2 = arith.constant 2 : index
    %c0_9 = arith.constant 0 : index
    %c0_10 = arith.constant 0 : index
    %9 = vector.load %arg2[%c2, %c0_9, %c0_10] : memref<9x64x32xbf16, #tpu.memory_space<vmem>>, vector<1x64x32xbf16>
    %10 = vector.shape_cast %9 : vector<1x64x32xbf16> to vector<64x32xbf16>
    %c0_11 = arith.constant 0 : index
    %c2_12 = arith.constant 2 : index
    %11 = vector.load %arg1[%c0_11, %c2_12] : memref<32x72xbf16, #tpu.memory_space<vmem>>, vector<32x58xbf16>
    %cst_13 = arith.constant dense<0.000000e+00> : vector<64x58xf32>
    %12 = tpu.matmul %10, %11, %cst_13 {dimension_numbers = #tpu.dot_dimension_numbers<[1], [0], [0], [1], [0, 0, 1, 1], [], []>} : vector<64x32xbf16>, vector<32x58xbf16>, vector<64x58xf32> -> vector<64x58xf32>
    %13 = arith.addf %8, %12 : vector<64x58xf32>
    %c3 = arith.constant 3 : index
    %c0_14 = arith.constant 0 : index
    %c0_15 = arith.constant 0 : index
    %14 = vector.load %arg2[%c3, %c0_14, %c0_15] : memref<9x64x32xbf16, #tpu.memory_space<vmem>>, vector<1x64x32xbf16>
    %15 = vector.shape_cast %14 : vector<1x64x32xbf16> to vector<64x32xbf16>
    %c0_16 = arith.constant 0 : index
    %c6 = arith.constant 6 : index
    %16 = vector.load %arg1[%c0_16, %c6] : memref<32x72xbf16, #tpu.memory_space<vmem>>, vector<32x58xbf16>
    %cst_17 = arith.constant dense<0.000000e+00> : vector<64x58xf32>
    %17 = tpu.matmul %15, %16, %cst_17 {dimension_numbers = #tpu.dot_dimension_numbers<[1], [0], [0], [1], [0, 0, 1, 1], [], []>} : vector<64x32xbf16>, vector<32x58xbf16>, vector<64x58xf32> -> vector<64x58xf32>
    %18 = arith.addf %13, %17 : vector<64x58xf32>
    %c4 = arith.constant 4 : index
    %c0_18 = arith.constant 0 : index
    %c0_19 = arith.constant 0 : index
    %19 = vector.load %arg2[%c4, %c0_18, %c0_19] : memref<9x64x32xbf16, #tpu.memory_space<vmem>>, vector<1x64x32xbf16>
    %20 = vector.shape_cast %19 : vector<1x64x32xbf16> to vector<64x32xbf16>
    %c0_20 = arith.constant 0 : index
    %c7 = arith.constant 7 : index
    %21 = vector.load %arg1[%c0_20, %c7] : memref<32x72xbf16, #tpu.memory_space<vmem>>, vector<32x58xbf16>
    %cst_21 = arith.constant dense<0.000000e+00> : vector<64x58xf32>
    %22 = tpu.matmul %20, %21, %cst_21 {dimension_numbers = #tpu.dot_dimension_numbers<[1], [0], [0], [1], [0, 0, 1, 1], [], []>} : vector<64x32xbf16>, vector<32x58xbf16>, vector<64x58xf32> -> vector<64x58xf32>
    %23 = arith.addf %18, %22 : vector<64x58xf32>
    %c5 = arith.constant 5 : index
    %c0_22 = arith.constant 0 : index
    %c0_23 = arith.constant 0 : index
    %24 = vector.load %arg2[%c5, %c0_22, %c0_23] : memref<9x64x32xbf16, #tpu.memory_space<vmem>>, vector<1x64x32xbf16>
    %25 = vector.shape_cast %24 : vector<1x64x32xbf16> to vector<64x32xbf16>
    %c0_24 = arith.constant 0 : index
    %c8 = arith.constant 8 : index
    %26 = vector.load %arg1[%c0_24, %c8] : memref<32x72xbf16, #tpu.memory_space<vmem>>, vector<32x58xbf16>
    %cst_25 = arith.constant dense<0.000000e+00> : vector<64x58xf32>
    %27 = tpu.matmul %25, %26, %cst_25 {dimension_numbers = #tpu.dot_dimension_numbers<[1], [0], [0], [1], [0, 0, 1, 1], [], []>} : vector<64x32xbf16>, vector<32x58xbf16>, vector<64x58xf32> -> vector<64x58xf32>
    %28 = arith.addf %23, %27 : vector<64x58xf32>
    %c6_26 = arith.constant 6 : index
    %c0_27 = arith.constant 0 : index
    %c0_28 = arith.constant 0 : index
    %29 = vector.load %arg2[%c6_26, %c0_27, %c0_28] : memref<9x64x32xbf16, #tpu.memory_space<vmem>>, vector<1x64x32xbf16>
    %30 = vector.shape_cast %29 : vector<1x64x32xbf16> to vector<64x32xbf16>
    %c0_29 = arith.constant 0 : index
    %c12 = arith.constant 12 : index
    %31 = vector.load %arg1[%c0_29, %c12] : memref<32x72xbf16, #tpu.memory_space<vmem>>, vector<32x58xbf16>
    %cst_30 = arith.constant dense<0.000000e+00> : vector<64x58xf32>
    %32 = tpu.matmul %30, %31, %cst_30 {dimension_numbers = #tpu.dot_dimension_numbers<[1], [0], [0], [1], [0, 0, 1, 1], [], []>} : vector<64x32xbf16>, vector<32x58xbf16>, vector<64x58xf32> -> vector<64x58xf32>
    %33 = arith.addf %28, %32 : vector<64x58xf32>
    %c7_31 = arith.constant 7 : index
    %c0_32 = arith.constant 0 : index
    %c0_33 = arith.constant 0 : index
    %34 = vector.load %arg2[%c7_31, %c0_32, %c0_33] : memref<9x64x32xbf16, #tpu.memory_space<vmem>>, vector<1x64x32xbf16>
    %35 = vector.shape_cast %34 : vector<1x64x32xbf16> to vector<64x32xbf16>
    %c0_34 = arith.constant 0 : index
    %c13 = arith.constant 13 : index
    %36 = vector.load %arg1[%c0_34, %c13] : memref<32x72xbf16, #tpu.memory_space<vmem>>, vector<32x58xbf16>
    %cst_35 = arith.constant dense<0.000000e+00> : vector<64x58xf32>
    %37 = tpu.matmul %35, %36, %cst_35 {dimension_numbers = #tpu.dot_dimension_numbers<[1], [0], [0], [1], [0, 0, 1, 1], [], []>} : vector<64x32xbf16>, vector<32x58xbf16>, vector<64x58xf32> -> vector<64x58xf32>
    %38 = arith.addf %33, %37 : vector<64x58xf32>
    %c8_36 = arith.constant 8 : index
    %c0_37 = arith.constant 0 : index
    %c0_38 = arith.constant 0 : index
    %39 = vector.load %arg2[%c8_36, %c0_37, %c0_38] : memref<9x64x32xbf16, #tpu.memory_space<vmem>>, vector<1x64x32xbf16>
    %40 = vector.shape_cast %39 : vector<1x64x32xbf16> to vector<64x32xbf16>
    %c0_39 = arith.constant 0 : index
    %c14 = arith.constant 14 : index
    %41 = vector.load %arg1[%c0_39, %c14] : memref<32x72xbf16, #tpu.memory_space<vmem>>, vector<32x58xbf16>
    %cst_40 = arith.constant dense<0.000000e+00> : vector<64x58xf32>
    %42 = tpu.matmul %40, %41, %cst_40 {dimension_numbers = #tpu.dot_dimension_numbers<[1], [0], [0], [1], [0, 0, 1, 1], [], []>} : vector<64x32xbf16>, vector<32x58xbf16>, vector<64x58xf32> -> vector<64x58xf32>
    %43 = arith.addf %38, %42 : vector<64x58xf32>
    %c0_41 = arith.constant 0 : index
    %c0_42 = arith.constant 0 : index
    %44 = vector.load %arg3[%c0_41, %c0_42] : memref<64x1xf32, #tpu.memory_space<vmem>>, vector<64x1xf32>
    %45 = vector.broadcast %44 : vector<64x1xf32> to vector<64x58xf32>
    %46 = arith.addf %43, %45 : vector<64x58xf32>
    %cst_43 = arith.constant 0.000000e+00 : f32
    %47 = vector.broadcast %cst_43 : f32 to vector<64x58xf32>
    %48 = arith.maximumf %46, %47 : vector<64x58xf32>
    %49 = arith.truncf %48 : vector<64x58xf32> to vector<64x58xbf16>
    %c0_44 = arith.constant 0 : index
    %c0_45 = arith.constant 0 : index
    %50 = vector.load %arg4[%c0_44, %c0_45] : memref<64x58xbf16, #tpu.memory_space<vmem>>, vector<64x58xbf16>
    tpu.vector_store %arg4[%c0_44, %c0_45], %49 {strides = array<i32>} : memref<64x58xbf16, #tpu.memory_space<vmem>>, vector<64x58xbf16>,
    return
  }
  func.func @transform_0(%arg0: i32) -> (i32, i32) {
    %c0_i32 = arith.constant 0 : i32
    %c0_i32_0 = arith.constant 0 : i32
    %c0_i32_1 = arith.constant 0 : i32
    return %c0_i32, %c0_i32_0 : i32, i32
  }
  func.func @transform_1(%arg0: i32) -> (i32, i32, i32) {
    %c0_i32 = arith.constant 0 : i32
    %c0_i32_0 = arith.constant 0 : i32
    %c0_i32_1 = arith.constant 0 : i32
    %c0_i32_2 = arith.constant 0 : i32
    return %c0_i32, %c0_i32_0, %c0_i32_1 : i32, i32, i32
  }
  func.func @transform_2(%arg0: i32) -> (i32, i32) {
    %c0_i32 = arith.constant 0 : i32
    %c0_i32_0 = arith.constant 0 : i32
    %c0_i32_1 = arith.constant 0 : i32
    return %c0_i32, %c0_i32_0 : i32, i32
  }
  func.func @transform_3(%arg0: i32) -> (i32, i32) {
    %c0_i32 = arith.constant 0 : i32
    %c0_i32_0 = arith.constant 0 : i32
    return %c0_i32, %arg0 : i32, i32
  }
}

module attributes {stable_mosaic.version = 11 : i64} {
  func.func @_tap_conv_kernel(%arg0: i32, %arg1: memref<32x200xbf16, #tpu.memory_space<vmem>>, %arg2: memref<9x16x32xbf16, #tpu.memory_space<vmem>>, %arg3: memref<16x1xf32, #tpu.memory_space<vmem>>, %arg4: memref<16x178xbf16, #tpu.memory_space<vmem>>) attributes {dimension_semantics = [#tpu.dimension_semantics<parallel>], iteration_bounds = array<i64: 1>, scalar_prefetch = 0 : i64, scratch_operands = 0 : i64, tpu.core_type = #tpu.core_type<tc>, window_params = [{pipeline_mode = #tpu.pipeline_mode<synchronous>, transform_indices = @transform_0, window_bounds = array<i64: 32, 200>}, {pipeline_mode = #tpu.pipeline_mode<synchronous>, transform_indices = @transform_1, window_bounds = array<i64: 9, 16, 32>}, {pipeline_mode = #tpu.pipeline_mode<synchronous>, transform_indices = @transform_2, window_bounds = array<i64: 16, 1>}, {transform_indices = @transform_3, window_bounds = array<i64: 16, 178>}]} {
    %c0 = arith.constant 0 : index
    %c0_0 = arith.constant 0 : index
    %c0_1 = arith.constant 0 : index
    %0 = vector.load %arg2[%c0, %c0_0, %c0_1] : memref<9x16x32xbf16, #tpu.memory_space<vmem>>, vector<1x16x32xbf16>
    %1 = vector.shape_cast %0 : vector<1x16x32xbf16> to vector<16x32xbf16>
    %c0_2 = arith.constant 0 : index
    %c0_3 = arith.constant 0 : index
    %2 = vector.load %arg1[%c0_2, %c0_3] : memref<32x200xbf16, #tpu.memory_space<vmem>>, vector<32x178xbf16>
    %cst = arith.constant dense<0.000000e+00> : vector<16x178xf32>
    %3 = tpu.matmul %1, %2, %cst {dimension_numbers = #tpu.dot_dimension_numbers<[1], [0], [0], [1], [0, 0, 1, 1], [], []>} : vector<16x32xbf16>, vector<32x178xbf16>, vector<16x178xf32> -> vector<16x178xf32>
    %c1 = arith.constant 1 : index
    %c0_4 = arith.constant 0 : index
    %c0_5 = arith.constant 0 : index
    %4 = vector.load %arg2[%c1, %c0_4, %c0_5] : memref<9x16x32xbf16, #tpu.memory_space<vmem>>, vector<1x16x32xbf16>
    %5 = vector.shape_cast %4 : vector<1x16x32xbf16> to vector<16x32xbf16>
    %c0_6 = arith.constant 0 : index
    %c1_7 = arith.constant 1 : index
    %6 = vector.load %arg1[%c0_6, %c1_7] : memref<32x200xbf16, #tpu.memory_space<vmem>>, vector<32x178xbf16>
    %cst_8 = arith.constant dense<0.000000e+00> : vector<16x178xf32>
    %7 = tpu.matmul %5, %6, %cst_8 {dimension_numbers = #tpu.dot_dimension_numbers<[1], [0], [0], [1], [0, 0, 1, 1], [], []>} : vector<16x32xbf16>, vector<32x178xbf16>, vector<16x178xf32> -> vector<16x178xf32>
    %8 = arith.addf %3, %7 : vector<16x178xf32>
    %c2 = arith.constant 2 : index
    %c0_9 = arith.constant 0 : index
    %c0_10 = arith.constant 0 : index
    %9 = vector.load %arg2[%c2, %c0_9, %c0_10] : memref<9x16x32xbf16, #tpu.memory_space<vmem>>, vector<1x16x32xbf16>
    %10 = vector.shape_cast %9 : vector<1x16x32xbf16> to vector<16x32xbf16>
    %c0_11 = arith.constant 0 : index
    %c2_12 = arith.constant 2 : index
    %11 = vector.load %arg1[%c0_11, %c2_12] : memref<32x200xbf16, #tpu.memory_space<vmem>>, vector<32x178xbf16>
    %cst_13 = arith.constant dense<0.000000e+00> : vector<16x178xf32>
    %12 = tpu.matmul %10, %11, %cst_13 {dimension_numbers = #tpu.dot_dimension_numbers<[1], [0], [0], [1], [0, 0, 1, 1], [], []>} : vector<16x32xbf16>, vector<32x178xbf16>, vector<16x178xf32> -> vector<16x178xf32>
    %13 = arith.addf %8, %12 : vector<16x178xf32>
    %c3 = arith.constant 3 : index
    %c0_14 = arith.constant 0 : index
    %c0_15 = arith.constant 0 : index
    %14 = vector.load %arg2[%c3, %c0_14, %c0_15] : memref<9x16x32xbf16, #tpu.memory_space<vmem>>, vector<1x16x32xbf16>
    %15 = vector.shape_cast %14 : vector<1x16x32xbf16> to vector<16x32xbf16>
    %c0_16 = arith.constant 0 : index
    %c10 = arith.constant 10 : index
    %16 = vector.load %arg1[%c0_16, %c10] : memref<32x200xbf16, #tpu.memory_space<vmem>>, vector<32x178xbf16>
    %cst_17 = arith.constant dense<0.000000e+00> : vector<16x178xf32>
    %17 = tpu.matmul %15, %16, %cst_17 {dimension_numbers = #tpu.dot_dimension_numbers<[1], [0], [0], [1], [0, 0, 1, 1], [], []>} : vector<16x32xbf16>, vector<32x178xbf16>, vector<16x178xf32> -> vector<16x178xf32>
    %18 = arith.addf %13, %17 : vector<16x178xf32>
    %c4 = arith.constant 4 : index
    %c0_18 = arith.constant 0 : index
    %c0_19 = arith.constant 0 : index
    %19 = vector.load %arg2[%c4, %c0_18, %c0_19] : memref<9x16x32xbf16, #tpu.memory_space<vmem>>, vector<1x16x32xbf16>
    %20 = vector.shape_cast %19 : vector<1x16x32xbf16> to vector<16x32xbf16>
    %c0_20 = arith.constant 0 : index
    %c11 = arith.constant 11 : index
    %21 = vector.load %arg1[%c0_20, %c11] : memref<32x200xbf16, #tpu.memory_space<vmem>>, vector<32x178xbf16>
    %cst_21 = arith.constant dense<0.000000e+00> : vector<16x178xf32>
    %22 = tpu.matmul %20, %21, %cst_21 {dimension_numbers = #tpu.dot_dimension_numbers<[1], [0], [0], [1], [0, 0, 1, 1], [], []>} : vector<16x32xbf16>, vector<32x178xbf16>, vector<16x178xf32> -> vector<16x178xf32>
    %23 = arith.addf %18, %22 : vector<16x178xf32>
    %c5 = arith.constant 5 : index
    %c0_22 = arith.constant 0 : index
    %c0_23 = arith.constant 0 : index
    %24 = vector.load %arg2[%c5, %c0_22, %c0_23] : memref<9x16x32xbf16, #tpu.memory_space<vmem>>, vector<1x16x32xbf16>
    %25 = vector.shape_cast %24 : vector<1x16x32xbf16> to vector<16x32xbf16>
    %c0_24 = arith.constant 0 : index
    %c12 = arith.constant 12 : index
    %26 = vector.load %arg1[%c0_24, %c12] : memref<32x200xbf16, #tpu.memory_space<vmem>>, vector<32x178xbf16>
    %cst_25 = arith.constant dense<0.000000e+00> : vector<16x178xf32>
    %27 = tpu.matmul %25, %26, %cst_25 {dimension_numbers = #tpu.dot_dimension_numbers<[1], [0], [0], [1], [0, 0, 1, 1], [], []>} : vector<16x32xbf16>, vector<32x178xbf16>, vector<16x178xf32> -> vector<16x178xf32>
    %28 = arith.addf %23, %27 : vector<16x178xf32>
    %c6 = arith.constant 6 : index
    %c0_26 = arith.constant 0 : index
    %c0_27 = arith.constant 0 : index
    %29 = vector.load %arg2[%c6, %c0_26, %c0_27] : memref<9x16x32xbf16, #tpu.memory_space<vmem>>, vector<1x16x32xbf16>
    %30 = vector.shape_cast %29 : vector<1x16x32xbf16> to vector<16x32xbf16>
    %c0_28 = arith.constant 0 : index
    %c20 = arith.constant 20 : index
    %31 = vector.load %arg1[%c0_28, %c20] : memref<32x200xbf16, #tpu.memory_space<vmem>>, vector<32x178xbf16>
    %cst_29 = arith.constant dense<0.000000e+00> : vector<16x178xf32>
    %32 = tpu.matmul %30, %31, %cst_29 {dimension_numbers = #tpu.dot_dimension_numbers<[1], [0], [0], [1], [0, 0, 1, 1], [], []>} : vector<16x32xbf16>, vector<32x178xbf16>, vector<16x178xf32> -> vector<16x178xf32>
    %33 = arith.addf %28, %32 : vector<16x178xf32>
    %c7 = arith.constant 7 : index
    %c0_30 = arith.constant 0 : index
    %c0_31 = arith.constant 0 : index
    %34 = vector.load %arg2[%c7, %c0_30, %c0_31] : memref<9x16x32xbf16, #tpu.memory_space<vmem>>, vector<1x16x32xbf16>
    %35 = vector.shape_cast %34 : vector<1x16x32xbf16> to vector<16x32xbf16>
    %c0_32 = arith.constant 0 : index
    %c21 = arith.constant 21 : index
    %36 = vector.load %arg1[%c0_32, %c21] : memref<32x200xbf16, #tpu.memory_space<vmem>>, vector<32x178xbf16>
    %cst_33 = arith.constant dense<0.000000e+00> : vector<16x178xf32>
    %37 = tpu.matmul %35, %36, %cst_33 {dimension_numbers = #tpu.dot_dimension_numbers<[1], [0], [0], [1], [0, 0, 1, 1], [], []>} : vector<16x32xbf16>, vector<32x178xbf16>, vector<16x178xf32> -> vector<16x178xf32>
    %38 = arith.addf %33, %37 : vector<16x178xf32>
    %c8 = arith.constant 8 : index
    %c0_34 = arith.constant 0 : index
    %c0_35 = arith.constant 0 : index
    %39 = vector.load %arg2[%c8, %c0_34, %c0_35] : memref<9x16x32xbf16, #tpu.memory_space<vmem>>, vector<1x16x32xbf16>
    %40 = vector.shape_cast %39 : vector<1x16x32xbf16> to vector<16x32xbf16>
    %c0_36 = arith.constant 0 : index
    %c22 = arith.constant 22 : index
    %41 = vector.load %arg1[%c0_36, %c22] : memref<32x200xbf16, #tpu.memory_space<vmem>>, vector<32x178xbf16>
    %cst_37 = arith.constant dense<0.000000e+00> : vector<16x178xf32>
    %42 = tpu.matmul %40, %41, %cst_37 {dimension_numbers = #tpu.dot_dimension_numbers<[1], [0], [0], [1], [0, 0, 1, 1], [], []>} : vector<16x32xbf16>, vector<32x178xbf16>, vector<16x178xf32> -> vector<16x178xf32>
    %43 = arith.addf %38, %42 : vector<16x178xf32>
    %c0_38 = arith.constant 0 : index
    %c0_39 = arith.constant 0 : index
    %44 = vector.load %arg3[%c0_38, %c0_39] : memref<16x1xf32, #tpu.memory_space<vmem>>, vector<16x1xf32>
    %45 = vector.broadcast %44 : vector<16x1xf32> to vector<16x178xf32>
    %46 = arith.addf %43, %45 : vector<16x178xf32>
    %cst_40 = arith.constant 0.000000e+00 : f32
    %47 = vector.broadcast %cst_40 : f32 to vector<16x178xf32>
    %48 = arith.maximumf %46, %47 : vector<16x178xf32>
    %49 = arith.truncf %48 : vector<16x178xf32> to vector<16x178xbf16>
    %c0_41 = arith.constant 0 : index
    %c0_42 = arith.constant 0 : index
    %50 = vector.load %arg4[%c0_41, %c0_42] : memref<16x178xbf16, #tpu.memory_space<vmem>>, vector<16x178xbf16>
    tpu.vector_store %arg4[%c0_41, %c0_42], %49 {strides = array<i32>} : memref<16x178xbf16, #tpu.memory_space<vmem>>, vector<16x178xbf16>,
    return
  }
  func.func @transform_0(%arg0: i32) -> (i32, i32) {
    %c0_i32 = arith.constant 0 : i32
    %c0_i32_0 = arith.constant 0 : i32
    %c0_i32_1 = arith.constant 0 : i32
    return %c0_i32, %c0_i32_0 : i32, i32
  }
  func.func @transform_1(%arg0: i32) -> (i32, i32, i32) {
    %c0_i32 = arith.constant 0 : i32
    %c0_i32_0 = arith.constant 0 : i32
    %c0_i32_1 = arith.constant 0 : i32
    %c0_i32_2 = arith.constant 0 : i32
    return %c0_i32, %c0_i32_0, %c0_i32_1 : i32, i32, i32
  }
  func.func @transform_2(%arg0: i32) -> (i32, i32) {
    %c0_i32 = arith.constant 0 : i32
    %c0_i32_0 = arith.constant 0 : i32
    %c0_i32_1 = arith.constant 0 : i32
    return %c0_i32, %c0_i32_0 : i32, i32
  }
  func.func @transform_3(%arg0: i32) -> (i32, i32) {
    %c0_i32 = arith.constant 0 : i32
    %c0_i32_0 = arith.constant 0 : i32
    return %c0_i32, %arg0 : i32, i32
  }
}

module attributes {stable_mosaic.version = 11 : i64} {
  func.func @_tap_conv_kernel(%arg0: i32, %arg1: memref<16x200xbf16, #tpu.memory_space<vmem>>, %arg2: memref<9x32x16xbf16, #tpu.memory_space<vmem>>, %arg3: memref<32x1xf32, #tpu.memory_space<vmem>>, %arg4: memref<32x178xbf16, #tpu.memory_space<vmem>>) attributes {dimension_semantics = [#tpu.dimension_semantics<parallel>], iteration_bounds = array<i64: 1>, scalar_prefetch = 0 : i64, scratch_operands = 0 : i64, tpu.core_type = #tpu.core_type<tc>, window_params = [{pipeline_mode = #tpu.pipeline_mode<synchronous>, transform_indices = @transform_0, window_bounds = array<i64: 16, 200>}, {pipeline_mode = #tpu.pipeline_mode<synchronous>, transform_indices = @transform_1, window_bounds = array<i64: 9, 32, 16>}, {pipeline_mode = #tpu.pipeline_mode<synchronous>, transform_indices = @transform_2, window_bounds = array<i64: 32, 1>}, {transform_indices = @transform_3, window_bounds = array<i64: 32, 178>}]} {
    %c0 = arith.constant 0 : index
    %c0_0 = arith.constant 0 : index
    %c0_1 = arith.constant 0 : index
    %0 = vector.load %arg2[%c0, %c0_0, %c0_1] : memref<9x32x16xbf16, #tpu.memory_space<vmem>>, vector<1x32x16xbf16>
    %1 = vector.shape_cast %0 : vector<1x32x16xbf16> to vector<32x16xbf16>
    %c0_2 = arith.constant 0 : index
    %c0_3 = arith.constant 0 : index
    %2 = vector.load %arg1[%c0_2, %c0_3] : memref<16x200xbf16, #tpu.memory_space<vmem>>, vector<16x178xbf16>
    %cst = arith.constant dense<0.000000e+00> : vector<32x178xf32>
    %3 = tpu.matmul %1, %2, %cst {dimension_numbers = #tpu.dot_dimension_numbers<[1], [0], [0], [1], [0, 0, 1, 1], [], []>} : vector<32x16xbf16>, vector<16x178xbf16>, vector<32x178xf32> -> vector<32x178xf32>
    %c1 = arith.constant 1 : index
    %c0_4 = arith.constant 0 : index
    %c0_5 = arith.constant 0 : index
    %4 = vector.load %arg2[%c1, %c0_4, %c0_5] : memref<9x32x16xbf16, #tpu.memory_space<vmem>>, vector<1x32x16xbf16>
    %5 = vector.shape_cast %4 : vector<1x32x16xbf16> to vector<32x16xbf16>
    %c0_6 = arith.constant 0 : index
    %c1_7 = arith.constant 1 : index
    %6 = vector.load %arg1[%c0_6, %c1_7] : memref<16x200xbf16, #tpu.memory_space<vmem>>, vector<16x178xbf16>
    %cst_8 = arith.constant dense<0.000000e+00> : vector<32x178xf32>
    %7 = tpu.matmul %5, %6, %cst_8 {dimension_numbers = #tpu.dot_dimension_numbers<[1], [0], [0], [1], [0, 0, 1, 1], [], []>} : vector<32x16xbf16>, vector<16x178xbf16>, vector<32x178xf32> -> vector<32x178xf32>
    %8 = arith.addf %3, %7 : vector<32x178xf32>
    %c2 = arith.constant 2 : index
    %c0_9 = arith.constant 0 : index
    %c0_10 = arith.constant 0 : index
    %9 = vector.load %arg2[%c2, %c0_9, %c0_10] : memref<9x32x16xbf16, #tpu.memory_space<vmem>>, vector<1x32x16xbf16>
    %10 = vector.shape_cast %9 : vector<1x32x16xbf16> to vector<32x16xbf16>
    %c0_11 = arith.constant 0 : index
    %c2_12 = arith.constant 2 : index
    %11 = vector.load %arg1[%c0_11, %c2_12] : memref<16x200xbf16, #tpu.memory_space<vmem>>, vector<16x178xbf16>
    %cst_13 = arith.constant dense<0.000000e+00> : vector<32x178xf32>
    %12 = tpu.matmul %10, %11, %cst_13 {dimension_numbers = #tpu.dot_dimension_numbers<[1], [0], [0], [1], [0, 0, 1, 1], [], []>} : vector<32x16xbf16>, vector<16x178xbf16>, vector<32x178xf32> -> vector<32x178xf32>
    %13 = arith.addf %8, %12 : vector<32x178xf32>
    %c3 = arith.constant 3 : index
    %c0_14 = arith.constant 0 : index
    %c0_15 = arith.constant 0 : index
    %14 = vector.load %arg2[%c3, %c0_14, %c0_15] : memref<9x32x16xbf16, #tpu.memory_space<vmem>>, vector<1x32x16xbf16>
    %15 = vector.shape_cast %14 : vector<1x32x16xbf16> to vector<32x16xbf16>
    %c0_16 = arith.constant 0 : index
    %c10 = arith.constant 10 : index
    %16 = vector.load %arg1[%c0_16, %c10] : memref<16x200xbf16, #tpu.memory_space<vmem>>, vector<16x178xbf16>
    %cst_17 = arith.constant dense<0.000000e+00> : vector<32x178xf32>
    %17 = tpu.matmul %15, %16, %cst_17 {dimension_numbers = #tpu.dot_dimension_numbers<[1], [0], [0], [1], [0, 0, 1, 1], [], []>} : vector<32x16xbf16>, vector<16x178xbf16>, vector<32x178xf32> -> vector<32x178xf32>
    %18 = arith.addf %13, %17 : vector<32x178xf32>
    %c4 = arith.constant 4 : index
    %c0_18 = arith.constant 0 : index
    %c0_19 = arith.constant 0 : index
    %19 = vector.load %arg2[%c4, %c0_18, %c0_19] : memref<9x32x16xbf16, #tpu.memory_space<vmem>>, vector<1x32x16xbf16>
    %20 = vector.shape_cast %19 : vector<1x32x16xbf16> to vector<32x16xbf16>
    %c0_20 = arith.constant 0 : index
    %c11 = arith.constant 11 : index
    %21 = vector.load %arg1[%c0_20, %c11] : memref<16x200xbf16, #tpu.memory_space<vmem>>, vector<16x178xbf16>
    %cst_21 = arith.constant dense<0.000000e+00> : vector<32x178xf32>
    %22 = tpu.matmul %20, %21, %cst_21 {dimension_numbers = #tpu.dot_dimension_numbers<[1], [0], [0], [1], [0, 0, 1, 1], [], []>} : vector<32x16xbf16>, vector<16x178xbf16>, vector<32x178xf32> -> vector<32x178xf32>
    %23 = arith.addf %18, %22 : vector<32x178xf32>
    %c5 = arith.constant 5 : index
    %c0_22 = arith.constant 0 : index
    %c0_23 = arith.constant 0 : index
    %24 = vector.load %arg2[%c5, %c0_22, %c0_23] : memref<9x32x16xbf16, #tpu.memory_space<vmem>>, vector<1x32x16xbf16>
    %25 = vector.shape_cast %24 : vector<1x32x16xbf16> to vector<32x16xbf16>
    %c0_24 = arith.constant 0 : index
    %c12 = arith.constant 12 : index
    %26 = vector.load %arg1[%c0_24, %c12] : memref<16x200xbf16, #tpu.memory_space<vmem>>, vector<16x178xbf16>
    %cst_25 = arith.constant dense<0.000000e+00> : vector<32x178xf32>
    %27 = tpu.matmul %25, %26, %cst_25 {dimension_numbers = #tpu.dot_dimension_numbers<[1], [0], [0], [1], [0, 0, 1, 1], [], []>} : vector<32x16xbf16>, vector<16x178xbf16>, vector<32x178xf32> -> vector<32x178xf32>
    %28 = arith.addf %23, %27 : vector<32x178xf32>
    %c6 = arith.constant 6 : index
    %c0_26 = arith.constant 0 : index
    %c0_27 = arith.constant 0 : index
    %29 = vector.load %arg2[%c6, %c0_26, %c0_27] : memref<9x32x16xbf16, #tpu.memory_space<vmem>>, vector<1x32x16xbf16>
    %30 = vector.shape_cast %29 : vector<1x32x16xbf16> to vector<32x16xbf16>
    %c0_28 = arith.constant 0 : index
    %c20 = arith.constant 20 : index
    %31 = vector.load %arg1[%c0_28, %c20] : memref<16x200xbf16, #tpu.memory_space<vmem>>, vector<16x178xbf16>
    %cst_29 = arith.constant dense<0.000000e+00> : vector<32x178xf32>
    %32 = tpu.matmul %30, %31, %cst_29 {dimension_numbers = #tpu.dot_dimension_numbers<[1], [0], [0], [1], [0, 0, 1, 1], [], []>} : vector<32x16xbf16>, vector<16x178xbf16>, vector<32x178xf32> -> vector<32x178xf32>
    %33 = arith.addf %28, %32 : vector<32x178xf32>
    %c7 = arith.constant 7 : index
    %c0_30 = arith.constant 0 : index
    %c0_31 = arith.constant 0 : index
    %34 = vector.load %arg2[%c7, %c0_30, %c0_31] : memref<9x32x16xbf16, #tpu.memory_space<vmem>>, vector<1x32x16xbf16>
    %35 = vector.shape_cast %34 : vector<1x32x16xbf16> to vector<32x16xbf16>
    %c0_32 = arith.constant 0 : index
    %c21 = arith.constant 21 : index
    %36 = vector.load %arg1[%c0_32, %c21] : memref<16x200xbf16, #tpu.memory_space<vmem>>, vector<16x178xbf16>
    %cst_33 = arith.constant dense<0.000000e+00> : vector<32x178xf32>
    %37 = tpu.matmul %35, %36, %cst_33 {dimension_numbers = #tpu.dot_dimension_numbers<[1], [0], [0], [1], [0, 0, 1, 1], [], []>} : vector<32x16xbf16>, vector<16x178xbf16>, vector<32x178xf32> -> vector<32x178xf32>
    %38 = arith.addf %33, %37 : vector<32x178xf32>
    %c8 = arith.constant 8 : index
    %c0_34 = arith.constant 0 : index
    %c0_35 = arith.constant 0 : index
    %39 = vector.load %arg2[%c8, %c0_34, %c0_35] : memref<9x32x16xbf16, #tpu.memory_space<vmem>>, vector<1x32x16xbf16>
    %40 = vector.shape_cast %39 : vector<1x32x16xbf16> to vector<32x16xbf16>
    %c0_36 = arith.constant 0 : index
    %c22 = arith.constant 22 : index
    %41 = vector.load %arg1[%c0_36, %c22] : memref<16x200xbf16, #tpu.memory_space<vmem>>, vector<16x178xbf16>
    %cst_37 = arith.constant dense<0.000000e+00> : vector<32x178xf32>
    %42 = tpu.matmul %40, %41, %cst_37 {dimension_numbers = #tpu.dot_dimension_numbers<[1], [0], [0], [1], [0, 0, 1, 1], [], []>} : vector<32x16xbf16>, vector<16x178xbf16>, vector<32x178xf32> -> vector<32x178xf32>
    %43 = arith.addf %38, %42 : vector<32x178xf32>
    %c0_38 = arith.constant 0 : index
    %c0_39 = arith.constant 0 : index
    %44 = vector.load %arg3[%c0_38, %c0_39] : memref<32x1xf32, #tpu.memory_space<vmem>>, vector<32x1xf32>
    %45 = vector.broadcast %44 : vector<32x1xf32> to vector<32x178xf32>
    %46 = arith.addf %43, %45 : vector<32x178xf32>
    %cst_40 = arith.constant 0.000000e+00 : f32
    %47 = vector.broadcast %cst_40 : f32 to vector<32x178xf32>
    %48 = arith.maximumf %46, %47 : vector<32x178xf32>
    %49 = arith.truncf %48 : vector<32x178xf32> to vector<32x178xbf16>
    %c0_41 = arith.constant 0 : index
    %c0_42 = arith.constant 0 : index
    %50 = vector.load %arg4[%c0_41, %c0_42] : memref<32x178xbf16, #tpu.memory_space<vmem>>, vector<32x178xbf16>
    tpu.vector_store %arg4[%c0_41, %c0_42], %49 {strides = array<i32>} : memref<32x178xbf16, #tpu.memory_space<vmem>>, vector<32x178xbf16>,
    return
  }
  func.func @transform_0(%arg0: i32) -> (i32, i32) {
    %c0_i32 = arith.constant 0 : i32
    %c0_i32_0 = arith.constant 0 : i32
    %c0_i32_1 = arith.constant 0 : i32
    return %c0_i32, %c0_i32_0 : i32, i32
  }
  func.func @transform_1(%arg0: i32) -> (i32, i32, i32) {
    %c0_i32 = arith.constant 0 : i32
    %c0_i32_0 = arith.constant 0 : i32
    %c0_i32_1 = arith.constant 0 : i32
    %c0_i32_2 = arith.constant 0 : i32
    return %c0_i32, %c0_i32_0, %c0_i32_1 : i32, i32, i32
  }
  func.func @transform_2(%arg0: i32) -> (i32, i32) {
    %c0_i32 = arith.constant 0 : i32
    %c0_i32_0 = arith.constant 0 : i32
    %c0_i32_1 = arith.constant 0 : i32
    return %c0_i32, %c0_i32_0 : i32, i32
  }
  func.func @transform_3(%arg0: i32) -> (i32, i32) {
    %c0_i32 = arith.constant 0 : i32
    %c0_i32_0 = arith.constant 0 : i32
    return %c0_i32, %arg0 : i32, i32
  }
}

module attributes {stable_mosaic.version = 11 : i64} {
  func.func @_tap_conv_kernel(%arg0: i32, %arg1: memref<16x648xbf16, #tpu.memory_space<vmem>>, %arg2: memref<9x8x16xbf16, #tpu.memory_space<vmem>>, %arg3: memref<8x1xf32, #tpu.memory_space<vmem>>, %arg4: memref<8x610xbf16, #tpu.memory_space<vmem>>) attributes {dimension_semantics = [#tpu.dimension_semantics<parallel>], iteration_bounds = array<i64: 1>, scalar_prefetch = 0 : i64, scratch_operands = 0 : i64, tpu.core_type = #tpu.core_type<tc>, window_params = [{pipeline_mode = #tpu.pipeline_mode<synchronous>, transform_indices = @transform_0, window_bounds = array<i64: 16, 648>}, {pipeline_mode = #tpu.pipeline_mode<synchronous>, transform_indices = @transform_1, window_bounds = array<i64: 9, 8, 16>}, {pipeline_mode = #tpu.pipeline_mode<synchronous>, transform_indices = @transform_2, window_bounds = array<i64: 8, 1>}, {transform_indices = @transform_3, window_bounds = array<i64: 8, 610>}]} {
    %c0 = arith.constant 0 : index
    %c0_0 = arith.constant 0 : index
    %c0_1 = arith.constant 0 : index
    %0 = vector.load %arg2[%c0, %c0_0, %c0_1] : memref<9x8x16xbf16, #tpu.memory_space<vmem>>, vector<1x8x16xbf16>
    %1 = vector.shape_cast %0 : vector<1x8x16xbf16> to vector<8x16xbf16>
    %c0_2 = arith.constant 0 : index
    %c0_3 = arith.constant 0 : index
    %2 = vector.load %arg1[%c0_2, %c0_3] : memref<16x648xbf16, #tpu.memory_space<vmem>>, vector<16x610xbf16>
    %cst = arith.constant dense<0.000000e+00> : vector<8x610xf32>
    %3 = tpu.matmul %1, %2, %cst {dimension_numbers = #tpu.dot_dimension_numbers<[1], [0], [0], [1], [0, 0, 1, 1], [], []>} : vector<8x16xbf16>, vector<16x610xbf16>, vector<8x610xf32> -> vector<8x610xf32>
    %c1 = arith.constant 1 : index
    %c0_4 = arith.constant 0 : index
    %c0_5 = arith.constant 0 : index
    %4 = vector.load %arg2[%c1, %c0_4, %c0_5] : memref<9x8x16xbf16, #tpu.memory_space<vmem>>, vector<1x8x16xbf16>
    %5 = vector.shape_cast %4 : vector<1x8x16xbf16> to vector<8x16xbf16>
    %c0_6 = arith.constant 0 : index
    %c1_7 = arith.constant 1 : index
    %6 = vector.load %arg1[%c0_6, %c1_7] : memref<16x648xbf16, #tpu.memory_space<vmem>>, vector<16x610xbf16>
    %cst_8 = arith.constant dense<0.000000e+00> : vector<8x610xf32>
    %7 = tpu.matmul %5, %6, %cst_8 {dimension_numbers = #tpu.dot_dimension_numbers<[1], [0], [0], [1], [0, 0, 1, 1], [], []>} : vector<8x16xbf16>, vector<16x610xbf16>, vector<8x610xf32> -> vector<8x610xf32>
    %8 = arith.addf %3, %7 : vector<8x610xf32>
    %c2 = arith.constant 2 : index
    %c0_9 = arith.constant 0 : index
    %c0_10 = arith.constant 0 : index
    %9 = vector.load %arg2[%c2, %c0_9, %c0_10] : memref<9x8x16xbf16, #tpu.memory_space<vmem>>, vector<1x8x16xbf16>
    %10 = vector.shape_cast %9 : vector<1x8x16xbf16> to vector<8x16xbf16>
    %c0_11 = arith.constant 0 : index
    %c2_12 = arith.constant 2 : index
    %11 = vector.load %arg1[%c0_11, %c2_12] : memref<16x648xbf16, #tpu.memory_space<vmem>>, vector<16x610xbf16>
    %cst_13 = arith.constant dense<0.000000e+00> : vector<8x610xf32>
    %12 = tpu.matmul %10, %11, %cst_13 {dimension_numbers = #tpu.dot_dimension_numbers<[1], [0], [0], [1], [0, 0, 1, 1], [], []>} : vector<8x16xbf16>, vector<16x610xbf16>, vector<8x610xf32> -> vector<8x610xf32>
    %13 = arith.addf %8, %12 : vector<8x610xf32>
    %c3 = arith.constant 3 : index
    %c0_14 = arith.constant 0 : index
    %c0_15 = arith.constant 0 : index
    %14 = vector.load %arg2[%c3, %c0_14, %c0_15] : memref<9x8x16xbf16, #tpu.memory_space<vmem>>, vector<1x8x16xbf16>
    %15 = vector.shape_cast %14 : vector<1x8x16xbf16> to vector<8x16xbf16>
    %c0_16 = arith.constant 0 : index
    %c18 = arith.constant 18 : index
    %16 = vector.load %arg1[%c0_16, %c18] : memref<16x648xbf16, #tpu.memory_space<vmem>>, vector<16x610xbf16>
    %cst_17 = arith.constant dense<0.000000e+00> : vector<8x610xf32>
    %17 = tpu.matmul %15, %16, %cst_17 {dimension_numbers = #tpu.dot_dimension_numbers<[1], [0], [0], [1], [0, 0, 1, 1], [], []>} : vector<8x16xbf16>, vector<16x610xbf16>, vector<8x610xf32> -> vector<8x610xf32>
    %18 = arith.addf %13, %17 : vector<8x610xf32>
    %c4 = arith.constant 4 : index
    %c0_18 = arith.constant 0 : index
    %c0_19 = arith.constant 0 : index
    %19 = vector.load %arg2[%c4, %c0_18, %c0_19] : memref<9x8x16xbf16, #tpu.memory_space<vmem>>, vector<1x8x16xbf16>
    %20 = vector.shape_cast %19 : vector<1x8x16xbf16> to vector<8x16xbf16>
    %c0_20 = arith.constant 0 : index
    %c19 = arith.constant 19 : index
    %21 = vector.load %arg1[%c0_20, %c19] : memref<16x648xbf16, #tpu.memory_space<vmem>>, vector<16x610xbf16>
    %cst_21 = arith.constant dense<0.000000e+00> : vector<8x610xf32>
    %22 = tpu.matmul %20, %21, %cst_21 {dimension_numbers = #tpu.dot_dimension_numbers<[1], [0], [0], [1], [0, 0, 1, 1], [], []>} : vector<8x16xbf16>, vector<16x610xbf16>, vector<8x610xf32> -> vector<8x610xf32>
    %23 = arith.addf %18, %22 : vector<8x610xf32>
    %c5 = arith.constant 5 : index
    %c0_22 = arith.constant 0 : index
    %c0_23 = arith.constant 0 : index
    %24 = vector.load %arg2[%c5, %c0_22, %c0_23] : memref<9x8x16xbf16, #tpu.memory_space<vmem>>, vector<1x8x16xbf16>
    %25 = vector.shape_cast %24 : vector<1x8x16xbf16> to vector<8x16xbf16>
    %c0_24 = arith.constant 0 : index
    %c20 = arith.constant 20 : index
    %26 = vector.load %arg1[%c0_24, %c20] : memref<16x648xbf16, #tpu.memory_space<vmem>>, vector<16x610xbf16>
    %cst_25 = arith.constant dense<0.000000e+00> : vector<8x610xf32>
    %27 = tpu.matmul %25, %26, %cst_25 {dimension_numbers = #tpu.dot_dimension_numbers<[1], [0], [0], [1], [0, 0, 1, 1], [], []>} : vector<8x16xbf16>, vector<16x610xbf16>, vector<8x610xf32> -> vector<8x610xf32>
    %28 = arith.addf %23, %27 : vector<8x610xf32>
    %c6 = arith.constant 6 : index
    %c0_26 = arith.constant 0 : index
    %c0_27 = arith.constant 0 : index
    %29 = vector.load %arg2[%c6, %c0_26, %c0_27] : memref<9x8x16xbf16, #tpu.memory_space<vmem>>, vector<1x8x16xbf16>
    %30 = vector.shape_cast %29 : vector<1x8x16xbf16> to vector<8x16xbf16>
    %c0_28 = arith.constant 0 : index
    %c36 = arith.constant 36 : index
    %31 = vector.load %arg1[%c0_28, %c36] : memref<16x648xbf16, #tpu.memory_space<vmem>>, vector<16x610xbf16>
    %cst_29 = arith.constant dense<0.000000e+00> : vector<8x610xf32>
    %32 = tpu.matmul %30, %31, %cst_29 {dimension_numbers = #tpu.dot_dimension_numbers<[1], [0], [0], [1], [0, 0, 1, 1], [], []>} : vector<8x16xbf16>, vector<16x610xbf16>, vector<8x610xf32> -> vector<8x610xf32>
    %33 = arith.addf %28, %32 : vector<8x610xf32>
    %c7 = arith.constant 7 : index
    %c0_30 = arith.constant 0 : index
    %c0_31 = arith.constant 0 : index
    %34 = vector.load %arg2[%c7, %c0_30, %c0_31] : memref<9x8x16xbf16, #tpu.memory_space<vmem>>, vector<1x8x16xbf16>
    %35 = vector.shape_cast %34 : vector<1x8x16xbf16> to vector<8x16xbf16>
    %c0_32 = arith.constant 0 : index
    %c37 = arith.constant 37 : index
    %36 = vector.load %arg1[%c0_32, %c37] : memref<16x648xbf16, #tpu.memory_space<vmem>>, vector<16x610xbf16>
    %cst_33 = arith.constant dense<0.000000e+00> : vector<8x610xf32>
    %37 = tpu.matmul %35, %36, %cst_33 {dimension_numbers = #tpu.dot_dimension_numbers<[1], [0], [0], [1], [0, 0, 1, 1], [], []>} : vector<8x16xbf16>, vector<16x610xbf16>, vector<8x610xf32> -> vector<8x610xf32>
    %38 = arith.addf %33, %37 : vector<8x610xf32>
    %c8 = arith.constant 8 : index
    %c0_34 = arith.constant 0 : index
    %c0_35 = arith.constant 0 : index
    %39 = vector.load %arg2[%c8, %c0_34, %c0_35] : memref<9x8x16xbf16, #tpu.memory_space<vmem>>, vector<1x8x16xbf16>
    %40 = vector.shape_cast %39 : vector<1x8x16xbf16> to vector<8x16xbf16>
    %c0_36 = arith.constant 0 : index
    %c38 = arith.constant 38 : index
    %41 = vector.load %arg1[%c0_36, %c38] : memref<16x648xbf16, #tpu.memory_space<vmem>>, vector<16x610xbf16>
    %cst_37 = arith.constant dense<0.000000e+00> : vector<8x610xf32>
    %42 = tpu.matmul %40, %41, %cst_37 {dimension_numbers = #tpu.dot_dimension_numbers<[1], [0], [0], [1], [0, 0, 1, 1], [], []>} : vector<8x16xbf16>, vector<16x610xbf16>, vector<8x610xf32> -> vector<8x610xf32>
    %43 = arith.addf %38, %42 : vector<8x610xf32>
    %c0_38 = arith.constant 0 : index
    %c0_39 = arith.constant 0 : index
    %44 = vector.load %arg3[%c0_38, %c0_39] : memref<8x1xf32, #tpu.memory_space<vmem>>, vector<8x1xf32>
    %45 = vector.broadcast %44 : vector<8x1xf32> to vector<8x610xf32>
    %46 = arith.addf %43, %45 : vector<8x610xf32>
    %cst_40 = arith.constant 0.000000e+00 : f32
    %47 = vector.broadcast %cst_40 : f32 to vector<8x610xf32>
    %48 = arith.maximumf %46, %47 : vector<8x610xf32>
    %49 = arith.truncf %48 : vector<8x610xf32> to vector<8x610xbf16>
    %c0_41 = arith.constant 0 : index
    %c0_42 = arith.constant 0 : index
    %50 = vector.load %arg4[%c0_41, %c0_42] : memref<8x610xbf16, #tpu.memory_space<vmem>>, vector<8x610xbf16>
    tpu.vector_store %arg4[%c0_41, %c0_42], %49 {strides = array<i32>} : memref<8x610xbf16, #tpu.memory_space<vmem>>, vector<8x610xbf16>,
    return
  }
  func.func @transform_0(%arg0: i32) -> (i32, i32) {
    %c0_i32 = arith.constant 0 : i32
    %c0_i32_0 = arith.constant 0 : i32
    %c0_i32_1 = arith.constant 0 : i32
    return %c0_i32, %c0_i32_0 : i32, i32
  }
  func.func @transform_1(%arg0: i32) -> (i32, i32, i32) {
    %c0_i32 = arith.constant 0 : i32
    %c0_i32_0 = arith.constant 0 : i32
    %c0_i32_1 = arith.constant 0 : i32
    %c0_i32_2 = arith.constant 0 : i32
    return %c0_i32, %c0_i32_0, %c0_i32_1 : i32, i32, i32
  }
  func.func @transform_2(%arg0: i32) -> (i32, i32) {
    %c0_i32 = arith.constant 0 : i32
    %c0_i32_0 = arith.constant 0 : i32
    %c0_i32_1 = arith.constant 0 : i32
    return %c0_i32, %c0_i32_0 : i32, i32
  }
  func.func @transform_3(%arg0: i32) -> (i32, i32) {
    %c0_i32 = arith.constant 0 : i32
    %c0_i32_0 = arith.constant 0 : i32
    return %c0_i32, %arg0 : i32, i32
  }
}

module attributes {stable_mosaic.version = 11 : i64} {
  func.func @_tap_conv_kernel(%arg0: i32, %arg1: memref<8x648xbf16, #tpu.memory_space<vmem>>, %arg2: memref<9x128x8xbf16, #tpu.memory_space<vmem>>, %arg3: memref<128x1xf32, #tpu.memory_space<vmem>>, %arg4: memref<128x610xbf16, #tpu.memory_space<vmem>>) attributes {dimension_semantics = [#tpu.dimension_semantics<parallel>], iteration_bounds = array<i64: 1>, scalar_prefetch = 0 : i64, scratch_operands = 0 : i64, tpu.core_type = #tpu.core_type<tc>, window_params = [{pipeline_mode = #tpu.pipeline_mode<synchronous>, transform_indices = @transform_0, window_bounds = array<i64: 8, 648>}, {pipeline_mode = #tpu.pipeline_mode<synchronous>, transform_indices = @transform_1, window_bounds = array<i64: 9, 128, 8>}, {pipeline_mode = #tpu.pipeline_mode<synchronous>, transform_indices = @transform_2, window_bounds = array<i64: 128, 1>}, {transform_indices = @transform_3, window_bounds = array<i64: 128, 610>}]} {
    %c0 = arith.constant 0 : index
    %c0_0 = arith.constant 0 : index
    %c0_1 = arith.constant 0 : index
    %0 = vector.load %arg2[%c0, %c0_0, %c0_1] : memref<9x128x8xbf16, #tpu.memory_space<vmem>>, vector<1x128x8xbf16>
    %1 = vector.shape_cast %0 : vector<1x128x8xbf16> to vector<128x8xbf16>
    %c0_2 = arith.constant 0 : index
    %c0_3 = arith.constant 0 : index
    %2 = vector.load %arg1[%c0_2, %c0_3] : memref<8x648xbf16, #tpu.memory_space<vmem>>, vector<8x610xbf16>
    %cst = arith.constant dense<0.000000e+00> : vector<128x610xf32>
    %3 = tpu.matmul %1, %2, %cst {dimension_numbers = #tpu.dot_dimension_numbers<[1], [0], [0], [1], [0, 0, 1, 1], [], []>} : vector<128x8xbf16>, vector<8x610xbf16>, vector<128x610xf32> -> vector<128x610xf32>
    %c1 = arith.constant 1 : index
    %c0_4 = arith.constant 0 : index
    %c0_5 = arith.constant 0 : index
    %4 = vector.load %arg2[%c1, %c0_4, %c0_5] : memref<9x128x8xbf16, #tpu.memory_space<vmem>>, vector<1x128x8xbf16>
    %5 = vector.shape_cast %4 : vector<1x128x8xbf16> to vector<128x8xbf16>
    %c0_6 = arith.constant 0 : index
    %c1_7 = arith.constant 1 : index
    %6 = vector.load %arg1[%c0_6, %c1_7] : memref<8x648xbf16, #tpu.memory_space<vmem>>, vector<8x610xbf16>
    %cst_8 = arith.constant dense<0.000000e+00> : vector<128x610xf32>
    %7 = tpu.matmul %5, %6, %cst_8 {dimension_numbers = #tpu.dot_dimension_numbers<[1], [0], [0], [1], [0, 0, 1, 1], [], []>} : vector<128x8xbf16>, vector<8x610xbf16>, vector<128x610xf32> -> vector<128x610xf32>
    %8 = arith.addf %3, %7 : vector<128x610xf32>
    %c2 = arith.constant 2 : index
    %c0_9 = arith.constant 0 : index
    %c0_10 = arith.constant 0 : index
    %9 = vector.load %arg2[%c2, %c0_9, %c0_10] : memref<9x128x8xbf16, #tpu.memory_space<vmem>>, vector<1x128x8xbf16>
    %10 = vector.shape_cast %9 : vector<1x128x8xbf16> to vector<128x8xbf16>
    %c0_11 = arith.constant 0 : index
    %c2_12 = arith.constant 2 : index
    %11 = vector.load %arg1[%c0_11, %c2_12] : memref<8x648xbf16, #tpu.memory_space<vmem>>, vector<8x610xbf16>
    %cst_13 = arith.constant dense<0.000000e+00> : vector<128x610xf32>
    %12 = tpu.matmul %10, %11, %cst_13 {dimension_numbers = #tpu.dot_dimension_numbers<[1], [0], [0], [1], [0, 0, 1, 1], [], []>} : vector<128x8xbf16>, vector<8x610xbf16>, vector<128x610xf32> -> vector<128x610xf32>
    %13 = arith.addf %8, %12 : vector<128x610xf32>
    %c3 = arith.constant 3 : index
    %c0_14 = arith.constant 0 : index
    %c0_15 = arith.constant 0 : index
    %14 = vector.load %arg2[%c3, %c0_14, %c0_15] : memref<9x128x8xbf16, #tpu.memory_space<vmem>>, vector<1x128x8xbf16>
    %15 = vector.shape_cast %14 : vector<1x128x8xbf16> to vector<128x8xbf16>
    %c0_16 = arith.constant 0 : index
    %c18 = arith.constant 18 : index
    %16 = vector.load %arg1[%c0_16, %c18] : memref<8x648xbf16, #tpu.memory_space<vmem>>, vector<8x610xbf16>
    %cst_17 = arith.constant dense<0.000000e+00> : vector<128x610xf32>
    %17 = tpu.matmul %15, %16, %cst_17 {dimension_numbers = #tpu.dot_dimension_numbers<[1], [0], [0], [1], [0, 0, 1, 1], [], []>} : vector<128x8xbf16>, vector<8x610xbf16>, vector<128x610xf32> -> vector<128x610xf32>
    %18 = arith.addf %13, %17 : vector<128x610xf32>
    %c4 = arith.constant 4 : index
    %c0_18 = arith.constant 0 : index
    %c0_19 = arith.constant 0 : index
    %19 = vector.load %arg2[%c4, %c0_18, %c0_19] : memref<9x128x8xbf16, #tpu.memory_space<vmem>>, vector<1x128x8xbf16>
    %20 = vector.shape_cast %19 : vector<1x128x8xbf16> to vector<128x8xbf16>
    %c0_20 = arith.constant 0 : index
    %c19 = arith.constant 19 : index
    %21 = vector.load %arg1[%c0_20, %c19] : memref<8x648xbf16, #tpu.memory_space<vmem>>, vector<8x610xbf16>
    %cst_21 = arith.constant dense<0.000000e+00> : vector<128x610xf32>
    %22 = tpu.matmul %20, %21, %cst_21 {dimension_numbers = #tpu.dot_dimension_numbers<[1], [0], [0], [1], [0, 0, 1, 1], [], []>} : vector<128x8xbf16>, vector<8x610xbf16>, vector<128x610xf32> -> vector<128x610xf32>
    %23 = arith.addf %18, %22 : vector<128x610xf32>
    %c5 = arith.constant 5 : index
    %c0_22 = arith.constant 0 : index
    %c0_23 = arith.constant 0 : index
    %24 = vector.load %arg2[%c5, %c0_22, %c0_23] : memref<9x128x8xbf16, #tpu.memory_space<vmem>>, vector<1x128x8xbf16>
    %25 = vector.shape_cast %24 : vector<1x128x8xbf16> to vector<128x8xbf16>
    %c0_24 = arith.constant 0 : index
    %c20 = arith.constant 20 : index
    %26 = vector.load %arg1[%c0_24, %c20] : memref<8x648xbf16, #tpu.memory_space<vmem>>, vector<8x610xbf16>
    %cst_25 = arith.constant dense<0.000000e+00> : vector<128x610xf32>
    %27 = tpu.matmul %25, %26, %cst_25 {dimension_numbers = #tpu.dot_dimension_numbers<[1], [0], [0], [1], [0, 0, 1, 1], [], []>} : vector<128x8xbf16>, vector<8x610xbf16>, vector<128x610xf32> -> vector<128x610xf32>
    %28 = arith.addf %23, %27 : vector<128x610xf32>
    %c6 = arith.constant 6 : index
    %c0_26 = arith.constant 0 : index
    %c0_27 = arith.constant 0 : index
    %29 = vector.load %arg2[%c6, %c0_26, %c0_27] : memref<9x128x8xbf16, #tpu.memory_space<vmem>>, vector<1x128x8xbf16>
    %30 = vector.shape_cast %29 : vector<1x128x8xbf16> to vector<128x8xbf16>
    %c0_28 = arith.constant 0 : index
    %c36 = arith.constant 36 : index
    %31 = vector.load %arg1[%c0_28, %c36] : memref<8x648xbf16, #tpu.memory_space<vmem>>, vector<8x610xbf16>
    %cst_29 = arith.constant dense<0.000000e+00> : vector<128x610xf32>
    %32 = tpu.matmul %30, %31, %cst_29 {dimension_numbers = #tpu.dot_dimension_numbers<[1], [0], [0], [1], [0, 0, 1, 1], [], []>} : vector<128x8xbf16>, vector<8x610xbf16>, vector<128x610xf32> -> vector<128x610xf32>
    %33 = arith.addf %28, %32 : vector<128x610xf32>
    %c7 = arith.constant 7 : index
    %c0_30 = arith.constant 0 : index
    %c0_31 = arith.constant 0 : index
    %34 = vector.load %arg2[%c7, %c0_30, %c0_31] : memref<9x128x8xbf16, #tpu.memory_space<vmem>>, vector<1x128x8xbf16>
    %35 = vector.shape_cast %34 : vector<1x128x8xbf16> to vector<128x8xbf16>
    %c0_32 = arith.constant 0 : index
    %c37 = arith.constant 37 : index
    %36 = vector.load %arg1[%c0_32, %c37] : memref<8x648xbf16, #tpu.memory_space<vmem>>, vector<8x610xbf16>
    %cst_33 = arith.constant dense<0.000000e+00> : vector<128x610xf32>
    %37 = tpu.matmul %35, %36, %cst_33 {dimension_numbers = #tpu.dot_dimension_numbers<[1], [0], [0], [1], [0, 0, 1, 1], [], []>} : vector<128x8xbf16>, vector<8x610xbf16>, vector<128x610xf32> -> vector<128x610xf32>
    %38 = arith.addf %33, %37 : vector<128x610xf32>
    %c8 = arith.constant 8 : index
    %c0_34 = arith.constant 0 : index
    %c0_35 = arith.constant 0 : index
    %39 = vector.load %arg2[%c8, %c0_34, %c0_35] : memref<9x128x8xbf16, #tpu.memory_space<vmem>>, vector<1x128x8xbf16>
    %40 = vector.shape_cast %39 : vector<1x128x8xbf16> to vector<128x8xbf16>
    %c0_36 = arith.constant 0 : index
    %c38 = arith.constant 38 : index
    %41 = vector.load %arg1[%c0_36, %c38] : memref<8x648xbf16, #tpu.memory_space<vmem>>, vector<8x610xbf16>
    %cst_37 = arith.constant dense<0.000000e+00> : vector<128x610xf32>
    %42 = tpu.matmul %40, %41, %cst_37 {dimension_numbers = #tpu.dot_dimension_numbers<[1], [0], [0], [1], [0, 0, 1, 1], [], []>} : vector<128x8xbf16>, vector<8x610xbf16>, vector<128x610xf32> -> vector<128x610xf32>
    %43 = arith.addf %38, %42 : vector<128x610xf32>
    %c0_38 = arith.constant 0 : index
    %c0_39 = arith.constant 0 : index
    %44 = vector.load %arg3[%c0_38, %c0_39] : memref<128x1xf32, #tpu.memory_space<vmem>>, vector<128x1xf32>
    %45 = vector.broadcast %44 : vector<128x1xf32> to vector<128x610xf32>
    %46 = arith.addf %43, %45 : vector<128x610xf32>
    %cst_40 = arith.constant 0.000000e+00 : f32
    %47 = vector.broadcast %cst_40 : f32 to vector<128x610xf32>
    %48 = arith.maximumf %46, %47 : vector<128x610xf32>
    %49 = arith.truncf %48 : vector<128x610xf32> to vector<128x610xbf16>
    %c0_41 = arith.constant 0 : index
    %c0_42 = arith.constant 0 : index
    %50 = vector.load %arg4[%c0_41, %c0_42] : memref<128x610xbf16, #tpu.memory_space<vmem>>, vector<128x610xbf16>
    tpu.vector_store %arg4[%c0_41, %c0_42], %49 {strides = array<i32>} : memref<128x610xbf16, #tpu.memory_space<vmem>>, vector<128x610xbf16>,
    return
  }
  func.func @transform_0(%arg0: i32) -> (i32, i32) {
    %c0_i32 = arith.constant 0 : i32
    %c0_i32_0 = arith.constant 0 : i32
    %c0_i32_1 = arith.constant 0 : i32
    return %c0_i32, %c0_i32_0 : i32, i32
  }
  func.func @transform_1(%arg0: i32) -> (i32, i32, i32) {
    %c0_i32 = arith.constant 0 : i32
    %c0_i32_0 = arith.constant 0 : i32
    %c0_i32_1 = arith.constant 0 : i32
    %c0_i32_2 = arith.constant 0 : i32
    return %c0_i32, %c0_i32_0, %c0_i32_1 : i32, i32, i32
  }
  func.func @transform_2(%arg0: i32) -> (i32, i32) {
    %c0_i32 = arith.constant 0 : i32
    %c0_i32_0 = arith.constant 0 : i32
    %c0_i32_1 = arith.constant 0 : i32
    return %c0_i32, %c0_i32_0 : i32, i32
  }
  func.func @transform_3(%arg0: i32) -> (i32, i32) {
    %c0_i32 = arith.constant 0 : i32
    %c0_i32_0 = arith.constant 0 : i32
    return %c0_i32, %arg0 : i32, i32
  }
}

</mosaic_0001>

<bundles_post_ra>
// kernel: encoder_forward.11
= control target key start
LH: loop header
LB: loop body
LE: loop exit
PB: predicated region body
PF: predicated region fallthrough
CT: control target
= control target key end

     0   :  { %v284_v1 = vmov 0   ;;  %vm94_vm0 = vcmask 392192   ;;  %s353_s1 = inlined_call_operand.vmem [shape: bf16[48,512], index: 1, kind: input, shape index: {}]   ;;  %s354_s2 = inlined_call_operand.vmem [shape: f32[8,1], index: 2, kind: input, shape index: {}]   ;;  %s355_s0 = inlined_call_operand.vmem [shape: bf16[8,48], index: 0, kind: input, shape index: {}]   ;;  %s356_s3 = inlined_call_operand.vmem [shape: bf16[8,512], index: 3, kind: output, shape index: {}]  }
   0x1   :  { %v258_v0 = vld [vmem:[%s353_s1 + $0x44] ss:$16 sps:$4 sm:$0xff]   ;;  %130 = vmatprep.mubr.bf16.mxu0 %v284_v1  ;;  %171 = vmatprep.mubr.bf16.mxu1 %v284_v1  ;;  %v260_v2 = vld [vmem:[%s353_s1 + $0x4c] ss:$16 sps:$4 sm:$0xff]   ;;  %v262_v3 = vld [vmem:[%s353_s1 + $0x40] ss:$16 sps:$4 sm:$0xff]  }
   0x2   :  { %257 = vset.pattern.permute.xlu0 %v284_v1  ;;  %108 = vmatprep.subr.bf16.mxu0 %v258_v0  ;;  %v263_v4 = vld [vmem:[%s353_s1 + $0x48] ss:$16 sps:$4 sm:$0xff]   ;;  %v264_v5 = vld [vmem:[%s353_s1 + $0x24] ss:$16 sps:$4 sm:$0xff]   ;;  %v266_v6 = vld [vmem:[%s353_s1 + $0x2c] ss:$16 sps:$4 sm:$0xff]  }
   0x3   :  { %149 = vmatprep.subr.bf16.mxu1 %v260_v2  ;;  %109 = vmatpush1.bf16.msra.mxu0 %v262_v3  ;;  %v268_v7 = vld [vmem:[%s353_s1 + $0x20] ss:$16 sps:$4 sm:$0xff]   ;;  %v269_v8 = vld [vmem:[%s353_s1 + $0x28] ss:$16 sps:$4 sm:$0xff]   ;;  %v270_v9 = vld [vmem:[%s353_s1 + $0x4] ss:$16 sps:$4 sm:$0xff]  }
   0x4   :  { %150 = vmatpush1.bf16.msra.mxu1 %v263_v4  ;;  %110 = vmatprep.subr.bf16.mxu0 %v264_v5  ;;  %v272_v10 = vld [vmem:[%s353_s1 + $0xc] ss:$16 sps:$4 sm:$0xff]   ;;  %v274_v11 = vld [vmem:[%s353_s1] ss:$16 sps:$4 sm:$0xff]   ;;  %v275_v12 = vld [vmem:[%s353_s1 + $0x8] ss:$16 sps:$4 sm:$0xff]  }
   0x5   :  { %151 = vmatprep.subr.bf16.mxu1 %v266_v6  ;;  %v28_v13 = vld [vmem:[%s354_s2] sm:$0xff] }
   0x6   :  { %31 = vperm.xlu0 %257, %v28_v13   ;;  %v15_v14 = vld [vmem:[%s355_s0] sm:$0xf] }
   0x7   :  { %111 = vmatpush1.bf16.msra.mxu0 %v268_v7 }
   0x8   :  { %152 = vmatpush1.bf16.msra.mxu1 %v269_v8  ;;  %112 = vmatprep.subr.bf16.mxu0 %v270_v9 }
   0x9   :  { %153 = vmatprep.subr.bf16.mxu1 %v272_v10 }
   0xb   :  { %113 = vmatpush1.bf16.msra.mxu0 %v274_v11 }
   0xc   :  { %154 = vmatpush1.bf16.msra.mxu1 %v275_v12 }
   0xe   :  { %250 = vmatmul.mubr.msk.bf16.vlgmr.msra.gmra.mxu0 %vm94_vm0, %v15_v14 }
   0xf   :  { %251 = vmatmul.mubr.msk.bf16.vlgmr.msra.gmra.mxu1 %vm94_vm0, %v15_v14 }
  0x81   :  { %v32_v15 = vpop.permute.xlu0 %31 }
  0xce   :  { %v132_v16 = vpop.f32.mrf.mxu0 }
  0xcf   :  { %v173_v17 = vpop.f32.mrf.mxu1  ;;  %v133_v18 = vadd.f32 %v132_v16, %v32_v15 }
  0xd0   :  { %v174_v19 = vadd.f32 %v173_v17, %v32_v15  ;;  %v134_v20 = vpop.f32.mrf.mxu0 }
  0xd1   :  { %v175_v21 = vpop.f32.mrf.mxu1  ;;  %v180_v22 = vmul.f32 %v133_v18, %v133_v18  ;;  %v135_v24 = vadd.f32 %v134_v20, %v32_v15 }
  0xd2   :  { %v182_v23 = vmul.f32 %v174_v19, %v174_v19  ;;  %v176_v25 = vadd.f32 %v175_v21, %v32_v15  ;;  %v136_v26 = vpop.f32.mrf.mxu0 }
  0xd3   :  { %v177_v27 = vpop.f32.mrf.mxu1  ;;  %v184_v28 = vmul.f32 %v180_v22, %v133_v18  ;;  %v181_v30 = vmul.f32 %v135_v24, %v135_v24 }
  0xd4   :  { %v186_v29 = vmul.f32 %v182_v23, %v174_v19  ;;  %v183_v31 = vmul.f32 %v176_v25, %v176_v25  ;;  %v137_v32 = vpop.f32.mrf.mxu0 }
  0xd5   :  { %v178_v33 = vpop.f32.mrf.mxu1  ;;  %v188_v34 = vmul.f32 0.044715, %v184_v28  ;;  %v185_v36 = vmul.f32 %v181_v30, %v135_v24 }
  0xd6   :  { %v190_v35 = vmul.f32 0.044715, %v186_v29  ;;  %v187_v37 = vmul.f32 %v183_v31, %v176_v25 }
  0xd7   :  { %v192_v38 = vadd.f32 %v188_v34, %v133_v18  ;;  %v189_v40 = vmul.f32 0.044715, %v185_v36 }
  0xd8   :  { %v194_v39 = vadd.f32 %v190_v35, %v174_v19  ;;  %v191_v41 = vmul.f32 0.044715, %v187_v37 }
  0xd9   :  { %v196_v42 = vmul.f32 0.7978846, %v192_v38  ;;  %v193_v44 = vadd.f32 %v189_v40, %v135_v24 }
  0xda   :  { %v198_v43 = vmul.f32 0.7978846, %v194_v39  ;;  %v195_v45 = vadd.f32 %v191_v41, %v176_v25 }
  0xdb   :  { %276 = vtanh.f32 %v196_v42  ;;  %v197_v46 = vmul.f32 0.7978846, %v193_v44 }
  0xdc   :  { %v199_v47 = vmul.f32 0.7978846, %v195_v45  ;;  %278 = vtanh.f32 %v198_v43 }
  0xdd   :  { %280 = vtanh.f32 %v197_v46 }
  0xde   :  { %282 = vtanh.f32 %v199_v47 }
  0xe8   :  { %v277_v48 = vpop.eup %276 }
  0xe9   :  { %v279_v49 = vpop.eup %278  ;;  %v204_v50 = vadd.f32 1.0, %v277_v48 }
  0xea   :  { %v281_v51 = vpop.eup %280  ;;  %v206_v52 = vadd.f32 1.0, %v279_v49 }
  0xeb   :  { %v283_v53 = vpop.eup %282  ;;  %v208_v54 = vmul.f32 0.5, %v204_v50  ;;  %v205_v55 = vadd.f32 1.0, %v281_v51 }
  0xec   :  { %v210_v56 = vmul.f32 0.5, %v206_v52  ;;  %v207_v57 = vadd.f32 1.0, %v283_v53 }
  0xed   :  { %v209_v58 = vmul.f32 0.5, %v205_v55  ;;  %v212_v60 = vmul.f32 %v208_v54, %v133_v18 }
  0xee   :  { %v211_v59 = vmul.f32 0.5, %v207_v57  ;;  %v214_v62 = vmul.f32 %v210_v56, %v174_v19 }
  0xef   :  { %v213_v61 = vmul.f32 %v209_v58, %v135_v24 }
  0xf0   :  { %v215_v63 = vmul.f32 %v211_v59, %v176_v25 }
  0xf1   :  { %v254_v0 = vpack.c.bf16 %v213_v61, %v212_v60 }
  0xf2   :  { %v255_v1 = vpack.c.bf16 %v215_v63, %v214_v62 }
  0xf3   :  { %232 = vst [vmem:[%s356_s3] sm:$0xff] %v254_v0 }
  0xf4   :  { %233 = vst [vmem:[%s356_s3 + $0x8] sm:$0xff] %v255_v1 }

// kernel: encoder_forward.12
= control target key start
LH: loop header
LB: loop body
LE: loop exit
PB: predicated region body
PF: predicated region fallthrough
CT: control target
= control target key end

     0   :  { %v162_v0 = vmov 0.0   ;;  %vm163_vm0 = vmmov 0   ;;  %v164_v2 = vmov 0   ;;  %vm50_vm1 = vcmask 261120   ;;  %s203_s1 = inlined_call_operand.vmem [shape: bf16[32,128], index: 1, kind: input, shape index: {}]   ;;  %s204_s2 = inlined_call_operand.vmem [shape: f32[16,1], index: 2, kind: input, shape index: {}]   ;;  %s205_s0 = inlined_call_operand.vmem [shape: bf16[16,32], index: 0, kind: input, shape index: {}]   ;;  %s206_s3 = inlined_call_operand.vmem [shape: bf16[16,128], index: 3, kind: output, shape index: {}]  }
   0x1   :  { %143 = vmatprep.subr.bf16.mxu0 %v162_v0  ;;  %v155_v1 = vld [vmem:[%s203_s1 + $0x8] sm:$0xff]   ;;  %147 = vmatprep.mubr.msk.bf16.mxu0 %vm163_vm0, %v162_v0  ;;  %v156_v3 = vld [vmem:[%s203_s1] sm:$0xff]  }
   0x2   :  { %154 = vset.pattern.permute.xlu0 %v164_v2  ;;  %144 = vmatpush3.bf16.msra.mxu0 %v155_v1  ;;  %v21_v4 = vld [vmem:[%s204_s2] sm:$0xff]  ;;  %v22_v6 = vld [vmem:[%s204_s2 + $0x8] sm:$0xff] }
   0x3   :  { %145 = vmatprep.subr.bf16.mxu0 %v162_v0  ;;  %25 = vperm.xlu0 %154, %v21_v4   ;;  %v157_v5 = vld [vmem:[%s205_s0] sm:$0xff]  }
   0x6   :  { %146 = vmatpush3.bf16.msra.mxu0 %v156_v3 }
   0x7   :  { %30 = vperm.xlu0 %154, %v22_v6  }
   0x9   :  { %148 = vmatmul.mubr.msk.bf16.vlgmr.msra.gmra.mxu0 %vm50_vm1, %v157_v5 }
  0x7e   :  { %v26_v7 = vpop.permute.xlu0 %25 }
  0x82   :  { %v31_v12 = vpop.permute.xlu0 %30 }
  0xc9   :  { %v88_v8 = vpop.f32.mrf.mxu0 }
  0xca   :  { %v89_v9 = vadd.f32 %v88_v8, %v26_v7 }
  0xcb   :  { %v149_v10 = vpop.f32.mrf.mxu0 }
  0xcc   :  { %v95_v11 = vmul.f32 %v89_v9, %v89_v9 }
  0xcd   :  { %v91_v13 = vpop.f32.mrf.mxu0 }
  0xce   :  { %v97_v14 = vmul.f32 %v95_v11, %v89_v9  ;;  %v92_v15 = vadd.f32 %v91_v13, %v31_v12 }
  0xcf   :  { %v150_v16 = vpop.f32.mrf.mxu0 }
  0xd0   :  { %v99_v17 = vmul.f32 0.044715, %v97_v14  ;;  %v96_v18 = vmul.f32 %v92_v15, %v92_v15 }
  0xd2   :  { %v101_v19 = vadd.f32 %v99_v17, %v89_v9  ;;  %v98_v20 = vmul.f32 %v96_v18, %v92_v15 }
  0xd4   :  { %v103_v21 = vmul.f32 0.7978846, %v101_v19  ;;  %v100_v22 = vmul.f32 0.044715, %v98_v20 }
  0xd6   :  { %158 = vtanh.f32 %v103_v21  ;;  %v102_v23 = vadd.f32 %v100_v22, %v92_v15 }
  0xd8   :  { %v104_v24 = vmul.f32 0.7978846, %v102_v23 }
  0xda   :  { %160 = vtanh.f32 %v104_v24 }
  0xe3   :  { %v159_v25 = vpop.eup %158 }
  0xe4   :  { %v107_v26 = vadd.f32 1.0, %v159_v25 }
  0xe6   :  { %v109_v28 = vmul.f32 0.5, %v107_v26 }
  0xe7   :  { %v161_v27 = vpop.eup %160 }
  0xe8   :  { %v108_v29 = vadd.f32 1.0, %v161_v27  ;;  %v111_v31 = vmul.f32 %v109_v28, %v89_v9 }
  0xea   :  { %v110_v30 = vmul.f32 0.5, %v108_v29 }
  0xec   :  { %v112_v32 = vmul.f32 %v110_v30, %v92_v15 }
  0xee   :  { %v138_v33 = vpack.c.bf16 %v112_v32, %v111_v31 }
  0xf0   :  { %139 = vst [vmem:[%s206_s3] sm:$0xff] %v138_v33  }

// kernel: encoder_forward.13
= control target key start
LH: loop header
LB: loop body
LE: loop exit
PB: predicated region body
PF: predicated region fallthrough
CT: control target
= control target key end

     0   :  { %v253_v1 = vmov 0   ;;  %vm85_vm0 = vcmask 523264   ;;  %vm193_vm1 = vcmask 257024   ;;  %s318_s1 = inlined_call_operand.vmem [shape: bf16[64,32], index: 1, kind: input, shape index: {}]   ;;  %s319_s0 = inlined_call_operand.vmem [shape: bf16[32,64], index: 0, kind: input, shape index: {}]   ;;  %s320_s2 = inlined_call_operand.vmem [shape: f32[32,1], index: 2, kind: input, shape index: {}]   ;;  %s321_s3 = inlined_call_operand.vmem [shape: bf16[32,32], index: 3, kind: output, shape index: {}]  }
   0x1   :  { %v239_v0 = vld [vmem:[%s318_s1 + $0x18] sm:$0xff]   ;;  %238 = vset.pattern.permute.xlu1 %v253_v1  ;;  %237 = vset.pattern.permute.xlu0 %v253_v1  ;;  %v240_v2 = vld [vmem:[%s318_s1 + $0x10] sm:$0xff]   ;;  %v241_v3 = vld [vmem:[%s318_s1 + $0x8] sm:$0xff]  }
   0x2   :  { %224 = vmatprep.subr.bf16.mxu0 %v239_v0  ;;  %v243_v4 = vld [vmem:[%s319_s0] sm:$0xff]   ;;  %v29_v5 = vld [vmem:[%s320_s2 + $0x10] sm:$0xff]  ;;  %v30_v8 = vld [vmem:[%s320_s2 + $0x18] sm:$0xff] }
   0x3   :  { %225 = vmatpush3.bf16.msra.mxu0 %v239_v0  ;;  %232 = vmatprep.mubr.msk.bf16.mxu0 %vm85_vm0, %v243_v4  ;;  %v27_v6 = vld [vmem:[%s320_s2] sm:$0xff]  ;;  %v28_v9 = vld [vmem:[%s320_s2 + $0x8] sm:$0xff] }
   0x4   :  { %226 = vmatprep.subr.bf16.mxu0 %v240_v2  ;;  %43 = vperm.xlu1 %238, %v29_v5   ;;  %v242_v7 = vld [vmem:[%s318_s1] sm:$0xff]   ;;  %v244_v10 = vld [vmem:[%s319_s0 + $0x8] sm:$0xff]  }
   0x5   :  { %33 = vperm.xlu0 %237, %v27_v6  }
   0x7   :  { %227 = vmatpush3.bf16.msra.mxu0 %v240_v2 }
   0x8   :  { %228 = vmatprep.subr.bf16.mxu0 %v241_v3  ;;  %48 = vperm.xlu1 %238, %v30_v8  }
   0x9   :  { %38 = vperm.xlu0 %237, %v28_v9  }
   0xb   :  { %229 = vmatpush3.bf16.msra.mxu0 %v241_v3 }
   0xc   :  { %230 = vmatprep.subr.bf16.mxu0 %v242_v7 }
   0xf   :  { %231 = vmatpush3.bf16.msra.mxu0 %v242_v7 }
  0x12   :  { %233 = vmatmul.mubr.msk.bf16.vlgmr.msra.gmra.mxu0 %vm85_vm0, %v244_v10 }
  0x7f   :  { %v44_v11 = vpop.permute.xlu1 %43 }
  0x80   :  { %v34_v12 = vpop.permute.xlu0 %33 }
  0x83   :  { %v49_v18 = vpop.permute.xlu1 %48 }
  0x84   :  { %v39_v23 = vpop.permute.xlu0 %38 }
  0xd2   :  { %v234_v13 = vpop.f32.mrf.mxu0 }
  0xd3   :  { %v135_v14 = vadd.f32 %v234_v13, %v44_v11 }
  0xd4   :  { %v126_v15 = vpop.f32.mrf.mxu0 }
  0xd5   :  { %v143_v16 = vmul.f32 %v135_v14, %v135_v14  ;;  %v127_v17 = vadd.f32 %v126_v15, %v34_v12 }
  0xd6   :  { %v235_v19 = vpop.f32.mrf.mxu0 }
  0xd7   :  { %v147_v20 = vmul.f32 %v143_v16, %v135_v14  ;;  %v141_v21 = vmul.f32 %v127_v17, %v127_v17  ;;  %v138_v22 = vadd.f32 %v235_v19, %v49_v18 }
  0xd8   :  { %v129_v24 = vpop.f32.mrf.mxu0 }
  0xd9   :  { %v151_v25 = vmul.f32 0.044715, %v147_v20  ;;  %v145_v26 = vmul.f32 %v141_v21, %v127_v17  ;;  %v144_v27 = vmul.f32 %v138_v22, %v138_v22  ;;  %v130_v28 = vadd.f32 %v129_v24, %v39_v23 }
  0xdb   :  { %v155_v29 = vadd.f32 %v151_v25, %v135_v14  ;;  %v149_v30 = vmul.f32 0.044715, %v145_v26  ;;  %v148_v31 = vmul.f32 %v144_v27, %v138_v22  ;;  %v142_v32 = vmul.f32 %v130_v28, %v130_v28 }
  0xdd   :  { %v159_v33 = vmul.f32 0.7978846, %v155_v29  ;;  %v153_v34 = vadd.f32 %v149_v30, %v127_v17  ;;  %v152_v35 = vmul.f32 0.044715, %v148_v31  ;;  %v146_v36 = vmul.f32 %v142_v32, %v130_v28 }
  0xdf   :  { %245 = vtanh.f32 %v159_v33  ;;  %v157_v37 = vmul.f32 0.7978846, %v153_v34  ;;  %v156_v38 = vadd.f32 %v152_v35, %v138_v22  ;;  %v150_v39 = vmul.f32 0.044715, %v146_v36 }
  0xe1   :  { %247 = vtanh.f32 %v157_v37  ;;  %v160_v40 = vmul.f32 0.7978846, %v156_v38  ;;  %v154_v41 = vadd.f32 %v150_v39, %v130_v28 }
  0xe3   :  { %249 = vtanh.f32 %v160_v40  ;;  %v158_v42 = vmul.f32 0.7978846, %v154_v41 }
  0xe5   :  { %251 = vtanh.f32 %v158_v42 }
  0xec   :  { %v246_v43 = vpop.eup %245 }
  0xed   :  { %v167_v44 = vadd.f32 1.0, %v246_v43 }
  0xee   :  { %v248_v45 = vpop.eup %247 }
  0xef   :  { %v171_v46 = vmul.f32 0.5, %v167_v44  ;;  %v165_v47 = vadd.f32 1.0, %v248_v45 }
  0xf0   :  { %v250_v48 = vpop.eup %249 }
  0xf1   :  { %v175_v49 = vmul.f32 %v171_v46, %v135_v14  ;;  %v169_v50 = vmul.f32 0.5, %v165_v47  ;;  %v168_v51 = vadd.f32 1.0, %v250_v48 }
  0xf2   :  { %v252_v52 = vpop.eup %251 }
  0xf3   :  { %v216_v53 = vpack.c.bf16 %v175_v49, %v175_v49  ;;  %v173_v54 = vmul.f32 %v169_v50, %v127_v17  ;;  %v172_v55 = vmul.f32 0.5, %v168_v51  ;;  %v166_v56 = vadd.f32 1.0, %v252_v52 }
  0xf5   :  { %196 = vst.msk [vmem:[%s321_s3 + $0x8] sm:$0xf] %vm193_vm1, %v216_v53  ;;  %v214_v57 = vpack.c.bf16 %v173_v54, %v173_v54  ;;  %v176_v58 = vmul.f32 %v172_v55, %v138_v22  ;;  %v170_v59 = vmul.f32 0.5, %v166_v56 }
  0xf7   :  { %194 = vst.msk [vmem:[%s321_s3] sm:$0xf] %vm193_vm1, %v214_v57  ;;  %v217_v60 = vpack.c.bf16 %v176_v58, %v176_v58  ;;  %v174_v61 = vmul.f32 %v170_v59, %v130_v28 }
  0xf9   :  { %197 = vst.msk [vmem:[%s321_s3 + $0xc] sm:$0xf] %vm193_vm1, %v217_v60  ;;  %v215_v62 = vpack.c.bf16 %v174_v61, %v174_v61 }
  0xfb   :  { %195 = vst.msk [vmem:[%s321_s3 + $0x4] sm:$0xf] %vm193_vm1, %v215_v62 }

// kernel: encoder_forward.14
= control target key start
LH: loop header
LB: loop body
LE: loop exit
PB: predicated region body
PF: predicated region fallthrough
CT: control target
= control target key end

     0   :  { %v452_v1 = vmov 0   ;;  %vm328_vm0 = vcmask 60416   ;;  %s621_s1 = inlined_call_operand.vmem [shape: bf16[128,8], index: 1, kind: input, shape index: {}]   ;;  %s622_s0 = inlined_call_operand.vmem [shape: bf16[64,128], index: 0, kind: input, shape index: {}]   ;;  %s623_s2 = inlined_call_operand.vmem [shape: f32[64,1], index: 2, kind: input, shape index: {}]   ;;  %s624_s3 = inlined_call_operand.vmem [shape: bf16[64,8], index: 3, kind: output, shape index: {}]  }
   0x1   :  { %v424_v0 = vld [vmem:[%s621_s1 + $0x38] sm:$0xff]   ;;  %423 = vset.pattern.permute.xlu1 %v452_v1  ;;  %422 = vset.pattern.permute.xlu0 %v452_v1  ;;  %v425_v2 = vld [vmem:[%s621_s1 + $0x30] sm:$0xff]   ;;  %v426_v3 = vld [vmem:[%s621_s1 + $0x28] sm:$0xff]  }
   0x2   :  { %381 = vmatprep.subr.bf16.mxu0 %v424_v0  ;;  %405 = vmatprep.subr.bf16.mxu1 %v424_v0  ;;  %v427_v4 = vld [vmem:[%s621_s1 + $0x20] sm:$0xff]   ;;  %v433_v6 = vld [vmem:[%s622_s0 + $0x10] sm:$0xff]   ;;  %v428_v7 = vld [vmem:[%s621_s1 + $0x18] sm:$0xff]  }
   0x3   :  { %382 = vmatpush3.bf16.msra.mxu0 %v424_v0  ;;  %413 = vmatpush3.bf16.msra.mxu1 %v424_v0  ;;  %v432_v5 = vld [vmem:[%s622_s0] sm:$0xff]   ;;  %v41_v8 = vld [vmem:[%s623_s2 + $0x10] sm:$0xff]  ;;  %v42_v10 = vld [vmem:[%s623_s2 + $0x18] sm:$0xff] }
   0x4   :  { %383 = vmatprep.subr.bf16.mxu0 %v425_v2  ;;  %406 = vmatprep.subr.bf16.mxu1 %v425_v2  ;;  %v39_v9 = vld [vmem:[%s623_s2] sm:$0xff]  ;;  %v40_v11 = vld [vmem:[%s623_s2 + $0x8] sm:$0xff]  ;;  %v429_v12 = vld [vmem:[%s621_s1 + $0x10] sm:$0xff]  }
   0x5   :  { %397 = vmatprep.mubr.bf16.mxu0 %v432_v5  ;;  %401 = vmatprep.mubr.bf16.mxu1 %v433_v6  ;;  %v44_v13 = vld [vmem:[%s623_s2 + $0x28] sm:$0xff]  ;;  %v43_v14 = vld [vmem:[%s623_s2 + $0x20] sm:$0xff]  ;;  %v46_v16 = vld [vmem:[%s623_s2 + $0x38] sm:$0xff] }
   0x6   :  { %59 = vperm.xlu1 %423, %v41_v8   ;;  %49 = vperm.xlu0 %422, %v39_v9   ;;  %v430_v15 = vld [vmem:[%s621_s1 + $0x8] sm:$0xff]   ;;  %v45_v17 = vld [vmem:[%s623_s2 + $0x30] sm:$0xff]  ;;  %v431_v18 = vld [vmem:[%s621_s1] sm:$0xff]  }
   0x7   :  { %384 = vmatpush3.bf16.msra.mxu0 %v425_v2  ;;  %414 = vmatpush3.bf16.msra.mxu1 %v425_v2  ;;  %v434_v19 = vld [vmem:[%s622_s0 + $0x8] sm:$0xff]   ;;  %v435_v20 = vld [vmem:[%s622_s0 + $0x18] sm:$0xff]  }
   0x8   :  { %385 = vmatprep.subr.bf16.mxu0 %v426_v3  ;;  %407 = vmatprep.subr.bf16.mxu1 %v426_v3 }
   0xa   :  { %64 = vperm.xlu1 %423, %v42_v10   ;;  %54 = vperm.xlu0 %422, %v40_v11  }
   0xb   :  { %386 = vmatpush3.bf16.msra.mxu0 %v426_v3  ;;  %415 = vmatpush3.bf16.msra.mxu1 %v426_v3 }
   0xc   :  { %387 = vmatprep.subr.bf16.mxu0 %v427_v4  ;;  %408 = vmatprep.subr.bf16.mxu1 %v427_v4 }
   0xe   :  { %74 = vperm.xlu1 %423, %v44_v13   ;;  %69 = vperm.xlu0 %422, %v43_v14  }
   0xf   :  { %388 = vmatpush3.bf16.msra.mxu0 %v427_v4  ;;  %416 = vmatpush3.bf16.msra.mxu1 %v427_v4 }
  0x10   :  { %389 = vmatprep.subr.bf16.mxu0 %v428_v7  ;;  %409 = vmatprep.subr.bf16.mxu1 %v428_v7 }
  0x12   :  { %84 = vperm.xlu1 %423, %v46_v16   ;;  %79 = vperm.xlu0 %422, %v45_v17  }
  0x13   :  { %390 = vmatpush3.bf16.msra.mxu0 %v428_v7  ;;  %417 = vmatpush3.bf16.msra.mxu1 %v428_v7 }
  0x14   :  { %391 = vmatprep.subr.bf16.mxu0 %v429_v12  ;;  %410 = vmatprep.subr.bf16.mxu1 %v429_v12 }
  0x17   :  { %392 = vmatpush3.bf16.msra.mxu0 %v429_v12  ;;  %418 = vmatpush3.bf16.msra.mxu1 %v429_v12 }
  0x18   :  { %393 = vmatprep.subr.bf16.mxu0 %v430_v15  ;;  %411 = vmatprep.subr.bf16.mxu1 %v430_v15 }
  0x1b   :  { %394 = vmatpush3.bf16.msra.mxu0 %v430_v15  ;;  %419 = vmatpush3.bf16.msra.mxu1 %v430_v15 }
  0x1c   :  { %395 = vmatprep.subr.bf16.mxu0 %v431_v18  ;;  %412 = vmatprep.subr.bf16.mxu1 %v431_v18 }
  0x1f   :  { %396 = vmatpush3.bf16.msra.mxu0 %v431_v18  ;;  %420 = vmatpush3.bf16.msra.mxu1 %v431_v18 }
  0x22   :  { %398 = vmatmul.mubr.bf16.vlgmr.msra.gmra.mxu0 %v434_v19  ;;  %402 = vmatmul.mubr.bf16.vlgmr.msra.gmra.mxu1 %v435_v20 }
  0x81   :  { %v50_v21 = vpop.permute.xlu0 %49  ;;  %v60_v22 = vpop.permute.xlu1 %59 }
  0x85   :  { %v55_v23 = vpop.permute.xlu0 %54  ;;  %v65_v24 = vpop.permute.xlu1 %64 }
  0x89   :  { %v70_v25 = vpop.permute.xlu0 %69  ;;  %v75_v26 = vpop.permute.xlu1 %74 }
  0x8d   :  { %v80_v27 = vpop.permute.xlu0 %79  ;;  %v85_v40 = vpop.permute.xlu1 %84 }
  0xe2   :  { %v399_v28 = vpop.f32.mrf.mxu0  ;;  %v403_v29 = vpop.f32.mrf.mxu1 }
  0xe3   :  { %v533_v30 = vadd.f32 %v399_v28, %v60_v22  ;;  %v535_v31 = vadd.f32 %v403_v29, %v80_v27 }
  0xe4   :  { %v193_v32 = vpop.f32.mrf.mxu0  ;;  %v209_v33 = vpop.f32.mrf.mxu1 }
  0xe5   :  { %v226_v34 = vmul.f32 %v533_v30, %v533_v30  ;;  %v230_v35 = vmul.f32 %v535_v31, %v535_v31  ;;  %v541_v36 = vadd.f32 %v193_v32, %v50_v21  ;;  %v543_v37 = vadd.f32 %v209_v33, %v70_v25 }
  0xe6   :  { %v400_v38 = vpop.f32.mrf.mxu0  ;;  %v404_v39 = vpop.f32.mrf.mxu1 }
  0xe7   :  { %v234_v41 = vmul.f32 %v226_v34, %v533_v30  ;;  %v238_v42 = vmul.f32 %v230_v35, %v535_v31  ;;  %v224_v43 = vmul.f32 %v541_v36, %v541_v36  ;;  %v228_v44 = vmul.f32 %v543_v37, %v543_v37 }
  0xe8   :  { %v551_v45 = vadd.f32 %v400_v38, %v65_v24  ;;  %v553_v46 = vadd.f32 %v404_v39, %v85_v40  ;;  %v196_v47 = vpop.f32.mrf.mxu0  ;;  %v212_v48 = vpop.f32.mrf.mxu1 }
  0xe9   :  { %v242_v49 = vmul.f32 0.044715, %v234_v41  ;;  %v246_v50 = vmul.f32 0.044715, %v238_v42  ;;  %v232_v51 = vmul.f32 %v224_v43, %v541_v36  ;;  %v236_v52 = vmul.f32 %v228_v44, %v543_v37 }
  0xea   :  { %v227_v53 = vmul.f32 %v551_v45, %v551_v45  ;;  %v231_v54 = vmul.f32 %v553_v46, %v553_v46  ;;  %v561_v55 = vadd.f32 %v196_v47, %v55_v23  ;;  %v563_v56 = vadd.f32 %v212_v48, %v75_v26 }
  0xeb   :  { %v250_v57 = vadd.f32 %v242_v49, %v533_v30  ;;  %v254_v58 = vadd.f32 %v246_v50, %v535_v31  ;;  %v240_v59 = vmul.f32 0.044715, %v232_v51  ;;  %v244_v60 = vmul.f32 0.044715, %v236_v52 }
  0xec   :  { %v235_v61 = vmul.f32 %v227_v53, %v551_v45  ;;  %v239_v62 = vmul.f32 %v231_v54, %v553_v46  ;;  %v225_v63 = vmul.f32 %v561_v55, %v561_v55  ;;  %v229_v0 = vmul.f32 %v563_v56, %v563_v56 }
  0xed   :  { %v258_v1 = vmul.f32 0.7978846, %v250_v57  ;;  %v262_v2 = vmul.f32 0.7978846, %v254_v58  ;;  %v248_v3 = vadd.f32 %v240_v59, %v541_v36  ;;  %v252_v4 = vadd.f32 %v244_v60, %v543_v37 }
  0xee   :  { %v243_v5 = vmul.f32 0.044715, %v235_v61  ;;  %v247_v6 = vmul.f32 0.044715, %v239_v62  ;;  %v233_v7 = vmul.f32 %v225_v63, %v561_v55  ;;  %v237_v8 = vmul.f32 %v229_v0, %v563_v56 }
  0xef   :  { %436 = vtanh.f32 %v258_v1  ;;  %v256_v9 = vmul.f32 0.7978846, %v248_v3  ;;  %v260_v10 = vmul.f32 0.7978846, %v252_v4 }
  0xf0   :  { %438 = vtanh.f32 %v262_v2  ;;  %v251_v11 = vadd.f32 %v243_v5, %v551_v45  ;;  %v255_v12 = vadd.f32 %v247_v6, %v553_v46  ;;  %v241_v13 = vmul.f32 0.044715, %v233_v7 }
  0xf1   :  { %440 = vtanh.f32 %v256_v9  ;;  %v245_v14 = vmul.f32 0.044715, %v237_v8 }
  0xf2   :  { %442 = vtanh.f32 %v260_v10  ;;  %v259_v15 = vmul.f32 0.7978846, %v251_v11  ;;  %v263_v16 = vmul.f32 0.7978846, %v255_v12  ;;  %v249_v17 = vadd.f32 %v241_v13, %v561_v55 }
  0xf3   :  { %v253_v18 = vadd.f32 %v245_v14, %v563_v56 }
  0xf4   :  { %444 = vtanh.f32 %v259_v15  ;;  %v257_v19 = vmul.f32 0.7978846, %v249_v17 }
  0xf5   :  { %446 = vtanh.f32 %v263_v16  ;;  %v261_v20 = vmul.f32 0.7978846, %v253_v18 }
  0xf6   :  { %448 = vtanh.f32 %v257_v19 }
  0xf7   :  { %450 = vtanh.f32 %v261_v20 }
  0xfc   :  { %v437_v21 = vpop.eup %436 }
  0xfd   :  { %v439_v22 = vpop.eup %438  ;;  %v274_v23 = vadd.f32 1.0, %v437_v21 }
  0xfe   :  { %v441_v24 = vpop.eup %440  ;;  %v278_v25 = vadd.f32 1.0, %v439_v22 }
  0xff   :  { %v443_v26 = vpop.eup %442  ;;  %v282_v27 = vmul.f32 0.5, %v274_v23  ;;  %v272_v28 = vadd.f32 1.0, %v441_v24 }
 0x100   :  { %v286_v29 = vmul.f32 0.5, %v278_v25  ;;  %v276_v32 = vadd.f32 1.0, %v443_v26 }
 0x101   :  { %v445_v33 = vpop.eup %444  ;;  %v290_v34 = vmul.f32 %v282_v27, %v533_v30  ;;  %v280_v35 = vmul.f32 0.5, %v272_v28 }
 0x102   :  { %v447_v38 = vpop.eup %446  ;;  %v294_v39 = vmul.f32 %v286_v29, %v535_v31  ;;  %v284_v40 = vmul.f32 0.5, %v276_v32  ;;  %v275_v41 = vadd.f32 1.0, %v445_v33 }
 0x103   :  { %v449_v42 = vpop.eup %448  ;;  %v363_v43 = vpack.c.bf16 %v290_v34, %v290_v34  ;;  %v288_v44 = vmul.f32 %v280_v35, %v541_v36  ;;  %v279_v47 = vadd.f32 1.0, %v447_v38 }
 0x104   :  { %v451_v48 = vpop.eup %450  ;;  %v367_v49 = vpack.c.bf16 %v294_v39, %v294_v39  ;;  %v292_v50 = vmul.f32 %v284_v40, %v543_v37  ;;  %v283_v51 = vmul.f32 0.5, %v275_v41  ;;  %v273_v52 = vadd.f32 1.0, %v449_v42 }
 0x105   :  { %331 = vst.msk [vmem:[%s624_s3 + $0x8] sm:$0xf] %vm328_vm0, %v363_v43  ;;  %v361_v30 = vpack.c.bf16 %v288_v44, %v288_v44  ;;  %v287_v31 = vmul.f32 0.5, %v279_v47  ;;  %v277_v53 = vadd.f32 1.0, %v451_v48 }
 0x106   :  { %335 = vst.msk [vmem:[%s624_s3 + $0x18] sm:$0xf] %vm328_vm0, %v367_v49  ;;  %v365_v36 = vpack.c.bf16 %v292_v50, %v292_v50  ;;  %v291_v54 = vmul.f32 %v283_v51, %v551_v45  ;;  %v281_v57 = vmul.f32 0.5, %v273_v52 }
 0x107   :  { %329 = vst.msk [vmem:[%s624_s3] sm:$0xf] %vm328_vm0, %v361_v30  ;;  %v295_v37 = vmul.f32 %v287_v31, %v553_v46  ;;  %v285_v58 = vmul.f32 0.5, %v277_v53 }
 0x108   :  { %333 = vst.msk [vmem:[%s624_s3 + $0x10] sm:$0xf] %vm328_vm0, %v365_v36  ;;  %v364_v59 = vpack.c.bf16 %v291_v54, %v291_v54  ;;  %v289_v60 = vmul.f32 %v281_v57, %v561_v55 }
 0x109   :  { %v368_v61 = vpack.c.bf16 %v295_v37, %v295_v37  ;;  %v293_v45 = vmul.f32 %v285_v58, %v563_v56 }
 0x10a   :  { %332 = vst.msk [vmem:[%s624_s3 + $0xc] sm:$0xf] %vm328_vm0, %v364_v59  ;;  %v362_v62 = vpack.c.bf16 %v289_v60, %v289_v60 }
 0x10b   :  { %336 = vst.msk [vmem:[%s624_s3 + $0x1c] sm:$0xf] %vm328_vm0, %v368_v61  ;;  %v366_v46 = vpack.c.bf16 %v293_v45, %v293_v45 }
 0x10c   :  { %330 = vst.msk [vmem:[%s624_s3 + $0x4] sm:$0xf] %vm328_vm0, %v362_v62 }
 0x10d   :  { %334 = vst.msk [vmem:[%s624_s3 + $0x14] sm:$0xf] %vm328_vm0, %v366_v46 }

// kernel: encoder_forward.15
= control target key start
LH: loop header
LB: loop body
LE: loop exit
PB: predicated region body
PF: predicated region fallthrough
CT: control target
= control target key end

     0   :  { %s2797_s16 = smov 127   ;;  %vm128_vm0 = vcmask 523264   ;;  %s2798_s25 = smov 126   ;;  %v2805_v28 = vmov 0   ;;  %vm2049_vm1 = vcmask 175104   ;;  %s3517_s0 = inlined_call_operand.vmem [shape: bf16[64,32], index: 0, kind: input, shape index: {}]   ;;  %s3518_s1 = inlined_call_operand.vmem [shape: bf16[9,128,64], index: 1, kind: input, shape index: {}]   ;;  %s3519_s2 = inlined_call_operand.vmem [shape: f32[128,1], index: 2, kind: input, shape index: {}]   ;;  %s3520_s3 = inlined_call_operand.vmem [shape: bf16[128,22], index: 3, kind: output, shape index: {}]  }
   0x1   :  { %v2829_v0 = vld [vmem:[%s3517_s0 + $0x18] sm:$0xff]   ;;  %v2834_v1 = vld [vmem:[%s3517_s0 + $0x10] sm:$0xff]   ;;  %v2840_v2 = vld [vmem:[%s3517_s0 + $0x8] sm:$0xff]   ;;  %s2800_s26 = smov 123   ;;  %s2801_s27 = smov 122   ;;  %2720 = vset.pattern.permute.xlu1 %v2805_v28  ;;  %2719 = vset.pattern.permute.xlu0 %v2805_v28 }
   0x2   :  { %122 = vrot.lane.b32.xlu0 %v2829_v0, %s2797_s16  ;;  %118 = vrot.lane.b32.xlu1 %v2840_v2, %s2797_s16  ;;  %v2846_v3 = vld [vmem:[%s3517_s0] sm:$0xff]   ;;  %s2799_s0 = smov 124   ;;  %s2802_s28 = smov 120   ;;  %v2727_v11 = vld [vmem:[%s3518_s1 + $0x48] sm:$0xff]  }
   0x3   :  { %v2725_v4 = vld [vmem:[%s3518_s1 + $0x40] sm:$0xff]   ;;  %s2803_s29 = smov 119   ;;  %s2804_s30 = smov 118   ;;  %v2728_v12 = vld [vmem:[%s3518_s1 + $0x68] sm:$0xff]   ;;  %v2729_v14 = vld [vmem:[%s3518_s1 + $0x50] sm:$0xff]  }
   0x4   :  { %v2726_v5 = vld [vmem:[%s3518_s1 + $0x60] sm:$0xff]   ;;  %2494 = vmatprep.mubr.msk.bf16.mxu0 %vm128_vm0, %v2725_v4  ;;  %v2730_v15 = vld [vmem:[%s3518_s1 + $0x70] sm:$0xff]   ;;  %v2731_v18 = vld [vmem:[%s3518_s1 + $0x58] sm:$0xff]  }
   0x5   :  { %2502 = vmatprep.mubr.msk.bf16.mxu1 %vm128_vm0, %v2726_v5  ;;  %v2732_v19 = vld [vmem:[%s3518_s1 + $0x78] sm:$0xff]   ;;  %v2733_v22 = vld [vmem:[%s3518_s1] sm:$0xff]   ;;  %v2735_v24 = vld [vmem:[%s3518_s1 + $0x8] sm:$0xff]  }
   0x6   :  { %120 = vrot.lane.b32.xlu0 %v2834_v1, %s2797_s16  ;;  %116 = vrot.lane.b32.xlu1 %v2846_v3, %s2797_s16  ;;  %v2734_v23 = vld [vmem:[%s3518_s1 + $0x80] sm:$0xff]   ;;  %v2736_v25 = vld [vmem:[%s3518_s1 + $0x88] sm:$0xff]  }
   0x7   :  { %v1857_v29 = vld [vmem:[%s3519_s2] sm:$0xff]  ;;  %v1858_v30 = vld [vmem:[%s3519_s2 + $0x8] sm:$0xff]  ;;  %v2737_v31 = vld [vmem:[%s3518_s1 + $0x10] sm:$0xff]  }
   0x8   :  { %v2738_v32 = vld [vmem:[%s3518_s1 + $0x90] sm:$0xff]   ;;  %v1860_v33 = vld [vmem:[%s3519_s2 + $0x18] sm:$0xff]  ;;  %v2741_v39 = vld [vmem:[%s3518_s1 + $0x20] sm:$0xff]  }
   0x9   :  { %v1859_v34 = vld [vmem:[%s3519_s2 + $0x10] sm:$0xff]  ;;  %v2739_v37 = vld [vmem:[%s3518_s1 + $0x18] sm:$0xff]   ;;  %v2742_v40 = vld [vmem:[%s3518_s1 + $0xa0] sm:$0xff]  }
   0xa   :  { %478 = vrot.lane.b32.xlu0 %v2829_v0, %s2798_s25  ;;  %476 = vrot.lane.b32.xlu1 %v2834_v1, %s2798_s25  ;;  %v2740_v38 = vld [vmem:[%s3518_s1 + $0x98] sm:$0xff]   ;;  %v1862_v43 = vld [vmem:[%s3519_s2 + $0x28] sm:$0xff] }
   0xb   :  { %v1861_v44 = vld [vmem:[%s3519_s2 + $0x20] sm:$0xff]  ;;  %v2743_v45 = vld [vmem:[%s3518_s1 + $0x28] sm:$0xff]   ;;  %v2745_v49 = vld [vmem:[%s3518_s1 + $0x30] sm:$0xff]  }
   0xc   :  { %v2744_v46 = vld [vmem:[%s3518_s1 + $0xa8] sm:$0xff]   ;;  %v2746_v50 = vld [vmem:[%s3518_s1 + $0xb0] sm:$0xff]   ;;  %v1864_v51 = vld [vmem:[%s3519_s2 + $0x38] sm:$0xff] }
   0xd   :  { %v1863_v52 = vld [vmem:[%s3519_s2 + $0x30] sm:$0xff]  ;;  %v1866_v53 = vld [vmem:[%s3519_s2 + $0x48] sm:$0xff]  ;;  %v1865_v54 = vld [vmem:[%s3519_s2 + $0x40] sm:$0xff] }
   0xe   :  { %474 = vrot.lane.b32.xlu0 %v2840_v2, %s2798_s25  ;;  %472 = vrot.lane.b32.xlu1 %v2846_v3, %s2798_s25  ;;  %v2747_v55 = vld [vmem:[%s3518_s1 + $0x38] sm:$0xff]   ;;  %v2749_v57 = vld [vmem:[%s3518_s1 + $0xc0] sm:$0xff]  }
   0xf   :  { %v2748_v56 = vld [vmem:[%s3518_s1 + $0xb8] sm:$0xff]   ;;  %v2750_v58 = vld [vmem:[%s3518_s1 + $0x100] sm:$0xff]   ;;  %v1867_v60 = vld [vmem:[%s3519_s2 + $0x50] sm:$0xff] }
  0x10   :  { %v1868_v59 = vld [vmem:[%s3519_s2 + $0x58] sm:$0xff]  ;;  %v1870_v61 = vld [vmem:[%s3519_s2 + $0x68] sm:$0xff]  ;;  %v1869_v62 = vld [vmem:[%s3519_s2 + $0x60] sm:$0xff] }
  0x11   :  { %v2751_v63 = vld [vmem:[%s3518_s1 + $0xc8] sm:$0xff]   ;;  %v2754_v4 = vld [vmem:[%s3518_s1 + $0x110] sm:$0xff]   ;;  %v1872_v5 = vld [vmem:[%s3519_s2 + $0x78] sm:$0xff] }
  0x12   :  { %684 = vrot.lane.b32.xlu0 %v2829_v0, %s2799_s0  ;;  %890 = vrot.lane.b32.xlu1 %v2829_v0, %s2800_s26 }
  0x16   :  { %682 = vrot.lane.b32.xlu0 %v2834_v1, %s2799_s0  ;;  %888 = vrot.lane.b32.xlu1 %v2834_v1, %s2800_s26 }
  0x1a   :  { %680 = vrot.lane.b32.xlu0 %v2840_v2, %s2799_s0  ;;  %886 = vrot.lane.b32.xlu1 %v2840_v2, %s2800_s26 }
  0x1e   :  { %678 = vrot.lane.b32.xlu0 %v2846_v3, %s2799_s0  ;;  %884 = vrot.lane.b32.xlu1 %v2846_v3, %s2800_s26 }
  0x22   :  { %1096 = vrot.lane.b32.xlu0 %v2829_v0, %s2801_s27  ;;  %1302 = vrot.lane.b32.xlu1 %v2829_v0, %s2802_s28 }
  0x26   :  { %1094 = vrot.lane.b32.xlu0 %v2834_v1, %s2801_s27  ;;  %1300 = vrot.lane.b32.xlu1 %v2834_v1, %s2802_s28 }
  0x2a   :  { %1092 = vrot.lane.b32.xlu0 %v2840_v2, %s2801_s27  ;;  %1298 = vrot.lane.b32.xlu1 %v2840_v2, %s2802_s28 }
  0x2e   :  { %1090 = vrot.lane.b32.xlu0 %v2846_v3, %s2801_s27  ;;  %1296 = vrot.lane.b32.xlu1 %v2846_v3, %s2802_s28 }
  0x32   :  { %1508 = vrot.lane.b32.xlu0 %v2829_v0, %s2803_s29  ;;  %1714 = vrot.lane.b32.xlu1 %v2829_v0, %s2804_s30 }
  0x36   :  { %1506 = vrot.lane.b32.xlu0 %v2834_v1, %s2803_s29  ;;  %1712 = vrot.lane.b32.xlu1 %v2834_v1, %s2804_s30 }
  0x3a   :  { %1504 = vrot.lane.b32.xlu0 %v2840_v2, %s2803_s29  ;;  %1710 = vrot.lane.b32.xlu1 %v2840_v2, %s2804_s30 }
  0x3e   :  { %1502 = vrot.lane.b32.xlu0 %v2846_v3, %s2803_s29  ;;  %1708 = vrot.lane.b32.xlu1 %v2846_v3, %s2804_s30 }
  0x42   :  { %1875 = vperm.xlu0 %2719, %v1857_v29   ;;  %1880 = vperm.xlu1 %2720, %v1858_v30   ;;  %v2769_v29 = vld [vmem:[%s3518_s1 + $0x150] sm:$0xff]  }
  0x43   :  { %v2770_v30 = vld [vmem:[%s3518_s1 + $0x190] sm:$0xff]  }
  0x46   :  { %1890 = vperm.xlu0 %2719, %v1860_v33   ;;  %1885 = vperm.xlu1 %2720, %v1859_v34   ;;  %v2771_v33 = vld [vmem:[%s3518_s1 + $0x158] sm:$0xff]  }
  0x47   :  { %v2772_v34 = vld [vmem:[%s3518_s1 + $0x198] sm:$0xff]  }
  0x4a   :  { %1900 = vperm.xlu0 %2719, %v1862_v43   ;;  %1895 = vperm.xlu1 %2720, %v1861_v44   ;;  %v2779_v43 = vld [vmem:[%s3518_s1 + $0x178] sm:$0xff]  }
  0x4b   :  { %v2780_v44 = vld [vmem:[%s3518_s1 + $0x1b8] sm:$0xff]  }
  0x4e   :  { %1910 = vperm.xlu0 %2719, %v1864_v51   ;;  %1905 = vperm.xlu1 %2720, %v1863_v52   ;;  %v2787_v51 = vld [vmem:[%s3518_s1 + $0x1d8] sm:$0xff]  }
  0x4f   :  { %v2788_v52 = vld [vmem:[%s3518_s1 + $0x218] sm:$0xff]  }
  0x52   :  { %1920 = vperm.xlu0 %2719, %v1866_v53   ;;  %1915 = vperm.xlu1 %2720, %v1865_v54   ;;  %v2789_v53 = vld [vmem:[%s3518_s1 + $0x1e0] sm:$0xff]  }
  0x53   :  { %v2790_v54 = vld [vmem:[%s3518_s1 + $0x220] sm:$0xff]  }
  0x56   :  { %1930 = vperm.xlu0 %2719, %v1868_v59   ;;  %1925 = vperm.xlu1 %2720, %v1867_v60   ;;  %v2795_v59 = vld [vmem:[%s3518_s1 + $0x1f8] sm:$0xff]  }
  0x57   :  { %v2796_v60 = vld [vmem:[%s3518_s1 + $0x238] sm:$0xff]  }
  0x5a   :  { %1940 = vperm.xlu0 %2719, %v1870_v61   ;;  %1935 = vperm.xlu1 %2720, %v1869_v62  }
  0x5e   :  { %1950 = vperm.xlu0 %2719, %v1872_v5  }
  0x74   :  { %v123_v6 = vpop.permute.xlu0 %122  ;;  %v119_v7 = vpop.permute.xlu1 %118 }
  0x75   :  { %2486 = vmatprep.subr.bf16.mxu0 %v123_v6  ;;  %2702 = vmatprep.subr.bf16.mxu1 %v123_v6 }
  0x76   :  { %2487 = vmatpush3.bf16.msra.mxu0 %v123_v6  ;;  %2706 = vmatpush3.bf16.msra.mxu1 %v123_v6  ;;  %v1871_v6 = vld [vmem:[%s3519_s2 + $0x70] sm:$0xff] }
  0x77   :  { %1945 = vperm.xlu1 %2720, %v1871_v6  }
  0x78   :  { %v121_v8 = vpop.permute.xlu0 %120  ;;  %v117_v9 = vpop.permute.xlu1 %116 }
  0x79   :  { %2488 = vmatprep.subr.bf16.mxu0 %v121_v8  ;;  %2703 = vmatprep.subr.bf16.mxu1 %v121_v8 }
  0x7a   :  { %2489 = vmatpush3.bf16.msra.mxu0 %v121_v8  ;;  %2707 = vmatpush3.bf16.msra.mxu1 %v121_v8 }
  0x7b   :  { %2490 = vmatprep.subr.bf16.mxu0 %v119_v7  ;;  %2704 = vmatprep.subr.bf16.mxu1 %v119_v7 }
  0x7c   :  { %v479_v10 = vpop.permute.xlu0 %478  ;;  %v477_v13 = vpop.permute.xlu1 %476 }
  0x7e   :  { %2491 = vmatpush3.bf16.msra.mxu0 %v119_v7  ;;  %2708 = vmatpush3.bf16.msra.mxu1 %v119_v7 }
  0x7f   :  { %2492 = vmatprep.subr.bf16.mxu0 %v117_v9  ;;  %2705 = vmatprep.subr.bf16.mxu1 %v117_v9 }
  0x80   :  { %v475_v16 = vpop.permute.xlu0 %474  ;;  %v473_v17 = vpop.permute.xlu1 %472 }
  0x82   :  { %2493 = vmatpush3.bf16.msra.mxu0 %v117_v9  ;;  %2709 = vmatpush3.bf16.msra.mxu1 %v117_v9  ;;  %v2755_v9 = vld [vmem:[%s3518_s1 + $0xd8] sm:$0xff]  }
  0x83   :  { %2510 = vmatprep.subr.bf16.mxu1 %v2829_v0  ;;  %2534 = vmatprep.subr.bf16.mxu0 %v479_v10 }
  0x84   :  { %v685_v20 = vpop.permute.xlu0 %684  ;;  %v891_v21 = vpop.permute.xlu1 %890 }
  0x85   :  { %2495 = vmatmul.mubr.msk.bf16.vlgmr.msra.gmra.mxu0 %vm128_vm0, %v2727_v11  ;;  %2503 = vmatmul.mubr.msk.bf16.vlgmr.msra.gmra.mxu1 %vm128_vm0, %v2728_v12  ;;  %v2757_v11 = vld [vmem:[%s3518_s1 + $0xe0] sm:$0xff]  }
  0x86   :  { %2511 = vmatpush3.bf16.msra.mxu1 %v2829_v0  ;;  %2535 = vmatpush3.bf16.msra.mxu0 %v479_v10  ;;  %v2752_v0 = vld [vmem:[%s3518_s1 + $0x108] sm:$0xff]   ;;  %v2756_v10 = vld [vmem:[%s3518_s1 + $0x118] sm:$0xff]   ;;  %v2758_v12 = vld [vmem:[%s3518_s1 + $0x120] sm:$0xff]  }
  0x87   :  { %2512 = vmatprep.subr.bf16.mxu1 %v2834_v1  ;;  %2536 = vmatprep.subr.bf16.mxu0 %v477_v13 }
  0x88   :  { %2498 = vmatprep.mubr.msk.bf16.mxu0 %vm128_vm0, %v2729_v14  ;;  %2506 = vmatprep.mubr.msk.bf16.mxu1 %vm128_vm0, %v2730_v15  ;;  %v683_v26 = vpop.permute.xlu0 %682  ;;  %v889_v27 = vpop.permute.xlu1 %888  ;;  %v2759_v15 = vld [vmem:[%s3518_s1 + $0xe8] sm:$0xff]  }
  0x8a   :  { %2513 = vmatpush3.bf16.msra.mxu1 %v2834_v1  ;;  %2537 = vmatpush3.bf16.msra.mxu0 %v477_v13 }
  0x8b   :  { %2514 = vmatprep.subr.bf16.mxu1 %v2840_v2  ;;  %2538 = vmatprep.subr.bf16.mxu0 %v475_v16 }
  0x8c   :  { %v681_v35 = vpop.permute.xlu0 %680  ;;  %v887_v36 = vpop.permute.xlu1 %886 }
  0x8d   :  { %2499 = vmatmul.mubr.msk.bf16.gmra.mxu0 %vm128_vm0, %v2731_v18  ;;  %2507 = vmatmul.mubr.msk.bf16.gmra.mxu1 %vm128_vm0, %v2732_v19  ;;  %v2761_v19 = vld [vmem:[%s3518_s1 + $0xf0] sm:$0xff]  }
  0x8e   :  { %2515 = vmatpush3.bf16.msra.mxu1 %v2840_v2  ;;  %2539 = vmatpush3.bf16.msra.mxu0 %v475_v16  ;;  %v2760_v16 = vld [vmem:[%s3518_s1 + $0x128] sm:$0xff]  }
  0x8f   :  { %2516 = vmatprep.subr.bf16.mxu1 %v2846_v3  ;;  %2540 = vmatprep.subr.bf16.mxu0 %v473_v17 }
  0x90   :  { %2518 = vmatprep.mubr.msk.bf16.mxu1 %vm128_vm0, %v2733_v22  ;;  %2542 = vmatprep.mubr.msk.bf16.mxu0 %vm128_vm0, %v2734_v23  ;;  %v679_v41 = vpop.permute.xlu0 %678  ;;  %v885_v42 = vpop.permute.xlu1 %884  ;;  %v2764_v22 = vld [vmem:[%s3518_s1 + $0x138] sm:$0xff]   ;;  %v2765_v23 = vld [vmem:[%s3518_s1 + $0x140] sm:$0xff]  }
  0x92   :  { %2517 = vmatpush3.bf16.msra.mxu1 %v2846_v3  ;;  %2541 = vmatpush3.bf16.msra.mxu0 %v473_v17  ;;  %v2753_v3 = vld [vmem:[%s3518_s1 + $0xd0] sm:$0xff]  }
  0x93   :  { %2558 = vmatprep.subr.bf16.mxu1 %v685_v20  ;;  %2582 = vmatprep.subr.bf16.mxu0 %v891_v21 }
  0x94   :  { %v1097_v47 = vpop.permute.xlu0 %1096  ;;  %v1303_v48 = vpop.permute.xlu1 %1302 }
  0x95   :  { %2519 = vmatmul.mubr.msk.bf16.vlgmr.msra.gmra.mxu1 %vm128_vm0, %v2735_v24  ;;  %2543 = vmatmul.mubr.msk.bf16.vlgmr.msra.gmra.mxu0 %vm128_vm0, %v2736_v25  ;;  %v2766_v24 = vld [vmem:[%s3518_s1 + $0x180] sm:$0xff]   ;;  %v2767_v25 = vld [vmem:[%s3518_s1 + $0x148] sm:$0xff]  }
  0x96   :  { %2559 = vmatpush3.bf16.msra.mxu1 %v685_v20  ;;  %2583 = vmatpush3.bf16.msra.mxu0 %v891_v21  ;;  %v2762_v20 = vld [vmem:[%s3518_s1 + $0x130] sm:$0xff]   ;;  %v2763_v21 = vld [vmem:[%s3518_s1 + $0xf8] sm:$0xff]  }
  0x97   :  { %2522 = vmatprep.mubr.msk.bf16.mxu1 %vm128_vm0, %v2737_v31  ;;  %2546 = vmatprep.mubr.msk.bf16.mxu0 %vm128_vm0, %v2738_v32 }
  0x98   :  { %2560 = vmatprep.subr.bf16.mxu1 %v683_v26  ;;  %2584 = vmatprep.subr.bf16.mxu0 %v889_v27  ;;  %v1095_v1 = vpop.permute.xlu0 %1094  ;;  %v1301_v2 = vpop.permute.xlu1 %1300 }
  0x9a   :  { %2561 = vmatpush3.bf16.msra.mxu1 %v683_v26  ;;  %2585 = vmatpush3.bf16.msra.mxu0 %v889_v27  ;;  %v2768_v26 = vld [vmem:[%s3518_s1 + $0x188] sm:$0xff]  }
  0x9b   :  { %2562 = vmatprep.subr.bf16.mxu1 %v681_v35  ;;  %2586 = vmatprep.subr.bf16.mxu0 %v887_v36 }
  0x9c   :  { %v1093_v7 = vpop.permute.xlu0 %1092  ;;  %v1299_v8 = vpop.permute.xlu1 %1298 }
  0x9d   :  { %2523 = vmatmul.mubr.msk.bf16.gmra.mxu1 %vm128_vm0, %v2739_v37  ;;  %2547 = vmatmul.mubr.msk.bf16.gmra.mxu0 %vm128_vm0, %v2740_v38 }
  0x9e   :  { %2526 = vmatprep.mubr.msk.bf16.mxu1 %vm128_vm0, %v2741_v39  ;;  %2550 = vmatprep.mubr.msk.bf16.mxu0 %vm128_vm0, %v2742_v40  ;;  %v2775_v39 = vld [vmem:[%s3518_s1 + $0x168] sm:$0xff]  }
  0x9f   :  { %2563 = vmatpush3.bf16.msra.mxu1 %v681_v35  ;;  %2587 = vmatpush3.bf16.msra.mxu0 %v887_v36  ;;  %v2773_v35 = vld [vmem:[%s3518_s1 + $0x160] sm:$0xff]   ;;  %v2776_v40 = vld [vmem:[%s3518_s1 + $0x1a8] sm:$0xff]  }
  0xa0   :  { %2564 = vmatprep.subr.bf16.mxu1 %v679_v41  ;;  %2588 = vmatprep.subr.bf16.mxu0 %v885_v42  ;;  %v1091_v13 = vpop.permute.xlu0 %1090  ;;  %v1297_v14 = vpop.permute.xlu1 %1296  ;;  %v2774_v36 = vld [vmem:[%s3518_s1 + $0x1a0] sm:$0xff]  }
  0xa3   :  { %2565 = vmatpush3.bf16.msra.mxu1 %v679_v41  ;;  %2589 = vmatpush3.bf16.msra.mxu0 %v885_v42  ;;  %v2777_v41 = vld [vmem:[%s3518_s1 + $0x170] sm:$0xff]  }
  0xa4   :  { %2606 = vmatprep.subr.bf16.mxu1 %v1097_v47  ;;  %2630 = vmatprep.subr.bf16.mxu0 %v1303_v48  ;;  %v1509_v17 = vpop.permute.xlu0 %1508  ;;  %v1715_v18 = vpop.permute.xlu1 %1714  ;;  %v2778_v42 = vld [vmem:[%s3518_s1 + $0x1b0] sm:$0xff]  }
  0xa5   :  { %2527 = vmatmul.mubr.msk.bf16.gmra.mxu1 %vm128_vm0, %v2743_v45  ;;  %2551 = vmatmul.mubr.msk.bf16.gmra.mxu0 %vm128_vm0, %v2744_v46  ;;  %v2781_v45 = vld [vmem:[%s3518_s1 + $0x1c0] sm:$0xff]  }
  0xa6   :  { %2530 = vmatprep.mubr.msk.bf16.mxu1 %vm128_vm0, %v2745_v49  ;;  %2554 = vmatprep.mubr.msk.bf16.mxu0 %vm128_vm0, %v2746_v50  ;;  %v2782_v46 = vld [vmem:[%s3518_s1 + $0x200] sm:$0xff]   ;;  %v2785_v49 = vld [vmem:[%s3518_s1 + $0x1d0] sm:$0xff]  }
  0xa7   :  { %v2786_v50 = vld [vmem:[%s3518_s1 + $0x210] sm:$0xff]  }
  0xa8   :  { %v1507_v27 = vpop.permute.xlu0 %1506  ;;  %v1713_v28 = vpop.permute.xlu1 %1712 }
  0xac   :  { %v1505_v31 = vpop.permute.xlu0 %1504  ;;  %v1711_v32 = vpop.permute.xlu1 %1710 }
  0xad   :  { %2531 = vmatmul.mubr.msk.bf16.gmra.mxu1 %vm128_vm0, %v2747_v55  ;;  %2555 = vmatmul.mubr.msk.bf16.gmra.mxu0 %vm128_vm0, %v2748_v56  ;;  %v2791_v55 = vld [vmem:[%s3518_s1 + $0x1e8] sm:$0xff]  }
  0xae   :  { %2566 = vmatprep.mubr.msk.bf16.mxu1 %vm128_vm0, %v2749_v57  ;;  %2590 = vmatprep.mubr.msk.bf16.mxu0 %vm128_vm0, %v2750_v58  ;;  %v2792_v56 = vld [vmem:[%s3518_s1 + $0x228] sm:$0xff]   ;;  %v2793_v57 = vld [vmem:[%s3518_s1 + $0x1f0] sm:$0xff]  }
  0xaf   :  { %v2794_v58 = vld [vmem:[%s3518_s1 + $0x230] sm:$0xff]  }
  0xb0   :  { %v1503_v37 = vpop.permute.xlu0 %1502  ;;  %v1709_v38 = vpop.permute.xlu1 %1708 }
  0xb5   :  { %2567 = vmatmul.mubr.msk.bf16.vlgmr.msra.gmra.mxu1 %vm128_vm0, %v2751_v63  ;;  %2591 = vmatmul.mubr.msk.bf16.vlgmr.msra.gmra.mxu0 %vm128_vm0, %v2752_v0 }
  0xb6   :  { %2607 = vmatpush3.bf16.msra.mxu1 %v1097_v47  ;;  %2631 = vmatpush3.bf16.msra.mxu0 %v1303_v48  ;;  %v2783_v47 = vld [vmem:[%s3518_s1 + $0x1c8] sm:$0xff]  }
  0xb7   :  { %2570 = vmatprep.mubr.msk.bf16.mxu1 %vm128_vm0, %v2753_v3  ;;  %2594 = vmatprep.mubr.msk.bf16.mxu0 %vm128_vm0, %v2754_v4  ;;  %v2784_v48 = vld [vmem:[%s3518_s1 + $0x208] sm:$0xff]  }
  0xb8   :  { %2608 = vmatprep.subr.bf16.mxu1 %v1095_v1  ;;  %2632 = vmatprep.subr.bf16.mxu0 %v1301_v2 }
  0xba   :  { %2609 = vmatpush3.bf16.msra.mxu1 %v1095_v1  ;;  %2633 = vmatpush3.bf16.msra.mxu0 %v1301_v2 }
  0xbb   :  { %2610 = vmatprep.subr.bf16.mxu1 %v1093_v7  ;;  %2634 = vmatprep.subr.bf16.mxu0 %v1299_v8 }
  0xbd   :  { %2571 = vmatmul.mubr.msk.bf16.gmra.mxu1 %vm128_vm0, %v2755_v9  ;;  %2595 = vmatmul.mubr.msk.bf16.gmra.mxu0 %vm128_vm0, %v2756_v10 }
  0xbe   :  { %2574 = vmatprep.mubr.msk.bf16.mxu1 %vm128_vm0, %v2757_v11  ;;  %2598 = vmatprep.mubr.msk.bf16.mxu0 %vm128_vm0, %v2758_v12 }
  0xbf   :  { %2611 = vmatpush3.bf16.msra.mxu1 %v1093_v7  ;;  %2635 = vmatpush3.bf16.msra.mxu0 %v1299_v8 }
  0xc0   :  { %2612 = vmatprep.subr.bf16.mxu1 %v1091_v13  ;;  %2636 = vmatprep.subr.bf16.mxu0 %v1297_v14 }
  0xc3   :  { %2613 = vmatpush3.bf16.msra.mxu1 %v1091_v13  ;;  %2637 = vmatpush3.bf16.msra.mxu0 %v1297_v14 }
  0xc4   :  { %2654 = vmatprep.subr.bf16.mxu1 %v1509_v17  ;;  %2678 = vmatprep.subr.bf16.mxu0 %v1715_v18 }
  0xc5   :  { %2575 = vmatmul.mubr.msk.bf16.gmra.mxu1 %vm128_vm0, %v2759_v15  ;;  %2599 = vmatmul.mubr.msk.bf16.gmra.mxu0 %vm128_vm0, %v2760_v16 }
  0xc6   :  { %2578 = vmatprep.mubr.msk.bf16.mxu1 %vm128_vm0, %v2761_v19  ;;  %2602 = vmatprep.mubr.msk.bf16.mxu0 %vm128_vm0, %v2762_v20 }
  0xcd   :  { %2579 = vmatmul.mubr.msk.bf16.gmra.mxu1 %vm128_vm0, %v2763_v21  ;;  %2603 = vmatmul.mubr.msk.bf16.gmra.mxu0 %vm128_vm0, %v2764_v22 }
  0xce   :  { %2614 = vmatprep.mubr.msk.bf16.mxu1 %vm128_vm0, %v2765_v23  ;;  %2638 = vmatprep.mubr.msk.bf16.mxu0 %vm128_vm0, %v2766_v24 }
  0xd5   :  { %2615 = vmatmul.mubr.msk.bf16.vlgmr.msra.gmra.mxu1 %vm128_vm0, %v2767_v25  ;;  %2639 = vmatmul.mubr.msk.bf16.vlgmr.msra.gmra.mxu0 %vm128_vm0, %v2768_v26 }
  0xd6   :  { %2655 = vmatpush3.bf16.msra.mxu1 %v1509_v17  ;;  %2679 = vmatpush3.bf16.msra.mxu0 %v1715_v18 }
  0xd7   :  { %2618 = vmatprep.mubr.msk.bf16.mxu1 %vm128_vm0, %v2769_v29  ;;  %2642 = vmatprep.mubr.msk.bf16.mxu0 %vm128_vm0, %v2770_v30 }
  0xd8   :  { %2656 = vmatprep.subr.bf16.mxu1 %v1507_v27  ;;  %2680 = vmatprep.subr.bf16.mxu0 %v1713_v28 }
  0xda   :  { %2657 = vmatpush3.bf16.msra.mxu1 %v1507_v27  ;;  %2681 = vmatpush3.bf16.msra.mxu0 %v1713_v28 }
  0xdb   :  { %2658 = vmatprep.subr.bf16.mxu1 %v1505_v31  ;;  %2682 = vmatprep.subr.bf16.mxu0 %v1711_v32 }
  0xdd   :  { %2619 = vmatmul.mubr.msk.bf16.gmra.mxu1 %vm128_vm0, %v2771_v33  ;;  %2643 = vmatmul.mubr.msk.bf16.gmra.mxu0 %vm128_vm0, %v2772_v34 }
  0xde   :  { %2622 = vmatprep.mubr.msk.bf16.mxu1 %vm128_vm0, %v2773_v35  ;;  %2646 = vmatprep.mubr.msk.bf16.mxu0 %vm128_vm0, %v2774_v36 }
  0xdf   :  { %2659 = vmatpush3.bf16.msra.mxu1 %v1505_v31  ;;  %2683 = vmatpush3.bf16.msra.mxu0 %v1711_v32 }
  0xe0   :  { %2660 = vmatprep.subr.bf16.mxu1 %v1503_v37  ;;  %2684 = vmatprep.subr.bf16.mxu0 %v1709_v38 }
  0xe3   :  { %2661 = vmatpush3.bf16.msra.mxu1 %v1503_v37  ;;  %2685 = vmatpush3.bf16.msra.mxu0 %v1709_v38 }
  0xe5   :  { %2623 = vmatmul.mubr.msk.bf16.gmra.mxu1 %vm128_vm0, %v2775_v39  ;;  %2647 = vmatmul.mubr.msk.bf16.gmra.mxu0 %vm128_vm0, %v2776_v40 }
  0xe6   :  { %2626 = vmatprep.mubr.msk.bf16.mxu1 %vm128_vm0, %v2777_v41  ;;  %2650 = vmatprep.mubr.msk.bf16.mxu0 %vm128_vm0, %v2778_v42 }
  0xed   :  { %2627 = vmatmul.mubr.msk.bf16.gmra.mxu1 %vm128_vm0, %v2779_v43  ;;  %2651 = vmatmul.mubr.msk.bf16.gmra.mxu0 %vm128_vm0, %v2780_v44 }
  0xee   :  { %2662 = vmatprep.mubr.msk.bf16.mxu1 %vm128_vm0, %v2781_v45  ;;  %2686 = vmatprep.mubr.msk.bf16.mxu0 %vm128_vm0, %v2782_v46 }
  0xf5   :  { %2663 = vmatmul.mubr.msk.bf16.vlgmr.msra.gmra.mxu1 %vm128_vm0, %v2783_v47  ;;  %2687 = vmatmul.mubr.msk.bf16.vlgmr.msra.gmra.mxu0 %vm128_vm0, %v2784_v48 }
  0xf6   :  { %2666 = vmatprep.mubr.msk.bf16.mxu1 %vm128_vm0, %v2785_v49  ;;  %2690 = vmatprep.mubr.msk.bf16.mxu0 %vm128_vm0, %v2786_v50 }
  0xfd   :  { %2667 = vmatmul.mubr.msk.bf16.gmra.mxu1 %vm128_vm0, %v2787_v51  ;;  %2691 = vmatmul.mubr.msk.bf16.gmra.mxu0 %vm128_vm0, %v2788_v52 }
  0xfe   :  { %2670 = vmatprep.mubr.msk.bf16.mxu1 %vm128_vm0, %v2789_v53  ;;  %2694 = vmatprep.mubr.msk.bf16.mxu0 %vm128_vm0, %v2790_v54 }
 0x105   :  { %2671 = vmatmul.mubr.msk.bf16.gmra.mxu1 %vm128_vm0, %v2791_v55  ;;  %2695 = vmatmul.mubr.msk.bf16.gmra.mxu0 %vm128_vm0, %v2792_v56 }
 0x106   :  { %2674 = vmatprep.mubr.msk.bf16.mxu1 %vm128_vm0, %v2793_v57  ;;  %2698 = vmatprep.mubr.msk.bf16.mxu0 %vm128_vm0, %v2794_v58 }
 0x10d   :  { %2675 = vmatmul.mubr.msk.bf16.gmra.mxu1 %vm128_vm0, %v2795_v59  ;;  %2699 = vmatmul.mubr.msk.bf16.gmra.mxu0 %vm128_vm0, %v2796_v60 }
 0x145   :  { %v2496_v61 = vpop.f32.mrf.mxu0  ;;  %v2504_v62 = vpop.f32.mrf.mxu1 }
 0x147   :  { %v187_v63 = vpop.f32.mrf.mxu0  ;;  %v219_v0 = vpop.f32.mrf.mxu1 }
 0x149   :  { %v2497_v1 = vpop.f32.mrf.mxu0  ;;  %v2505_v2 = vpop.f32.mrf.mxu1 }
 0x14b   :  { %v190_v3 = vpop.f32.mrf.mxu0  ;;  %v222_v4 = vpop.f32.mrf.mxu1 }
 0x14d   :  { %v2500_v5 = vpop.f32.mrf.mxu0  ;;  %v2508_v6 = vpop.f32.mrf.mxu1 }
 0x14f   :  { %v203_v7 = vpop.f32.mrf.mxu0  ;;  %v235_v8 = vpop.f32.mrf.mxu1 }
 0x151   :  { %v2501_v9 = vpop.f32.mrf.mxu0  ;;  %v2509_v10 = vpop.f32.mrf.mxu1 }
 0x153   :  { %v206_v11 = vpop.f32.mrf.mxu0  ;;  %v3222_v12 = vpop.f32.mrf.mxu1 }
 0x155   :  { %v2520_v13 = vpop.f32.mrf.mxu1  ;;  %v2544_v14 = vpop.f32.mrf.mxu0 }
 0x156   :  { %v361_v15 = vadd.f32 %v2520_v13, %v2496_v61 }
 0x157   :  { %v352_v16 = vpop.f32.mrf.mxu1  ;;  %v542_v17 = vpop.f32.mrf.mxu0 }
 0x158   :  { %v3224_v18 = vadd.f32 %v2544_v14, %v361_v15  ;;  %v353_v19 = vadd.f32 %v352_v16, %v187_v63 }
 0x159   :  { %v2521_v20 = vpop.f32.mrf.mxu1  ;;  %v2545_v21 = vpop.f32.mrf.mxu0 }
 0x15a   :  { %v3226_v22 = vadd.f32 %v542_v17, %v353_v19  ;;  %v364_v23 = vadd.f32 %v2521_v20, %v2497_v1 }
 0x15b   :  { %v355_v24 = vpop.f32.mrf.mxu1  ;;  %v545_v25 = vpop.f32.mrf.mxu0 }
 0x15c   :  { %v3228_v26 = vadd.f32 %v2545_v21, %v364_v23  ;;  %v356_v27 = vadd.f32 %v355_v24, %v190_v3 }
 0x15d   :  { %v2524_v28 = vpop.f32.mrf.mxu1  ;;  %v2548_v29 = vpop.f32.mrf.mxu0 }
 0x15e   :  { %v3230_v30 = vadd.f32 %v545_v25, %v356_v27  ;;  %v377_v31 = vadd.f32 %v2524_v28, %v2500_v5 }
 0x15f   :  { %v368_v32 = vpop.f32.mrf.mxu1  ;;  %v558_v33 = vpop.f32.mrf.mxu0 }
 0x160   :  { %v3232_v34 = vadd.f32 %v2548_v29, %v377_v31  ;;  %v369_v35 = vadd.f32 %v368_v32, %v203_v7 }
 0x161   :  { %v2525_v36 = vpop.f32.mrf.mxu1  ;;  %v2549_v37 = vpop.f32.mrf.mxu0 }
 0x162   :  { %v3234_v38 = vadd.f32 %v558_v33, %v369_v35  ;;  %v380_v39 = vadd.f32 %v2525_v36, %v2501_v9 }
 0x163   :  { %v371_v40 = vpop.f32.mrf.mxu1  ;;  %v561_v41 = vpop.f32.mrf.mxu0 }
 0x164   :  { %v3236_v42 = vadd.f32 %v2549_v37, %v380_v39  ;;  %v372_v43 = vadd.f32 %v371_v40, %v206_v11 }
 0x165   :  { %v2528_v44 = vpop.f32.mrf.mxu1  ;;  %v2552_v45 = vpop.f32.mrf.mxu0 }
 0x166   :  { %v3238_v46 = vadd.f32 %v561_v41, %v372_v43  ;;  %v393_v47 = vadd.f32 %v2528_v44, %v2504_v62 }
 0x167   :  { %v384_v48 = vpop.f32.mrf.mxu1  ;;  %v574_v49 = vpop.f32.mrf.mxu0 }
 0x168   :  { %v3240_v50 = vadd.f32 %v2552_v45, %v393_v47  ;;  %v385_v51 = vadd.f32 %v384_v48, %v219_v0 }
 0x169   :  { %v2529_v52 = vpop.f32.mrf.mxu1  ;;  %v2553_v53 = vpop.f32.mrf.mxu0 }
 0x16a   :  { %v3242_v54 = vadd.f32 %v574_v49, %v385_v51  ;;  %v396_v55 = vadd.f32 %v2529_v52, %v2505_v2 }
 0x16b   :  { %v387_v56 = vpop.f32.mrf.mxu1  ;;  %v577_v57 = vpop.f32.mrf.mxu0 }
 0x16c   :  { %v3244_v58 = vadd.f32 %v2553_v53, %v396_v55  ;;  %v388_v59 = vadd.f32 %v387_v56, %v222_v4 }
 0x16d   :  { %v2532_v60 = vpop.f32.mrf.mxu1  ;;  %v2556_v61 = vpop.f32.mrf.mxu0 }
 0x16e   :  { %v3246_v63 = vadd.f32 %v577_v57, %v388_v59  ;;  %v409_v62 = vadd.f32 %v2532_v60, %v2508_v6 }
 0x16f   :  { %v400_v1 = vpop.f32.mrf.mxu1  ;;  %v590_v3 = vpop.f32.mrf.mxu0 }
 0x170   :  { %v3248_v5 = vadd.f32 %v2556_v61, %v409_v62  ;;  %v401_v0 = vadd.f32 %v400_v1, %v235_v8 }
 0x171   :  { %v2533_v7 = vpop.f32.mrf.mxu1  ;;  %v2557_v9 = vpop.f32.mrf.mxu0 }
 0x172   :  { %v3250_v11 = vadd.f32 %v590_v3, %v401_v0  ;;  %v412_v2 = vadd.f32 %v2533_v7, %v2509_v10 }
 0x173   :  { %v403_v13 = vpop.f32.mrf.mxu1  ;;  %v593_v14 = vpop.f32.mrf.mxu0 }
 0x174   :  { %v3252_v15 = vadd.f32 %v2557_v9, %v412_v2  ;;  %v404_v4 = vadd.f32 %v403_v13, %v3222_v12 }
 0x175   :  { %v2568_v16 = vpop.f32.mrf.mxu1  ;;  %v3255_v17 = vpop.f32.mrf.mxu0 }
 0x176   :  { %3521 = vst [vmem:[#allocation2_spill] sm:$0xff] %v3252_v15  ;;  %v3257_v6 = vadd.f32 %v593_v14, %v404_v4 }
 0x177   :  { %v748_v19 = vpop.f32.mrf.mxu1  ;;  %v3259_v20 = vpop.f32.mrf.mxu0 }
 0x178   :  { %3522 = vst [vmem:[#allocation3_spill] sm:$0xff] %v3257_v6 }
 0x179   :  { %v2569_v8 = vpop.f32.mrf.mxu1  ;;  %v3261_v21 = vpop.f32.mrf.mxu0 }
 0x17b   :  { %v751_v23 = vpop.f32.mrf.mxu1  ;;  %v3263_v24 = vpop.f32.mrf.mxu0 }
 0x17d   :  { %v3265_v10 = vpop.f32.mrf.mxu1  ;;  %v3267_v25 = vpop.f32.mrf.mxu0 }
 0x17f   :  { %v3269_v27 = vpop.f32.mrf.mxu1  ;;  %v3271_v12 = vpop.f32.mrf.mxu0 }
 0x181   :  { %v3273_v28 = vpop.f32.mrf.mxu1  ;;  %v3275_v29 = vpop.f32.mrf.mxu0 }
 0x183   :  { %v3277_v31 = vpop.f32.mrf.mxu1  ;;  %v3279_v32 = vpop.f32.mrf.mxu0 }
 0x185   :  { %v3281_v33 = vpop.f32.mrf.mxu1  ;;  %v3283_v35 = vpop.f32.mrf.mxu0 }
 0x187   :  { %v3285_v36 = vpop.f32.mrf.mxu1  ;;  %v3287_v37 = vpop.f32.mrf.mxu0 }
 0x189   :  { %v3289_v39 = vpop.f32.mrf.mxu1  ;;  %v3291_v40 = vpop.f32.mrf.mxu0 }
 0x18b   :  { %v3293_v41 = vpop.f32.mrf.mxu1  ;;  %v3295_v43 = vpop.f32.mrf.mxu0 }
 0x18c   :  { %3523 = vst [vmem:[#allocation4_spill] sm:$0xff] %v3295_v43 }
 0x18d   :  { %v3297_v44 = vpop.f32.mrf.mxu1  ;;  %v3299_v45 = vpop.f32.mrf.mxu0 }
 0x18e   :  { %3524 = vst [vmem:[#allocation5_spill] sm:$0xff] %v3299_v45  ;;  %v813_v45 = vadd.f32 %v2568_v16, %v3224_v18 }
 0x18f   :  { %v3301_v47 = vpop.f32.mrf.mxu1  ;;  %v3303_v48 = vpop.f32.mrf.mxu0 }
 0x190   :  { %3525 = vst [vmem:[#allocation6_spill] sm:$0xff] %v3303_v48 }
 0x191   :  { %v3305_v49 = vpop.f32.mrf.mxu1  ;;  %v3307_v51 = vpop.f32.mrf.mxu0 }
 0x192   :  { %3526 = vst [vmem:[#allocation7_spill] sm:$0xff] %v3305_v49  ;;  %3527 = vst [vmem:[#allocation8_spill] sm:$0xff] %v3307_v51 }
 0x193   :  { %v3309_v52 = vpop.f32.mrf.mxu1  ;;  %v3311_v53 = vpop.f32.mrf.mxu0 }
 0x194   :  { %3528 = vst [vmem:[#allocation9_spill] sm:$0xff] %v3309_v52  ;;  %3529 = vst [vmem:[#allocation10_spill] sm:$0xff] %v3311_v53  ;;  %v3337_v52 = vpop.permute.xlu1 %1880 }
 0x195   :  { %v2616_v55 = vpop.f32.mrf.mxu1  ;;  %v2640_v56 = vpop.f32.mrf.mxu0  ;;  %3535 = vst [vmem:[#allocation16_spill] sm:$0xff] %v3337_v52 }
 0x197   :  { %v1160_v57 = vpop.f32.mrf.mxu1  ;;  %v1366_v59 = vpop.f32.mrf.mxu0 }
 0x199   :  { %v2617_v60 = vpop.f32.mrf.mxu1  ;;  %v3313_v61 = vpop.f32.mrf.mxu0 }
 0x19b   :  { %v1163_v62 = vpop.f32.mrf.mxu1  ;;  %v3315_v1 = vpop.f32.mrf.mxu0 }
 0x19d   :  { %v3317_v3 = vpop.f32.mrf.mxu1  ;;  %v3319_v0 = vpop.f32.mrf.mxu0 }
 0x19f   :  { %v3321_v7 = vpop.f32.mrf.mxu1  ;;  %v3323_v9 = vpop.f32.mrf.mxu0 }
 0x1a1   :  { %v3325_v2 = vpop.f32.mrf.mxu1  ;;  %v3327_v13 = vpop.f32.mrf.mxu0 }
 0x1a2   :  { %3530 = vst [vmem:[#allocation11_spill] sm:$0xff] %v3327_v13 }
 0x1a3   :  { %v3329_v14 = vpop.f32.mrf.mxu1  ;;  %v3331_v4 = vpop.f32.mrf.mxu0 }
 0x1a4   :  { %3531 = vst [vmem:[#allocation12_spill] sm:$0xff] %v3329_v14  ;;  %3532 = vst [vmem:[#allocation13_spill] sm:$0xff] %v3331_v4  ;;  %v811_v4 = vadd.f32 %v748_v19, %v3226_v22 }
 0x1a5   :  { %v3333_v53 = vpop.f32.mrf.mxu1  ;;  %v3335_v51 = vpop.f32.mrf.mxu0 }
 0x1a6   :  { %3533 = vst [vmem:[#allocation14_spill] sm:$0xff] %v3333_v53  ;;  %3534 = vst [vmem:[#allocation15_spill] sm:$0xff] %v3335_v51  ;;  %v3353_v53 = vpop.permute.xlu0 %1875  ;;  %v1886_v51 = vpop.permute.xlu1 %1885  ;;  %v1017_v16 = vadd.f32 %v3259_v20, %v811_v4 }
 0x1a7   :  { %v3339_v6 = vpop.f32.mrf.mxu1  ;;  %v3341_v49 = vpop.f32.mrf.mxu0 }
 0x1a8   :  { %3536 = vst [vmem:[#allocation17_spill] sm:$0xff] %v3339_v6  ;;  %3537 = vst [vmem:[#allocation18_spill] sm:$0xff] %v3341_v49  ;;  %v1019_v49 = vadd.f32 %v3255_v17, %v813_v45 }
 0x1a9   :  { %v3343_v15 = vpop.f32.mrf.mxu1  ;;  %v3345_v48 = vpop.f32.mrf.mxu0 }
 0x1aa   :  { %3538 = vst [vmem:[#allocation19_spill] sm:$0xff] %v3343_v15  ;;  %3539 = vst [vmem:[#allocation20_spill] sm:$0xff] %v3345_v48  ;;  %v814_v15 = vadd.f32 %v2569_v8, %v3228_v26  ;;  %v1225_v22 = vadd.f32 %v2616_v55, %v1019_v49  ;;  %v1891_v14 = vpop.permute.xlu0 %1890  ;;  %v3372_v17 = vpop.permute.xlu1 %1895  ;;  %v817_v26 = vadd.f32 %v3265_v10, %v3232_v34 }
 0x1ab   :  { %v3348_v13 = vpop.f32.mrf.mxu1  ;;  %v3350_v43 = vpop.f32.mrf.mxu0  ;;  %v815_v8 = vadd.f32 %v3269_v27, %v3234_v38  ;;  %v821_v34 = vadd.f32 %v3281_v33, %v3240_v50  ;;  %v819_v38 = vadd.f32 %v3285_v36, %v3242_v54 }
 0x1ac   :  { %3540 = vst [vmem:[#allocation21_spill] sm:$0xff] %v3348_v13  ;;  %3541 = vst [vmem:[#allocation22_spill] sm:$0xff] %v3350_v43  ;;  %v812_v43 = vadd.f32 %v751_v23, %v3230_v30  ;;  %v818_v30 = vadd.f32 %v3273_v28, %v3236_v42 }
 0x1ad   :  { %v3355_v52 = vpop.f32.mrf.mxu1  ;;  %v3357_v6 = vpop.f32.mrf.mxu0 }
 0x1ae   :  { %3542 = vst [vmem:[#allocation23_spill] sm:$0xff] %v3355_v52  ;;  %3543 = vst [vmem:[#allocation24_spill] sm:$0xff] %v3357_v6  ;;  %v1020_v52 = vadd.f32 %v3261_v21, %v814_v15  ;;  %v1223_v6 = vadd.f32 %v1160_v57, %v1017_v16  ;;  %v1018_v45 = vadd.f32 %v3263_v24, %v812_v43  ;;  %v3398_v36 = vpop.permute.xlu0 %1900 }
 0x1af   :  { %v3361_v48 = vpop.f32.mrf.mxu1  ;;  %v3363_v18 = vpop.f32.mrf.mxu0  ;;  %v816_v15 = vadd.f32 %v3277_v31, %v3238_v46  ;;  %v1431_v21 = vadd.f32 %v2640_v56, %v1225_v22  ;;  %v1023_v57 = vadd.f32 %v3267_v25, %v817_v26  ;;  %v1021_v24 = vadd.f32 %v3271_v12, %v815_v8 }
 0x1b0   :  { %v1226_v49 = vadd.f32 %v2617_v60, %v1020_v52  ;;  %v1429_v42 = vadd.f32 %v1366_v59, %v1223_v6  ;;  %v1224_v28 = vadd.f32 %v1163_v62, %v1018_v45  ;;  %v1024_v46 = vadd.f32 %v3275_v29, %v818_v30  ;;  %v1906_v6 = vpop.permute.xlu1 %1905 }
 0x1b1   :  { %v3367_v19 = vpop.f32.mrf.mxu1  ;;  %v3369_v13 = vpop.f32.mrf.mxu0  ;;  %v822_v31 = vadd.f32 %v3289_v39, %v3244_v58  ;;  %v1022_v33 = vadd.f32 %v3279_v32, %v816_v15  ;;  %v1027_v25 = vadd.f32 %v3283_v35, %v821_v34  ;;  %v1025_v12 = vadd.f32 %v3287_v37, %v819_v38  ;;  %v3545_v34 = vld [vmem:[#allocation4_spill] sm:$0xff] }
 0x1b2   :  { %v1432_v54 = vadd.f32 %v3313_v61, %v1226_v49  ;;  %v1229_v29 = vadd.f32 %v3317_v3, %v1023_v57  ;;  %v1227_v59 = vadd.f32 %v3321_v7, %v1021_v24  ;;  %v1430_v60 = vadd.f32 %v3315_v1, %v1224_v28  ;;  %v3548_v57 = vld [vmem:[#allocation16_spill] sm:$0xff] }
 0x1b3   :  { %v3380_v20 = vpop.f32.mrf.mxu1  ;;  %v3382_v23 = vpop.f32.mrf.mxu0  ;;  %v1028_v4 = vadd.f32 %v3291_v40, %v822_v31  ;;  %v820_v16 = vadd.f32 %v3293_v41, %v3246_v63  ;;  %v825_v35 = vadd.f32 %v3297_v44, %v3248_v5  ;;  %v1230_v37 = vadd.f32 %v3325_v2, %v1024_v46  ;;  %v3544_v63 = vld [vmem:[#allocation12_spill] sm:$0xff]  ;;  %v3549_v46 = vld [vmem:[#allocation5_spill] sm:$0xff] }
 0x1b4   :  { %v1435_v40 = vadd.f32 %v3319_v0, %v1229_v29  ;;  %v1433_v30 = vadd.f32 %v3323_v9, %v1227_v59  ;;  %v1228_v41 = vadd.f32 %v3544_v63, %v1022_v33  ;;  %v1911_v44 = vpop.permute.xlu0 %1910  ;;  %v3417_v2 = vpop.permute.xlu1 %1915  ;;  %v3551_v33 = vld [vmem:[#allocation13_spill] sm:$0xff] }
 0x1b5   :  { %v2664_v10 = vpop.f32.mrf.mxu1  ;;  %v2688_v27 = vpop.f32.mrf.mxu0  ;;  %v1026_v38 = vadd.f32 %v3545_v34, %v820_v16  ;;  %v1031_v31 = vadd.f32 %v3549_v46, %v825_v35  ;;  %v3554_v16 = vld [vmem:[#allocation19_spill] sm:$0xff] }
 0x1b6   :  { %v1637_v55 = vadd.f32 %v2664_v10, %v1431_v21  ;;  %v3546_v10 = vld [vmem:[#allocation11_spill] sm:$0xff]  ;;  %v1234_v35 = vadd.f32 %v3554_v16, %v1028_v4 }
 0x1b7   :  { %v1572_v43 = vpop.f32.mrf.mxu1  ;;  %v1778_v50 = vpop.f32.mrf.mxu0  ;;  %v3557_v4 = vld [vmem:[#allocation3_spill] sm:$0xff] }
 0x1b8   :  { %v1843_v52 = vadd.f32 %v2688_v27, %v1637_v55  ;;  %v1635_v56 = vadd.f32 %v1572_v43, %v1429_v42  ;;  %v1436_v27 = vadd.f32 %v3546_v10, %v1230_v37  ;;  %v3550_v43 = vld [vmem:[#allocation6_spill] sm:$0xff] }
 0x1b9   :  { %v2665_v58 = vpop.f32.mrf.mxu1  ;;  %v2689_v39 = vpop.f32.mrf.mxu0 }
 0x1ba   :  { %v1955_v32 = vadd.f32 %v1886_v51, %v1843_v52  ;;  %v1841_v62 = vadd.f32 %v1778_v50, %v1635_v56  ;;  %v1638_v61 = vadd.f32 %v2665_v58, %v1432_v54  ;;  %v823_v51 = vadd.f32 %v3301_v47, %v3250_v11  ;;  %v3547_v11 = vld [vmem:[#allocation14_spill] sm:$0xff] }
 0x1bb   :  { %v1575_v3 = vpop.f32.mrf.mxu1  ;;  %v1781_v22 = vpop.f32.mrf.mxu0  ;;  %v1233_v47 = vadd.f32 %v3547_v11, %v1027_v25  ;;  %v1434_v54 = vadd.f32 %v3551_v33, %v1228_v41 }
 0x1bc   :  { %v1971_v7 = vmax.f32 %v1955_v32, 0.0  ;;  %v1953_v26 = vadd.f32 %v3353_v53, %v1841_v62  ;;  %v1844_v8 = vadd.f32 %v2689_v39, %v1638_v61  ;;  %v1636_v1 = vadd.f32 %v1575_v3, %v1430_v60  ;;  %v3552_v60 = vld [vmem:[#allocation15_spill] sm:$0xff]  ;;  %v3553_v62 = vld [vmem:[#allocation17_spill] sm:$0xff] }
 0x1bd   :  { %v2668_v45 = vpop.f32.mrf.mxu1  ;;  %v2692_v5 = vpop.f32.mrf.mxu0  ;;  %v1029_v50 = vadd.f32 %v3550_v43, %v823_v51  ;;  %v1439_v32 = vadd.f32 %v3552_v60, %v1233_v47  ;;  %v1231_v61 = vadd.f32 %v3553_v62, %v1025_v12  ;;  %v3556_v12 = vld [vmem:[#allocation7_spill] sm:$0xff]  ;;  %v3561_v47 = vld [vmem:[#allocation20_spill] sm:$0xff]  ;;  %v3563_v43 = vld [vmem:[#allocation22_spill] sm:$0xff] }
 0x1be   :  { %v2364_v15 = vpack.c.bf16 %v1971_v7, %v1971_v7  ;;  %v1969_v21 = vmax.f32 %v1953_v26, 0.0  ;;  %v1956_v49 = vadd.f32 %v1891_v14, %v1844_v8  ;;  %v1842_v53 = vadd.f32 %v1781_v22, %v1636_v1  ;;  %v3437_v7 = vpop.permute.xlu0 %1920  ;;  %v1926_v26 = vpop.permute.xlu1 %1925 }
 0x1bf   :  { %v1641_v0 = vadd.f32 %v2668_v45, %v1435_v40  ;;  %v1588_v42 = vpop.f32.mrf.mxu1  ;;  %v1794_v9 = vpop.f32.mrf.mxu0  ;;  %v3559_v45 = vld [vmem:[#allocation21_spill] sm:$0xff] }
 0x1c0   :  { %2052 = vst.msk [vmem:[%s3520_s3 + $0x8] sm:$0xf] %vm2049_vm1, %v2364_v15  ;;  %v2362_v28 = vpack.c.bf16 %v1969_v21, %v1969_v21  ;;  %v1972_v55 = vmax.f32 %v1956_v49, 0.0  ;;  %v1954_v24 = vadd.f32 %v3548_v57, %v1842_v53  ;;  %v1639_v14 = vadd.f32 %v1588_v42, %v1433_v30  ;;  %v3555_v30 = vld [vmem:[#allocation2_spill] sm:$0xff]  ;;  %v3562_v42 = vld [vmem:[#allocation23_spill] sm:$0xff] }
 0x1c1   :  { %v1847_v52 = vadd.f32 %v2692_v5, %v1641_v0  ;;  %v2669_v56 = vpop.f32.mrf.mxu1  ;;  %v2693_v25 = vpop.f32.mrf.mxu0  ;;  %v826_v63 = vadd.f32 %v3556_v12, %v3555_v30  ;;  %v1232_v5 = vadd.f32 %v3559_v45, %v1026_v38  ;;  %v1440_v0 = vadd.f32 %v3561_v47, %v1234_v35 }
 0x1c2   :  { %2050 = vst.msk [vmem:[%s3520_s3] sm:$0xf] %vm2049_vm1, %v2362_v28  ;;  %v2365_v29 = vpack.c.bf16 %v1972_v55, %v1972_v55  ;;  %v1970_v59 = vmax.f32 %v1954_v24, 0.0  ;;  %v1845_v58 = vadd.f32 %v1794_v9, %v1639_v14  ;;  %v1642_v39 = vadd.f32 %v2669_v56, %v1436_v27  ;;  %v3560_v27 = vld [vmem:[#allocation18_spill] sm:$0xff]  ;;  %v1931_v56 = vpop.permute.xlu0 %1930 }
 0x1c3   :  { %v1959_v37 = vadd.f32 %v1906_v6, %v1847_v52  ;;  %v1591_v3 = vpop.f32.mrf.mxu1  ;;  %v1797_v22 = vpop.f32.mrf.mxu0  ;;  %v3558_v6 = vld [vmem:[#allocation9_spill] sm:$0xff]  ;;  %v1437_v11 = vadd.f32 %v3560_v27, %v1231_v61  ;;  %v1237_v9 = vadd.f32 %v3562_v42, %v1031_v31  ;;  %v1438_v33 = vadd.f32 %v3563_v43, %v1232_v5 }
 0x1c4   :  { %2053 = vst.msk [vmem:[%s3520_s3 + $0xc] sm:$0xf] %vm2049_vm1, %v2365_v29  ;;  %v2363_v8 = vpack.c.bf16 %v1970_v59, %v1970_v59  ;;  %v1957_v1 = vadd.f32 %v3372_v17, %v1845_v58  ;;  %v1848_v51 = vadd.f32 %v2693_v25, %v1642_v39  ;;  %v1640_v40 = vadd.f32 %v1591_v3, %v1434_v54  ;;  %v1936_v25 = vpop.permute.xlu1 %1935  ;;  %v3565_v39 = vld [vmem:[#allocation10_spill] sm:$0xff] }
 0x1c5   :  { %v824_v41 = vadd.f32 %v3558_v6, %v3557_v4  ;;  %v1975_v15 = vmax.f32 %v1959_v37, 0.0  ;;  %v2672_v21 = vpop.f32.mrf.mxu1  ;;  %v2696_v49 = vpop.f32.mrf.mxu0 }
 0x1c6   :  { %2051 = vst.msk [vmem:[%s3520_s3 + $0x4] sm:$0xf] %vm2049_vm1, %v2363_v8  ;;  %v1973_v53 = vmax.f32 %v1957_v1, 0.0  ;;  %v1960_v17 = vadd.f32 %v1911_v44, %v1848_v51  ;;  %v1846_v34 = vadd.f32 %v1797_v22, %v1640_v40  ;;  %v1645_v10 = vadd.f32 %v2672_v21, %v1439_v32  ;;  %v3566_v32 = vld [vmem:[#allocation24_spill] sm:$0xff] }
 0x1c7   :  { %v2368_v28 = vpack.c.bf16 %v1975_v15, %v1975_v15  ;;  %v1604_v38 = vpop.f32.mrf.mxu1  ;;  %v1810_v55 = vpop.f32.mrf.mxu0  ;;  %v1235_v44 = vadd.f32 %v3361_v48, %v1029_v50  ;;  %v3564_v48 = vld [vmem:[#allocation8_spill] sm:$0xff]  ;;  %v1030_v60 = vadd.f32 %v3565_v39, %v824_v41  ;;  %v1443_v62 = vadd.f32 %v3566_v32, %v1237_v9 }
 0x1c8   :  { %v2366_v57 = vpack.c.bf16 %v1973_v53, %v1973_v53  ;;  %v1976_v24 = vmax.f32 %v1960_v17, 0.0  ;;  %v1958_v14 = vadd.f32 %v3398_v36, %v1846_v34  ;;  %v1851_v46 = vadd.f32 %v2696_v49, %v1645_v10  ;;  %v1941_v15 = vpop.permute.xlu0 %1940 }
 0x1c9   :  { %2056 = vst.msk [vmem:[%s3520_s3 + $0x18] sm:$0xf] %vm2049_vm1, %v2368_v28  ;;  %v1643_v54 = vadd.f32 %v1604_v38, %v1437_v11  ;;  %v2673_v52 = vpop.f32.mrf.mxu1  ;;  %v2697_v31 = vpop.f32.mrf.mxu0  ;;  %v1032_v50 = vadd.f32 %v3564_v48, %v826_v63  ;;  %v1236_v51 = vadd.f32 %v3380_v20, %v1030_v60 }
 0x1ca   :  { %2054 = vst.msk [vmem:[%s3520_s3 + $0x10] sm:$0xf] %vm2049_vm1, %v2366_v57  ;;  %v2369_v36 = vpack.c.bf16 %v1976_v24, %v1976_v24  ;;  %v1974_v29 = vmax.f32 %v1958_v14, 0.0  ;;  %v1963_v59 = vadd.f32 %v1926_v26, %v1851_v46  ;;  %v1646_v58 = vadd.f32 %v2673_v52, %v1440_v0 }
 0x1cb   :  { %v1849_v61 = vadd.f32 %v1810_v55, %v1643_v54  ;;  %v1607_v16 = vpop.f32.mrf.mxu1  ;;  %v1813_v35 = vpop.f32.mrf.mxu0  ;;  %v1441_v26 = vadd.f32 %v3363_v18, %v1235_v44  ;;  %v1238_v1 = vadd.f32 %v3367_v19, %v1032_v50  ;;  %v1442_v17 = vadd.f32 %v3382_v23, %v1236_v51 }
 0x1cc   :  { %2057 = vst.msk [vmem:[%s3520_s3 + $0x1c] sm:$0xf] %vm2049_vm1, %v2369_v36  ;;  %v2367_v37 = vpack.c.bf16 %v1974_v29, %v1974_v29  ;;  %v1979_v3 = vmax.f32 %v1963_v59, 0.0  ;;  %v1852_v22 = vadd.f32 %v2697_v31, %v1646_v58  ;;  %v1644_v8 = vadd.f32 %v1607_v16, %v1438_v33  ;;  %v1946_v19 = vpop.permute.xlu1 %1945  ;;  %v1951_v24 = vpop.permute.xlu0 %1950 }
 0x1cd   :  { %v1961_v40 = vadd.f32 %v3417_v2, %v1849_v61  ;;  %v2676_v30 = vpop.f32.mrf.mxu1  ;;  %v2700_v12 = vpop.f32.mrf.mxu0  ;;  %v1444_v53 = vadd.f32 %v3369_v13, %v1238_v1 }
 0x1ce   :  { %2055 = vst.msk [vmem:[%s3520_s3 + $0x14] sm:$0xf] %vm2049_vm1, %v2367_v37  ;;  %v2372_v63 = vpack.c.bf16 %v1979_v3, %v1979_v3  ;;  %v1964_v4 = vadd.f32 %v1931_v56, %v1852_v22  ;;  %v1850_v6 = vadd.f32 %v1813_v35, %v1644_v8  ;;  %v1649_v41 = vadd.f32 %v2676_v30, %v1443_v62 }
 0x1cf   :  { %v1977_v45 = vmax.f32 %v1961_v40, 0.0  ;;  %v1620_v5 = vpop.f32.mrf.mxu1  ;;  %v1826_v18 = vpop.f32.mrf.mxu0 }
 0x1d0   :  { %2060 = vst.msk [vmem:[%s3520_s3 + $0x28] sm:$0xf] %vm2049_vm1, %v2372_v63  ;;  %v1980_v20 = vmax.f32 %v1964_v4, 0.0  ;;  %v1962_v2 = vadd.f32 %v3437_v7, %v1850_v6  ;;  %v1855_v21 = vadd.f32 %v2700_v12, %v1649_v41  ;;  %v1647_v49 = vadd.f32 %v1620_v5, %v1441_v26 }
 0x1d1   :  { %v2370_v34 = vpack.c.bf16 %v1977_v45, %v1977_v45  ;;  %v2677_v10 = vpop.f32.mrf.mxu1  ;;  %v2701_v27 = vpop.f32.mrf.mxu0 }
 0x1d2   :  { %v2373_v11 = vpack.c.bf16 %v1980_v20, %v1980_v20  ;;  %v1978_v47 = vmax.f32 %v1962_v2, 0.0  ;;  %v1967_v0 = vadd.f32 %v1946_v19, %v1855_v21  ;;  %v1853_v42 = vadd.f32 %v1826_v18, %v1647_v49 }
 0x1d3   :  { %2058 = vst.msk [vmem:[%s3520_s3 + $0x20] sm:$0xf] %vm2049_vm1, %v2370_v34  ;;  %v1650_v9 = vadd.f32 %v2677_v10, %v1444_v53  ;;  %v1623_v7 = vpop.f32.mrf.mxu1  ;;  %v1829_v57 = vpop.f32.mrf.mxu0 }
 0x1d4   :  { %2061 = vst.msk [vmem:[%s3520_s3 + $0x2c] sm:$0xf] %vm2049_vm1, %v2373_v11  ;;  %v2371_v13 = vpack.c.bf16 %v1978_v47, %v1978_v47  ;;  %v1983_v23 = vmax.f32 %v1967_v0, 0.0  ;;  %v1965_v28 = vadd.f32 %v1936_v25, %v1853_v42  ;;  %v1648_v38 = vadd.f32 %v1623_v7, %v1442_v17 }
 0x1d5   :  { %v1856_v55 = vadd.f32 %v2701_v27, %v1650_v9 }
 0x1d6   :  { %2059 = vst.msk [vmem:[%s3520_s3 + $0x24] sm:$0xf] %vm2049_vm1, %v2371_v13  ;;  %v2376_v14 = vpack.c.bf16 %v1983_v23, %v1983_v23  ;;  %v1981_v46 = vmax.f32 %v1965_v28, 0.0  ;;  %v1854_v43 = vadd.f32 %v1829_v57, %v1648_v38 }
 0x1d7   :  { %v1968_v33 = vadd.f32 %v1951_v24, %v1856_v55 }
 0x1d8   :  { %2064 = vst.msk [vmem:[%s3520_s3 + $0x38] sm:$0xf] %vm2049_vm1, %v2376_v14  ;;  %v2374_v44 = vpack.c.bf16 %v1981_v46, %v1981_v46  ;;  %v1966_v54 = vadd.f32 %v1941_v15, %v1854_v43 }
 0x1d9   :  { %v1984_v52 = vmax.f32 %v1968_v33, 0.0 }
 0x1da   :  { %2062 = vst.msk [vmem:[%s3520_s3 + $0x30] sm:$0xf] %vm2049_vm1, %v2374_v44  ;;  %v1982_v31 = vmax.f32 %v1966_v54, 0.0 }
 0x1db   :  { %v2377_v56 = vpack.c.bf16 %v1984_v52, %v1984_v52 }
 0x1dc   :  { %v2375_v25 = vpack.c.bf16 %v1982_v31, %v1982_v31 }
 0x1dd   :  { %2065 = vst.msk [vmem:[%s3520_s3 + $0x3c] sm:$0xf] %vm2049_vm1, %v2377_v56 }
 0x1de   :  { %2063 = vst.msk [vmem:[%s3520_s3 + $0x34] sm:$0xf] %vm2049_vm1, %v2375_v25 }

// kernel: encoder_forward.16
= control target key start
LH: loop header
LB: loop body
LE: loop exit
PB: predicated region body
PF: predicated region fallthrough
CT: control target
= control target key end

     0   :  { %s1133_s16 = smov 127   ;;  %vm74_vm0 = vcmask 523264   ;;  %s1134_s25 = smov 126   ;;  %v1141_v8 = vmov 0   ;;  %vm849_vm1 = vcmask 470016   ;;  %s1274_s0 = inlined_call_operand.vmem [shape: bf16[64,72], index: 0, kind: input, shape index: {}]   ;;  %s1275_s1 = inlined_call_operand.vmem [shape: bf16[9,32,64], index: 1, kind: input, shape index: {}]   ;;  %s1276_s2 = inlined_call_operand.vmem [shape: f32[32,1], index: 2, kind: input, shape index: {}]   ;;  %s1277_s3 = inlined_call_operand.vmem [shape: bf16[32,58], index: 3, kind: output, shape index: {}]  }
   0x1   :  { %v1111_v0 = vld [vmem:[%s1274_s0 + $0x18] sm:$0xff]   ;;  %v1112_v1 = vld [vmem:[%s1274_s0 + $0x10] sm:$0xff]   ;;  %v1113_v2 = vld [vmem:[%s1274_s0 + $0x8] sm:$0xff]   ;;  %s1135_s27 = smov 122   ;;  %s1136_s28 = smov 121   ;;  %1110 = vset.pattern.permute.xlu1 %v1141_v8  ;;  %1109 = vset.pattern.permute.xlu0 %v1141_v8 }
   0x2   :  { %68 = vrot.lane.b32.xlu0 %v1111_v0, %s1133_s16  ;;  %1004 = vmatprep.subr.bf16.mxu1 %v1111_v0  ;;  %v1114_v3 = vld [vmem:[%s1274_s0] sm:$0xff]   ;;  %v1115_v4 = vld [vmem:[%s1275_s1 + $0x10] sm:$0xff]   ;;  %v1118_v6 = vld [vmem:[%s1275_s1 + $0x8] sm:$0xff]   ;;  %s1137_s4 = smov 120   ;;  %s1138_s5 = smov 116  }
   0x3   :  { %1005 = vmatpush3.bf16.msra.mxu1 %v1111_v0  ;;  %64 = vrot.lane.b32.xlu1 %v1113_v2, %s1133_s16  ;;  %v1116_v5 = vld [vmem:[%s1275_s1] sm:$0xff]   ;;  %v1121_v7 = vld [vmem:[%s1275_s1 + $0x30] sm:$0xff]   ;;  %s1139_s6 = smov 115   ;;  %s1140_s7 = smov 114   ;;  %v802_v9 = vld [vmem:[%s1276_s2 + $0x8] sm:$0xff] }
   0x4   :  { %1006 = vmatprep.subr.bf16.mxu1 %v1112_v1  ;;  %1000 = vmatprep.mubr.msk.bf16.mxu0 %vm74_vm0, %v1115_v4  ;;  %v801_v10 = vld [vmem:[%s1276_s2] sm:$0xff]  ;;  %v803_v11 = vld [vmem:[%s1276_s2 + $0x10] sm:$0xff]  ;;  %v804_v12 = vld [vmem:[%s1276_s2 + $0x18] sm:$0xff] }
   0x5   :  { %1012 = vmatprep.mubr.msk.bf16.mxu1 %vm74_vm0, %v1116_v5  ;;  %v1117_v20 = vld [vmem:[%s1275_s1 + $0x18] sm:$0xff]   ;;  %v1119_v22 = vld [vmem:[%s1275_s1 + $0x20] sm:$0xff]   ;;  %v1120_v30 = vld [vmem:[%s1275_s1 + $0x28] sm:$0xff]  }
   0x6   :  { %66 = vrot.lane.b32.xlu0 %v1112_v1, %s1133_s16  ;;  %v1122_v31 = vld [vmem:[%s1275_s1 + $0x38] sm:$0xff]   ;;  %v1123_v34 = vld [vmem:[%s1275_s1 + $0x40] sm:$0xff]   ;;  %v1125_v35 = vld [vmem:[%s1275_s1 + $0x50] sm:$0xff]  }
   0x7   :  { %1007 = vmatpush3.bf16.msra.mxu1 %v1112_v1  ;;  %62 = vrot.lane.b32.xlu1 %v1114_v3, %s1133_s16  ;;  %v1124_v42 = vld [vmem:[%s1275_s1 + $0x48] sm:$0xff]   ;;  %v1126_v43 = vld [vmem:[%s1275_s1 + $0x58] sm:$0xff]   ;;  %v1127_v46 = vld [vmem:[%s1275_s1 + $0x60] sm:$0xff]  }
   0x8   :  { %1008 = vmatprep.subr.bf16.mxu1 %v1113_v2  ;;  %v1129_v47 = vld [vmem:[%s1275_s1 + $0x70] sm:$0xff]   ;;  %v1128_v53 = vld [vmem:[%s1275_s1 + $0x68] sm:$0xff]   ;;  %v1130_v54 = vld [vmem:[%s1275_s1 + $0x78] sm:$0xff]  }
   0x9   :  { %v1131_v55 = vld [vmem:[%s1275_s1 + $0x80] sm:$0xff]   ;;  %v1132_v58 = vld [vmem:[%s1275_s1 + $0x88] sm:$0xff]  }
   0xa   :  { %220 = vrot.lane.b32.xlu0 %v1111_v0, %s1134_s25 }
   0xb   :  { %1009 = vmatpush3.bf16.msra.mxu1 %v1113_v2  ;;  %218 = vrot.lane.b32.xlu1 %v1112_v1, %s1134_s25 }
   0xc   :  { %1010 = vmatprep.subr.bf16.mxu1 %v1114_v3 }
   0xe   :  { %216 = vrot.lane.b32.xlu0 %v1113_v2, %s1134_s25 }
   0xf   :  { %1011 = vmatpush3.bf16.msra.mxu1 %v1114_v3  ;;  %214 = vrot.lane.b32.xlu1 %v1114_v3, %s1134_s25 }
  0x12   :  { %306 = vrot.lane.b32.xlu0 %v1111_v0, %s1135_s27  ;;  %1013 = vmatmul.mubr.msk.bf16.vlgmr.msra.gmra.mxu1 %vm74_vm0, %v1118_v6 }
  0x13   :  { %392 = vrot.lane.b32.xlu1 %v1111_v0, %s1136_s28  ;;  %1036 = vmatprep.mubr.msk.bf16.mxu1 %vm74_vm0, %v1121_v7 }
  0x16   :  { %304 = vrot.lane.b32.xlu0 %v1112_v1, %s1135_s27 }
  0x17   :  { %390 = vrot.lane.b32.xlu1 %v1112_v1, %s1136_s28 }
  0x1a   :  { %302 = vrot.lane.b32.xlu0 %v1113_v2, %s1135_s27 }
  0x1b   :  { %388 = vrot.lane.b32.xlu1 %v1113_v2, %s1136_s28 }
  0x1e   :  { %300 = vrot.lane.b32.xlu0 %v1114_v3, %s1135_s27 }
  0x1f   :  { %386 = vrot.lane.b32.xlu1 %v1114_v3, %s1136_s28 }
  0x22   :  { %478 = vrot.lane.b32.xlu0 %v1111_v0, %s1137_s4 }
  0x23   :  { %564 = vrot.lane.b32.xlu1 %v1111_v0, %s1138_s5 }
  0x26   :  { %476 = vrot.lane.b32.xlu0 %v1112_v1, %s1137_s4 }
  0x27   :  { %562 = vrot.lane.b32.xlu1 %v1112_v1, %s1138_s5 }
  0x2a   :  { %474 = vrot.lane.b32.xlu0 %v1113_v2, %s1137_s4 }
  0x2b   :  { %560 = vrot.lane.b32.xlu1 %v1113_v2, %s1138_s5 }
  0x2e   :  { %472 = vrot.lane.b32.xlu0 %v1114_v3, %s1137_s4 }
  0x2f   :  { %558 = vrot.lane.b32.xlu1 %v1114_v3, %s1138_s5 }
  0x32   :  { %650 = vrot.lane.b32.xlu0 %v1111_v0, %s1139_s6 }
  0x33   :  { %736 = vrot.lane.b32.xlu1 %v1111_v0, %s1140_s7 }
  0x36   :  { %648 = vrot.lane.b32.xlu0 %v1112_v1, %s1139_s6 }
  0x37   :  { %734 = vrot.lane.b32.xlu1 %v1112_v1, %s1140_s7 }
  0x3a   :  { %646 = vrot.lane.b32.xlu0 %v1113_v2, %s1139_s6 }
  0x3b   :  { %732 = vrot.lane.b32.xlu1 %v1113_v2, %s1140_s7 }
  0x3e   :  { %644 = vrot.lane.b32.xlu0 %v1114_v3, %s1139_s6 }
  0x3f   :  { %730 = vrot.lane.b32.xlu1 %v1114_v3, %s1140_s7 }
  0x42   :  { %807 = vperm.xlu0 %1109, %v801_v10  }
  0x43   :  { %812 = vperm.xlu1 %1110, %v802_v9  }
  0x46   :  { %822 = vperm.xlu0 %1109, %v804_v12  }
  0x47   :  { %817 = vperm.xlu1 %1110, %v803_v11  }
  0x74   :  { %v69_v13 = vpop.permute.xlu0 %68 }
  0x75   :  { %992 = vmatprep.subr.bf16.mxu0 %v69_v13  ;;  %v65_v14 = vpop.permute.xlu1 %64 }
  0x76   :  { %993 = vmatpush3.bf16.msra.mxu0 %v69_v13 }
  0x78   :  { %v67_v15 = vpop.permute.xlu0 %66 }
  0x79   :  { %994 = vmatprep.subr.bf16.mxu0 %v67_v15  ;;  %v63_v16 = vpop.permute.xlu1 %62 }
  0x7a   :  { %995 = vmatpush3.bf16.msra.mxu0 %v67_v15 }
  0x7b   :  { %996 = vmatprep.subr.bf16.mxu0 %v65_v14 }
  0x7c   :  { %v221_v17 = vpop.permute.xlu0 %220 }
  0x7d   :  { %v219_v18 = vpop.permute.xlu1 %218 }
  0x7e   :  { %997 = vmatpush3.bf16.msra.mxu0 %v65_v14 }
  0x7f   :  { %998 = vmatprep.subr.bf16.mxu0 %v63_v16 }
  0x80   :  { %v217_v19 = vpop.permute.xlu0 %216 }
  0x81   :  { %v215_v21 = vpop.permute.xlu1 %214 }
  0x82   :  { %999 = vmatpush3.bf16.msra.mxu0 %v63_v16 }
  0x83   :  { %1016 = vmatprep.subr.bf16.mxu0 %v221_v17 }
  0x84   :  { %v307_v23 = vpop.permute.xlu0 %306 }
  0x85   :  { %1001 = vmatmul.mubr.msk.bf16.vlgmr.msra.gmra.mxu0 %vm74_vm0, %v1117_v20  ;;  %1028 = vmatprep.subr.bf16.mxu1 %v307_v23  ;;  %v393_v24 = vpop.permute.xlu1 %392 }
  0x86   :  { %1017 = vmatpush3.bf16.msra.mxu0 %v221_v17  ;;  %1029 = vmatpush3.bf16.msra.mxu1 %v307_v23 }
  0x87   :  { %1018 = vmatprep.subr.bf16.mxu0 %v219_v18  ;;  %1024 = vmatprep.mubr.msk.bf16.mxu0 %vm74_vm0, %v1119_v22 }
  0x88   :  { %v305_v25 = vpop.permute.xlu0 %304 }
  0x89   :  { %1030 = vmatprep.subr.bf16.mxu1 %v305_v25  ;;  %v391_v26 = vpop.permute.xlu1 %390 }
  0x8a   :  { %1019 = vmatpush3.bf16.msra.mxu0 %v219_v18  ;;  %1031 = vmatpush3.bf16.msra.mxu1 %v305_v25 }
  0x8b   :  { %1020 = vmatprep.subr.bf16.mxu0 %v217_v19 }
  0x8c   :  { %v303_v27 = vpop.permute.xlu0 %302 }
  0x8d   :  { %1032 = vmatprep.subr.bf16.mxu1 %v303_v27  ;;  %v389_v28 = vpop.permute.xlu1 %388 }
  0x8e   :  { %1021 = vmatpush3.bf16.msra.mxu0 %v217_v19  ;;  %1033 = vmatpush3.bf16.msra.mxu1 %v303_v27 }
  0x8f   :  { %1022 = vmatprep.subr.bf16.mxu0 %v215_v21 }
  0x90   :  { %v301_v29 = vpop.permute.xlu0 %300 }
  0x91   :  { %1034 = vmatprep.subr.bf16.mxu1 %v301_v29  ;;  %v387_v32 = vpop.permute.xlu1 %386 }
  0x92   :  { %1023 = vmatpush3.bf16.msra.mxu0 %v215_v21  ;;  %1035 = vmatpush3.bf16.msra.mxu1 %v301_v29 }
  0x93   :  { %1040 = vmatprep.subr.bf16.mxu0 %v393_v24 }
  0x94   :  { %v479_v33 = vpop.permute.xlu0 %478 }
  0x95   :  { %1025 = vmatmul.mubr.msk.bf16.vlgmr.msra.gmra.mxu0 %vm74_vm0, %v1120_v30  ;;  %1037 = vmatmul.mubr.msk.bf16.vlgmr.msra.gmra.mxu1 %vm74_vm0, %v1122_v31  ;;  %v565_v36 = vpop.permute.xlu1 %564 }
  0x96   :  { %1041 = vmatpush3.bf16.msra.mxu0 %v393_v24  ;;  %1052 = vmatprep.subr.bf16.mxu1 %v479_v33 }
  0x97   :  { %1053 = vmatpush3.bf16.msra.mxu1 %v479_v33  ;;  %1042 = vmatprep.subr.bf16.mxu0 %v391_v26 }
  0x98   :  { %v477_v37 = vpop.permute.xlu0 %476  ;;  %1048 = vmatprep.mubr.msk.bf16.mxu0 %vm74_vm0, %v1123_v34  ;;  %1060 = vmatprep.mubr.msk.bf16.mxu1 %vm74_vm0, %v1125_v35 }
  0x99   :  { %1054 = vmatprep.subr.bf16.mxu1 %v477_v37  ;;  %v563_v38 = vpop.permute.xlu1 %562 }
  0x9a   :  { %1043 = vmatpush3.bf16.msra.mxu0 %v391_v26 }
  0x9b   :  { %1055 = vmatpush3.bf16.msra.mxu1 %v477_v37  ;;  %1044 = vmatprep.subr.bf16.mxu0 %v389_v28 }
  0x9c   :  { %v475_v39 = vpop.permute.xlu0 %474 }
  0x9d   :  { %1056 = vmatprep.subr.bf16.mxu1 %v475_v39  ;;  %v561_v40 = vpop.permute.xlu1 %560 }
  0x9e   :  { %1045 = vmatpush3.bf16.msra.mxu0 %v389_v28 }
  0x9f   :  { %1057 = vmatpush3.bf16.msra.mxu1 %v475_v39  ;;  %1046 = vmatprep.subr.bf16.mxu0 %v387_v32 }
  0xa0   :  { %v473_v41 = vpop.permute.xlu0 %472 }
  0xa1   :  { %1058 = vmatprep.subr.bf16.mxu1 %v473_v41  ;;  %v559_v45 = vpop.permute.xlu1 %558 }
  0xa2   :  { %1047 = vmatpush3.bf16.msra.mxu0 %v387_v32 }
  0xa3   :  { %1059 = vmatpush3.bf16.msra.mxu1 %v473_v41  ;;  %1064 = vmatprep.subr.bf16.mxu0 %v565_v36 }
  0xa4   :  { %v651_v44 = vpop.permute.xlu0 %650 }
  0xa5   :  { %1049 = vmatmul.mubr.msk.bf16.vlgmr.msra.gmra.mxu0 %vm74_vm0, %v1124_v42  ;;  %1076 = vmatprep.subr.bf16.mxu1 %v651_v44  ;;  %v737_v49 = vpop.permute.xlu1 %736 }
  0xa6   :  { %1065 = vmatpush3.bf16.msra.mxu0 %v565_v36  ;;  %1061 = vmatmul.mubr.msk.bf16.vlgmr.msra.gmra.mxu1 %vm74_vm0, %v1126_v43 }
  0xa7   :  { %1077 = vmatpush3.bf16.msra.mxu1 %v651_v44  ;;  %1066 = vmatprep.subr.bf16.mxu0 %v563_v38 }
  0xa8   :  { %v649_v48 = vpop.permute.xlu0 %648  ;;  %1072 = vmatprep.mubr.msk.bf16.mxu0 %vm74_vm0, %v1127_v46  ;;  %1084 = vmatprep.mubr.msk.bf16.mxu1 %vm74_vm0, %v1129_v47 }
  0xa9   :  { %1078 = vmatprep.subr.bf16.mxu1 %v649_v48  ;;  %v735_v52 = vpop.permute.xlu1 %734 }
  0xaa   :  { %1067 = vmatpush3.bf16.msra.mxu0 %v563_v38 }
  0xab   :  { %1079 = vmatpush3.bf16.msra.mxu1 %v649_v48  ;;  %1068 = vmatprep.subr.bf16.mxu0 %v561_v40 }
  0xac   :  { %v647_v50 = vpop.permute.xlu0 %646 }
  0xad   :  { %1080 = vmatprep.subr.bf16.mxu1 %v647_v50  ;;  %v733_v56 = vpop.permute.xlu1 %732 }
  0xae   :  { %1069 = vmatpush3.bf16.msra.mxu0 %v561_v40 }
  0xaf   :  { %1081 = vmatpush3.bf16.msra.mxu1 %v647_v50  ;;  %1070 = vmatprep.subr.bf16.mxu0 %v559_v45 }
  0xb0   :  { %v645_v51 = vpop.permute.xlu0 %644 }
  0xb1   :  { %1082 = vmatprep.subr.bf16.mxu1 %v645_v51  ;;  %v731_v57 = vpop.permute.xlu1 %730 }
  0xb2   :  { %1071 = vmatpush3.bf16.msra.mxu0 %v559_v45 }
  0xb3   :  { %1083 = vmatpush3.bf16.msra.mxu1 %v645_v51  ;;  %1088 = vmatprep.subr.bf16.mxu0 %v737_v49 }
  0xb5   :  { %1073 = vmatmul.mubr.msk.bf16.vlgmr.msra.gmra.mxu0 %vm74_vm0, %v1128_v53 }
  0xb6   :  { %1089 = vmatpush3.bf16.msra.mxu0 %v737_v49  ;;  %1085 = vmatmul.mubr.msk.bf16.vlgmr.msra.gmra.mxu1 %vm74_vm0, %v1130_v54 }
  0xb7   :  { %1090 = vmatprep.subr.bf16.mxu0 %v735_v52  ;;  %1096 = vmatprep.mubr.msk.bf16.mxu0 %vm74_vm0, %v1131_v55 }
  0xba   :  { %1091 = vmatpush3.bf16.msra.mxu0 %v735_v52 }
  0xbb   :  { %1092 = vmatprep.subr.bf16.mxu0 %v733_v56 }
  0xbd   :  { %v808_v51 = vpop.permute.xlu0 %807 }
  0xbe   :  { %1093 = vmatpush3.bf16.msra.mxu0 %v733_v56  ;;  %v813_v38 = vpop.permute.xlu1 %812 }
  0xbf   :  { %1094 = vmatprep.subr.bf16.mxu0 %v731_v57 }
  0xc2   :  { %1095 = vmatpush3.bf16.msra.mxu0 %v731_v57  ;;  %v818_v53 = vpop.permute.xlu1 %817 }
  0xc5   :  { %1097 = vmatmul.mubr.msk.bf16.vlgmr.msra.gmra.mxu0 %vm74_vm0, %v1132_v58 }
  0xd2   :  { %v1014_v60 = vpop.f32.mrf.mxu1 }
  0xd4   :  { %v184_v62 = vpop.f32.mrf.mxu1 }
  0xd6   :  { %v1015_v0 = vpop.f32.mrf.mxu1 }
  0xd8   :  { %v187_v3 = vpop.f32.mrf.mxu1 }
 0x145   :  { %v1002_v59 = vpop.f32.mrf.mxu0 }
 0x146   :  { %v193_v16 = vadd.f32 %v1014_v60, %v1002_v59 }
 0x147   :  { %v115_v61 = vpop.f32.mrf.mxu0 }
 0x148   :  { %v185_v17 = vadd.f32 %v184_v62, %v115_v61 }
 0x149   :  { %v1003_v63 = vpop.f32.mrf.mxu0 }
 0x14a   :  { %v196_v21 = vadd.f32 %v1015_v0, %v1003_v63 }
 0x14b   :  { %v118_v1 = vpop.f32.mrf.mxu0 }
 0x14c   :  { %v188_v24 = vadd.f32 %v187_v3, %v118_v1  ;;  %v823_v3 = vpop.permute.xlu0 %822 }
 0x155   :  { %v1026_v2 = vpop.f32.mrf.mxu0  ;;  %v1038_v5 = vpop.f32.mrf.mxu1 }
 0x156   :  { %v283_v18 = vadd.f32 %v1026_v2, %v193_v16 }
 0x157   :  { %v266_v4 = vpop.f32.mrf.mxu0  ;;  %v352_v7 = vpop.f32.mrf.mxu1 }
 0x158   :  { %v281_v22 = vadd.f32 %v266_v4, %v185_v17  ;;  %v369_v25 = vadd.f32 %v1038_v5, %v283_v18 }
 0x159   :  { %v1027_v6 = vpop.f32.mrf.mxu0  ;;  %v1039_v9 = vpop.f32.mrf.mxu1 }
 0x15a   :  { %v284_v26 = vadd.f32 %v1027_v6, %v196_v21  ;;  %v367_v28 = vadd.f32 %v352_v7, %v281_v22 }
 0x15b   :  { %v269_v8 = vpop.f32.mrf.mxu0  ;;  %v355_v11 = vpop.f32.mrf.mxu1 }
 0x15c   :  { %v282_v29 = vadd.f32 %v269_v8, %v188_v24  ;;  %v370_v33 = vadd.f32 %v1039_v9, %v284_v26 }
 0x15e   :  { %v368_v35 = vadd.f32 %v355_v11, %v282_v29 }
 0x165   :  { %v1050_v10 = vpop.f32.mrf.mxu0 }
 0x166   :  { %v1062_v13 = vpop.f32.mrf.mxu1  ;;  %v455_v30 = vadd.f32 %v1050_v10, %v369_v25 }
 0x167   :  { %v438_v12 = vpop.f32.mrf.mxu0 }
 0x168   :  { %v524_v15 = vpop.f32.mrf.mxu1  ;;  %v453_v34 = vadd.f32 %v438_v12, %v367_v28  ;;  %v541_v36 = vadd.f32 %v1062_v13, %v455_v30 }
 0x169   :  { %v1051_v14 = vpop.f32.mrf.mxu0 }
 0x16a   :  { %v1063_v20 = vpop.f32.mrf.mxu1  ;;  %v456_v37 = vadd.f32 %v1051_v14, %v370_v33  ;;  %v539_v41 = vadd.f32 %v524_v15, %v453_v34 }
 0x16b   :  { %v441_v19 = vpop.f32.mrf.mxu0 }
 0x16c   :  { %v527_v27 = vpop.f32.mrf.mxu1  ;;  %v454_v42 = vadd.f32 %v441_v19, %v368_v35  ;;  %v542_v44 = vadd.f32 %v1063_v20, %v456_v37 }
 0x16e   :  { %v540_v48 = vadd.f32 %v527_v27, %v454_v42 }
 0x175   :  { %v1074_v23 = vpop.f32.mrf.mxu0 }
 0x176   :  { %v1086_v32 = vpop.f32.mrf.mxu1  ;;  %v627_v43 = vadd.f32 %v1074_v23, %v541_v36 }
 0x177   :  { %v610_v31 = vpop.f32.mrf.mxu0 }
 0x178   :  { %v696_v40 = vpop.f32.mrf.mxu1  ;;  %v625_v45 = vadd.f32 %v610_v31, %v539_v41  ;;  %v713_v49 = vadd.f32 %v1086_v32, %v627_v43 }
 0x179   :  { %v1075_v39 = vpop.f32.mrf.mxu0 }
 0x17a   :  { %v1087_v47 = vpop.f32.mrf.mxu1  ;;  %v628_v50 = vadd.f32 %v1075_v39, %v542_v44  ;;  %v711_v54 = vadd.f32 %v696_v40, %v625_v45 }
 0x17b   :  { %v613_v46 = vpop.f32.mrf.mxu0 }
 0x17c   :  { %v626_v55 = vadd.f32 %v613_v46, %v540_v48  ;;  %v699_v57 = vpop.f32.mrf.mxu1  ;;  %v714_v59 = vadd.f32 %v1087_v47, %v628_v50 }
 0x17e   :  { %v712_v63 = vadd.f32 %v699_v57, %v626_v55 }
 0x185   :  { %v1098_v52 = vpop.f32.mrf.mxu0 }
 0x186   :  { %v799_v56 = vadd.f32 %v1098_v52, %v713_v49 }
 0x187   :  { %v782_v58 = vpop.f32.mrf.mxu0 }
 0x188   :  { %v797_v60 = vadd.f32 %v782_v58, %v711_v54  ;;  %v827_v61 = vadd.f32 %v818_v53, %v799_v56 }
 0x189   :  { %v1099_v62 = vpop.f32.mrf.mxu0 }
 0x18a   :  { %v825_v0 = vadd.f32 %v808_v51, %v797_v60  ;;  %v831_v1 = vmax.f32 %v827_v61, 0.0  ;;  %v800_v2 = vadd.f32 %v1099_v62, %v714_v59 }
 0x18b   :  { %v785_v4 = vpop.f32.mrf.mxu0 }
 0x18c   :  { %v829_v5 = vmax.f32 %v825_v0, 0.0  ;;  %v936_v6 = vpack.c.bf16 %v831_v1, %v831_v1  ;;  %v828_v7 = vadd.f32 %v823_v3, %v800_v2  ;;  %v798_v8 = vadd.f32 %v785_v4, %v712_v63 }
 0x18e   :  { %v934_v9 = vpack.c.bf16 %v829_v5, %v829_v5  ;;  %852 = vst.msk [vmem:[%s1277_s3 + $0x8] sm:$0xf] %vm849_vm1, %v936_v6  ;;  %v832_v10 = vmax.f32 %v828_v7, 0.0  ;;  %v826_v11 = vadd.f32 %v813_v38, %v798_v8 }
 0x190   :  { %850 = vst.msk [vmem:[%s1277_s3] sm:$0xf] %vm849_vm1, %v934_v9  ;;  %v937_v12 = vpack.c.bf16 %v832_v10, %v832_v10  ;;  %v830_v13 = vmax.f32 %v826_v11, 0.0 }
 0x192   :  { %853 = vst.msk [vmem:[%s1277_s3 + $0xc] sm:$0xf] %vm849_vm1, %v937_v12  ;;  %v935_v14 = vpack.c.bf16 %v830_v13, %v830_v13 }
 0x194   :  { %851 = vst.msk [vmem:[%s1277_s3 + $0x4] sm:$0xf] %vm849_vm1, %v935_v14 }

// kernel: encoder_forward.17
= control target key start
LH: loop header
LB: loop body
LE: loop exit
PB: predicated region body
PF: predicated region fallthrough
CT: control target
= control target key end

     0   :  { %s1567_s16 = smov 127   ;;  %s1568_s17 = smov 126   ;;  %vm72_vm0 = vcmask 261120   ;;  %v1575_v4 = vmov 0   ;;  %vm1185_vm1 = vcmask 470016   ;;  %s1841_s0 = inlined_call_operand.vmem [shape: bf16[32,72], index: 0, kind: input, shape index: {}]   ;;  %s1842_s1 = inlined_call_operand.vmem [shape: bf16[9,64,32], index: 1, kind: input, shape index: {}]   ;;  %s1843_s2 = inlined_call_operand.vmem [shape: f32[64,1], index: 2, kind: input, shape index: {}]   ;;  %s1844_s3 = inlined_call_operand.vmem [shape: bf16[64,58], index: 3, kind: output, shape index: {}]  }
   0x1   :  { %v1599_v0 = vld [vmem:[%s1841_s0 + $0x8] sm:$0xff]   ;;  %v1604_v1 = vld [vmem:[%s1841_s0] sm:$0xff]   ;;  %v1532_v3 = vld [vmem:[%s1842_s1 + $0x30] sm:$0xff]   ;;  %s1569_s0 = smov 122   ;;  %s1570_s22 = smov 121   ;;  %1528 = vset.pattern.permute.xlu1 %v1575_v4  ;;  %1527 = vset.pattern.permute.xlu0 %v1575_v4 }
   0x2   :  { %68 = vrot.lane.b32.xlu0 %v1599_v0, %s1567_s16  ;;  %280 = vrot.lane.b32.xlu1 %v1599_v0, %s1568_s17  ;;  %v1531_v2 = vld [vmem:[%s1842_s1 + $0x20] sm:$0xff]   ;;  %s1571_s23 = smov 120   ;;  %s1572_s24 = smov 116   ;;  %v1090_v5 = vld [vmem:[%s1843_s2 + $0x8] sm:$0xff] }
   0x3   :  { %1410 = vmatprep.mubr.msk.bf16.mxu0 %vm72_vm0, %v1531_v2  ;;  %1414 = vmatprep.mubr.msk.bf16.mxu1 %vm72_vm0, %v1532_v3  ;;  %s1573_s25 = smov 115   ;;  %s1574_s26 = smov 114   ;;  %v1089_v6 = vld [vmem:[%s1843_s2] sm:$0xff]  ;;  %v1091_v7 = vld [vmem:[%s1843_s2 + $0x10] sm:$0xff]  ;;  %v1092_v8 = vld [vmem:[%s1843_s2 + $0x18] sm:$0xff] }
   0x4   :  { %v1093_v9 = vld [vmem:[%s1843_s2 + $0x20] sm:$0xff]  ;;  %v1094_v10 = vld [vmem:[%s1843_s2 + $0x28] sm:$0xff]  ;;  %v1095_v11 = vld [vmem:[%s1843_s2 + $0x30] sm:$0xff] }
   0x5   :  { %v1096_v12 = vld [vmem:[%s1843_s2 + $0x38] sm:$0xff]  ;;  %v1533_v16 = vld [vmem:[%s1842_s1 + $0x28] sm:$0xff]   ;;  %v1535_v19 = vld [vmem:[%s1842_s1] sm:$0xff]  }
   0x6   :  { %66 = vrot.lane.b32.xlu0 %v1604_v1, %s1567_s16  ;;  %278 = vrot.lane.b32.xlu1 %v1604_v1, %s1568_s17  ;;  %v1534_v17 = vld [vmem:[%s1842_s1 + $0x38] sm:$0xff]   ;;  %v1536_v20 = vld [vmem:[%s1842_s1 + $0x40] sm:$0xff]  }
   0x7   :  { %v1537_v23 = vld [vmem:[%s1842_s1 + $0x8] sm:$0xff]   ;;  %v1539_v25 = vld [vmem:[%s1842_s1 + $0x10] sm:$0xff]   ;;  %v1541_v31 = vld [vmem:[%s1842_s1 + $0x18] sm:$0xff]  }
   0x8   :  { %v1538_v24 = vld [vmem:[%s1842_s1 + $0x48] sm:$0xff]   ;;  %v1540_v26 = vld [vmem:[%s1842_s1 + $0x50] sm:$0xff]   ;;  %v1542_v32 = vld [vmem:[%s1842_s1 + $0x58] sm:$0xff]  }
   0x9   :  { %v1543_v33 = vld [vmem:[%s1842_s1 + $0x60] sm:$0xff]   ;;  %v1545_v35 = vld [vmem:[%s1842_s1 + $0x68] sm:$0xff]   ;;  %v1547_v37 = vld [vmem:[%s1842_s1 + $0x70] sm:$0xff]  }
   0xa   :  { %400 = vrot.lane.b32.xlu0 %v1599_v0, %s1569_s0  ;;  %520 = vrot.lane.b32.xlu1 %v1599_v0, %s1570_s22  ;;  %v1544_v34 = vld [vmem:[%s1842_s1 + $0x80] sm:$0xff]   ;;  %v1546_v36 = vld [vmem:[%s1842_s1 + $0x88] sm:$0xff]  }
   0xb   :  { %v1548_v38 = vld [vmem:[%s1842_s1 + $0x90] sm:$0xff]   ;;  %v1549_v43 = vld [vmem:[%s1842_s1 + $0x78] sm:$0xff]   ;;  %v1551_v45 = vld [vmem:[%s1842_s1 + $0xa0] sm:$0xff]  }
   0xc   :  { %v1550_v44 = vld [vmem:[%s1842_s1 + $0x98] sm:$0xff]   ;;  %v1552_v46 = vld [vmem:[%s1842_s1 + $0xc0] sm:$0xff]   ;;  %v1553_v47 = vld [vmem:[%s1842_s1 + $0xa8] sm:$0xff]  }
   0xd   :  { %v1554_v48 = vld [vmem:[%s1842_s1 + $0xc8] sm:$0xff]   ;;  %v1555_v49 = vld [vmem:[%s1842_s1 + $0xb0] sm:$0xff]   ;;  %v1557_v53 = vld [vmem:[%s1842_s1 + $0xb8] sm:$0xff]  }
   0xe   :  { %398 = vrot.lane.b32.xlu0 %v1604_v1, %s1569_s0  ;;  %518 = vrot.lane.b32.xlu1 %v1604_v1, %s1570_s22  ;;  %v1556_v50 = vld [vmem:[%s1842_s1 + $0xd0] sm:$0xff]   ;;  %v1558_v54 = vld [vmem:[%s1842_s1 + $0xd8] sm:$0xff]  }
   0xf   :  { %v1559_v55 = vld [vmem:[%s1842_s1 + $0xe0] sm:$0xff]   ;;  %v1561_v57 = vld [vmem:[%s1842_s1 + $0xe8] sm:$0xff]   ;;  %v1563_v59 = vld [vmem:[%s1842_s1 + $0xf0] sm:$0xff]  }
  0x10   :  { %v1560_v56 = vld [vmem:[%s1842_s1 + $0x100] sm:$0xff]   ;;  %v1562_v58 = vld [vmem:[%s1842_s1 + $0x108] sm:$0xff]   ;;  %v1564_v60 = vld [vmem:[%s1842_s1 + $0x110] sm:$0xff]  }
  0x11   :  { %v1565_v61 = vld [vmem:[%s1842_s1 + $0xf8] sm:$0xff]  }
  0x12   :  { %640 = vrot.lane.b32.xlu0 %v1599_v0, %s1571_s23  ;;  %760 = vrot.lane.b32.xlu1 %v1599_v0, %s1572_s24  ;;  %v1566_v62 = vld [vmem:[%s1842_s1 + $0x118] sm:$0xff]  }
  0x16   :  { %638 = vrot.lane.b32.xlu0 %v1604_v1, %s1571_s23  ;;  %758 = vrot.lane.b32.xlu1 %v1604_v1, %s1572_s24 }
  0x1a   :  { %880 = vrot.lane.b32.xlu0 %v1599_v0, %s1573_s25  ;;  %1000 = vrot.lane.b32.xlu1 %v1599_v0, %s1574_s26 }
  0x1e   :  { %878 = vrot.lane.b32.xlu0 %v1604_v1, %s1573_s25  ;;  %998 = vrot.lane.b32.xlu1 %v1604_v1, %s1574_s26 }
  0x22   :  { %1104 = vperm.xlu1 %1528, %v1090_v5   ;;  %1099 = vperm.xlu0 %1527, %v1089_v6  }
  0x26   :  { %1109 = vperm.xlu1 %1528, %v1091_v7   ;;  %1114 = vperm.xlu0 %1527, %v1092_v8  }
  0x2a   :  { %1119 = vperm.xlu1 %1528, %v1093_v9   ;;  %1124 = vperm.xlu0 %1527, %v1094_v10  }
  0x2e   :  { %1129 = vperm.xlu1 %1528, %v1095_v11   ;;  %1134 = vperm.xlu0 %1527, %v1096_v12  }
  0x74   :  { %v69_v13 = vpop.permute.xlu0 %68  ;;  %v281_v14 = vpop.permute.xlu1 %280 }
  0x75   :  { %1406 = vmatprep.subr.bf16.mxu0 %v69_v13  ;;  %1514 = vmatprep.subr.bf16.mxu1 %v69_v13 }
  0x76   :  { %1407 = vmatpush3.bf16.msra.mxu0 %v69_v13  ;;  %1516 = vmatpush3.bf16.msra.mxu1 %v69_v13 }
  0x78   :  { %v67_v15 = vpop.permute.xlu0 %66  ;;  %v279_v18 = vpop.permute.xlu1 %278 }
  0x79   :  { %1408 = vmatprep.subr.bf16.mxu0 %v67_v15  ;;  %1515 = vmatprep.subr.bf16.mxu1 %v67_v15 }
  0x7a   :  { %1409 = vmatpush3.bf16.msra.mxu0 %v67_v15  ;;  %1517 = vmatpush3.bf16.msra.mxu1 %v67_v15 }
  0x7b   :  { %1418 = vmatprep.subr.bf16.mxu1 %v1599_v0  ;;  %1430 = vmatprep.subr.bf16.mxu0 %v281_v14 }
  0x7c   :  { %v401_v21 = vpop.permute.xlu0 %400  ;;  %v521_v22 = vpop.permute.xlu1 %520 }
  0x7d   :  { %1411 = vmatmul.mubr.msk.bf16.vlgmr.msra.gmra.mxu0 %vm72_vm0, %v1533_v16  ;;  %1415 = vmatmul.mubr.msk.bf16.vlgmr.msra.gmra.mxu1 %vm72_vm0, %v1534_v17 }
  0x7e   :  { %1419 = vmatpush3.bf16.msra.mxu1 %v1599_v0  ;;  %1431 = vmatpush3.bf16.msra.mxu0 %v281_v14 }
  0x7f   :  { %1420 = vmatprep.subr.bf16.mxu1 %v1604_v1  ;;  %1432 = vmatprep.subr.bf16.mxu0 %v279_v18 }
  0x80   :  { %1422 = vmatprep.mubr.msk.bf16.mxu1 %vm72_vm0, %v1535_v19  ;;  %1434 = vmatprep.mubr.msk.bf16.mxu0 %vm72_vm0, %v1536_v20  ;;  %v399_v27 = vpop.permute.xlu0 %398  ;;  %v519_v28 = vpop.permute.xlu1 %518 }
  0x82   :  { %1421 = vmatpush3.bf16.msra.mxu1 %v1604_v1  ;;  %1433 = vmatpush3.bf16.msra.mxu0 %v279_v18 }
  0x83   :  { %1442 = vmatprep.subr.bf16.mxu1 %v401_v21  ;;  %1454 = vmatprep.subr.bf16.mxu0 %v521_v22 }
  0x84   :  { %v641_v29 = vpop.permute.xlu0 %640  ;;  %v761_v30 = vpop.permute.xlu1 %760 }
  0x85   :  { %1423 = vmatmul.mubr.msk.bf16.vlgmr.msra.gmra.mxu1 %vm72_vm0, %v1537_v23  ;;  %1435 = vmatmul.mubr.msk.bf16.vlgmr.msra.gmra.mxu0 %vm72_vm0, %v1538_v24 }
  0x86   :  { %1443 = vmatpush3.bf16.msra.mxu1 %v401_v21  ;;  %1455 = vmatpush3.bf16.msra.mxu0 %v521_v22 }
  0x87   :  { %1426 = vmatprep.mubr.msk.bf16.mxu1 %vm72_vm0, %v1539_v25  ;;  %1438 = vmatprep.mubr.msk.bf16.mxu0 %vm72_vm0, %v1540_v26 }
  0x88   :  { %1444 = vmatprep.subr.bf16.mxu1 %v399_v27  ;;  %1456 = vmatprep.subr.bf16.mxu0 %v519_v28  ;;  %v639_v39 = vpop.permute.xlu0 %638  ;;  %v759_v40 = vpop.permute.xlu1 %758 }
  0x8a   :  { %1445 = vmatpush3.bf16.msra.mxu1 %v399_v27  ;;  %1457 = vmatpush3.bf16.msra.mxu0 %v519_v28 }
  0x8b   :  { %1466 = vmatprep.subr.bf16.mxu1 %v641_v29  ;;  %1478 = vmatprep.subr.bf16.mxu0 %v761_v30 }
  0x8c   :  { %v881_v41 = vpop.permute.xlu0 %880  ;;  %v1001_v42 = vpop.permute.xlu1 %1000 }
  0x8d   :  { %1427 = vmatmul.mubr.msk.bf16.gmra.mxu1 %vm72_vm0, %v1541_v31  ;;  %1439 = vmatmul.mubr.msk.bf16.gmra.mxu0 %vm72_vm0, %v1542_v32 }
  0x8e   :  { %1446 = vmatprep.mubr.msk.bf16.mxu1 %vm72_vm0, %v1543_v33  ;;  %1458 = vmatprep.mubr.msk.bf16.mxu0 %vm72_vm0, %v1544_v34 }
  0x90   :  { %v879_v51 = vpop.permute.xlu0 %878  ;;  %v999_v52 = vpop.permute.xlu1 %998 }
  0x95   :  { %1447 = vmatmul.mubr.msk.bf16.vlgmr.msra.gmra.mxu1 %vm72_vm0, %v1545_v35  ;;  %1459 = vmatmul.mubr.msk.bf16.vlgmr.msra.gmra.mxu0 %vm72_vm0, %v1546_v36 }
  0x96   :  { %1467 = vmatpush3.bf16.msra.mxu1 %v641_v29  ;;  %1479 = vmatpush3.bf16.msra.mxu0 %v761_v30 }
  0x97   :  { %1450 = vmatprep.mubr.msk.bf16.mxu1 %vm72_vm0, %v1547_v37  ;;  %1462 = vmatprep.mubr.msk.bf16.mxu0 %vm72_vm0, %v1548_v38 }
  0x98   :  { %1468 = vmatprep.subr.bf16.mxu1 %v639_v39  ;;  %1480 = vmatprep.subr.bf16.mxu0 %v759_v40 }
  0x9a   :  { %1469 = vmatpush3.bf16.msra.mxu1 %v639_v39  ;;  %1481 = vmatpush3.bf16.msra.mxu0 %v759_v40 }
  0x9b   :  { %1490 = vmatprep.subr.bf16.mxu1 %v881_v41  ;;  %1502 = vmatprep.subr.bf16.mxu0 %v1001_v42 }
  0x9d   :  { %1451 = vmatmul.mubr.msk.bf16.gmra.mxu1 %vm72_vm0, %v1549_v43  ;;  %1463 = vmatmul.mubr.msk.bf16.gmra.mxu0 %vm72_vm0, %v1550_v44 }
  0x9e   :  { %1470 = vmatprep.mubr.msk.bf16.mxu1 %vm72_vm0, %v1551_v45  ;;  %1482 = vmatprep.mubr.msk.bf16.mxu0 %vm72_vm0, %v1552_v46 }
  0xa5   :  { %1471 = vmatmul.mubr.msk.bf16.vlgmr.msra.gmra.mxu1 %vm72_vm0, %v1553_v47  ;;  %1483 = vmatmul.mubr.msk.bf16.vlgmr.msra.gmra.mxu0 %vm72_vm0, %v1554_v48 }
  0xa6   :  { %1491 = vmatpush3.bf16.msra.mxu1 %v881_v41  ;;  %1503 = vmatpush3.bf16.msra.mxu0 %v1001_v42 }
  0xa7   :  { %1474 = vmatprep.mubr.msk.bf16.mxu1 %vm72_vm0, %v1555_v49  ;;  %1486 = vmatprep.mubr.msk.bf16.mxu0 %vm72_vm0, %v1556_v50 }
  0xa8   :  { %1492 = vmatprep.subr.bf16.mxu1 %v879_v51  ;;  %1504 = vmatprep.subr.bf16.mxu0 %v999_v52 }
  0xaa   :  { %1493 = vmatpush3.bf16.msra.mxu1 %v879_v51  ;;  %1505 = vmatpush3.bf16.msra.mxu0 %v999_v52 }
  0xad   :  { %1475 = vmatmul.mubr.msk.bf16.gmra.mxu1 %vm72_vm0, %v1557_v53  ;;  %1487 = vmatmul.mubr.msk.bf16.gmra.mxu0 %vm72_vm0, %v1558_v54 }
  0xae   :  { %1494 = vmatprep.mubr.msk.bf16.mxu1 %vm72_vm0, %v1559_v55  ;;  %1506 = vmatprep.mubr.msk.bf16.mxu0 %vm72_vm0, %v1560_v56 }
  0xb5   :  { %1495 = vmatmul.mubr.msk.bf16.vlgmr.msra.gmra.mxu1 %vm72_vm0, %v1561_v57  ;;  %1507 = vmatmul.mubr.msk.bf16.vlgmr.msra.gmra.mxu0 %vm72_vm0, %v1562_v58 }
  0xb6   :  { %1498 = vmatprep.mubr.msk.bf16.mxu1 %vm72_vm0, %v1563_v59  ;;  %1510 = vmatprep.mubr.msk.bf16.mxu0 %vm72_vm0, %v1564_v60 }
  0xbd   :  { %1499 = vmatmul.mubr.msk.bf16.gmra.mxu1 %vm72_vm0, %v1565_v61  ;;  %1511 = vmatmul.mubr.msk.bf16.gmra.mxu0 %vm72_vm0, %v1566_v62 }
 0x13d   :  { %v1412_v63 = vpop.f32.mrf.mxu0  ;;  %v1416_v0 = vpop.f32.mrf.mxu1 }
 0x13f   :  { %v119_v1 = vpop.f32.mrf.mxu0  ;;  %v135_v2 = vpop.f32.mrf.mxu1 }
 0x141   :  { %v1413_v3 = vpop.f32.mrf.mxu0  ;;  %v1417_v4 = vpop.f32.mrf.mxu1 }
 0x143   :  { %v122_v5 = vpop.f32.mrf.mxu0  ;;  %v1794_v6 = vpop.f32.mrf.mxu1 }
 0x145   :  { %v1424_v7 = vpop.f32.mrf.mxu1  ;;  %v1436_v8 = vpop.f32.mrf.mxu0 }
 0x146   :  { %v227_v39 = vadd.f32 %v1424_v7, %v1412_v63 }
 0x147   :  { %v218_v9 = vpop.f32.mrf.mxu1  ;;  %v330_v10 = vpop.f32.mrf.mxu0 }
 0x148   :  { %v219_v42 = vadd.f32 %v218_v9, %v119_v1  ;;  %v363_v45 = vadd.f32 %v1436_v8, %v227_v39 }
 0x149   :  { %v1425_v11 = vpop.f32.mrf.mxu1  ;;  %v1437_v12 = vpop.f32.mrf.mxu0 }
 0x14a   :  { %v230_v46 = vadd.f32 %v1425_v11, %v1413_v3  ;;  %v361_v49 = vadd.f32 %v330_v10, %v219_v42  ;;  %v1802_v10 = vpop.permute.xlu1 %1104 }
 0x14b   :  { %v221_v13 = vpop.f32.mrf.mxu1  ;;  %v333_v14 = vpop.f32.mrf.mxu0 }
 0x14c   :  { %v222_v50 = vadd.f32 %v221_v13, %v122_v5  ;;  %v364_v54 = vadd.f32 %v1437_v12, %v230_v46 }
 0x14d   :  { %v1428_v15 = vpop.f32.mrf.mxu1  ;;  %v1440_v16 = vpop.f32.mrf.mxu0 }
 0x14e   :  { %v243_v56 = vadd.f32 %v1428_v15, %v1416_v0  ;;  %v362_v60 = vadd.f32 %v333_v14, %v222_v50 }
 0x14f   :  { %v234_v17 = vpop.f32.mrf.mxu1  ;;  %v346_v18 = vpop.f32.mrf.mxu0 }
 0x150   :  { %v235_v57 = vadd.f32 %v234_v17, %v135_v2  ;;  %v367_v5 = vadd.f32 %v1440_v16, %v243_v56  ;;  %v1100_v17 = vpop.permute.xlu0 %1099 }
 0x151   :  { %v1429_v19 = vpop.f32.mrf.mxu1  ;;  %v1441_v20 = vpop.f32.mrf.mxu0 }
 0x152   :  { %v246_v63 = vadd.f32 %v1429_v19, %v1417_v4  ;;  %v365_v11 = vadd.f32 %v346_v18, %v235_v57 }
 0x153   :  { %v237_v21 = vpop.f32.mrf.mxu1  ;;  %v1796_v22 = vpop.f32.mrf.mxu0 }
 0x154   :  { %v238_v12 = vadd.f32 %v237_v21, %v1794_v6  ;;  %v368_v14 = vadd.f32 %v1441_v20, %v246_v63  ;;  %v1110_v21 = vpop.permute.xlu1 %1109  ;;  %v1115_v46 = vpop.permute.xlu0 %1114 }
 0x155   :  { %v1448_v23 = vpop.f32.mrf.mxu1  ;;  %v1460_v24 = vpop.f32.mrf.mxu0 }
 0x156   :  { %v483_v51 = vadd.f32 %v1448_v23, %v363_v45 }
 0x157   :  { %v450_v25 = vpop.f32.mrf.mxu1  ;;  %v570_v26 = vpop.f32.mrf.mxu0 }
 0x158   :  { %v481_v55 = vadd.f32 %v450_v25, %v361_v49  ;;  %v603_v61 = vadd.f32 %v1460_v24, %v483_v51  ;;  %v1120_v57 = vpop.permute.xlu1 %1119 }
 0x159   :  { %v1449_v27 = vpop.f32.mrf.mxu1  ;;  %v1461_v28 = vpop.f32.mrf.mxu0 }
 0x15a   :  { %v484_v62 = vadd.f32 %v1449_v27, %v364_v54  ;;  %v601_v3 = vadd.f32 %v570_v26, %v481_v55 }
 0x15b   :  { %v453_v29 = vpop.f32.mrf.mxu1  ;;  %v573_v30 = vpop.f32.mrf.mxu0 }
 0x15c   :  { %v482_v8 = vadd.f32 %v453_v29, %v362_v60  ;;  %v604_v2 = vadd.f32 %v1461_v28, %v484_v62  ;;  %v366_v29 = vadd.f32 %v1796_v22, %v238_v12 }
 0x15d   :  { %v1452_v31 = vpop.f32.mrf.mxu1  ;;  %v1464_v32 = vpop.f32.mrf.mxu0 }
 0x15e   :  { %v487_v23 = vadd.f32 %v1452_v31, %v367_v5  ;;  %v602_v25 = vadd.f32 %v573_v30, %v482_v8  ;;  %v1125_v8 = vpop.permute.xlu0 %1124 }
 0x15f   :  { %v466_v33 = vpop.f32.mrf.mxu1  ;;  %v586_v34 = vpop.f32.mrf.mxu0 }
 0x160   :  { %v485_v24 = vadd.f32 %v466_v33, %v365_v11  ;;  %v607_v28 = vadd.f32 %v1464_v32, %v487_v23 }
 0x161   :  { %v1453_v35 = vpop.f32.mrf.mxu1  ;;  %v1798_v36 = vpop.f32.mrf.mxu0 }
 0x162   :  { %v488_v39 = vadd.f32 %v1453_v35, %v368_v14 }
 0x163   :  { %v469_v37 = vpop.f32.mrf.mxu1  ;;  %v1800_v38 = vpop.f32.mrf.mxu0 }
 0x164   :  { %v486_v45 = vadd.f32 %v469_v37, %v366_v29 }
 0x165   :  { %v1472_v40 = vpop.f32.mrf.mxu1  ;;  %v1484_v41 = vpop.f32.mrf.mxu0 }
 0x166   :  { %v723_v9 = vadd.f32 %v1472_v40, %v603_v61  ;;  %v606_v32 = vadd.f32 %v1800_v38, %v486_v45 }
 0x167   :  { %v690_v43 = vpop.f32.mrf.mxu1  ;;  %v810_v44 = vpop.f32.mrf.mxu0 }
 0x168   :  { %v721_v15 = vadd.f32 %v690_v43, %v601_v3  ;;  %v843_v26 = vadd.f32 %v1484_v41, %v723_v9  ;;  %v605_v43 = vadd.f32 %v586_v34, %v485_v24  ;;  %v608_v41 = vadd.f32 %v1798_v36, %v488_v39 }
 0x169   :  { %v1473_v47 = vpop.f32.mrf.mxu1  ;;  %v1485_v48 = vpop.f32.mrf.mxu0 }
 0x16a   :  { %v724_v27 = vadd.f32 %v1473_v47, %v604_v2  ;;  %v841_v40 = vadd.f32 %v810_v44, %v721_v15 }
 0x16b   :  { %v693_v52 = vpop.f32.mrf.mxu1  ;;  %v813_v53 = vpop.f32.mrf.mxu0 }
 0x16c   :  { %v722_v6 = vadd.f32 %v693_v52, %v602_v25  ;;  %v844_v33 = vadd.f32 %v1485_v48, %v724_v27  ;;  %v1130_v25 = vpop.permute.xlu1 %1129 }
 0x16d   :  { %v1476_v58 = vpop.f32.mrf.mxu1  ;;  %v1488_v59 = vpop.f32.mrf.mxu0 }
 0x16e   :  { %v727_v47 = vadd.f32 %v1476_v58, %v607_v28  ;;  %v842_v51 = vadd.f32 %v813_v53, %v722_v6 }
 0x16f   :  { %v706_v1 = vpop.f32.mrf.mxu1  ;;  %v826_v7 = vpop.f32.mrf.mxu0 }
 0x170   :  { %v725_v22 = vadd.f32 %v706_v1, %v605_v43  ;;  %v847_v62 = vadd.f32 %v1488_v59, %v727_v47 }
 0x171   :  { %v1477_v13 = vpop.f32.mrf.mxu1  ;;  %v1489_v0 = vpop.f32.mrf.mxu0 }
 0x172   :  { %v728_v34 = vadd.f32 %v1477_v13, %v608_v41  ;;  %v845_v36 = vadd.f32 %v826_v7, %v725_v22 }
 0x173   :  { %v709_v4 = vpop.f32.mrf.mxu1  ;;  %v829_v19 = vpop.f32.mrf.mxu0 }
 0x174   :  { %v726_v58 = vadd.f32 %v709_v4, %v606_v32  ;;  %v848_v38 = vadd.f32 %v1489_v0, %v728_v34 }
 0x175   :  { %v1496_v16 = vpop.f32.mrf.mxu1  ;;  %v1508_v18 = vpop.f32.mrf.mxu0 }
 0x176   :  { %v963_v42 = vadd.f32 %v1496_v16, %v843_v26 }
 0x177   :  { %v930_v20 = vpop.f32.mrf.mxu1  ;;  %v1050_v31 = vpop.f32.mrf.mxu0 }
 0x178   :  { %v1083_v49 = vadd.f32 %v1508_v18, %v963_v42  ;;  %v961_v30 = vadd.f32 %v930_v20, %v841_v40  ;;  %v1135_v40 = vpop.permute.xlu0 %1134 }
 0x179   :  { %v1497_v35 = vpop.f32.mrf.mxu1  ;;  %v1509_v50 = vpop.f32.mrf.mxu0 }
 0x17a   :  { %v1139_v44 = vadd.f32 %v1110_v21, %v1083_v49  ;;  %v1081_v52 = vadd.f32 %v1050_v31, %v961_v30  ;;  %v964_v54 = vadd.f32 %v1497_v35, %v844_v33 }
 0x17b   :  { %v933_v37 = vpop.f32.mrf.mxu1  ;;  %v1053_v55 = vpop.f32.mrf.mxu0 }
 0x17c   :  { %v1147_v56 = vmax.f32 %v1139_v44, 0.0  ;;  %v1137_v48 = vadd.f32 %v1100_v17, %v1081_v52  ;;  %v1084_v60 = vadd.f32 %v1509_v50, %v964_v54  ;;  %v962_v61 = vadd.f32 %v933_v37, %v842_v51 }
 0x17d   :  { %v1500_v63 = vpop.f32.mrf.mxu1  ;;  %v1512_v1 = vpop.f32.mrf.mxu0  ;;  %v846_v17 = vadd.f32 %v829_v19, %v726_v58 }
 0x17e   :  { %v1346_v53 = vpack.c.bf16 %v1147_v56, %v1147_v56  ;;  %v1145_v3 = vmax.f32 %v1137_v48, 0.0  ;;  %v1140_v9 = vadd.f32 %v1115_v46, %v1084_v60  ;;  %v1082_v5 = vadd.f32 %v1053_v55, %v962_v61 }
 0x17f   :  { %v967_v11 = vadd.f32 %v1500_v63, %v847_v62  ;;  %v946_v12 = vpop.f32.mrf.mxu1  ;;  %v1066_v13 = vpop.f32.mrf.mxu0 }
 0x180   :  { %1188 = vst.msk [vmem:[%s1844_s3 + $0x8] sm:$0xf] %vm1185_vm1, %v1346_v53  ;;  %v1344_v59 = vpack.c.bf16 %v1145_v3, %v1145_v3  ;;  %v1148_v7 = vmax.f32 %v1140_v9, 0.0  ;;  %v1138_v2 = vadd.f32 %v1802_v10, %v1082_v5  ;;  %v965_v15 = vadd.f32 %v946_v12, %v845_v36 }
 0x181   :  { %v1087_v14 = vadd.f32 %v1512_v1, %v967_v11  ;;  %v1501_v23 = vpop.f32.mrf.mxu1  ;;  %v1513_v24 = vpop.f32.mrf.mxu0 }
 0x182   :  { %1186 = vst.msk [vmem:[%s1844_s3] sm:$0xf] %vm1185_vm1, %v1344_v59  ;;  %v1347_v0 = vpack.c.bf16 %v1148_v7, %v1148_v7  ;;  %v1146_v4 = vmax.f32 %v1138_v2, 0.0  ;;  %v1085_v26 = vadd.f32 %v1066_v13, %v965_v15  ;;  %v968_v27 = vadd.f32 %v1501_v23, %v848_v38 }
 0x183   :  { %v1143_v29 = vadd.f32 %v1130_v25, %v1087_v14  ;;  %v949_v39 = vpop.f32.mrf.mxu1  ;;  %v1069_v21 = vpop.f32.mrf.mxu0 }
 0x184   :  { %1189 = vst.msk [vmem:[%s1844_s3 + $0xc] sm:$0xf] %vm1185_vm1, %v1347_v0  ;;  %v1345_v10 = vpack.c.bf16 %v1146_v4, %v1146_v4  ;;  %v1141_v19 = vadd.f32 %v1120_v57, %v1085_v26  ;;  %v1088_v16 = vadd.f32 %v1513_v24, %v968_v27  ;;  %v966_v18 = vadd.f32 %v949_v39, %v846_v17 }
 0x185   :  { %v1151_v6 = vmax.f32 %v1143_v29, 0.0 }
 0x186   :  { %1187 = vst.msk [vmem:[%s1844_s3 + $0x4] sm:$0xf] %vm1185_vm1, %v1345_v10  ;;  %v1149_v42 = vmax.f32 %v1141_v19, 0.0  ;;  %v1144_v28 = vadd.f32 %v1135_v40, %v1088_v16  ;;  %v1086_v43 = vadd.f32 %v1069_v21, %v966_v18 }
 0x187   :  { %v1350_v45 = vpack.c.bf16 %v1151_v6, %v1151_v6 }
 0x188   :  { %v1348_v20 = vpack.c.bf16 %v1149_v42, %v1149_v42  ;;  %v1152_v31 = vmax.f32 %v1144_v28, 0.0  ;;  %v1142_v33 = vadd.f32 %v1125_v8, %v1086_v43 }
 0x189   :  { %1192 = vst.msk [vmem:[%s1844_s3 + $0x18] sm:$0xf] %vm1185_vm1, %v1350_v45 }
 0x18a   :  { %1190 = vst.msk [vmem:[%s1844_s3 + $0x10] sm:$0xf] %vm1185_vm1, %v1348_v20  ;;  %v1351_v46 = vpack.c.bf16 %v1152_v31, %v1152_v31  ;;  %v1150_v49 = vmax.f32 %v1142_v33, 0.0 }
 0x18c   :  { %1193 = vst.msk [vmem:[%s1844_s3 + $0x1c] sm:$0xf] %vm1185_vm1, %v1351_v46  ;;  %v1349_v30 = vpack.c.bf16 %v1150_v49, %v1150_v49 }
 0x18e   :  { %1191 = vst.msk [vmem:[%s1844_s3 + $0x14] sm:$0xf] %vm1185_vm1, %v1349_v30 }

// kernel: encoder_forward.18
= control target key start
LH: loop header
LB: loop body
LE: loop exit
PB: predicated region body
PF: predicated region fallthrough
CT: control target
= control target key end

     0   :  { %s782_s16 = smov 127   ;;  %v783_v4 = vmov 0   ;;  %vm60_vm0 = vcmask 261120   ;;  %s785_s23 = smov 118   ;;  %vm53_vm1 = vcmask 1039360   ;;  %vm178_vm2 = vcmask 1031168   ;;  %s890_s0 = inlined_call_operand.vmem [shape: bf16[32,200], index: 0, kind: input, shape index: {}]   ;;  %s891_s1 = inlined_call_operand.vmem [shape: bf16[9,16,32], index: 1, kind: input, shape index: {}]   ;;  %s892_s2 = inlined_call_operand.vmem [shape: f32[16,1], index: 2, kind: input, shape index: {}]   ;;  %s893_s3 = inlined_call_operand.vmem [shape: bf16[16,178], index: 3, kind: output, shape index: {}]  }
   0x1   :  { %v767_v0 = vld [vmem:[%s890_s0 + $0x10] ss:$8 sps:$4 sm:$0xff]   ;;  %v769_v1 = vld [vmem:[%s890_s0] ss:$8 sps:$4 sm:$0xff]   ;;  %v771_v2 = vld [vmem:[%s890_s0 + $0x14] ss:$8 sps:$4 sm:$0xff]   ;;  %96 = vmatprep.mubr.bf16.mxu0 %v783_v4  ;;  %151 = vmatprep.mubr.bf16.mxu1 %v783_v4 }
   0x2   :  { %49 = vrot.lane.b32.xlu0 %v767_v0, %s782_s16  ;;  %v772_v3 = vld [vmem:[%s890_s0 + $0x4] ss:$8 sps:$4 sm:$0xff]   ;;  %45 = vrot.lane.b32.xlu1 %v769_v1, %s782_s16  ;;  %s784_s0 = smov 126   ;;  %s786_s24 = smov 117   ;;  %vm251_vm3 = vcmask 965632   ;;  %v775_v23 = vld [vmem:[%s891_s1 + $0x10] sm:$0xff]  }
   0x3   :  { %131 = vmatprep.subr.bf16.mxu1 %v771_v2  ;;  %765 = vset.pattern.permute.xlu0 %v783_v4  ;;  %v774_v5 = vld [vmem:[%s891_s1] sm:$0xff]   ;;  %s787_s25 = smov 116   ;;  %s788_s26 = smov 108   ;;  %v674_v7 = vld [vmem:[%s892_s2 + $0x8] sm:$0xff]  ;;  %vm324_vm4 = vcmask 957440   ;;  %v776_v31 = vld [vmem:[%s891_s1 + $0x18] sm:$0xff]  }
   0x4   :  { %132 = vmatpush1.bf16.msra.mxu1 %v767_v0  ;;  %766 = vset.pattern.permute.xlu1 %v783_v4  ;;  %s789_s27 = smov 107   ;;  %s790_s28 = smov 106   ;;  %v673_v6 = vld [vmem:[%s892_s2] sm:$0xff]  ;;  %v773_v16 = vld [vmem:[%s891_s1 + $0x8] sm:$0xff]   ;;  %vm397_vm5 = vcmask 949248   ;;  %vm470_vm6 = vcmask 883712  }
   0x5   :  { %133 = vmatprep.subr.bf16.mxu1 %v772_v3  ;;  %v777_v35 = vld [vmem:[%s891_s1 + $0x20] sm:$0xff]   ;;  %v778_v45 = vld [vmem:[%s891_s1 + $0x28] sm:$0xff]   ;;  %v779_v49 = vld [vmem:[%s891_s1 + $0x30] sm:$0xff]   ;;  %vm543_vm7 = vcmask 875520   ;;  %vm616_vm8 = vcmask 867328   ;;  %vm705_vm9 = vcmask 1043456  }
   0x6   :  { %51 = vrot.lane.b32.xlu0 %v771_v2, %s782_s16  ;;  %47 = vrot.lane.b32.xlu1 %v772_v3, %s782_s16  ;;  %v780_v59 = vld [vmem:[%s891_s1 + $0x38] sm:$0xff]   ;;  %v781_v63 = vld [vmem:[%s891_s1 + $0x40] sm:$0xff]   ;;  %vm706_vm10 = vcmask 408580  }
   0x7   :  { %vm707_vm11 = vmor %vm706_vm10, %vm705_vm9 }
   0x8   :  { %134 = vmatpush1.bf16.msra.mxu1 %v769_v1 }
   0xa   :  { %174 = vrot.lane.b32.xlu0 %v767_v0, %s784_s0  ;;  %176 = vrot.lane.b32.xlu1 %v771_v2, %s784_s0 }
   0xb   :  { %723 = vmatmul.mubr.msk.bf16.vlgmr.msra.gmra.mxu1 %vm60_vm0, %v774_v5 }
   0xc   :  { %293 = vmatprep.mubr.bf16.mxu1 %v783_v4 }
   0xe   :  { %170 = vrot.lane.b32.xlu0 %v769_v1, %s784_s0  ;;  %172 = vrot.lane.b32.xlu1 %v772_v3, %s784_s0 }
  0x12   :  { %247 = vrot.lane.b32.xlu0 %v767_v0, %s785_s23  ;;  %249 = vrot.lane.b32.xlu1 %v771_v2, %s785_s23 }
  0x16   :  { %320 = vrot.lane.b32.xlu0 %v767_v0, %s786_s24  ;;  %322 = vrot.lane.b32.xlu1 %v771_v2, %s786_s24 }
  0x1a   :  { %243 = vrot.lane.b32.xlu0 %v769_v1, %s785_s23  ;;  %245 = vrot.lane.b32.xlu1 %v772_v3, %s785_s23 }
  0x1e   :  { %316 = vrot.lane.b32.xlu0 %v769_v1, %s786_s24  ;;  %318 = vrot.lane.b32.xlu1 %v772_v3, %s786_s24 }
  0x22   :  { %393 = vrot.lane.b32.xlu0 %v767_v0, %s787_s25  ;;  %395 = vrot.lane.b32.xlu1 %v771_v2, %s787_s25 }
  0x26   :  { %466 = vrot.lane.b32.xlu0 %v767_v0, %s788_s26  ;;  %468 = vrot.lane.b32.xlu1 %v771_v2, %s788_s26 }
  0x2a   :  { %389 = vrot.lane.b32.xlu0 %v769_v1, %s787_s25  ;;  %391 = vrot.lane.b32.xlu1 %v772_v3, %s787_s25 }
  0x2e   :  { %462 = vrot.lane.b32.xlu0 %v769_v1, %s788_s26  ;;  %464 = vrot.lane.b32.xlu1 %v772_v3, %s788_s26 }
  0x32   :  { %539 = vrot.lane.b32.xlu0 %v767_v0, %s789_s27  ;;  %541 = vrot.lane.b32.xlu1 %v771_v2, %s789_s27 }
  0x36   :  { %612 = vrot.lane.b32.xlu0 %v767_v0, %s790_s28  ;;  %614 = vrot.lane.b32.xlu1 %v771_v2, %s790_s28 }
  0x3a   :  { %535 = vrot.lane.b32.xlu0 %v769_v1, %s789_s27  ;;  %537 = vrot.lane.b32.xlu1 %v772_v3, %s789_s27 }
  0x3e   :  { %608 = vrot.lane.b32.xlu0 %v769_v1, %s790_s28  ;;  %610 = vrot.lane.b32.xlu1 %v772_v3, %s790_s28 }
  0x42   :  { %677 = vperm.xlu0 %765, %v673_v6   ;;  %682 = vperm.xlu1 %766, %v674_v7  }
  0x74   :  { %v50_v8 = vpop.permute.xlu0 %49  ;;  %v46_v9 = vpop.permute.xlu1 %45 }
  0x78   :  { %v52_v10 = vpop.permute.xlu0 %51  ;;  %v48_v11 = vpop.permute.xlu1 %47 }
  0x79   :  { %76 = vmatprep.subr.bf16.mxu0 %v52_v10  ;;  %v55_v12 = vsel %vm53_vm1, %v50_v8, %v52_v10  ;;  %v54_v15 = vsel %vm53_vm1, %v46_v9, %v48_v11 }
  0x7a   :  { %77 = vmatpush1.bf16.msra.mxu0 %v55_v12 }
  0x7b   :  { %78 = vmatprep.subr.bf16.mxu0 %v48_v11 }
  0x7c   :  { %v175_v13 = vpop.permute.xlu0 %174  ;;  %v177_v14 = vpop.permute.xlu1 %176 }
  0x7d   :  { %v180_v18 = vsel %vm178_vm2, %v175_v13, %v177_v14 }
  0x7e   :  { %79 = vmatpush1.bf16.msra.mxu0 %v54_v15 }
  0x7f   :  { %200 = vmatprep.subr.bf16.mxu0 %v177_v14 }
  0x80   :  { %v171_v17 = vpop.permute.xlu0 %170  ;;  %v173_v19 = vpop.permute.xlu1 %172 }
  0x81   :  { %721 = vmatmul.mubr.msk.bf16.vlgmr.msra.gmra.mxu0 %vm60_vm0, %v773_v16  ;;  %v179_v21 = vsel %vm178_vm2, %v171_v17, %v173_v19 }
  0x82   :  { %201 = vmatpush1.bf16.msra.mxu0 %v180_v18  ;;  %220 = vmatprep.mubr.bf16.mxu0 %v783_v4 }
  0x83   :  { %202 = vmatprep.subr.bf16.mxu0 %v173_v19 }
  0x84   :  { %v248_v20 = vpop.permute.xlu0 %247  ;;  %v250_v22 = vpop.permute.xlu1 %249 }
  0x85   :  { %v253_v24 = vsel %vm251_vm3, %v248_v20, %v250_v22  ;;  %273 = vmatprep.subr.bf16.mxu1 %v250_v22 }
  0x86   :  { %203 = vmatpush1.bf16.msra.mxu0 %v179_v21  ;;  %274 = vmatpush1.bf16.msra.mxu1 %v253_v24 }
  0x88   :  { %v321_v25 = vpop.permute.xlu0 %320  ;;  %v323_v26 = vpop.permute.xlu1 %322 }
  0x89   :  { %727 = vmatmul.mubr.msk.bf16.vlgmr.msra.gmra.mxu0 %vm60_vm0, %v775_v23  ;;  %v326_v27 = vsel %vm324_vm4, %v321_v25, %v323_v26  ;;  %346 = vmatprep.subr.bf16.mxu0 %v323_v26 }
  0x8a   :  { %366 = vmatprep.mubr.bf16.mxu0 %v783_v4  ;;  %347 = vmatpush1.bf16.msra.mxu0 %v326_v27 }
  0x8c   :  { %v244_v28 = vpop.permute.xlu0 %243  ;;  %v246_v29 = vpop.permute.xlu1 %245 }
  0x8d   :  { %v252_v30 = vsel %vm251_vm3, %v244_v28, %v246_v29  ;;  %275 = vmatprep.subr.bf16.mxu1 %v246_v29 }
  0x8e   :  { %276 = vmatpush1.bf16.msra.mxu1 %v252_v30 }
  0x90   :  { %v317_v32 = vpop.permute.xlu0 %316  ;;  %v319_v33 = vpop.permute.xlu1 %318 }
  0x91   :  { %v325_v34 = vsel %vm324_vm4, %v317_v32, %v319_v33  ;;  %348 = vmatprep.subr.bf16.mxu0 %v319_v33  ;;  %731 = vmatmul.mubr.msk.bf16.vlgmr.msra.gmra.mxu1 %vm60_vm0, %v776_v31 }
  0x92   :  { %349 = vmatpush1.bf16.msra.mxu0 %v325_v34  ;;  %439 = vmatprep.mubr.bf16.mxu1 %v783_v4 }
  0x94   :  { %v394_v36 = vpop.permute.xlu0 %393  ;;  %v396_v37 = vpop.permute.xlu1 %395 }
  0x95   :  { %v399_v38 = vsel %vm397_vm5, %v394_v36, %v396_v37  ;;  %419 = vmatprep.subr.bf16.mxu1 %v396_v37  ;;  %735 = vmatmul.mubr.msk.bf16.vlgmr.msra.gmra.mxu0 %vm60_vm0, %v777_v35 }
  0x96   :  { %420 = vmatpush1.bf16.msra.mxu1 %v399_v38  ;;  %512 = vmatprep.mubr.bf16.mxu0 %v783_v4 }
  0x98   :  { %v467_v39 = vpop.permute.xlu0 %466  ;;  %v469_v40 = vpop.permute.xlu1 %468 }
  0x99   :  { %v472_v41 = vsel %vm470_vm6, %v467_v39, %v469_v40  ;;  %492 = vmatprep.subr.bf16.mxu0 %v469_v40 }
  0x9a   :  { %493 = vmatpush1.bf16.msra.mxu0 %v472_v41 }
  0x9c   :  { %v390_v42 = vpop.permute.xlu0 %389  ;;  %v392_v43 = vpop.permute.xlu1 %391 }
  0x9d   :  { %v398_v44 = vsel %vm397_vm5, %v390_v42, %v392_v43  ;;  %421 = vmatprep.subr.bf16.mxu1 %v392_v43 }
  0x9e   :  { %422 = vmatpush1.bf16.msra.mxu1 %v398_v44 }
  0xa0   :  { %v463_v46 = vpop.permute.xlu0 %462  ;;  %v465_v47 = vpop.permute.xlu1 %464 }
  0xa1   :  { %v471_v48 = vsel %vm470_vm6, %v463_v46, %v465_v47  ;;  %739 = vmatmul.mubr.msk.bf16.vlgmr.msra.gmra.mxu1 %vm60_vm0, %v778_v45  ;;  %494 = vmatprep.subr.bf16.mxu0 %v465_v47 }
  0xa2   :  { %495 = vmatpush1.bf16.msra.mxu0 %v471_v48  ;;  %585 = vmatprep.mubr.bf16.mxu1 %v783_v4 }
  0xa4   :  { %v540_v50 = vpop.permute.xlu0 %539  ;;  %v542_v51 = vpop.permute.xlu1 %541 }
  0xa5   :  { %v545_v52 = vsel %vm543_vm7, %v540_v50, %v542_v51  ;;  %743 = vmatmul.mubr.msk.bf16.vlgmr.msra.gmra.mxu0 %vm60_vm0, %v779_v49  ;;  %565 = vmatprep.subr.bf16.mxu1 %v542_v51 }
  0xa6   :  { %566 = vmatpush1.bf16.msra.mxu1 %v545_v52  ;;  %658 = vmatprep.mubr.bf16.mxu0 %v783_v4 }
  0xa8   :  { %v613_v53 = vpop.permute.xlu0 %612  ;;  %v615_v54 = vpop.permute.xlu1 %614 }
  0xa9   :  { %v618_v55 = vsel %vm616_vm8, %v613_v53, %v615_v54  ;;  %638 = vmatprep.subr.bf16.mxu0 %v615_v54 }
  0xaa   :  { %639 = vmatpush1.bf16.msra.mxu0 %v618_v55 }
  0xac   :  { %v536_v56 = vpop.permute.xlu0 %535  ;;  %v538_v57 = vpop.permute.xlu1 %537 }
  0xad   :  { %v544_v58 = vsel %vm543_vm7, %v536_v56, %v538_v57  ;;  %567 = vmatprep.subr.bf16.mxu1 %v538_v57 }
  0xae   :  { %568 = vmatpush1.bf16.msra.mxu1 %v544_v58 }
  0xb0   :  { %v609_v60 = vpop.permute.xlu0 %608  ;;  %v611_v61 = vpop.permute.xlu1 %610 }
  0xb1   :  { %v617_v62 = vsel %vm616_vm8, %v609_v60, %v611_v61  ;;  %747 = vmatmul.mubr.msk.bf16.vlgmr.msra.gmra.mxu1 %vm60_vm0, %v780_v59  ;;  %640 = vmatprep.subr.bf16.mxu0 %v611_v61 }
  0xb2   :  { %641 = vmatpush1.bf16.msra.mxu0 %v617_v62 }
  0xb5   :  { %751 = vmatmul.mubr.msk.bf16.vlgmr.msra.gmra.mxu0 %vm60_vm0, %v781_v63 }
  0xbd   :  { %v678_v52 = vpop.permute.xlu0 %677 }
  0xcb   :  { %v153_v3 = vpop.f32.mrf.mxu1 }
  0xcd   :  { %v155_v5 = vpop.f32.mrf.mxu1 }
  0xcf   :  { %v157_v7 = vpop.f32.mrf.mxu1 }
  0xd1   :  { %v159_v9 = vpop.f32.mrf.mxu1 }
 0x141   :  { %v98_v0 = vpop.f32.mrf.mxu0 }
 0x142   :  { %v154_v19 = vadd.f32 %v153_v3, %v98_v0 }
 0x143   :  { %v100_v1 = vpop.f32.mrf.mxu0 }
 0x144   :  { %v156_v21 = vadd.f32 %v155_v5, %v100_v1 }
 0x145   :  { %v102_v2 = vpop.f32.mrf.mxu0 }
 0x146   :  { %v158_v24 = vadd.f32 %v157_v7, %v102_v2  ;;  %v683_v2 = vpop.permute.xlu1 %682 }
 0x147   :  { %v104_v4 = vpop.f32.mrf.mxu0 }
 0x148   :  { %v160_v28 = vadd.f32 %v159_v9, %v104_v4 }
 0x149   :  { %v222_v6 = vpop.f32.mrf.mxu0 }
 0x14a   :  { %v231_v23 = vadd.f32 %v222_v6, %v154_v19 }
 0x14b   :  { %v224_v8 = vpop.f32.mrf.mxu0 }
 0x14c   :  { %v232_v27 = vadd.f32 %v224_v8, %v156_v21 }
 0x14d   :  { %v226_v10 = vpop.f32.mrf.mxu0 }
 0x14e   :  { %v233_v29 = vadd.f32 %v226_v10, %v158_v24 }
 0x14f   :  { %v228_v11 = vpop.f32.mrf.mxu0 }
 0x150   :  { %v234_v33 = vadd.f32 %v228_v11, %v160_v28 }
 0x151   :  { %v295_v12 = vpop.f32.mrf.mxu1 }
 0x152   :  { %v304_v30 = vadd.f32 %v295_v12, %v231_v23 }
 0x153   :  { %v297_v13 = vpop.f32.mrf.mxu1 }
 0x154   :  { %v305_v34 = vadd.f32 %v297_v13, %v232_v27 }
 0x155   :  { %v368_v14 = vpop.f32.mrf.mxu0  ;;  %v299_v15 = vpop.f32.mrf.mxu1 }
 0x156   :  { %v377_v35 = vadd.f32 %v368_v14, %v304_v30  ;;  %v306_v36 = vadd.f32 %v299_v15, %v233_v29 }
 0x157   :  { %v370_v16 = vpop.f32.mrf.mxu0  ;;  %v301_v17 = vpop.f32.mrf.mxu1 }
 0x158   :  { %v378_v39 = vadd.f32 %v370_v16, %v305_v34  ;;  %v307_v40 = vadd.f32 %v301_v17, %v234_v33 }
 0x159   :  { %v372_v18 = vpop.f32.mrf.mxu0 }
 0x15a   :  { %v379_v43 = vadd.f32 %v372_v18, %v306_v36 }
 0x15b   :  { %v374_v22 = vpop.f32.mrf.mxu0 }
 0x15c   :  { %v380_v48 = vadd.f32 %v374_v22, %v307_v40 }
 0x161   :  { %v441_v20 = vpop.f32.mrf.mxu1 }
 0x162   :  { %v450_v41 = vadd.f32 %v441_v20, %v377_v35 }
 0x163   :  { %v443_v25 = vpop.f32.mrf.mxu1 }
 0x164   :  { %v451_v44 = vadd.f32 %v443_v25, %v378_v39 }
 0x165   :  { %v514_v26 = vpop.f32.mrf.mxu0  ;;  %v445_v31 = vpop.f32.mrf.mxu1 }
 0x166   :  { %v523_v45 = vadd.f32 %v514_v26, %v450_v41  ;;  %v452_v49 = vadd.f32 %v445_v31, %v379_v43 }
 0x167   :  { %v516_v32 = vpop.f32.mrf.mxu0  ;;  %v447_v37 = vpop.f32.mrf.mxu1 }
 0x168   :  { %v524_v50 = vadd.f32 %v516_v32, %v451_v44  ;;  %v453_v55 = vadd.f32 %v447_v37, %v380_v48 }
 0x169   :  { %v518_v38 = vpop.f32.mrf.mxu0 }
 0x16a   :  { %v525_v56 = vadd.f32 %v518_v38, %v452_v49 }
 0x16b   :  { %v520_v46 = vpop.f32.mrf.mxu0 }
 0x16c   :  { %v526_v61 = vadd.f32 %v520_v46, %v453_v55 }
 0x171   :  { %v587_v42 = vpop.f32.mrf.mxu1 }
 0x172   :  { %v596_v51 = vadd.f32 %v587_v42, %v523_v45 }
 0x173   :  { %v589_v47 = vpop.f32.mrf.mxu1 }
 0x174   :  { %v597_v57 = vadd.f32 %v589_v47, %v524_v50 }
 0x175   :  { %v591_v53 = vpop.f32.mrf.mxu1  ;;  %v660_v54 = vpop.f32.mrf.mxu0 }
 0x176   :  { %v669_v58 = vadd.f32 %v660_v54, %v596_v51  ;;  %v598_v62 = vadd.f32 %v591_v53, %v525_v56 }
 0x177   :  { %v593_v59 = vpop.f32.mrf.mxu1  ;;  %v662_v60 = vpop.f32.mrf.mxu0 }
 0x178   :  { %v685_v63 = vadd.f32 %v678_v52, %v669_v58  ;;  %v670_v0 = vadd.f32 %v662_v60, %v597_v57  ;;  %v599_v3 = vadd.f32 %v593_v59, %v526_v61 }
 0x179   :  { %v664_v1 = vpop.f32.mrf.mxu0 }
 0x17a   :  { %v686_v4 = vadd.f32 %v678_v52, %v670_v0  ;;  %v671_v5 = vadd.f32 %v664_v1, %v598_v62  ;;  %v689_v7 = vmax.f32 %v685_v63, 0.0 }
 0x17b   :  { %v666_v6 = vpop.f32.mrf.mxu0 }
 0x17c   :  { %v690_v8 = vmax.f32 %v686_v4, 0.0  ;;  %v672_v9 = vadd.f32 %v666_v6, %v599_v3  ;;  %v687_v10 = vadd.f32 %v683_v2, %v671_v5 }
 0x17e   :  { %v754_v11 = vpack.c.bf16 %v690_v8, %v689_v7  ;;  %v688_v12 = vadd.f32 %v683_v2, %v672_v9  ;;  %v691_v13 = vmax.f32 %v687_v10, 0.0 }
 0x180   :  { %708 = vst.msk [vmem:[%s893_s3] sm:$0xff] %vm707_vm11, %v754_v11  ;;  %v692_v14 = vmax.f32 %v688_v12, 0.0 }
 0x182   :  { %v755_v15 = vpack.c.bf16 %v692_v14, %v691_v13 }
 0x184   :  { %709 = vst.msk [vmem:[%s893_s3 + $0x8] sm:$0xff] %vm707_vm11, %v755_v15 }

// kernel: encoder_forward.19
= control target key start
LH: loop header
LB: loop body
LE: loop exit
PB: predicated region body
PF: predicated region fallthrough
CT: control target
= control target key end

     0   :  { %v1000_v1 = vmov 0   ;;  %s1001_s14 = smov 127   ;;  %s1002_s15 = smov 126   ;;  %vm48_vm0 = vcmask 1039360   ;;  %vm202_vm1 = vcmask 1031168   ;;  %vm52_vm2 = vcmask 130048   ;;  %s1177_s0 = inlined_call_operand.vmem [shape: bf16[16,200], index: 0, kind: input, shape index: {}]   ;;  %s1178_s1 = inlined_call_operand.vmem [shape: bf16[9,32,16], index: 1, kind: input, shape index: {}]   ;;  %s1179_s2 = inlined_call_operand.vmem [shape: f32[32,1], index: 2, kind: input, shape index: {}]   ;;  %s1180_s3 = inlined_call_operand.vmem [shape: bf16[32,178], index: 3, kind: output, shape index: {}]  }
   0x1   :  { %v979_v0 = vld [vmem:[%s1177_s0] ss:$8 sps:$4 sm:$0xff]   ;;  %91 = vmatprep.mubr.bf16.mxu0 %v1000_v1  ;;  %101 = vmatprep.mubr.bf16.mxu1 %v1000_v1  ;;  %v981_v2 = vld [vmem:[%s1177_s0 + $0x4] ss:$8 sps:$4 sm:$0xff]   ;;  %s1003_s18 = smov 118   ;;  %s1004_s19 = smov 117  }
   0x2   :  { %977 = vset.pattern.permute.xlu0 %v1000_v1  ;;  %978 = vset.pattern.permute.xlu1 %v1000_v1  ;;  %s1005_s20 = smov 116   ;;  %s1006_s21 = smov 108   ;;  %v813_v3 = vld [vmem:[%s1179_s2] sm:$0xff]  ;;  %v814_v4 = vld [vmem:[%s1179_s2 + $0x8] sm:$0xff]  ;;  %v815_v5 = vld [vmem:[%s1179_s2 + $0x10] sm:$0xff]  ;;  %vm292_vm3 = vcmask 965632  }
   0x3   :  { %44 = vrot.lane.b32.xlu0 %v979_v0, %s1001_s14  ;;  %198 = vrot.lane.b32.xlu1 %v979_v0, %s1002_s15  ;;  %s1007_s22 = smov 107   ;;  %s1008_s23 = smov 106   ;;  %v816_v6 = vld [vmem:[%s1179_s2 + $0x18] sm:$0xff]  ;;  %v982_v12 = vld [vmem:[%s1178_s1 + $0x10] sm:$0xff]   ;;  %vm382_vm4 = vcmask 957440   ;;  %vm472_vm5 = vcmask 949248  }
   0x4   :  { %v983_v13 = vld [vmem:[%s1178_s1 + $0x18] sm:$0xff]   ;;  %v984_v19 = vld [vmem:[%s1178_s1] sm:$0xff]   ;;  %v986_v25 = vld [vmem:[%s1178_s1 + $0x8] sm:$0xff]   ;;  %vm562_vm6 = vcmask 883712   ;;  %vm652_vm7 = vcmask 875520   ;;  %vm742_vm8 = vcmask 867328  }
   0x5   :  { %v985_v20 = vld [vmem:[%s1178_s1 + $0x20] sm:$0xff]   ;;  %v987_v26 = vld [vmem:[%s1178_s1 + $0x28] sm:$0xff]   ;;  %v988_v30 = vld [vmem:[%s1178_s1 + $0x30] sm:$0xff]   ;;  %vm877_vm9 = vcmask 1043456   ;;  %vm878_vm10 = vcmask 408580  }
   0x6   :  { %v989_v31 = vld [vmem:[%s1178_s1 + $0x40] sm:$0xff]   ;;  %v990_v35 = vld [vmem:[%s1178_s1 + $0x38] sm:$0xff]   ;;  %v991_v36 = vld [vmem:[%s1178_s1 + $0x48] sm:$0xff]  }
   0x7   :  { %46 = vrot.lane.b32.xlu0 %v981_v2, %s1001_s14  ;;  %200 = vrot.lane.b32.xlu1 %v981_v2, %s1002_s15  ;;  %v992_v39 = vld [vmem:[%s1178_s1 + $0x50] sm:$0xff]   ;;  %v993_v40 = vld [vmem:[%s1178_s1 + $0x60] sm:$0xff]   ;;  %vm1153_vm11 = vmor %vm878_vm10, %vm877_vm9 }
   0x8   :  { %v994_v43 = vld [vmem:[%s1178_s1 + $0x58] sm:$0xff]   ;;  %v995_v44 = vld [vmem:[%s1178_s1 + $0x68] sm:$0xff]   ;;  %v996_v45 = vld [vmem:[%s1178_s1 + $0x70] sm:$0xff]  }
   0x9   :  { %v997_v46 = vld [vmem:[%s1178_s1 + $0x80] sm:$0xff]   ;;  %v998_v47 = vld [vmem:[%s1178_s1 + $0x78] sm:$0xff]   ;;  %v999_v48 = vld [vmem:[%s1178_s1 + $0x88] sm:$0xff]  }
   0xb   :  { %290 = vrot.lane.b32.xlu1 %v981_v2, %s1003_s18  ;;  %288 = vrot.lane.b32.xlu0 %v979_v0, %s1003_s18 }
   0xf   :  { %380 = vrot.lane.b32.xlu1 %v981_v2, %s1004_s19  ;;  %378 = vrot.lane.b32.xlu0 %v979_v0, %s1004_s19 }
  0x13   :  { %470 = vrot.lane.b32.xlu1 %v981_v2, %s1005_s20  ;;  %468 = vrot.lane.b32.xlu0 %v979_v0, %s1005_s20 }
  0x17   :  { %560 = vrot.lane.b32.xlu1 %v981_v2, %s1006_s21  ;;  %558 = vrot.lane.b32.xlu0 %v979_v0, %s1006_s21 }
  0x1b   :  { %650 = vrot.lane.b32.xlu1 %v981_v2, %s1007_s22  ;;  %648 = vrot.lane.b32.xlu0 %v979_v0, %s1007_s22 }
  0x1f   :  { %740 = vrot.lane.b32.xlu1 %v981_v2, %s1008_s23  ;;  %738 = vrot.lane.b32.xlu0 %v979_v0, %s1008_s23 }
  0x23   :  { %819 = vperm.xlu0 %977, %v813_v3   ;;  %824 = vperm.xlu1 %978, %v814_v4  }
  0x27   :  { %829 = vperm.xlu1 %978, %v815_v5   ;;  %834 = vperm.xlu0 %977, %v816_v6  }
  0x75   :  { %v45_v7 = vpop.permute.xlu0 %44  ;;  %v199_v8 = vpop.permute.xlu1 %198 }
  0x79   :  { %v47_v9 = vpop.permute.xlu0 %46  ;;  %v201_v10 = vpop.permute.xlu1 %200 }
  0x7a   :  { %73 = vmatprep.subr.bf16.mxu0 %v47_v9  ;;  %966 = vmatprep.subr.bf16.mxu1 %v47_v9  ;;  %v49_v11 = vsel %vm48_vm0, %v45_v7, %v47_v9  ;;  %v203_v14 = vsel %vm202_vm1, %v199_v8, %v201_v10 }
  0x7b   :  { %74 = vmatpush1.bf16.msra.mxu0 %v49_v11  ;;  %967 = vmatpush1.bf16.msra.mxu1 %v49_v11 }
  0x7c   :  { %144 = vmatprep.subr.bf16.mxu1 %v981_v2  ;;  %226 = vmatprep.subr.bf16.mxu0 %v201_v10 }
  0x7d   :  { %v291_v15 = vpop.permute.xlu1 %290  ;;  %v289_v16 = vpop.permute.xlu0 %288 }
  0x7e   :  { %896 = vmatmul.mubr.msk.bf16.vlgmr.msra.gmra.mxu0 %vm52_vm2, %v982_v12  ;;  %897 = vmatmul.mubr.msk.bf16.vlgmr.msra.gmra.mxu1 %vm52_vm2, %v983_v13  ;;  %v293_v21 = vsel %vm292_vm3, %v289_v16, %v291_v15 }
  0x7f   :  { %145 = vmatpush1.bf16.msra.mxu1 %v979_v0  ;;  %227 = vmatpush1.bf16.msra.mxu0 %v203_v14 }
  0x80   :  { %316 = vmatprep.subr.bf16.mxu1 %v291_v15  ;;  %162 = vmatprep.mubr.bf16.mxu1 %v1000_v1 }
  0x81   :  { %244 = vmatprep.mubr.bf16.mxu0 %v1000_v1  ;;  %v381_v17 = vpop.permute.xlu1 %380  ;;  %v379_v18 = vpop.permute.xlu0 %378 }
  0x82   :  { %406 = vmatprep.subr.bf16.mxu0 %v381_v17  ;;  %v383_v22 = vsel %vm382_vm4, %v379_v18, %v381_v17 }
  0x85   :  { %v471_v23 = vpop.permute.xlu1 %470  ;;  %v469_v27 = vpop.permute.xlu0 %468 }
  0x86   :  { %900 = vmatmul.mubr.msk.bf16.vlgmr.msra.gmra.mxu1 %vm52_vm2, %v984_v19  ;;  %908 = vmatmul.mubr.msk.bf16.vlgmr.msra.gmra.mxu0 %vm52_vm2, %v985_v20  ;;  %v473_v32 = vsel %vm472_vm5, %v469_v27, %v471_v23 }
  0x87   :  { %317 = vmatpush1.bf16.msra.mxu1 %v293_v21  ;;  %407 = vmatpush1.bf16.msra.mxu0 %v383_v22 }
  0x88   :  { %172 = vmatprep.mubr.bf16.mxu1 %v1000_v1  ;;  %254 = vmatprep.mubr.bf16.mxu0 %v1000_v1 }
  0x89   :  { %496 = vmatprep.subr.bf16.mxu1 %v471_v23  ;;  %v561_v24 = vpop.permute.xlu1 %560  ;;  %v559_v29 = vpop.permute.xlu0 %558 }
  0x8a   :  { %586 = vmatprep.subr.bf16.mxu0 %v561_v24  ;;  %v563_v33 = vsel %vm562_vm6, %v559_v29, %v561_v24 }
  0x8d   :  { %v651_v28 = vpop.permute.xlu1 %650  ;;  %v649_v37 = vpop.permute.xlu0 %648 }
  0x8e   :  { %901 = vmatmul.mubr.msk.bf16.gmra.mxu1 %vm52_vm2, %v986_v25  ;;  %909 = vmatmul.mubr.msk.bf16.gmra.mxu0 %vm52_vm2, %v987_v26  ;;  %v653_v41 = vsel %vm652_vm7, %v649_v37, %v651_v28 }
  0x8f   :  { %334 = vmatprep.mubr.bf16.mxu1 %v1000_v1  ;;  %424 = vmatprep.mubr.bf16.mxu0 %v1000_v1 }
  0x91   :  { %v741_v34 = vpop.permute.xlu1 %740  ;;  %v739_v38 = vpop.permute.xlu0 %738 }
  0x92   :  { %v743_v42 = vsel %vm742_vm8, %v739_v38, %v741_v34 }
  0x96   :  { %916 = vmatmul.mubr.msk.bf16.vlgmr.msra.gmra.mxu1 %vm52_vm2, %v988_v30  ;;  %924 = vmatmul.mubr.msk.bf16.vlgmr.msra.gmra.mxu0 %vm52_vm2, %v989_v31 }
  0x97   :  { %497 = vmatpush1.bf16.msra.mxu1 %v473_v32  ;;  %587 = vmatpush1.bf16.msra.mxu0 %v563_v33 }
  0x98   :  { %344 = vmatprep.mubr.bf16.mxu1 %v1000_v1  ;;  %434 = vmatprep.mubr.bf16.mxu0 %v1000_v1 }
  0x99   :  { %676 = vmatprep.subr.bf16.mxu1 %v651_v28  ;;  %766 = vmatprep.subr.bf16.mxu0 %v741_v34 }
  0x9e   :  { %917 = vmatmul.mubr.msk.bf16.gmra.mxu1 %vm52_vm2, %v990_v35  ;;  %925 = vmatmul.mubr.msk.bf16.gmra.mxu0 %vm52_vm2, %v991_v36 }
  0x9f   :  { %514 = vmatprep.mubr.bf16.mxu1 %v1000_v1  ;;  %604 = vmatprep.mubr.bf16.mxu0 %v1000_v1 }
  0xa6   :  { %932 = vmatmul.mubr.msk.bf16.vlgmr.msra.gmra.mxu1 %vm52_vm2, %v992_v39  ;;  %940 = vmatmul.mubr.msk.bf16.vlgmr.msra.gmra.mxu0 %vm52_vm2, %v993_v40 }
  0xa7   :  { %677 = vmatpush1.bf16.msra.mxu1 %v653_v41  ;;  %767 = vmatpush1.bf16.msra.mxu0 %v743_v42 }
  0xa8   :  { %524 = vmatprep.mubr.bf16.mxu1 %v1000_v1  ;;  %614 = vmatprep.mubr.bf16.mxu0 %v1000_v1 }
  0xae   :  { %933 = vmatmul.mubr.msk.bf16.gmra.mxu1 %vm52_vm2, %v994_v43  ;;  %941 = vmatmul.mubr.msk.bf16.gmra.mxu0 %vm52_vm2, %v995_v44 }
  0xaf   :  { %694 = vmatprep.mubr.bf16.mxu1 %v1000_v1  ;;  %784 = vmatprep.mubr.bf16.mxu0 %v1000_v1 }
  0xb6   :  { %948 = vmatmul.mubr.msk.bf16.vlgmr.msra.gmra.mxu1 %vm52_vm2, %v996_v45  ;;  %956 = vmatmul.mubr.msk.bf16.vlgmr.msra.gmra.mxu0 %vm52_vm2, %v997_v46 }
  0xb7   :  { %704 = vmatprep.mubr.bf16.mxu1 %v1000_v1  ;;  %794 = vmatprep.mubr.bf16.mxu0 %v1000_v1 }
  0xbe   :  { %949 = vmatmul.mubr.msk.bf16.gmra.mxu1 %vm52_vm2, %v998_v47  ;;  %957 = vmatmul.mubr.msk.bf16.gmra.mxu0 %vm52_vm2, %v999_v48 }
 0x13e   :  { %v93_v49 = vpop.f32.mrf.mxu0  ;;  %v103_v50 = vpop.f32.mrf.mxu1 }
 0x140   :  { %v95_v51 = vpop.f32.mrf.mxu0  ;;  %v105_v52 = vpop.f32.mrf.mxu1 }
 0x142   :  { %v97_v53 = vpop.f32.mrf.mxu0  ;;  %v107_v54 = vpop.f32.mrf.mxu1 }
 0x144   :  { %v99_v55 = vpop.f32.mrf.mxu0  ;;  %v1139_v56 = vpop.f32.mrf.mxu1 }
 0x146   :  { %v164_v57 = vpop.f32.mrf.mxu1  ;;  %v246_v58 = vpop.f32.mrf.mxu0 }
 0x147   :  { %v165_v25 = vadd.f32 %v164_v57, %v93_v49 }
 0x148   :  { %v166_v59 = vpop.f32.mrf.mxu1  ;;  %v248_v60 = vpop.f32.mrf.mxu0 }
 0x149   :  { %v167_v28 = vadd.f32 %v166_v59, %v95_v51  ;;  %v265_v31 = vadd.f32 %v246_v58, %v165_v25 }
 0x14a   :  { %v168_v61 = vpop.f32.mrf.mxu1  ;;  %v250_v62 = vpop.f32.mrf.mxu0 }
 0x14b   :  { %v169_v32 = vadd.f32 %v168_v61, %v97_v53  ;;  %v266_v35 = vadd.f32 %v248_v60, %v167_v28 }
 0x14c   :  { %v170_v63 = vpop.f32.mrf.mxu1  ;;  %v252_v0 = vpop.f32.mrf.mxu0 }
 0x14d   :  { %v171_v36 = vadd.f32 %v170_v63, %v99_v55  ;;  %v267_v41 = vadd.f32 %v250_v62, %v169_v32 }
 0x14e   :  { %v174_v1 = vpop.f32.mrf.mxu1  ;;  %v256_v2 = vpop.f32.mrf.mxu0 }
 0x14f   :  { %v175_v38 = vadd.f32 %v174_v1, %v103_v50  ;;  %v268_v45 = vadd.f32 %v252_v0, %v171_v36 }
 0x150   :  { %v176_v3 = vpop.f32.mrf.mxu1  ;;  %v258_v4 = vpop.f32.mrf.mxu0 }
 0x151   :  { %v269_v48 = vadd.f32 %v256_v2, %v175_v38  ;;  %v177_v49 = vadd.f32 %v176_v3, %v105_v52 }
 0x152   :  { %v178_v5 = vpop.f32.mrf.mxu1  ;;  %v260_v6 = vpop.f32.mrf.mxu0 }
 0x153   :  { %v179_v51 = vadd.f32 %v178_v5, %v107_v54 }
 0x154   :  { %v180_v7 = vpop.f32.mrf.mxu1  ;;  %v262_v8 = vpop.f32.mrf.mxu0 }
 0x155   :  { %v181_v55 = vadd.f32 %v180_v7, %v1139_v56 }
 0x156   :  { %v336_v9 = vpop.f32.mrf.mxu1  ;;  %v426_v10 = vpop.f32.mrf.mxu0 }
 0x157   :  { %v355_v37 = vadd.f32 %v336_v9, %v265_v31  ;;  %v270_v9 = vadd.f32 %v258_v4, %v177_v49  ;;  %v272_v54 = vadd.f32 %v262_v8, %v181_v55 }
 0x158   :  { %v338_v11 = vpop.f32.mrf.mxu1  ;;  %v428_v12 = vpop.f32.mrf.mxu0 }
 0x159   :  { %v356_v42 = vadd.f32 %v338_v11, %v266_v35  ;;  %v445_v46 = vadd.f32 %v426_v10, %v355_v37  ;;  %v271_v11 = vadd.f32 %v260_v6, %v179_v51  ;;  %v825_v35 = vpop.permute.xlu1 %824 }
 0x15a   :  { %v340_v13 = vpop.f32.mrf.mxu1  ;;  %v430_v14 = vpop.f32.mrf.mxu0 }
 0x15b   :  { %v357_v47 = vadd.f32 %v340_v13, %v267_v41  ;;  %v446_v58 = vadd.f32 %v428_v12, %v356_v42 }
 0x15c   :  { %v342_v15 = vpop.f32.mrf.mxu1  ;;  %v432_v16 = vpop.f32.mrf.mxu0 }
 0x15d   :  { %v358_v59 = vadd.f32 %v342_v15, %v268_v45  ;;  %v447_v62 = vadd.f32 %v430_v14, %v357_v47 }
 0x15e   :  { %v346_v17 = vpop.f32.mrf.mxu1  ;;  %v436_v18 = vpop.f32.mrf.mxu0 }
 0x15f   :  { %v359_v50 = vadd.f32 %v346_v17, %v269_v48  ;;  %v448_v13 = vadd.f32 %v432_v16, %v358_v59  ;;  %v820_v17 = vpop.permute.xlu0 %819 }
 0x160   :  { %v348_v19 = vpop.f32.mrf.mxu1  ;;  %v1141_v20 = vpop.f32.mrf.mxu0 }
 0x161   :  { %v449_v3 = vadd.f32 %v436_v18, %v359_v50  ;;  %v360_v5 = vadd.f32 %v348_v19, %v270_v9  ;;  %v830_v50 = vpop.permute.xlu1 %829 }
 0x162   :  { %v350_v21 = vpop.f32.mrf.mxu1  ;;  %v1143_v22 = vpop.f32.mrf.mxu0 }
 0x163   :  { %v361_v12 = vadd.f32 %v350_v21, %v271_v11  ;;  %v450_v16 = vadd.f32 %v1141_v20, %v360_v5 }
 0x164   :  { %v352_v23 = vpop.f32.mrf.mxu1  ;;  %v1145_v24 = vpop.f32.mrf.mxu0 }
 0x165   :  { %v362_v28 = vadd.f32 %v352_v23, %v272_v54  ;;  %v451_v8 = vadd.f32 %v1143_v22, %v361_v12 }
 0x166   :  { %v516_v26 = vpop.f32.mrf.mxu1  ;;  %v606_v27 = vpop.f32.mrf.mxu0 }
 0x167   :  { %v535_v60 = vadd.f32 %v516_v26, %v445_v46  ;;  %v452_v23 = vadd.f32 %v1145_v24, %v362_v28 }
 0x168   :  { %v518_v29 = vpop.f32.mrf.mxu1  ;;  %v608_v30 = vpop.f32.mrf.mxu0 }
 0x169   :  { %v536_v1 = vadd.f32 %v518_v29, %v446_v58  ;;  %v625_v2 = vadd.f32 %v606_v27, %v535_v60 }
 0x16a   :  { %v520_v33 = vpop.f32.mrf.mxu1  ;;  %v610_v34 = vpop.f32.mrf.mxu0 }
 0x16b   :  { %v537_v52 = vadd.f32 %v520_v33, %v447_v62  ;;  %v626_v26 = vadd.f32 %v608_v30, %v536_v1 }
 0x16c   :  { %v522_v39 = vpop.f32.mrf.mxu1  ;;  %v612_v40 = vpop.f32.mrf.mxu0 }
 0x16d   :  { %v538_v56 = vadd.f32 %v522_v39, %v448_v13  ;;  %v627_v6 = vadd.f32 %v610_v34, %v537_v52 }
 0x16e   :  { %v526_v43 = vpop.f32.mrf.mxu1  ;;  %v616_v44 = vpop.f32.mrf.mxu0 }
 0x16f   :  { %v539_v14 = vadd.f32 %v526_v43, %v449_v3  ;;  %v628_v21 = vadd.f32 %v612_v40, %v538_v56 }
 0x170   :  { %v528_v57 = vpop.f32.mrf.mxu1  ;;  %v618_v53 = vpop.f32.mrf.mxu0 }
 0x171   :  { %v629_v36 = vadd.f32 %v616_v44, %v539_v14  ;;  %v540_v37 = vadd.f32 %v528_v57, %v450_v16 }
 0x172   :  { %v530_v61 = vpop.f32.mrf.mxu1  ;;  %v620_v63 = vpop.f32.mrf.mxu0 }
 0x173   :  { %v541_v39 = vadd.f32 %v530_v61, %v451_v8  ;;  %v630_v51 = vadd.f32 %v618_v53, %v540_v37 }
 0x174   :  { %v532_v0 = vpop.f32.mrf.mxu1  ;;  %v622_v10 = vpop.f32.mrf.mxu0 }
 0x175   :  { %v542_v22 = vadd.f32 %v532_v0, %v452_v23  ;;  %v631_v58 = vadd.f32 %v620_v63, %v541_v39 }
 0x176   :  { %v696_v15 = vpop.f32.mrf.mxu1  ;;  %v786_v25 = vpop.f32.mrf.mxu0 }
 0x177   :  { %v715_v7 = vadd.f32 %v696_v15, %v625_v2  ;;  %v632_v9 = vadd.f32 %v622_v10, %v542_v22  ;;  %v835_v15 = vpop.permute.xlu0 %834 }
 0x178   :  { %v698_v29 = vpop.f32.mrf.mxu1  ;;  %v788_v4 = vpop.f32.mrf.mxu0 }
 0x179   :  { %v805_v31 = vadd.f32 %v786_v25, %v715_v7  ;;  %v716_v32 = vadd.f32 %v698_v29, %v626_v26 }
 0x17a   :  { %v700_v18 = vpop.f32.mrf.mxu1  ;;  %v790_v19 = vpop.f32.mrf.mxu0 }
 0x17b   :  { %v806_v27 = vadd.f32 %v788_v4, %v716_v32  ;;  %v717_v30 = vadd.f32 %v700_v18, %v627_v6  ;;  %v837_v33 = vadd.f32 %v820_v17, %v805_v31 }
 0x17c   :  { %v702_v34 = vpop.f32.mrf.mxu1  ;;  %v792_v38 = vpop.f32.mrf.mxu0 }
 0x17d   :  { %v807_v41 = vadd.f32 %v790_v19, %v717_v30  ;;  %v838_v20 = vadd.f32 %v820_v17, %v806_v27  ;;  %v718_v42 = vadd.f32 %v702_v34, %v628_v21  ;;  %v845_v43 = vmax.f32 %v837_v33, 0.0 }
 0x17e   :  { %v706_v45 = vpop.f32.mrf.mxu1  ;;  %v796_v46 = vpop.f32.mrf.mxu0 }
 0x17f   :  { %v846_v40 = vmax.f32 %v838_v20, 0.0  ;;  %v808_v47 = vadd.f32 %v792_v38, %v718_v42  ;;  %v839_v48 = vadd.f32 %v825_v35, %v807_v41  ;;  %v719_v49 = vadd.f32 %v706_v45, %v629_v36 }
 0x180   :  { %v708_v44 = vpop.f32.mrf.mxu1  ;;  %v798_v57 = vpop.f32.mrf.mxu0 }
 0x181   :  { %v962_v59 = vpack.c.bf16 %v846_v40, %v845_v43  ;;  %v840_v60 = vadd.f32 %v825_v35, %v808_v47  ;;  %v809_v55 = vadd.f32 %v796_v46, %v719_v49  ;;  %v720_v61 = vadd.f32 %v708_v44, %v630_v51 }
 0x182   :  { %v710_v62 = vpop.f32.mrf.mxu1  ;;  %v800_v1 = vpop.f32.mrf.mxu0  ;;  %v847_v53 = vmax.f32 %v839_v48, 0.0 }
 0x183   :  { %880 = vst.msk [vmem:[%s1180_s3] sm:$0xff] %vm1153_vm11, %v962_v59  ;;  %v848_v11 = vmax.f32 %v840_v60, 0.0  ;;  %v721_v0 = vadd.f32 %v710_v62, %v631_v58  ;;  %v810_v13 = vadd.f32 %v798_v57, %v720_v61  ;;  %v841_v2 = vadd.f32 %v830_v50, %v809_v55 }
 0x184   :  { %v712_v63 = vpop.f32.mrf.mxu1  ;;  %v802_v12 = vpop.f32.mrf.mxu0 }
 0x185   :  { %v963_v52 = vpack.c.bf16 %v848_v11, %v847_v53  ;;  %v811_v54 = vadd.f32 %v800_v1, %v721_v0  ;;  %v722_v3 = vadd.f32 %v712_v63, %v632_v9  ;;  %v842_v5 = vadd.f32 %v830_v50, %v810_v13 }
 0x186   :  { %v849_v26 = vmax.f32 %v841_v2, 0.0 }
 0x187   :  { %881 = vst.msk [vmem:[%s1180_s3 + $0x8] sm:$0xff] %vm1153_vm11, %v963_v52  ;;  %v812_v10 = vadd.f32 %v802_v12, %v722_v3  ;;  %v843_v25 = vadd.f32 %v835_v15, %v811_v54  ;;  %v850_v56 = vmax.f32 %v842_v5, 0.0 }
 0x189   :  { %v844_v7 = vadd.f32 %v835_v15, %v812_v10  ;;  %v964_v17 = vpack.c.bf16 %v850_v56, %v849_v26  ;;  %v851_v28 = vmax.f32 %v843_v25, 0.0 }
 0x18b   :  { %v852_v14 = vmax.f32 %v844_v7, 0.0  ;;  %882 = vst.msk [vmem:[%s1180_s3 + $0x10] sm:$0xff] %vm1153_vm11, %v964_v17 }
 0x18d   :  { %v965_v29 = vpack.c.bf16 %v852_v14, %v851_v28 }
 0x18f   :  { %883 = vst.msk [vmem:[%s1180_s3 + $0x18] sm:$0xff] %vm1153_vm11, %v965_v29 }

// kernel: encoder_forward.20
= control target key start
LH: loop header
LB: loop body
LE: loop exit
PB: predicated region body
PF: predicated region fallthrough
CT: control target
= control target key end

     0   :  { %v1616_v1 = vmov 0   ;;  %s1617_s16 = smov 127   ;;  %s1618_s23 = smov 126   ;;  %vm55_vm0 = vcmask 1039360   ;;  %vm65_vm1 = vcmask 130048   ;;  %v1625_v17 = vmov 0.0   ;;  %s1895_s0 = inlined_call_operand.vmem [shape: bf16[16,648], index: 0, kind: input, shape index: {}]   ;;  %s1896_s2 = inlined_call_operand.vmem [shape: f32[8,1], index: 2, kind: input, shape index: {}]   ;;  %s1897_s1 = inlined_call_operand.vmem [shape: bf16[9,8,16], index: 1, kind: input, shape index: {}]   ;;  %s1898_s3 = inlined_call_operand.vmem [shape: bf16[8,610], index: 3, kind: output, shape index: {}]  }
   0x1   :  { %v1650_v0 = vld [vmem:[%s1895_s0 + $0x4] ss:$24 sps:$4 sm:$0xff]   ;;  %101 = vmatprep.mubr.bf16.mxu0 %v1616_v1  ;;  %142 = vmatprep.mubr.bf16.mxu1 %v1616_v1  ;;  %v1657_v2 = vld [vmem:[%s1895_s0] ss:$24 sps:$4 sm:$0xff]   ;;  %v1677_v5 = vld [vmem:[%s1895_s0 + $0x10] ss:$24 sps:$4 sm:$0xff]  }
   0x2   :  { %1604 = vset.pattern.permute.xlu1 %v1616_v1  ;;  %1605 = vset.pattern.permute.xlu0 %v1616_v1  ;;  %v1665_v3 = vld [vmem:[%s1895_s0 + $0x8] ss:$24 sps:$4 sm:$0xff]   ;;  %v1671_v4 = vld [vmem:[%s1895_s0 + $0xc] ss:$24 sps:$4 sm:$0xff]   ;;  %s1619_s24 = smov 110   ;;  %s1620_s25 = smov 109  }
   0x3   :  { %47 = vrot.lane.b32.xlu0 %v1650_v0, %s1617_s16  ;;  %45 = vrot.lane.b32.xlu1 %v1657_v2, %s1617_s16  ;;  %s1621_s26 = smov 108   ;;  %s1622_s27 = smov 92   ;;  %v1613_v6 = vld [vmem:[%s1895_s0 + $0x10] ss:$24 sps:$4 sm:$0xff]   ;;  %v1615_v7 = vld [vmem:[%s1895_s0 + $0x14] ss:$24 sps:$4 sm:$0xff]  }
   0x4   :  { %s1623_s5 = smov 91   ;;  %s1624_s6 = smov 90   ;;  %v1424_v8 = vld [vmem:[%s1896_s2] sm:$0xff]  ;;  %vm1626_vm2 = vmmov 0   ;;  %vm333_vm3 = vcmask 1031168   ;;  %vm485_vm4 = vcmask 900096  }
   0x5   :  { %v1469_v15 = vld [vmem:[%s1897_s1 + $0x4] sm:$0xf]  ;;  %v15_v26 = vld [vmem:[%s1897_s1] sm:$0xf]  ;;  %v1481_v37 = vld [vmem:[%s1897_s1 + $0x8] sm:$0xf] }
   0x6   :  { %vm637_vm5 = vcmask 891904   ;;  %v1485_v48 = vld [vmem:[%s1897_s1 + $0xc] sm:$0xf]  ;;  %vm789_vm6 = vcmask 883712   ;;  %v1489_v59 = vld [vmem:[%s1897_s1 + $0x10] sm:$0xf] }
   0x7   :  { %49 = vrot.lane.b32.xlu0 %v1665_v3, %s1617_s16  ;;  %51 = vrot.lane.b32.xlu1 %v1671_v4, %s1617_s16  ;;  %vm973_vm7 = vcmask 752640   ;;  %vm1128_vm8 = vcmask 744448   ;;  %vm1283_vm9 = vcmask 736256   ;;  %vm1463_vm10 = vcmask 797696  }
   0xb   :  { %53 = vrot.lane.b32.xlu0 %v1677_v5, %s1617_s16  ;;  %325 = vrot.lane.b32.xlu1 %v1650_v0, %s1618_s23 }
   0xf   :  { %327 = vrot.lane.b32.xlu0 %v1665_v3, %s1618_s23  ;;  %323 = vrot.lane.b32.xlu1 %v1657_v2, %s1618_s23 }
  0x13   :  { %329 = vrot.lane.b32.xlu0 %v1671_v4, %s1618_s23  ;;  %331 = vrot.lane.b32.xlu1 %v1677_v5, %s1618_s23 }
  0x17   :  { %477 = vrot.lane.b32.xlu0 %v1650_v0, %s1619_s24  ;;  %479 = vrot.lane.b32.xlu1 %v1665_v3, %s1619_s24 }
  0x1b   :  { %475 = vrot.lane.b32.xlu0 %v1657_v2, %s1619_s24  ;;  %481 = vrot.lane.b32.xlu1 %v1671_v4, %s1619_s24 }
  0x1f   :  { %483 = vrot.lane.b32.xlu0 %v1677_v5, %s1619_s24  ;;  %629 = vrot.lane.b32.xlu1 %v1650_v0, %s1620_s25 }
  0x23   :  { %631 = vrot.lane.b32.xlu0 %v1665_v3, %s1620_s25  ;;  %627 = vrot.lane.b32.xlu1 %v1657_v2, %s1620_s25 }
  0x27   :  { %633 = vrot.lane.b32.xlu0 %v1671_v4, %s1620_s25  ;;  %635 = vrot.lane.b32.xlu1 %v1677_v5, %s1620_s25 }
  0x2b   :  { %781 = vrot.lane.b32.xlu0 %v1650_v0, %s1621_s26  ;;  %783 = vrot.lane.b32.xlu1 %v1665_v3, %s1621_s26 }
  0x2f   :  { %779 = vrot.lane.b32.xlu0 %v1657_v2, %s1621_s26  ;;  %785 = vrot.lane.b32.xlu1 %v1671_v4, %s1621_s26 }
  0x33   :  { %787 = vrot.lane.b32.xlu0 %v1677_v5, %s1621_s26  ;;  %963 = vrot.lane.b32.xlu1 %v1650_v0, %s1622_s27 }
  0x37   :  { %965 = vrot.lane.b32.xlu0 %v1665_v3, %s1622_s27  ;;  %961 = vrot.lane.b32.xlu1 %v1657_v2, %s1622_s27 }
  0x3b   :  { %967 = vrot.lane.b32.xlu0 %v1671_v4, %s1622_s27  ;;  %969 = vrot.lane.b32.xlu1 %v1613_v6, %s1622_s27 }
  0x3f   :  { %971 = vrot.lane.b32.xlu0 %v1615_v7, %s1622_s27  ;;  %1118 = vrot.lane.b32.xlu1 %v1650_v0, %s1623_s5 }
  0x43   :  { %1120 = vrot.lane.b32.xlu0 %v1665_v3, %s1623_s5  ;;  %1116 = vrot.lane.b32.xlu1 %v1657_v2, %s1623_s5 }
  0x47   :  { %1122 = vrot.lane.b32.xlu0 %v1671_v4, %s1623_s5  ;;  %1124 = vrot.lane.b32.xlu1 %v1613_v6, %s1623_s5 }
  0x4b   :  { %1126 = vrot.lane.b32.xlu0 %v1615_v7, %s1623_s5  ;;  %1273 = vrot.lane.b32.xlu1 %v1650_v0, %s1624_s6 }
  0x4f   :  { %1275 = vrot.lane.b32.xlu0 %v1665_v3, %s1624_s6  ;;  %1271 = vrot.lane.b32.xlu1 %v1657_v2, %s1624_s6 }
  0x53   :  { %1277 = vrot.lane.b32.xlu0 %v1671_v4, %s1624_s6  ;;  %1279 = vrot.lane.b32.xlu1 %v1613_v6, %s1624_s6 }
  0x57   :  { %1281 = vrot.lane.b32.xlu0 %v1615_v7, %s1624_s6  ;;  %1427 = vperm.xlu1 %1604, %v1424_v8   ;;  %v1493_v7 = vld [vmem:[%s1897_s1 + $0x14] sm:$0xf] }
  0x75   :  { %v48_v9 = vpop.permute.xlu0 %47  ;;  %v46_v10 = vpop.permute.xlu1 %45 }
  0x76   :  { %v56_v14 = vsel %vm55_vm0, %v46_v10, %v48_v9 }
  0x79   :  { %v50_v11 = vpop.permute.xlu0 %49  ;;  %v52_v12 = vpop.permute.xlu1 %51 }
  0x7a   :  { %v57_v13 = vsel %vm55_vm0, %v48_v9, %v50_v11  ;;  %v58_v20 = vsel %vm55_vm0, %v50_v11, %v52_v12 }
  0x7b   :  { %83 = vmatprep.subr.bf16.mxu0 %v57_v13 }
  0x7c   :  { %84 = vmatpush1.bf16.msra.mxu0 %v56_v14 }
  0x7d   :  { %v54_v16 = vpop.permute.xlu0 %53  ;;  %1539 = vmatprep.subr.bf16.mxu0 %v1625_v17  ;;  %v326_v19 = vpop.permute.xlu1 %325 }
  0x7e   :  { %v59_v18 = vsel %vm55_vm0, %v52_v12, %v54_v16 }
  0x7f   :  { %1475 = vmatmul.mubr.msk.bf16.vlgmr.msra.gmra.mxu0 %vm65_vm1, %v1469_v15  ;;  %124 = vmatprep.subr.bf16.mxu1 %v59_v18 }
  0x80   :  { %125 = vmatpush1.bf16.msra.mxu1 %v58_v20  ;;  %1540 = vmatpush3.bf16.msra.mxu0 %v54_v16  ;;  %v1497_v16 = vld [vmem:[%s1897_s1 + $0x18] sm:$0xf] }
  0x81   :  { %213 = vmatprep.subr.bf16.mxu1 %v1650_v0  ;;  %1541 = vmatprep.mubr.msk.bf16.mxu0 %vm1626_vm2, %v1625_v17  ;;  %v328_v21 = vpop.permute.xlu0 %327  ;;  %v324_v22 = vpop.permute.xlu1 %323 }
  0x82   :  { %254 = vmatprep.subr.bf16.mxu0 %v1671_v4  ;;  %v335_v24 = vsel %vm333_vm3, %v326_v19, %v328_v21  ;;  %v334_v30 = vsel %vm333_vm3, %v324_v22, %v326_v19 }
  0x83   :  { %1476 = vmatmul.mubr.msk.bf16.vlgmr.msra.gmra.mxu1 %vm65_vm1, %v1469_v15 }
  0x84   :  { %214 = vmatpush1.bf16.msra.mxu1 %v1657_v2  ;;  %231 = vmatprep.mubr.bf16.mxu1 %v1616_v1 }
  0x85   :  { %v330_v23 = vpop.permute.xlu0 %329  ;;  %1545 = vmatprep.subr.bf16.mxu1 %v1625_v17  ;;  %v332_v25 = vpop.permute.xlu1 %331 }
  0x86   :  { %v337_v28 = vsel %vm333_vm3, %v330_v23, %v332_v25  ;;  %v336_v33 = vsel %vm333_vm3, %v328_v21, %v330_v23 }
  0x87   :  { %1542 = vmatmul.mubr.msk.bf16.vlgmr.msra.gmra.mxu0 %vm65_vm1, %v1469_v15 }
  0x88   :  { %255 = vmatpush1.bf16.msra.mxu0 %v1665_v3  ;;  %272 = vmatprep.mubr.bf16.mxu0 %v1616_v1 }
  0x89   :  { %360 = vmatprep.subr.bf16.mxu0 %v335_v24  ;;  %v478_v27 = vpop.permute.xlu0 %477  ;;  %v480_v29 = vpop.permute.xlu1 %479 }
  0x8a   :  { %v487_v35 = vsel %vm485_vm4, %v478_v27, %v480_v29 }
  0x8b   :  { %1478 = vmatmul.mubr.msk.bf16.vlgmr.msra.gmra.mxu1 %vm65_vm1, %v15_v26 }
  0x8c   :  { %1546 = vmatpush3.bf16.msra.mxu1 %v1677_v5  ;;  %1547 = vmatprep.mubr.msk.bf16.mxu1 %vm1626_vm2, %v1625_v17 }
  0x8d   :  { %401 = vmatprep.subr.bf16.mxu1 %v337_v28  ;;  %v476_v31 = vpop.permute.xlu0 %475  ;;  %v482_v32 = vpop.permute.xlu1 %481 }
  0x8e   :  { %v486_v41 = vsel %vm485_vm4, %v476_v31, %v478_v27  ;;  %v488_v44 = vsel %vm485_vm4, %v480_v29, %v482_v32  ;;  %v1507_v27 = vld [vmem:[%s1897_s1 + $0x1c] sm:$0xf] }
  0x8f   :  { %1479 = vmatmul.mubr.msk.bf16.vlgmr.msra.gmra.mxu0 %vm65_vm1, %v15_v26 }
  0x90   :  { %361 = vmatpush1.bf16.msra.mxu0 %v334_v30  ;;  %378 = vmatprep.mubr.bf16.mxu0 %v1616_v1 }
  0x91   :  { %1551 = vmatprep.subr.bf16.mxu0 %v1625_v17  ;;  %v484_v34 = vpop.permute.xlu0 %483  ;;  %v630_v36 = vpop.permute.xlu1 %629 }
  0x92   :  { %v489_v39 = vsel %vm485_vm4, %v482_v32, %v484_v34 }
  0x93   :  { %1548 = vmatmul.mubr.msk.bf16.vlgmr.msra.gmra.mxu1 %vm65_vm1, %v15_v26 }
  0x94   :  { %402 = vmatpush1.bf16.msra.mxu1 %v336_v33  ;;  %419 = vmatprep.mubr.bf16.mxu1 %v1616_v1  ;;  %v1511_v33 = vld [vmem:[%s1897_s1 + $0x20] sm:$0xf] }
  0x95   :  { %512 = vmatprep.subr.bf16.mxu1 %v487_v35  ;;  %v632_v38 = vpop.permute.xlu0 %631  ;;  %v628_v40 = vpop.permute.xlu1 %627 }
  0x96   :  { %v639_v46 = vsel %vm637_vm5, %v630_v36, %v632_v38  ;;  %v638_v52 = vsel %vm637_vm5, %v628_v40, %v630_v36 }
  0x97   :  { %1482 = vmatmul.mubr.msk.bf16.vlgmr.msra.gmra.mxu0 %vm65_vm1, %v1481_v37 }
  0x98   :  { %1552 = vmatpush3.bf16.msra.mxu0 %v332_v25  ;;  %1553 = vmatprep.mubr.msk.bf16.mxu0 %vm1626_vm2, %v1625_v17 }
  0x99   :  { %553 = vmatprep.subr.bf16.mxu0 %v489_v39  ;;  %v634_v42 = vpop.permute.xlu0 %633  ;;  %v636_v43 = vpop.permute.xlu1 %635 }
  0x9a   :  { %v641_v50 = vsel %vm637_vm5, %v634_v42, %v636_v43  ;;  %v640_v55 = vsel %vm637_vm5, %v632_v38, %v634_v42 }
  0x9b   :  { %1483 = vmatmul.mubr.msk.bf16.vlgmr.msra.gmra.mxu1 %vm65_vm1, %v1481_v37 }
  0x9c   :  { %513 = vmatpush1.bf16.msra.mxu1 %v486_v41  ;;  %530 = vmatprep.mubr.bf16.mxu1 %v1616_v1 }
  0x9d   :  { %1557 = vmatprep.subr.bf16.mxu1 %v1625_v17  ;;  %v782_v45 = vpop.permute.xlu0 %781  ;;  %v784_v47 = vpop.permute.xlu1 %783 }
  0x9e   :  { %v791_v57 = vsel %vm789_vm6, %v782_v45, %v784_v47 }
  0x9f   :  { %1554 = vmatmul.mubr.msk.bf16.vlgmr.msra.gmra.mxu0 %vm65_vm1, %v1481_v37 }
  0xa0   :  { %554 = vmatpush1.bf16.msra.mxu0 %v488_v44  ;;  %571 = vmatprep.mubr.bf16.mxu0 %v1616_v1 }
  0xa1   :  { %664 = vmatprep.subr.bf16.mxu0 %v639_v46  ;;  %v780_v49 = vpop.permute.xlu0 %779  ;;  %v786_v51 = vpop.permute.xlu1 %785 }
  0xa2   :  { %v790_v63 = vsel %vm789_vm6, %v780_v49, %v782_v45  ;;  %v792_v3 = vsel %vm789_vm6, %v784_v47, %v786_v51 }
  0xa3   :  { %1486 = vmatmul.mubr.msk.bf16.vlgmr.msra.gmra.mxu1 %vm65_vm1, %v1485_v48 }
  0xa4   :  { %1558 = vmatpush3.bf16.msra.mxu1 %v484_v34  ;;  %1559 = vmatprep.mubr.msk.bf16.mxu1 %vm1626_vm2, %v1625_v17 }
  0xa5   :  { %705 = vmatprep.subr.bf16.mxu1 %v641_v50  ;;  %v788_v53 = vpop.permute.xlu0 %787  ;;  %v964_v54 = vpop.permute.xlu1 %963 }
  0xa6   :  { %v793_v61 = vsel %vm789_vm6, %v786_v51, %v788_v53 }
  0xa7   :  { %1487 = vmatmul.mubr.msk.bf16.vlgmr.msra.gmra.mxu0 %vm65_vm1, %v1485_v48 }
  0xa8   :  { %665 = vmatpush1.bf16.msra.mxu0 %v638_v52  ;;  %682 = vmatprep.mubr.bf16.mxu0 %v1616_v1 }
  0xa9   :  { %1563 = vmatprep.subr.bf16.mxu0 %v1625_v17  ;;  %v966_v56 = vpop.permute.xlu0 %965  ;;  %v962_v58 = vpop.permute.xlu1 %961 }
  0xaa   :  { %v975_v4 = vsel %vm973_vm7, %v964_v54, %v966_v56  ;;  %v974_v9 = vsel %vm973_vm7, %v962_v58, %v964_v54 }
  0xab   :  { %1560 = vmatmul.mubr.msk.bf16.vlgmr.msra.gmra.mxu1 %vm65_vm1, %v1485_v48 }
  0xac   :  { %706 = vmatpush1.bf16.msra.mxu1 %v640_v55  ;;  %723 = vmatprep.mubr.bf16.mxu1 %v1616_v1 }
  0xad   :  { %816 = vmatprep.subr.bf16.mxu1 %v791_v57  ;;  %v968_v60 = vpop.permute.xlu0 %967  ;;  %v970_v62 = vpop.permute.xlu1 %969 }
  0xae   :  { %v977_v8 = vsel %vm973_vm7, %v968_v60, %v970_v62  ;;  %v976_v12 = vsel %vm973_vm7, %v966_v56, %v968_v60 }
  0xaf   :  { %1490 = vmatmul.mubr.msk.bf16.vlgmr.msra.gmra.mxu0 %vm65_vm1, %v1489_v59 }
  0xb0   :  { %1564 = vmatpush3.bf16.msra.mxu0 %v636_v43  ;;  %1565 = vmatprep.mubr.msk.bf16.mxu0 %vm1626_vm2, %v1625_v17 }
  0xb1   :  { %857 = vmatprep.subr.bf16.mxu0 %v793_v61  ;;  %v972_v0 = vpop.permute.xlu0 %971  ;;  %v1119_v2 = vpop.permute.xlu1 %1118 }
  0xb2   :  { %v978_v18 = vsel %vm973_vm7, %v970_v62, %v972_v0 }
  0xb3   :  { %1491 = vmatmul.mubr.msk.bf16.vlgmr.msra.gmra.mxu1 %vm65_vm1, %v1489_v59 }
  0xb4   :  { %817 = vmatpush1.bf16.msra.mxu1 %v790_v63  ;;  %834 = vmatprep.mubr.bf16.mxu1 %v1616_v1 }
  0xb5   :  { %1569 = vmatprep.subr.bf16.mxu1 %v1625_v17  ;;  %v1121_v5 = vpop.permute.xlu0 %1120  ;;  %v1117_v6 = vpop.permute.xlu1 %1116 }
  0xb6   :  { %v1130_v13 = vsel %vm1128_vm8, %v1119_v2, %v1121_v5  ;;  %v1129_v20 = vsel %vm1128_vm8, %v1117_v6, %v1119_v2 }
  0xb7   :  { %1566 = vmatmul.mubr.msk.bf16.vlgmr.msra.gmra.mxu0 %vm65_vm1, %v1489_v59 }
  0xb8   :  { %858 = vmatpush1.bf16.msra.mxu0 %v792_v3  ;;  %875 = vmatprep.mubr.bf16.mxu0 %v1616_v1 }
  0xb9   :  { %1001 = vmatprep.subr.bf16.mxu0 %v975_v4  ;;  %v1123_v10 = vpop.permute.xlu0 %1122  ;;  %v1125_v11 = vpop.permute.xlu1 %1124 }
  0xba   :  { %v1132_v19 = vsel %vm1128_vm8, %v1123_v10, %v1125_v11  ;;  %v1131_v23 = vsel %vm1128_vm8, %v1121_v5, %v1123_v10 }
  0xbb   :  { %1494 = vmatmul.mubr.msk.bf16.vlgmr.msra.gmra.mxu1 %vm65_vm1, %v1493_v7 }
  0xbc   :  { %1570 = vmatpush3.bf16.msra.mxu1 %v788_v53  ;;  %1571 = vmatprep.mubr.msk.bf16.mxu1 %vm1626_vm2, %v1625_v17 }
  0xbd   :  { %1042 = vmatprep.subr.bf16.mxu1 %v977_v8  ;;  %v1127_v14 = vpop.permute.xlu0 %1126  ;;  %v1274_v15 = vpop.permute.xlu1 %1273 }
  0xbe   :  { %v1133_v28 = vsel %vm1128_vm8, %v1125_v11, %v1127_v14 }
  0xbf   :  { %1495 = vmatmul.mubr.msk.bf16.vlgmr.msra.gmra.mxu0 %vm65_vm1, %v1493_v7 }
  0xc0   :  { %1002 = vmatpush1.bf16.msra.mxu0 %v974_v9  ;;  %1019 = vmatprep.mubr.bf16.mxu0 %v1616_v1 }
  0xc1   :  { %1575 = vmatprep.subr.bf16.mxu0 %v1625_v17  ;;  %v1276_v21 = vpop.permute.xlu0 %1275  ;;  %v1272_v22 = vpop.permute.xlu1 %1271 }
  0xc2   :  { %v1285_v24 = vsel %vm1283_vm9, %v1274_v15, %v1276_v21  ;;  %v1284_v30 = vsel %vm1283_vm9, %v1272_v22, %v1274_v15 }
  0xc3   :  { %1572 = vmatmul.mubr.msk.bf16.vlgmr.msra.gmra.mxu1 %vm65_vm1, %v1493_v7 }
  0xc4   :  { %1043 = vmatpush1.bf16.msra.mxu1 %v976_v12  ;;  %1060 = vmatprep.mubr.bf16.mxu1 %v1616_v1 }
  0xc5   :  { %1156 = vmatprep.subr.bf16.mxu1 %v1130_v13  ;;  %v1278_v25 = vpop.permute.xlu0 %1277  ;;  %v1280_v26 = vpop.permute.xlu1 %1279 }
  0xc6   :  { %v1287_v29 = vsel %vm1283_vm9, %v1278_v25, %v1280_v26  ;;  %v1286_v31 = vsel %vm1283_vm9, %v1276_v21, %v1278_v25 }
  0xc7   :  { %1504 = vmatmul.mubr.msk.bf16.vlgmr.msra.gmra.mxu0 %vm65_vm1, %v1497_v16 }
  0xc8   :  { %1576 = vmatpush3.bf16.msra.mxu0 %v978_v18  ;;  %1577 = vmatprep.mubr.msk.bf16.mxu0 %vm1626_vm2, %v1625_v17 }
  0xc9   :  { %1197 = vmatprep.subr.bf16.mxu0 %v1132_v19  ;;  %v1282_v32 = vpop.permute.xlu0 %1281 }
  0xca   :  { %v1288_v34 = vsel %vm1283_vm9, %v1280_v26, %v1282_v32 }
  0xcb   :  { %1505 = vmatmul.mubr.msk.bf16.vlgmr.msra.gmra.mxu1 %vm65_vm1, %v1497_v16 }
  0xcc   :  { %1157 = vmatpush1.bf16.msra.mxu1 %v1129_v20  ;;  %1174 = vmatprep.mubr.bf16.mxu1 %v1616_v1 }
  0xcd   :  { %1581 = vmatprep.subr.bf16.mxu1 %v1625_v17 }
  0xcf   :  { %1578 = vmatmul.mubr.msk.bf16.vlgmr.msra.gmra.mxu0 %vm65_vm1, %v1497_v16 }
  0xd0   :  { %1198 = vmatpush1.bf16.msra.mxu0 %v1131_v23  ;;  %1215 = vmatprep.mubr.bf16.mxu0 %v1616_v1 }
  0xd1   :  { %1311 = vmatprep.subr.bf16.mxu0 %v1285_v24 }
  0xd3   :  { %1508 = vmatmul.mubr.msk.bf16.vlgmr.msra.gmra.mxu1 %vm65_vm1, %v1507_v27 }
  0xd4   :  { %1582 = vmatpush3.bf16.msra.mxu1 %v1133_v28  ;;  %1583 = vmatprep.mubr.msk.bf16.mxu1 %vm1626_vm2, %v1625_v17 }
  0xd5   :  { %1352 = vmatprep.subr.bf16.mxu1 %v1287_v29 }
  0xd7   :  { %1509 = vmatmul.mubr.msk.bf16.vlgmr.msra.gmra.mxu0 %vm65_vm1, %v1507_v27 }
  0xd8   :  { %1312 = vmatpush1.bf16.msra.mxu0 %v1284_v30  ;;  %1329 = vmatprep.mubr.bf16.mxu0 %v1616_v1 }
  0xd9   :  { %1587 = vmatprep.subr.bf16.mxu0 %v1625_v17 }
  0xdb   :  { %1584 = vmatmul.mubr.msk.bf16.vlgmr.msra.gmra.mxu1 %vm65_vm1, %v1507_v27 }
  0xdc   :  { %1353 = vmatpush1.bf16.msra.mxu1 %v1286_v31  ;;  %1370 = vmatprep.mubr.bf16.mxu1 %v1616_v1 }
  0xdf   :  { %1512 = vmatmul.mubr.msk.bf16.vlgmr.msra.gmra.mxu0 %vm65_vm1, %v1511_v33 }
  0xe0   :  { %1588 = vmatpush3.bf16.msra.mxu0 %v1288_v34  ;;  %1589 = vmatprep.mubr.msk.bf16.mxu0 %vm1626_vm2, %v1625_v17 }
  0xe3   :  { %1513 = vmatmul.mubr.msk.bf16.vlgmr.msra.gmra.mxu1 %vm65_vm1, %v1511_v33 }
  0xe7   :  { %1590 = vmatmul.mubr.msk.bf16.vlgmr.msra.gmra.mxu0 %vm65_vm1, %v1511_v33 }
 0x13f   :  { %v103_v35 = vpop.f32.mrf.mxu0 }
 0x141   :  { %v105_v36 = vpop.f32.mrf.mxu0 }
 0x143   :  { %v107_v37 = vpop.f32.mrf.mxu0  ;;  %v144_v38 = vpop.f32.mrf.mxu1 }
 0x145   :  { %v108_v39 = vpop.f32.mrf.mxu0  ;;  %v146_v40 = vpop.f32.mrf.mxu1 }
 0x147   :  { %v148_v41 = vpop.f32.mrf.mxu1  ;;  %v185_v1 = vpop.f32.mrf.mxu0 }
 0x149   :  { %v149_v42 = vpop.f32.mrf.mxu1  ;;  %v1543_v43 = vpop.f32.mrf.mxu0 }
 0x14b   :  { %v188_v44 = vpop.f32.mrf.mxu0  ;;  %v233_v45 = vpop.f32.mrf.mxu1 }
 0x14c   :  { %v1859_v46 = vadd.f32 %v233_v45, %v103_v35 }
 0x14d   :  { %v1544_v47 = vpop.f32.mrf.mxu0  ;;  %v235_v17 = vpop.f32.mrf.mxu1 }
 0x14e   :  { %v1861_v48 = vadd.f32 %v235_v17, %v105_v36 }
 0x14f   :  { %v237_v49 = vpop.f32.mrf.mxu1  ;;  %v274_v50 = vpop.f32.mrf.mxu0 }
 0x150   :  { %v1863_v51 = vadd.f32 %v274_v50, %v144_v38 }
 0x151   :  { %v238_v52 = vpop.f32.mrf.mxu1  ;;  %v276_v53 = vpop.f32.mrf.mxu0 }
 0x152   :  { %v1865_v54 = vadd.f32 %v276_v53, %v146_v40 }
 0x153   :  { %v278_v55 = vpop.f32.mrf.mxu0  ;;  %v315_v56 = vpop.f32.mrf.mxu1 }
 0x154   :  { %v1867_v57 = vadd.f32 %v315_v56, %v185_v1 }
 0x155   :  { %v279_v58 = vpop.f32.mrf.mxu0  ;;  %v1549_v59 = vpop.f32.mrf.mxu1 }
 0x157   :  { %v318_v60 = vpop.f32.mrf.mxu1  ;;  %v380_v61 = vpop.f32.mrf.mxu0 }
 0x159   :  { %v1550_v62 = vpop.f32.mrf.mxu1  ;;  %v382_v63 = vpop.f32.mrf.mxu0 }
 0x15b   :  { %v384_v0 = vpop.f32.mrf.mxu0  ;;  %v1869_v2 = vpop.f32.mrf.mxu1 }
 0x15d   :  { %v385_v3 = vpop.f32.mrf.mxu0  ;;  %v1871_v4 = vpop.f32.mrf.mxu1 }
 0x15e   :  { %v468_v3 = vadd.f32 %v380_v61, %v1859_v46 }
 0x15f   :  { %v425_v5 = vpop.f32.mrf.mxu1  ;;  %v1873_v6 = vpop.f32.mrf.mxu0 }
 0x160   :  { %v472_v61 = vadd.f32 %v1873_v6, %v1867_v57 }
 0x161   :  { %v426_v7 = vpop.f32.mrf.mxu1  ;;  %v1555_v8 = vpop.f32.mrf.mxu0 }
 0x162   :  { %v469_v8 = vadd.f32 %v382_v63, %v1861_v48 }
 0x163   :  { %v465_v9 = vpop.f32.mrf.mxu0  ;;  %v532_v10 = vpop.f32.mrf.mxu1 }
 0x164   :  { %v620_v9 = vadd.f32 %v532_v10, %v468_v3 }
 0x165   :  { %v1556_v11 = vpop.f32.mrf.mxu0  ;;  %v534_v12 = vpop.f32.mrf.mxu1 }
 0x167   :  { %v536_v13 = vpop.f32.mrf.mxu1  ;;  %v573_v14 = vpop.f32.mrf.mxu0 }
 0x169   :  { %v537_v15 = vpop.f32.mrf.mxu1  ;;  %v575_v16 = vpop.f32.mrf.mxu0 }
 0x16a   :  { %v470_v15 = vadd.f32 %v1869_v2, %v1863_v51 }
 0x16b   :  { %v577_v18 = vpop.f32.mrf.mxu0  ;;  %v1875_v19 = vpop.f32.mrf.mxu1 }
 0x16c   :  { %v621_v18 = vadd.f32 %v534_v12, %v469_v8  ;;  %v624_v51 = vadd.f32 %v1875_v19, %v472_v61 }
 0x16d   :  { %v578_v20 = vpop.f32.mrf.mxu0  ;;  %v1561_v21 = vpop.f32.mrf.mxu1 }
 0x16f   :  { %v617_v22 = vpop.f32.mrf.mxu1  ;;  %v684_v23 = vpop.f32.mrf.mxu0 }
 0x170   :  { %v772_v20 = vadd.f32 %v684_v23, %v620_v9 }
 0x171   :  { %v1562_v24 = vpop.f32.mrf.mxu1  ;;  %v686_v25 = vpop.f32.mrf.mxu0 }
 0x172   :  { %v471_v24 = vadd.f32 %v1871_v4, %v1865_v54  ;;  %v1428_v4 = vpop.permute.xlu1 %1427 }
 0x173   :  { %v688_v26 = vpop.f32.mrf.mxu0  ;;  %v725_v27 = vpop.f32.mrf.mxu1 }
 0x174   :  { %v622_v26 = vadd.f32 %v573_v14, %v470_v15  ;;  %v623_v10 = vadd.f32 %v575_v16, %v471_v24 }
 0x175   :  { %v689_v28 = vpop.f32.mrf.mxu0  ;;  %v727_v29 = vpop.f32.mrf.mxu1 }
 0x176   :  { %v773_v28 = vadd.f32 %v686_v25, %v621_v18  ;;  %v775_v23 = vadd.f32 %v727_v29, %v623_v10 }
 0x177   :  { %v729_v30 = vpop.f32.mrf.mxu1  ;;  %v766_v31 = vpop.f32.mrf.mxu0 }
 0x178   :  { %v774_v30 = vadd.f32 %v725_v27, %v622_v26  ;;  %v776_v14 = vadd.f32 %v766_v31, %v624_v51 }
 0x179   :  { %v730_v32 = vpop.f32.mrf.mxu1  ;;  %v1567_v33 = vpop.f32.mrf.mxu0 }
 0x17b   :  { %v769_v34 = vpop.f32.mrf.mxu0  ;;  %v836_v35 = vpop.f32.mrf.mxu1 }
 0x17c   :  { %v924_v46 = vadd.f32 %v836_v35, %v772_v20 }
 0x17d   :  { %v1568_v36 = vpop.f32.mrf.mxu0  ;;  %v838_v37 = vpop.f32.mrf.mxu1 }
 0x17e   :  { %v925_v32 = vadd.f32 %v838_v37, %v773_v28 }
 0x17f   :  { %v840_v38 = vpop.f32.mrf.mxu1  ;;  %v877_v39 = vpop.f32.mrf.mxu0 }
 0x180   :  { %v926_v34 = vadd.f32 %v877_v39, %v774_v30 }
 0x181   :  { %v841_v40 = vpop.f32.mrf.mxu1  ;;  %v879_v41 = vpop.f32.mrf.mxu0 }
 0x182   :  { %v927_v38 = vadd.f32 %v879_v41, %v775_v23 }
 0x183   :  { %v881_v1 = vpop.f32.mrf.mxu0  ;;  %v918_v42 = vpop.f32.mrf.mxu1 }
 0x184   :  { %v928_v16 = vadd.f32 %v918_v42, %v776_v14 }
 0x185   :  { %v882_v43 = vpop.f32.mrf.mxu0  ;;  %v1573_v44 = vpop.f32.mrf.mxu1 }
 0x187   :  { %v921_v45 = vpop.f32.mrf.mxu1  ;;  %v1021_v47 = vpop.f32.mrf.mxu0 }
 0x188   :  { %v1109_v33 = vadd.f32 %v1021_v47, %v924_v46 }
 0x189   :  { %v1574_v17 = vpop.f32.mrf.mxu1  ;;  %v1023_v49 = vpop.f32.mrf.mxu0 }
 0x18a   :  { %v1110_v36 = vadd.f32 %v1023_v49, %v925_v32 }
 0x18b   :  { %v1025_v50 = vpop.f32.mrf.mxu0  ;;  %v1062_v52 = vpop.f32.mrf.mxu1 }
 0x18c   :  { %v1111_v57 = vadd.f32 %v1062_v52, %v926_v34 }
 0x18d   :  { %v1026_v53 = vpop.f32.mrf.mxu0  ;;  %v1064_v55 = vpop.f32.mrf.mxu1 }
 0x18e   :  { %v1112_v1 = vadd.f32 %v1064_v55, %v927_v38 }
 0x18f   :  { %v1066_v56 = vpop.f32.mrf.mxu1  ;;  %v1103_v58 = vpop.f32.mrf.mxu0 }
 0x190   :  { %v1113_v45 = vadd.f32 %v1103_v58, %v928_v16 }
 0x191   :  { %v1067_v59 = vpop.f32.mrf.mxu1  ;;  %v1579_v60 = vpop.f32.mrf.mxu0 }
 0x193   :  { %v1106_v62 = vpop.f32.mrf.mxu0  ;;  %v1176_v0 = vpop.f32.mrf.mxu1 }
 0x194   :  { %v1264_v54 = vadd.f32 %v1176_v0, %v1109_v33 }
 0x195   :  { %v1580_v5 = vpop.f32.mrf.mxu0  ;;  %v1178_v7 = vpop.f32.mrf.mxu1 }
 0x196   :  { %v1265_v6 = vadd.f32 %v1178_v7, %v1110_v36 }
 0x197   :  { %v1180_v11 = vpop.f32.mrf.mxu1  ;;  %v1217_v13 = vpop.f32.mrf.mxu0 }
 0x198   :  { %v1266_v43 = vadd.f32 %v1217_v13, %v1111_v57 }
 0x199   :  { %v1181_v21 = vpop.f32.mrf.mxu1  ;;  %v1219_v22 = vpop.f32.mrf.mxu0 }
 0x19a   :  { %v1267_v47 = vadd.f32 %v1219_v22, %v1112_v1 }
 0x19b   :  { %v1221_v48 = vpop.f32.mrf.mxu0  ;;  %v1258_v63 = vpop.f32.mrf.mxu1 }
 0x19c   :  { %v1268_v31 = vadd.f32 %v1258_v63, %v1113_v45 }
 0x19d   :  { %v1222_v2 = vpop.f32.mrf.mxu0  ;;  %v1585_v12 = vpop.f32.mrf.mxu1 }
 0x19f   :  { %v1261_v25 = vpop.f32.mrf.mxu1  ;;  %v1331_v35 = vpop.f32.mrf.mxu0 }
 0x1a0   :  { %v1419_v40 = vadd.f32 %v1331_v35, %v1264_v54 }
 0x1a1   :  { %v1586_v27 = vpop.f32.mrf.mxu1  ;;  %v1333_v37 = vpop.f32.mrf.mxu0 }
 0x1a2   :  { %v1420_v19 = vadd.f32 %v1333_v37, %v1265_v6  ;;  %v1430_v44 = vadd.f32 %v1428_v4, %v1419_v40 }
 0x1a3   :  { %v1335_v29 = vpop.f32.mrf.mxu0  ;;  %v1372_v39 = vpop.f32.mrf.mxu1 }
 0x1a4   :  { %v1431_v17 = vadd.f32 %v1428_v4, %v1420_v19  ;;  %v1421_v49 = vadd.f32 %v1372_v39, %v1266_v43  ;;  %v1435_v41 = vmax.f32 %v1430_v44, 0.0 }
 0x1a5   :  { %v1336_v50 = vpop.f32.mrf.mxu0  ;;  %v1374_v53 = vpop.f32.mrf.mxu1 }
 0x1a6   :  { %v1436_v52 = vmax.f32 %v1431_v17, 0.0  ;;  %v1432_v56 = vadd.f32 %v1428_v4, %v1421_v49  ;;  %v1422_v59 = vadd.f32 %v1374_v53, %v1267_v47 }
 0x1a7   :  { %v1376_v42 = vpop.f32.mrf.mxu1  ;;  %v1413_v60 = vpop.f32.mrf.mxu0 }
 0x1a8   :  { %v1518_v62 = vpack.c.bf16 %v1436_v52, %v1435_v41  ;;  %v1433_v55 = vadd.f32 %v1428_v4, %v1422_v59  ;;  %v1423_v0 = vadd.f32 %v1413_v60, %v1268_v31  ;;  %v1437_v58 = vmax.f32 %v1432_v56, 0.0 }
 0x1a9   :  { %v1377_v3 = vpop.f32.mrf.mxu1  ;;  %v1591_v5 = vpop.f32.mrf.mxu0 }
 0x1aa   :  { %v1438_v7 = vmax.f32 %v1433_v55, 0.0  ;;  %1461 = vst [vmem:[%s1898_s3] sm:$0xff] %v1518_v62  ;;  %v1434_v8 = vadd.f32 %v1428_v4, %v1423_v0 }
 0x1ab   :  { %v1416_v9 = vpop.f32.mrf.mxu0 }
 0x1ac   :  { %v1519_v11 = vpack.c.bf16 %v1438_v7, %v1437_v58  ;;  %v1439_v13 = vmax.f32 %v1434_v8, 0.0 }
 0x1ad   :  { %v1592_v15 = vpop.f32.mrf.mxu0 }
 0x1ae   :  { %1462 = vst [vmem:[%s1898_s3 + $0x8] sm:$0xff] %v1519_v11  ;;  %v1520_v18 = vpack.c.bf16 %v1439_v13, %v1439_v13 }
 0x1b0   :  { %1464 = vst.msk [vmem:[%s1898_s3 + $0x10] sm:$0xf] %vm1463_vm10, %v1520_v18 }

// kernel: encoder_forward.21
= control target key start
LH: loop header
LB: loop body
LE: loop exit
PB: predicated region body
PF: predicated region fallthrough
CT: control target
= control target key end

     0   :  { %v9437_v2 = vmov 0   ;;  %s5961_s16 = smov 127   ;;  %s5962_s19 = smov 126   ;;  %vm114_vm0 = vcmask 1039360   ;;  %vm144_vm1 = vcmask 1043456   ;;  %vm119_vm2 = vcmask 64512   ;;  %s9433_s0 = inlined_call_operand.vmem [shape: bf16[8,648], index: 0, kind: input, shape index: {}]   ;;  %s9434_s1 = inlined_call_operand.vmem [shape: bf16[9,128,8], index: 1, kind: input, shape index: {}]   ;;  %s9435_s2 = inlined_call_operand.vmem [shape: f32[128,1], index: 2, kind: input, shape index: {}]   ;;  %s9436_s3 = inlined_call_operand.vmem [shape: bf16[128,610], index: 3, kind: output, shape index: {}]  }
   0x1   :  { %v32_v0 = vld [vmem:[%s9433_s0 + $0x8] sm:$0xff]  ;;  %v31_v1 = vld [vmem:[%s9433_s0] sm:$0xff]  ;;  %192 = vmatprep.mubr.bf16.mxu0 %v9437_v2  ;;  %252 = vmatprep.mubr.bf16.mxu1 %v9437_v2  ;;  %v6012_v7 = vld [vmem:[%s9433_s0 + $0x10] ss:$0 sps:$4 sm:$0xff]   ;;  %s5963_s20 = smov 110   ;;  %s5964_s21 = smov 109  }
   0x2   :  { %v5997_v3 = vcombine.low %v32_v0, %v32_v0  ;;  %v5999_v4 = vcombine.low %v31_v1, %v31_v1  ;;  %5879 = vset.pattern.permute.xlu1 %v9437_v2  ;;  %5880 = vset.pattern.permute.xlu0 %v9437_v2  ;;  %v6005_v5 = vcombine.high %v32_v0, %v32_v0  ;;  %v5886_v15 = vld [vmem:[%s9434_s1 + $0x40] sm:$0xff]   ;;  %v6043_v16 = vld [vmem:[%s9434_s1 + $0x70] sm:$0xff]   ;;  %v5888_v24 = vld [vmem:[%s9434_s1 + $0x48] sm:$0xff]   ;;  %vm952_vm3 = vcmask 1031168   ;;  %s5965_s15 = smov 108   ;;  %s5966_s5 = smov 92  }
   0x3   :  { %v6007_v6 = vcombine.high %v31_v1, %v31_v1  ;;  %v5889_v25 = vld [vmem:[%s9434_s1 + $0x78] sm:$0xff]   ;;  %v5890_v29 = vld [vmem:[%s9434_s1 + $0x50] sm:$0xff]   ;;  %v5892_v32 = vld [vmem:[%s9434_s1 + $0x60] sm:$0xff]   ;;  %v560_v40 = vsel %vm144_vm1, %v6012_v7, 0  ;;  %vm1466_vm4 = vcmask 900096   ;;  %vm1980_vm5 = vcmask 891904  }
   0x4   :  { %108 = vrot.lane.b32.xlu1 %v5997_v3, %s5961_s16  ;;  %104 = vrot.lane.b32.xlu0 %v5999_v4, %s5961_s16  ;;  %v548_v30 = vsel %vm144_vm1, %v5999_v4, 0  ;;  %v5891_v31 = vld [vmem:[%s9434_s1 + $0x58] sm:$0xff]   ;;  %v5893_v33 = vld [vmem:[%s9434_s1 + $0x68] sm:$0xff]   ;;  %v554_v34 = vsel %vm144_vm1, %v5997_v3, 0  ;;  %s5967_s23 = smov 91   ;;  %vm3028_vm6 = vcmask 752640  }
   0x5   :  { %v5894_v37 = vld [vmem:[%s9434_s1] sm:$0xff]   ;;  %v5895_v42 = vld [vmem:[%s9434_s1 + $0x8] sm:$0xff]   ;;  %v5896_v43 = vld [vmem:[%s9434_s1 + $0x10] sm:$0xff]   ;;  %vm2494_vm7 = vcmask 883712   ;;  %s5968_s13 = smov 90   ;;  %vm4062_vm8 = vcmask 736256  }
   0x6   :  { %v5897_v44 = vld [vmem:[%s9434_s1 + $0x18] sm:$0xff]   ;;  %v5898_v45 = vld [vmem:[%s9434_s1 + $0x20] sm:$0xff]   ;;  %v5899_v46 = vld [vmem:[%s9434_s1 + $0x28] sm:$0xff]   ;;  %vm3545_vm9 = vcmask 744448   ;;  %vm5024_vm10 = vcmask 797696  }
   0x7   :  { %v5900_v47 = vld [vmem:[%s9434_s1 + $0x30] sm:$0xff]   ;;  %v5901_v49 = vld [vmem:[%s9434_s1 + $0x38] sm:$0xff]   ;;  %v6203_v52 = vld [vmem:[%s9434_s1 + $0x80] sm:$0xff]  }
   0x8   :  { %110 = vrot.lane.b32.xlu1 %v6005_v5, %s5961_s16  ;;  %106 = vrot.lane.b32.xlu0 %v6007_v6, %s5961_s16  ;;  %v6227_v59 = vld [vmem:[%s9434_s1 + $0x88] sm:$0xff]   ;;  %v6241_v60 = vld [vmem:[%s9434_s1 + $0x90] sm:$0xff]  }
   0x9   :  { %v6255_v61 = vld [vmem:[%s9434_s1 + $0x98] sm:$0xff]   ;;  %v6266_v63 = vld [vmem:[%s9434_s1 + $0xa0] sm:$0xff]   ;;  %v6280_v1 = vld [vmem:[%s9434_s1 + $0xa8] sm:$0xff]  }
   0xc   :  { %112 = vrot.lane.b32.xlu0 %v6012_v7, %s5961_s16  ;;  %942 = vrot.lane.b32.xlu1 %v5999_v4, %s5962_s19 }
  0x10   :  { %944 = vrot.lane.b32.xlu0 %v6007_v6, %s5962_s19  ;;  %946 = vrot.lane.b32.xlu1 %v5997_v3, %s5962_s19 }
  0x14   :  { %948 = vrot.lane.b32.xlu0 %v6005_v5, %s5962_s19  ;;  %950 = vrot.lane.b32.xlu1 %v6012_v7, %s5962_s19 }
  0x18   :  { %1456 = vrot.lane.b32.xlu0 %v5999_v4, %s5963_s20  ;;  %1458 = vrot.lane.b32.xlu1 %v6007_v6, %s5963_s20 }
  0x1c   :  { %1460 = vrot.lane.b32.xlu0 %v5997_v3, %s5963_s20  ;;  %1462 = vrot.lane.b32.xlu1 %v6005_v5, %s5963_s20 }
  0x20   :  { %1464 = vrot.lane.b32.xlu0 %v6012_v7, %s5963_s20  ;;  %1970 = vrot.lane.b32.xlu1 %v5999_v4, %s5964_s21 }
  0x24   :  { %1972 = vrot.lane.b32.xlu0 %v6007_v6, %s5964_s21  ;;  %1974 = vrot.lane.b32.xlu1 %v5997_v3, %s5964_s21 }
  0x28   :  { %1976 = vrot.lane.b32.xlu0 %v6005_v5, %s5964_s21  ;;  %1978 = vrot.lane.b32.xlu1 %v6012_v7, %s5964_s21 }
  0x2c   :  { %2484 = vrot.lane.b32.xlu0 %v5999_v4, %s5965_s15  ;;  %2486 = vrot.lane.b32.xlu1 %v6007_v6, %s5965_s15 }
  0x30   :  { %2488 = vrot.lane.b32.xlu0 %v5997_v3, %s5965_s15  ;;  %2490 = vrot.lane.b32.xlu1 %v6005_v5, %s5965_s15 }
  0x34   :  { %2492 = vrot.lane.b32.xlu0 %v6012_v7, %s5965_s15  ;;  %3016 = vrot.lane.b32.xlu1 %v5999_v4, %s5966_s5 }
  0x38   :  { %3018 = vrot.lane.b32.xlu0 %v6007_v6, %s5966_s5  ;;  %3020 = vrot.lane.b32.xlu1 %v5997_v3, %s5966_s5 }
  0x3c   :  { %3022 = vrot.lane.b32.xlu0 %v6005_v5, %s5966_s5 }
  0x76   :  { %v109_v8 = vpop.permute.xlu1 %108  ;;  %v105_v9 = vpop.permute.xlu0 %104 }
  0x7a   :  { %v107_v10 = vpop.permute.xlu0 %106  ;;  %v111_v11 = vpop.permute.xlu1 %110 }
  0x7b   :  { %v116_v12 = vsel %vm114_vm0, %v107_v10, %v109_v8  ;;  %v115_v13 = vsel %vm114_vm0, %v105_v9, %v107_v10  ;;  %v117_v17 = vsel %vm114_vm0, %v109_v8, %v111_v11 }
  0x7c   :  { %5104 = vmatprep.subr.msk.bf16.mxu0 %vm144_vm1, %v116_v12  ;;  %5859 = vmatprep.subr.msk.bf16.mxu1 %vm144_vm1, %v116_v12  ;;  %v146_v14 = vsel %vm144_vm1, %v115_v13, 0  ;;  %v152_v22 = vsel %vm144_vm1, %v117_v17, 0 }
  0x7d   :  { %175 = vmatpush1.bf16.msra.mxu0 %v146_v14  ;;  %5860 = vmatpush1.bf16.msra.mxu1 %v146_v14  ;;  %v6314_v14 = vld [vmem:[%s9434_s1 + $0xb8] sm:$0xff]  }
  0x7e   :  { %v113_v18 = vpop.permute.xlu0 %112  ;;  %v6052_v21 = vpop.permute.xlu1 %942 }
  0x7f   :  { %5861 = vmatprep.subr.msk.bf16.mxu0 %vm144_vm1, %v113_v18  ;;  %v118_v19 = vsel %vm114_vm0, %v111_v11, %v113_v18  ;;  %v158_v20 = vsel %vm144_vm1, %v113_v18, 0 }
  0x80   :  { %5105 = vmatmul.mubr.msk.bf16.vlgmr.msra.gmra.mxu0 %vm119_vm2, %v5886_v15  ;;  %5111 = vmatmul.mubr.msk.bf16.vlgmr.msra.gmra.mxu1 %vm119_vm2, %v6043_v16 }
  0x81   :  { %5113 = vmatprep.subr.msk.bf16.mxu1 %vm144_vm1, %v118_v19  ;;  %5698 = vmatpush3.bf16.msra.mxu0 %v158_v20 }
  0x82   :  { %288 = vmatpush1.bf16.msra.mxu1 %v152_v22  ;;  %202 = vmatprep.mubr.bf16.mxu0 %v9437_v2  ;;  %v945_v23 = vpop.permute.xlu0 %944  ;;  %v947_v26 = vpop.permute.xlu1 %946 }
  0x83   :  { %262 = vmatprep.mubr.bf16.mxu1 %v9437_v2  ;;  %5138 = vmatprep.subr.msk.bf16.mxu1 %vm144_vm1, %v6007_v6  ;;  %v954_v35 = vsel %vm952_vm3, %v945_v23, %v947_v26  ;;  %v953_v36 = vsel %vm952_vm3, %v6052_v21, %v945_v23 }
  0x84   :  { %5147 = vmatprep.subr.msk.bf16.mxu0 %vm144_vm1, %v6005_v5  ;;  %v982_v39 = vsel %vm144_vm1, %v953_v36, 0 }
  0x86   :  { %v949_v27 = vpop.permute.xlu0 %948  ;;  %v951_v38 = vpop.permute.xlu1 %950 }
  0x87   :  { %v6069_v28 = vsel %vm952_vm3, %v947_v26, %v949_v27  ;;  %v956_v41 = vsel %vm952_vm3, %v949_v27, %v951_v38  ;;  %v994_v55 = vsel %vm144_vm1, %v951_v38, 0 }
  0x88   :  { %5106 = vmatmul.mubr.msk.bf16.gmra.mxu0 %vm119_vm2, %v5888_v24  ;;  %5112 = vmatmul.mubr.msk.bf16.gmra.mxu1 %vm119_vm2, %v5889_v25  ;;  %v988_v56 = vsel %vm144_vm1, %v6069_v28, 0 }
  0x89   :  { %212 = vmatprep.mubr.bf16.mxu0 %v9437_v2  ;;  %305 = vmatprep.mubr.bf16.mxu1 %v9437_v2 }
  0x8a   :  { %v1457_v48 = vpop.permute.xlu0 %1456  ;;  %v1459_v50 = vpop.permute.xlu1 %1458 }
  0x8b   :  { %v1467_v62 = vsel %vm1466_vm4, %v1457_v48, %v1459_v50 }
  0x8c   :  { %v1496_v0 = vsel %vm144_vm1, %v1467_v62, 0 }
  0x8e   :  { %v6194_v51 = vpop.permute.xlu0 %1460  ;;  %v6205_v53 = vpop.permute.xlu1 %1462 }
  0x8f   :  { %v1468_v57 = vsel %vm1466_vm4, %v1459_v50, %v6194_v51  ;;  %v1469_v22 = vsel %vm1466_vm4, %v6194_v51, %v6205_v53 }
  0x90   :  { %5107 = vmatmul.mubr.msk.bf16.gmra.mxu0 %vm119_vm2, %v5890_v29  ;;  %5114 = vmatmul.mubr.msk.bf16.vlgmr.msra.gmra.mxu1 %vm119_vm2, %v5886_v15  ;;  %v1502_v27 = vsel %vm144_vm1, %v1469_v22, 0 }
  0x91   :  { %577 = vmatpush1.bf16.msra.mxu1 %v548_v30  ;;  %222 = vmatprep.mubr.bf16.mxu0 %v9437_v2 }
  0x92   :  { %315 = vmatprep.mubr.bf16.mxu1 %v9437_v2  ;;  %5862 = vmatprep.subr.msk.bf16.mxu1 %vm144_vm1, %v6012_v7  ;;  %v6207_v54 = vpop.permute.xlu0 %1464  ;;  %v6291_v7 = vld [vmem:[%s9434_s1 + $0xb0] sm:$0xff]  }
  0x93   :  { %v1470_v58 = vsel %vm1466_vm4, %v6205_v53, %v6207_v54 }
  0x96   :  { %v1973_v23 = vpop.permute.xlu0 %1972 }
  0x98   :  { %5108 = vmatmul.mubr.msk.bf16.gmra.mxu0 %vm119_vm2, %v5891_v31  ;;  %5115 = vmatmul.mubr.msk.bf16.gmra.mxu1 %vm119_vm2, %v5888_v24 }
  0x99   :  { %232 = vmatprep.mubr.bf16.mxu0 %v9437_v2  ;;  %325 = vmatprep.mubr.bf16.mxu1 %v9437_v2 }
  0xa0   :  { %5109 = vmatmul.mubr.msk.bf16.gmra.mxu0 %vm119_vm2, %v5892_v32  ;;  %5116 = vmatmul.mubr.msk.bf16.gmra.mxu1 %vm119_vm2, %v5890_v29 }
  0xa1   :  { %242 = vmatprep.mubr.bf16.mxu0 %v9437_v2  ;;  %335 = vmatprep.mubr.bf16.mxu1 %v9437_v2 }
  0xa8   :  { %5110 = vmatmul.mubr.msk.bf16.gmra.mxu0 %vm119_vm2, %v5893_v33  ;;  %5117 = vmatmul.mubr.msk.bf16.gmra.mxu1 %vm119_vm2, %v5891_v31 }
  0xa9   :  { %345 = vmatprep.mubr.bf16.mxu1 %v9437_v2  ;;  %5699 = vmatprep.mubr.msk.bf16.mxu0 %vm119_vm2, %v5886_v15  ;;  %v6316_v15 = vpop.permute.xlu1 %1970 }
  0xb0   :  { %5118 = vmatmul.mubr.msk.bf16.gmra.mxu1 %vm119_vm2, %v5892_v32  ;;  %5700 = vmatmul.mubr.msk.bf16.vlgmr.msra.gmra.mxu0 %vm119_vm2, %v5888_v24  ;;  %v6340_v24 = vpop.permute.xlu1 %1974 }
  0xb1   :  { %690 = vmatpush1.bf16.msra.mxu0 %v554_v34  ;;  %355 = vmatprep.mubr.bf16.mxu1 %v9437_v2  ;;  %v1982_v30 = vsel %vm1980_vm5, %v1973_v23, %v6340_v24 }
  0xb2   :  { %5703 = vmatprep.mubr.msk.bf16.mxu0 %vm119_vm2, %v5890_v29  ;;  %5188 = vmatprep.subr.msk.bf16.mxu0 %vm144_vm1, %v954_v35 }
  0xb8   :  { %5119 = vmatmul.mubr.msk.bf16.gmra.mxu1 %vm119_vm2, %v5893_v33  ;;  %5704 = vmatmul.mubr.msk.bf16.gmra.mxu0 %vm119_vm2, %v5891_v31 }
  0xb9   :  { %365 = vmatprep.mubr.bf16.mxu1 %v9437_v2  ;;  %5707 = vmatprep.mubr.msk.bf16.mxu0 %vm119_vm2, %v5892_v32 }
  0xc0   :  { %5120 = vmatmul.mubr.msk.bf16.gmra.mxu1 %vm119_vm2, %v6043_v16  ;;  %5708 = vmatmul.mubr.msk.bf16.gmra.mxu0 %vm119_vm2, %v5893_v33 }
  0xc1   :  { %375 = vmatprep.mubr.bf16.mxu1 %v9437_v2  ;;  %5711 = vmatprep.mubr.msk.bf16.mxu0 %vm119_vm2, %v6043_v16 }
  0xc8   :  { %5121 = vmatmul.mubr.msk.bf16.gmra.mxu1 %vm119_vm2, %v5889_v25  ;;  %5712 = vmatmul.mubr.msk.bf16.gmra.mxu0 %vm119_vm2, %v5889_v25 }
  0xc9   :  { %594 = vmatprep.mubr.bf16.mxu1 %v9437_v2  ;;  %707 = vmatprep.mubr.bf16.mxu0 %v9437_v2 }
  0xd0   :  { %5139 = vmatmul.mubr.msk.bf16.vlgmr.msra.gmra.mxu1 %vm119_vm2, %v5894_v37  ;;  %5148 = vmatmul.mubr.msk.bf16.vlgmr.msra.gmra.mxu0 %vm119_vm2, %v5894_v37 }
  0xd1   :  { %1011 = vmatpush1.bf16.msra.mxu0 %v982_v39  ;;  %5716 = vmatpush3.bf16.msra.mxu1 %v560_v40  ;;  %v2960_v39 = vld [vmem:[%s9433_s0 + $0x10] sm:$0xff] }
  0xd2   :  { %604 = vmatprep.mubr.bf16.mxu1 %v9437_v2  ;;  %717 = vmatprep.mubr.bf16.mxu0 %v9437_v2 }
  0xd3   :  { %5197 = vmatprep.subr.msk.bf16.mxu1 %vm144_vm1, %v956_v41  ;;  %5863 = vmatprep.subr.msk.bf16.mxu0 %vm144_vm1, %v951_v38 }
  0xd8   :  { %5140 = vmatmul.mubr.msk.bf16.gmra.mxu1 %vm119_vm2, %v5895_v42  ;;  %5149 = vmatmul.mubr.msk.bf16.gmra.mxu0 %vm119_vm2, %v5895_v42 }
  0xd9   :  { %614 = vmatprep.mubr.bf16.mxu1 %v9437_v2  ;;  %727 = vmatprep.mubr.bf16.mxu0 %v9437_v2 }
  0xe0   :  { %5141 = vmatmul.mubr.msk.bf16.gmra.mxu1 %vm119_vm2, %v5896_v43  ;;  %5150 = vmatmul.mubr.msk.bf16.gmra.mxu0 %vm119_vm2, %v5896_v43 }
  0xe1   :  { %624 = vmatprep.mubr.bf16.mxu1 %v9437_v2  ;;  %737 = vmatprep.mubr.bf16.mxu0 %v9437_v2 }
  0xe8   :  { %5142 = vmatmul.mubr.msk.bf16.gmra.mxu1 %vm119_vm2, %v5897_v44  ;;  %5151 = vmatmul.mubr.msk.bf16.gmra.mxu0 %vm119_vm2, %v5897_v44 }
  0xe9   :  { %634 = vmatprep.mubr.bf16.mxu1 %v9437_v2  ;;  %747 = vmatprep.mubr.bf16.mxu0 %v9437_v2 }
  0xf0   :  { %5143 = vmatmul.mubr.msk.bf16.gmra.mxu1 %vm119_vm2, %v5898_v45  ;;  %5152 = vmatmul.mubr.msk.bf16.gmra.mxu0 %vm119_vm2, %v5898_v45 }
  0xf1   :  { %644 = vmatprep.mubr.bf16.mxu1 %v9437_v2  ;;  %757 = vmatprep.mubr.bf16.mxu0 %v9437_v2 }
  0xf8   :  { %5144 = vmatmul.mubr.msk.bf16.gmra.mxu1 %vm119_vm2, %v5899_v46  ;;  %5153 = vmatmul.mubr.msk.bf16.gmra.mxu0 %vm119_vm2, %v5899_v46 }
  0xf9   :  { %654 = vmatprep.mubr.bf16.mxu1 %v9437_v2  ;;  %767 = vmatprep.mubr.bf16.mxu0 %v9437_v2 }
 0x100   :  { %5145 = vmatmul.mubr.msk.bf16.gmra.mxu1 %vm119_vm2, %v5900_v47  ;;  %5154 = vmatmul.mubr.msk.bf16.gmra.mxu0 %vm119_vm2, %v5900_v47 }
 0x101   :  { %664 = vmatprep.mubr.bf16.mxu1 %v9437_v2  ;;  %777 = vmatprep.mubr.bf16.mxu0 %v9437_v2 }
 0x108   :  { %5146 = vmatmul.mubr.msk.bf16.gmra.mxu1 %vm119_vm2, %v5901_v49  ;;  %5155 = vmatmul.mubr.msk.bf16.gmra.mxu0 %vm119_vm2, %v5901_v49 }
 0x109   :  { %5717 = vmatprep.mubr.msk.bf16.mxu1 %vm119_vm2, %v5894_v37  ;;  %1028 = vmatprep.mubr.bf16.mxu0 %v9437_v2 }
 0x110   :  { %5718 = vmatmul.mubr.msk.bf16.vlgmr.msra.gmra.mxu1 %vm119_vm2, %v5895_v42  ;;  %5189 = vmatmul.mubr.msk.bf16.vlgmr.msra.gmra.mxu0 %vm119_vm2, %v6203_v52  ;;  %v6388_v42 = vcombine.low %v2960_v39, %v2960_v39 }
 0x111   :  { %1124 = vmatpush1.bf16.msra.mxu1 %v988_v56  ;;  %5734 = vmatpush3.bf16.msra.mxu0 %v994_v55 }
 0x112   :  { %5721 = vmatprep.mubr.msk.bf16.mxu1 %vm119_vm2, %v5896_v43  ;;  %1038 = vmatprep.mubr.bf16.mxu0 %v9437_v2 }
 0x113   :  { %5238 = vmatprep.subr.msk.bf16.mxu1 %vm144_vm1, %v1468_v57  ;;  %5247 = vmatprep.subr.msk.bf16.mxu0 %vm144_vm1, %v1470_v58 }
 0x114   :  { %3024 = vrot.lane.b32.xlu1 %v6388_v42, %s5966_s5 }
 0x118   :  { %5722 = vmatmul.mubr.msk.bf16.gmra.mxu1 %vm119_vm2, %v5897_v44  ;;  %5190 = vmatmul.mubr.msk.bf16.gmra.mxu0 %vm119_vm2, %v6227_v59 }
 0x119   :  { %5725 = vmatprep.mubr.msk.bf16.mxu1 %vm119_vm2, %v5898_v45  ;;  %1048 = vmatprep.mubr.bf16.mxu0 %v9437_v2  ;;  %v6399_v45 = vcombine.high %v2960_v39, %v2960_v39  ;;  %v6466_v39 = vpop.permute.xlu0 %1976 }
 0x11a   :  { %3533 = vrot.lane.b32.xlu1 %v5999_v4, %s5967_s23 }
 0x11b   :  { %3026 = vrot.lane.b32.xlu0 %v6399_v45, %s5966_s5 }
 0x11e   :  { %3537 = vrot.lane.b32.xlu1 %v5997_v3, %s5967_s23 }
 0x11f   :  { %3535 = vrot.lane.b32.xlu0 %v6007_v6, %s5967_s23 }
 0x120   :  { %5726 = vmatmul.mubr.msk.bf16.gmra.mxu1 %vm119_vm2, %v5899_v46  ;;  %5191 = vmatmul.mubr.msk.bf16.gmra.mxu0 %vm119_vm2, %v6241_v60 }
 0x121   :  { %5729 = vmatprep.mubr.msk.bf16.mxu1 %vm119_vm2, %v5900_v47  ;;  %1058 = vmatprep.mubr.bf16.mxu0 %v9437_v2 }
 0x122   :  { %3541 = vrot.lane.b32.xlu1 %v6388_v42, %s5967_s23 }
 0x123   :  { %3539 = vrot.lane.b32.xlu0 %v6005_v5, %s5967_s23 }
 0x126   :  { %4050 = vrot.lane.b32.xlu1 %v5999_v4, %s5968_s13 }
 0x127   :  { %3543 = vrot.lane.b32.xlu0 %v6399_v45, %s5967_s23 }
 0x128   :  { %5730 = vmatmul.mubr.msk.bf16.gmra.mxu1 %vm119_vm2, %v5901_v49  ;;  %5192 = vmatmul.mubr.msk.bf16.gmra.mxu0 %vm119_vm2, %v6255_v61 }
 0x129   :  { %1068 = vmatprep.mubr.bf16.mxu0 %v9437_v2  ;;  %1141 = vmatprep.mubr.bf16.mxu1 %v9437_v2 }
 0x12a   :  { %4054 = vrot.lane.b32.xlu1 %v5997_v3, %s5968_s13 }
 0x12b   :  { %4052 = vrot.lane.b32.xlu0 %v6007_v6, %s5968_s13 }
 0x12e   :  { %4058 = vrot.lane.b32.xlu1 %v6388_v42, %s5968_s13 }
 0x12f   :  { %4056 = vrot.lane.b32.xlu0 %v6005_v5, %s5968_s13 }
 0x130   :  { %5193 = vmatmul.mubr.msk.bf16.gmra.mxu0 %vm119_vm2, %v6266_v63  ;;  %5198 = vmatmul.mubr.msk.bf16.vlgmr.msra.gmra.mxu1 %vm119_vm2, %v6203_v52 }
 0x131   :  { %1525 = vmatpush1.bf16.msra.mxu1 %v1496_v0  ;;  %1078 = vmatprep.mubr.bf16.mxu0 %v9437_v2 }
 0x132   :  { %1151 = vmatprep.mubr.bf16.mxu1 %v9437_v2  ;;  %5864 = vmatprep.subr.msk.bf16.mxu1 %vm144_vm1, %v6207_v54 }
 0x133   :  { %4060 = vrot.lane.b32.xlu0 %v6399_v45, %s5968_s13 }
 0x138   :  { %5194 = vmatmul.mubr.msk.bf16.gmra.mxu0 %vm119_vm2, %v6280_v1  ;;  %5199 = vmatmul.mubr.msk.bf16.gmra.mxu1 %vm119_vm2, %v6227_v59 }
 0x139   :  { %1088 = vmatprep.mubr.bf16.mxu0 %v9437_v2  ;;  %1161 = vmatprep.mubr.bf16.mxu1 %v9437_v2 }
 0x140   :  { %v6293_v8 = vpop.f32.mrf.mxu0  ;;  %v6295_v9 = vpop.f32.mrf.mxu1  ;;  %5195 = vmatmul.mubr.msk.bf16.gmra.mxu0 %vm119_vm2, %v6291_v7  ;;  %5200 = vmatmul.mubr.msk.bf16.gmra.mxu1 %vm119_vm2, %v6241_v60 }
 0x141   :  { %9445 = vst [vmem:[#allocation2_spill] sm:$0xff] %v6295_v9  ;;  %1098 = vmatprep.mubr.bf16.mxu0 %v9437_v2  ;;  %1171 = vmatprep.mubr.bf16.mxu1 %v9437_v2 }
 0x142   :  { %v6303_v10 = vpop.f32.mrf.mxu0  ;;  %v6305_v11 = vpop.f32.mrf.mxu1 }
 0x143   :  { %9446 = vst [vmem:[#allocation3_spill] sm:$0xff] %v6303_v10  ;;  %9447 = vst [vmem:[#allocation4_spill] sm:$0xff] %v6305_v11  ;;  %v6528_v11 = vpop.permute.xlu0 %2484 }
 0x144   :  { %v6307_v12 = vpop.f32.mrf.mxu0  ;;  %v6309_v13 = vpop.f32.mrf.mxu1 }
 0x145   :  { %9448 = vst [vmem:[#allocation5_spill] sm:$0xff] %v6307_v12  ;;  %9449 = vst [vmem:[#allocation6_spill] sm:$0xff] %v6309_v13  ;;  %v6526_v13 = vld [vmem:[%s9434_s1 + $0xd0] sm:$0xff]  }
 0x146   :  { %v6318_v16 = vpop.f32.mrf.mxu0  ;;  %v6320_v17 = vpop.f32.mrf.mxu1 }
 0x147   :  { %9450 = vst [vmem:[#allocation7_spill] sm:$0xff] %v6318_v16  ;;  %9451 = vst [vmem:[#allocation8_spill] sm:$0xff] %v6320_v17  ;;  %v6634_v16 = vld [vmem:[%s9434_s1 + $0xe8] sm:$0xff]  }
 0x148   :  { %v6322_v18 = vpop.f32.mrf.mxu0  ;;  %v6324_v19 = vpop.f32.mrf.mxu1  ;;  %5196 = vmatmul.mubr.msk.bf16.gmra.mxu0 %vm119_vm2, %v6314_v14  ;;  %5201 = vmatmul.mubr.msk.bf16.gmra.mxu1 %vm119_vm2, %v6255_v61 }
 0x149   :  { %9452 = vst [vmem:[#allocation9_spill] sm:$0xff] %v6322_v18  ;;  %9453 = vst [vmem:[#allocation10_spill] sm:$0xff] %v6324_v19  ;;  %1181 = vmatprep.mubr.bf16.mxu1 %v9437_v2  ;;  %5735 = vmatprep.mubr.msk.bf16.mxu0 %vm119_vm2, %v6203_v52 }
 0x14a   :  { %v6333_v20 = vpop.f32.mrf.mxu0  ;;  %v6335_v21 = vpop.f32.mrf.mxu1 }
 0x14b   :  { %9454 = vst [vmem:[#allocation11_spill] sm:$0xff] %v6333_v20  ;;  %9455 = vst [vmem:[#allocation12_spill] sm:$0xff] %v6335_v21 }
 0x14c   :  { %v6342_v25 = vpop.f32.mrf.mxu0  ;;  %v6344_v26 = vpop.f32.mrf.mxu1 }
 0x14d   :  { %9456 = vst [vmem:[#allocation13_spill] sm:$0xff] %v6342_v25  ;;  %9457 = vst [vmem:[#allocation14_spill] sm:$0xff] %v6344_v26 }
 0x14e   :  { %v6347_v28 = vpop.f32.mrf.mxu0  ;;  %v6349_v29 = vpop.f32.mrf.mxu1 }
 0x14f   :  { %9458 = vst [vmem:[#allocation15_spill] sm:$0xff] %v6347_v28  ;;  %9459 = vst [vmem:[#allocation16_spill] sm:$0xff] %v6349_v29 }
 0x150   :  { %v6353_v31 = vpop.f32.mrf.mxu0  ;;  %v6355_v32 = vpop.f32.mrf.mxu1  ;;  %5202 = vmatmul.mubr.msk.bf16.gmra.mxu1 %vm119_vm2, %v6266_v63  ;;  %5736 = vmatmul.mubr.msk.bf16.vlgmr.msra.gmra.mxu0 %vm119_vm2, %v6227_v59 }
 0x151   :  { %9460 = vst [vmem:[#allocation17_spill] sm:$0xff] %v6353_v31  ;;  %1638 = vmatpush1.bf16.msra.mxu0 %v1502_v27  ;;  %1191 = vmatprep.mubr.bf16.mxu1 %v9437_v2 }
 0x152   :  { %v6362_v33 = vpop.f32.mrf.mxu0  ;;  %v6364_v34 = vpop.f32.mrf.mxu1  ;;  %5739 = vmatprep.mubr.msk.bf16.mxu0 %vm119_vm2, %v6241_v60  ;;  %5288 = vmatprep.subr.msk.bf16.mxu0 %vm144_vm1, %v1982_v30 }
 0x153   :  { %9461 = vst [vmem:[#allocation18_spill] sm:$0xff] %v6362_v33 }
 0x154   :  { %v6369_v35 = vpop.f32.mrf.mxu0  ;;  %v6371_v36 = vpop.f32.mrf.mxu1 }
 0x155   :  { %9462 = vst [vmem:[#allocation19_spill] sm:$0xff] %v6369_v35 }
 0x156   :  { %v6373_v37 = vpop.f32.mrf.mxu0  ;;  %v6375_v38 = vpop.f32.mrf.mxu1 }
 0x157   :  { %9463 = vst [vmem:[#allocation20_spill] sm:$0xff] %v6373_v37  ;;  %v6594_v37 = vld [vmem:[%s9434_s1 + $0xe0] sm:$0xff]  }
 0x158   :  { %v6380_v40 = vpop.f32.mrf.mxu0  ;;  %v6382_v41 = vpop.f32.mrf.mxu1  ;;  %5203 = vmatmul.mubr.msk.bf16.gmra.mxu1 %vm119_vm2, %v6280_v1  ;;  %5740 = vmatmul.mubr.msk.bf16.gmra.mxu0 %vm119_vm2, %v6255_v61 }
 0x159   :  { %9464 = vst [vmem:[#allocation21_spill] sm:$0xff] %v6380_v40  ;;  %1201 = vmatprep.mubr.bf16.mxu1 %v9437_v2  ;;  %5743 = vmatprep.mubr.msk.bf16.mxu0 %vm119_vm2, %v6266_v63  ;;  %v1981_v63 = vsel %vm1980_vm5, %v6316_v15, %v1973_v23 }
 0x15a   :  { %v6393_v43 = vpop.f32.mrf.mxu0  ;;  %v6395_v44 = vpop.f32.mrf.mxu1  ;;  %v2010_v22 = vsel %vm144_vm1, %v1981_v63, 0 }
 0x15b   :  { %9465 = vst [vmem:[#allocation22_spill] sm:$0xff] %v6393_v43 }
 0x15c   :  { %v6401_v46 = vpop.f32.mrf.mxu0  ;;  %v6403_v47 = vpop.f32.mrf.mxu1 }
 0x15d   :  { %9466 = vst [vmem:[#allocation23_spill] sm:$0xff] %v6401_v46 }
 0x15e   :  { %v6407_v48 = vpop.f32.mrf.mxu0  ;;  %v6409_v49 = vpop.f32.mrf.mxu1 }
 0x15f   :  { %9467 = vst [vmem:[#allocation24_spill] sm:$0xff] %v6407_v48 }
 0x160   :  { %v6411_v50 = vpop.f32.mrf.mxu0  ;;  %v6413_v51 = vpop.f32.mrf.mxu1  ;;  %5204 = vmatmul.mubr.msk.bf16.gmra.mxu1 %vm119_vm2, %v6291_v7  ;;  %5744 = vmatmul.mubr.msk.bf16.gmra.mxu0 %vm119_vm2, %v6280_v1 }
 0x161   :  { %9468 = vst [vmem:[#allocation25_spill] sm:$0xff] %v6411_v50  ;;  %1211 = vmatprep.mubr.bf16.mxu1 %v9437_v2  ;;  %5747 = vmatprep.mubr.msk.bf16.mxu0 %vm119_vm2, %v6291_v7  ;;  %v6457_v7 = vld [vmem:[%s9434_s1 + $0xc0] sm:$0xff]  }
 0x162   :  { %v6422_v52 = vpop.f32.mrf.mxu0  ;;  %v6424_v53 = vpop.f32.mrf.mxu1 }
 0x163   :  { %9469 = vst [vmem:[#allocation26_spill] sm:$0xff] %v6422_v52 }
 0x164   :  { %v6426_v55 = vpop.f32.mrf.mxu0  ;;  %v6428_v56 = vpop.f32.mrf.mxu1 }
 0x165   :  { %9470 = vst [vmem:[#allocation27_spill] sm:$0xff] %v6426_v55  ;;  %v6563_v55 = vld [vmem:[%s9434_s1 + $0xd8] sm:$0xff]  }
 0x166   :  { %v6430_v57 = vpop.f32.mrf.mxu0  ;;  %v6432_v58 = vpop.f32.mrf.mxu1 }
 0x167   :  { %9471 = vst [vmem:[#allocation28_spill] sm:$0xff] %v6430_v57 }
 0x168   :  { %v6434_v59 = vpop.f32.mrf.mxu0  ;;  %v6436_v60 = vpop.f32.mrf.mxu1  ;;  %5205 = vmatmul.mubr.msk.bf16.gmra.mxu1 %vm119_vm2, %v6314_v14  ;;  %5748 = vmatmul.mubr.msk.bf16.gmra.mxu0 %vm119_vm2, %v6314_v14 }
 0x169   :  { %9472 = vst [vmem:[#allocation29_spill] sm:$0xff] %v6434_v59  ;;  %1542 = vmatprep.mubr.bf16.mxu1 %v9437_v2  ;;  %1655 = vmatprep.mubr.bf16.mxu0 %v9437_v2  ;;  %v6459_v14 = vpop.permute.xlu1 %1978  ;;  %v1508_v2 = vsel %vm144_vm1, %v6207_v54, 0 }
 0x16a   :  { %v6444_v61 = vpop.f32.mrf.mxu0  ;;  %v6446_v62 = vpop.f32.mrf.mxu1  ;;  %v1984_v63 = vsel %vm1980_vm5, %v6466_v39, %v6459_v14 }
 0x16b   :  { %9473 = vst [vmem:[#allocation30_spill] sm:$0xff] %v6444_v61 }
 0x16c   :  { %v6450_v0 = vpop.f32.mrf.mxu0  ;;  %v6452_v1 = vpop.f32.mrf.mxu1 }
 0x16d   :  { %9474 = vst [vmem:[#allocation31_spill] sm:$0xff] %v6450_v0  ;;  %v6552_v61 = vpop.permute.xlu1 %2486 }
 0x16e   :  { %v6462_v27 = vpop.f32.mrf.mxu0  ;;  %v6464_v30 = vpop.f32.mrf.mxu1 }
 0x16f   :  { %9475 = vst [vmem:[#allocation32_spill] sm:$0xff] %v6462_v27 }
 0x170   :  { %v6468_v15 = vpop.f32.mrf.mxu1  ;;  %v6470_v23 = vpop.f32.mrf.mxu0  ;;  %5239 = vmatmul.mubr.msk.bf16.vlgmr.msra.gmra.mxu1 %vm119_vm2, %v6457_v7  ;;  %5248 = vmatmul.mubr.msk.bf16.vlgmr.msra.gmra.mxu0 %vm119_vm2, %v6457_v7 }
 0x171   :  { %9476 = vst [vmem:[#allocation33_spill] sm:$0xff] %v6470_v23  ;;  %5752 = vmatpush3.bf16.msra.mxu1 %v1508_v2  ;;  %2039 = vmatpush1.bf16.msra.mxu0 %v2010_v22  ;;  %v9478_v23 = vmov 0   ;;  %v6497_v2 = vld [vmem:[%s9434_s1 + $0xc8] sm:$0xff]  }
 0x172   :  { %v6481_v29 = vpop.f32.mrf.mxu1  ;;  %v6483_v26 = vpop.f32.mrf.mxu0  ;;  %1552 = vmatprep.mubr.bf16.mxu1 %v9478_v23  ;;  %1665 = vmatprep.mubr.bf16.mxu0 %v9478_v23 }
 0x173   :  { %9477 = vst [vmem:[#allocation34_spill] sm:$0xff] %v6483_v26  ;;  %5297 = vmatprep.subr.msk.bf16.mxu1 %vm144_vm1, %v1984_v63  ;;  %5865 = vmatprep.subr.msk.bf16.mxu0 %vm144_vm1, %v6459_v14 }
 0x174   :  { %v6490_v54 = vpop.f32.mrf.mxu1  ;;  %v6492_v21 = vpop.f32.mrf.mxu0 }
 0x175   :  { %9479 = vst [vmem:[#allocation35_spill] sm:$0xff] %v6492_v21 }
 0x176   :  { %v6499_v22 = vpop.f32.mrf.mxu1  ;;  %v6501_v26 = vpop.f32.mrf.mxu0 }
 0x177   :  { %9480 = vst [vmem:[#allocation36_spill] sm:$0xff] %v6501_v26 }
 0x178   :  { %v6503_v19 = vpop.f32.mrf.mxu1  ;;  %v6505_v17 = vpop.f32.mrf.mxu0  ;;  %5240 = vmatmul.mubr.msk.bf16.gmra.mxu1 %vm119_vm2, %v6497_v2  ;;  %5249 = vmatmul.mubr.msk.bf16.gmra.mxu0 %vm119_vm2, %v6497_v2 }
 0x179   :  { %9481 = vst [vmem:[#allocation37_spill] sm:$0xff] %v6505_v17  ;;  %1562 = vmatprep.mubr.bf16.mxu1 %v9478_v23  ;;  %1675 = vmatprep.mubr.bf16.mxu0 %v9478_v23 }
 0x17a   :  { %v6513_v63 = vpop.f32.mrf.mxu1  ;;  %v6515_v21 = vpop.f32.mrf.mxu0 }
 0x17b   :  { %9482 = vst [vmem:[#allocation38_spill] sm:$0xff] %v6515_v21 }
 0x17c   :  { %v6519_v17 = vpop.f32.mrf.mxu1  ;;  %v6521_v26 = vpop.f32.mrf.mxu0 }
 0x17d   :  { %9483 = vst [vmem:[#allocation39_spill] sm:$0xff] %v6521_v26 }
 0x17e   :  { %v6530_v9 = vpop.f32.mrf.mxu1  ;;  %v6532_v27 = vpop.f32.mrf.mxu0 }
 0x17f   :  { %9484 = vst [vmem:[#allocation40_spill] sm:$0xff] %v6532_v27 }
 0x180   :  { %v6536_v21 = vpop.f32.mrf.mxu1  ;;  %v6538_v0 = vpop.f32.mrf.mxu0  ;;  %5241 = vmatmul.mubr.msk.bf16.gmra.mxu1 %vm119_vm2, %v6526_v13  ;;  %5250 = vmatmul.mubr.msk.bf16.gmra.mxu0 %vm119_vm2, %v6526_v13 }
 0x181   :  { %9485 = vst [vmem:[#allocation41_spill] sm:$0xff] %v6538_v0  ;;  %1572 = vmatprep.mubr.bf16.mxu1 %v9478_v23  ;;  %1685 = vmatprep.mubr.bf16.mxu0 %v9478_v23  ;;  %v6554_v0 = vpop.permute.xlu0 %2488 }
 0x182   :  { %v6546_v26 = vpop.f32.mrf.mxu1  ;;  %v6548_v27 = vpop.f32.mrf.mxu0 }
 0x183   :  { %9486 = vst [vmem:[#allocation42_spill] sm:$0xff] %v6548_v27 }
 0x184   :  { %v6556_v59 = vpop.f32.mrf.mxu1  ;;  %v6558_v57 = vpop.f32.mrf.mxu0 }
 0x185   :  { %9487 = vst [vmem:[#allocation43_spill] sm:$0xff] %v6558_v57  ;;  %v6579_v57 = vpop.permute.xlu1 %2490  ;;  %v6581_v46 = vpop.permute.xlu0 %2492 }
 0x186   :  { %v6565_v52 = vpop.f32.mrf.mxu1  ;;  %v6567_v27 = vpop.f32.mrf.mxu0 }
 0x187   :  { %9488 = vst [vmem:[#allocation44_spill] sm:$0xff] %v6567_v27 }
 0x188   :  { %v6569_v50 = vpop.f32.mrf.mxu1  ;;  %v6571_v48 = vpop.f32.mrf.mxu0  ;;  %5242 = vmatmul.mubr.msk.bf16.gmra.mxu1 %vm119_vm2, %v6563_v55  ;;  %5251 = vmatmul.mubr.msk.bf16.gmra.mxu0 %vm119_vm2, %v6563_v55 }
 0x189   :  { %9489 = vst [vmem:[#allocation45_spill] sm:$0xff] %v6571_v48  ;;  %1582 = vmatprep.mubr.bf16.mxu1 %v9478_v23  ;;  %1695 = vmatprep.mubr.bf16.mxu0 %v9478_v23  ;;  %v6596_v35 = vpop.permute.xlu1 %3016  ;;  %v6598_v33 = vpop.permute.xlu0 %3018 }
 0x18a   :  { %v6583_v43 = vpop.f32.mrf.mxu1  ;;  %v6585_v27 = vpop.f32.mrf.mxu0  ;;  %9492 = vst [vmem:[#allocation48_spill] sm:$0xff] %v6596_v35  ;;  %9493 = vst [vmem:[#allocation49_spill] sm:$0xff] %v6598_v33 }
 0x18b   :  { %9490 = vst [vmem:[#allocation46_spill] sm:$0xff] %v6585_v27 }
 0x18c   :  { %v6587_v40 = vpop.f32.mrf.mxu1  ;;  %v6589_v48 = vpop.f32.mrf.mxu0 }
 0x18d   :  { %9491 = vst [vmem:[#allocation47_spill] sm:$0xff] %v6589_v48  ;;  %v6615_v35 = vpop.permute.xlu1 %3020 }
 0x18e   :  { %v6600_v31 = vpop.f32.mrf.mxu1  ;;  %v6602_v28 = vpop.f32.mrf.mxu0  ;;  %9496 = vst [vmem:[#allocation52_spill] sm:$0xff] %v6615_v35 }
 0x18f   :  { %9494 = vst [vmem:[#allocation50_spill] sm:$0xff] %v6602_v28  ;;  %v6617_v28 = vpop.permute.xlu0 %3022 }
 0x190   :  { %v6604_v25 = vpop.f32.mrf.mxu1  ;;  %v709_v27 = vpop.f32.mrf.mxu0  ;;  %5243 = vmatmul.mubr.msk.bf16.gmra.mxu1 %vm119_vm2, %v6594_v37  ;;  %5252 = vmatmul.mubr.msk.bf16.gmra.mxu0 %vm119_vm2, %v6594_v37  ;;  %9497 = vst [vmem:[#allocation53_spill] sm:$0xff] %v6617_v28  ;;  %v6624_v18 = vsel %vm3028_vm6, %v6615_v35, %v6617_v28 }
 0x191   :  { %v6611_v48 = vadd.f32 %v709_v27, %v6355_v32  ;;  %1592 = vmatprep.mubr.bf16.mxu1 %v9478_v23  ;;  %1705 = vmatprep.mubr.bf16.mxu0 %v9478_v23  ;;  %9499 = vst [vmem:[#allocation55_spill] sm:$0xff] %v6624_v18 }
 0x192   :  { %v6619_v33 = vpop.f32.mrf.mxu1  ;;  %v711_v20 = vpop.f32.mrf.mxu0 }
 0x193   :  { %9495 = vst [vmem:[#allocation51_spill] sm:$0xff] %v6611_v48  ;;  %9498 = vst [vmem:[#allocation54_spill] sm:$0xff] %v6619_v33  ;;  %v6627_v32 = vadd.f32 %v711_v20, %v6364_v34 }
 0x194   :  { %v6629_v27 = vpop.f32.mrf.mxu1  ;;  %v713_v48 = vpop.f32.mrf.mxu0 }
 0x195   :  { %9500 = vst [vmem:[#allocation56_spill] sm:$0xff] %v6627_v32  ;;  %v6637_v12 = vadd.f32 %v713_v48, %v6371_v36 }
 0x196   :  { %v6639_v33 = vpop.f32.mrf.mxu1  ;;  %v715_v10 = vpop.f32.mrf.mxu0 }
 0x197   :  { %9501 = vst [vmem:[#allocation57_spill] sm:$0xff] %v6637_v12  ;;  %v6642_v28 = vadd.f32 %v715_v10, %v6375_v38  ;;  %v6665_v12 = vld [vmem:[%s9434_s1 + $0xf0] sm:$0xff]  }
 0x198   :  { %v6644_v18 = vpop.f32.mrf.mxu1  ;;  %v719_v20 = vpop.f32.mrf.mxu0  ;;  %5244 = vmatmul.mubr.msk.bf16.gmra.mxu1 %vm119_vm2, %v6634_v16  ;;  %5253 = vmatmul.mubr.msk.bf16.gmra.mxu0 %vm119_vm2, %v6634_v16 }
 0x199   :  { %9502 = vst [vmem:[#allocation58_spill] sm:$0xff] %v6642_v28  ;;  %v6651_v34 = vadd.f32 %v719_v20, %v6382_v41  ;;  %1602 = vmatprep.mubr.bf16.mxu1 %v9478_v23  ;;  %1715 = vmatprep.mubr.bf16.mxu0 %v9478_v23 }
 0x19a   :  { %v6655_v36 = vpop.f32.mrf.mxu1  ;;  %v721_v10 = vpop.f32.mrf.mxu0 }
 0x19b   :  { %9503 = vst [vmem:[#allocation59_spill] sm:$0xff] %v6651_v34  ;;  %v6658_v38 = vadd.f32 %v721_v10, %v6395_v44 }
 0x19c   :  { %v6660_v48 = vpop.f32.mrf.mxu1  ;;  %v723_v28 = vpop.f32.mrf.mxu0 }
 0x19d   :  { %9504 = vst [vmem:[#allocation60_spill] sm:$0xff] %v6658_v38  ;;  %v6668_v41 = vadd.f32 %v723_v28, %v6403_v47 }
 0x19e   :  { %v6670_v20 = vpop.f32.mrf.mxu1  ;;  %v725_v34 = vpop.f32.mrf.mxu0 }
 0x19f   :  { %9505 = vst [vmem:[#allocation61_spill] sm:$0xff] %v6668_v41  ;;  %v6673_v32 = vadd.f32 %v725_v34, %v6409_v49  ;;  %v6696_v41 = vld [vmem:[%s9434_s1 + $0xf8] sm:$0xff]  }
 0x1a0   :  { %v6675_v35 = vpop.f32.mrf.mxu1  ;;  %v729_v44 = vpop.f32.mrf.mxu0  ;;  %5245 = vmatmul.mubr.msk.bf16.gmra.mxu1 %vm119_vm2, %v6665_v12  ;;  %5254 = vmatmul.mubr.msk.bf16.gmra.mxu0 %vm119_vm2, %v6665_v12 }
 0x1a1   :  { %9506 = vst [vmem:[#allocation62_spill] sm:$0xff] %v6673_v32  ;;  %v6682_v10 = vadd.f32 %v729_v44, %v6413_v51  ;;  %1612 = vmatprep.mubr.bf16.mxu1 %v9478_v23  ;;  %1725 = vmatprep.mubr.bf16.mxu0 %v9478_v23 }
 0x1a2   :  { %v6686_v28 = vpop.f32.mrf.mxu1  ;;  %v731_v47 = vpop.f32.mrf.mxu0 }
 0x1a3   :  { %9507 = vst [vmem:[#allocation63_spill] sm:$0xff] %v6682_v10  ;;  %9508 = vst [vmem:[#allocation64_spill] sm:$0xff] %v6686_v28  ;;  %v6689_v49 = vadd.f32 %v731_v47, %v6424_v53 }
 0x1a4   :  { %v6691_v34 = vpop.f32.mrf.mxu1  ;;  %v733_v32 = vpop.f32.mrf.mxu0 }
 0x1a5   :  { %9509 = vst [vmem:[#allocation65_spill] sm:$0xff] %v6689_v49  ;;  %v6699_v51 = vadd.f32 %v733_v32, %v6428_v56 }
 0x1a6   :  { %v6701_v44 = vpop.f32.mrf.mxu1  ;;  %v735_v10 = vpop.f32.mrf.mxu0 }
 0x1a7   :  { %9510 = vst [vmem:[#allocation66_spill] sm:$0xff] %v6699_v51  ;;  %v6704_v38 = vadd.f32 %v735_v10, %v6432_v58  ;;  %v6728_v51 = vld [vmem:[%s9434_s1 + $0x100] sm:$0xff]  }
 0x1a8   :  { %v6706_v28 = vpop.f32.mrf.mxu1  ;;  %v739_v53 = vpop.f32.mrf.mxu0  ;;  %5246 = vmatmul.mubr.msk.bf16.gmra.mxu1 %vm119_vm2, %v6696_v41  ;;  %5255 = vmatmul.mubr.msk.bf16.gmra.mxu0 %vm119_vm2, %v6696_v41 }
 0x1a9   :  { %9511 = vst [vmem:[#allocation67_spill] sm:$0xff] %v6704_v38  ;;  %v6713_v47 = vadd.f32 %v739_v53, %v6436_v60  ;;  %5753 = vmatprep.mubr.msk.bf16.mxu1 %vm119_vm2, %v6457_v7  ;;  %2056 = vmatprep.mubr.bf16.mxu0 %v9478_v23  ;;  %v1983_v60 = vsel %vm1980_vm5, %v6340_v24, %v6466_v39 }
 0x1aa   :  { %v6718_v56 = vpop.f32.mrf.mxu1  ;;  %v741_v58 = vpop.f32.mrf.mxu0  ;;  %v2496_v24 = vsel %vm2494_vm7, %v6552_v61, %v6554_v0 }
 0x1ab   :  { %9512 = vst [vmem:[#allocation68_spill] sm:$0xff] %v6713_v47  ;;  %v6721_v32 = vadd.f32 %v741_v58, %v6446_v62  ;;  %v2022_v58 = vsel %vm144_vm1, %v6459_v14, 0  ;;  %v2016_v47 = vsel %vm144_vm1, %v1983_v60, 0 }
 0x1ac   :  { %v6723_v10 = vpop.f32.mrf.mxu1  ;;  %v743_v38 = vpop.f32.mrf.mxu0 }
 0x1ad   :  { %9513 = vst [vmem:[#allocation69_spill] sm:$0xff] %v6721_v32  ;;  %9514 = vst [vmem:[#allocation70_spill] sm:$0xff] %v6723_v10  ;;  %v6734_v7 = vadd.f32 %v743_v38, %v6452_v1  ;;  %v2498_v1 = vsel %vm2494_vm7, %v6579_v57, %v6581_v46 }
 0x1ae   :  { %v6736_v53 = vpop.f32.mrf.mxu1  ;;  %v745_v62 = vpop.f32.mrf.mxu0 }
 0x1af   :  { %v6741_v32 = vadd.f32 %v745_v62, %v6464_v30 }
 0x1b0   :  { %v6744_v49 = vpop.f32.mrf.mxu1  ;;  %v749_v10 = vpop.f32.mrf.mxu0  ;;  %5754 = vmatmul.mubr.msk.bf16.vlgmr.msra.gmra.mxu1 %vm119_vm2, %v6497_v2  ;;  %5289 = vmatmul.mubr.msk.bf16.vlgmr.msra.gmra.mxu0 %vm119_vm2, %v6728_v51 }
 0x1b1   :  { %v6757_v14 = vadd.f32 %v749_v10, %v6468_v15  ;;  %2152 = vmatpush1.bf16.msra.mxu1 %v2016_v47  ;;  %5770 = vmatpush3.bf16.msra.mxu0 %v2022_v58  ;;  %v6774_v47 = vld [vmem:[%s9434_s1 + $0x108] sm:$0xff]  }
 0x1b2   :  { %v6759_v30 = vpop.f32.mrf.mxu1  ;;  %v751_v39 = vpop.f32.mrf.mxu0  ;;  %5757 = vmatprep.mubr.msk.bf16.mxu1 %vm119_vm2, %v6526_v13  ;;  %2066 = vmatprep.mubr.bf16.mxu0 %v9478_v23 }
 0x1b3   :  { %v6765_v2 = vadd.f32 %v751_v39, %v6481_v29  ;;  %5338 = vmatprep.subr.msk.bf16.mxu1 %vm144_vm1, %v2496_v24  ;;  %5347 = vmatprep.subr.msk.bf16.mxu0 %vm144_vm1, %v2498_v1 }
 0x1b4   :  { %v6769_v38 = vpop.f32.mrf.mxu1  ;;  %v753_v15 = vpop.f32.mrf.mxu0 }
 0x1b5   :  { %v6777_v10 = vadd.f32 %v753_v15, %v6490_v54 }
 0x1b6   :  { %v6779_v13 = vpop.f32.mrf.mxu1  ;;  %v755_v60 = vpop.f32.mrf.mxu0 }
 0x1b7   :  { %v6782_v29 = vadd.f32 %v755_v60, %v6499_v22 }
 0x1b8   :  { %v6784_v62 = vpop.f32.mrf.mxu1  ;;  %v759_v58 = vpop.f32.mrf.mxu0  ;;  %5758 = vmatmul.mubr.msk.bf16.gmra.mxu1 %vm119_vm2, %v6563_v55  ;;  %5290 = vmatmul.mubr.msk.bf16.gmra.mxu0 %vm119_vm2, %v6774_v47 }
 0x1b9   :  { %v6791_v24 = vadd.f32 %v759_v58, %v6503_v19  ;;  %5761 = vmatprep.mubr.msk.bf16.mxu1 %vm119_vm2, %v6594_v37  ;;  %2076 = vmatprep.mubr.bf16.mxu0 %v9478_v23  ;;  %v6808_v37 = vld [vmem:[%s9434_s1 + $0x110] sm:$0xff]  }
 0x1ba   :  { %v6796_v54 = vpop.f32.mrf.mxu1  ;;  %v761_v22 = vpop.f32.mrf.mxu0 }
 0x1bb   :  { %v6801_v55 = vadd.f32 %v761_v22, %v6513_v63 }
 0x1bc   :  { %v6803_v1 = vpop.f32.mrf.mxu1  ;;  %v763_v19 = vpop.f32.mrf.mxu0 }
 0x1bd   :  { %v6811_v39 = vadd.f32 %v763_v19, %v6519_v17 }
 0x1be   :  { %v6813_v15 = vpop.f32.mrf.mxu1  ;;  %v765_v60 = vpop.f32.mrf.mxu0 }
 0x1bf   :  { %v6818_v4 = vadd.f32 %v765_v60, %v6530_v9 }
 0x1c0   :  { %v6820_v6 = vpop.f32.mrf.mxu1  ;;  %v769_v63 = vpop.f32.mrf.mxu0  ;;  %5762 = vmatmul.mubr.msk.bf16.gmra.mxu1 %vm119_vm2, %v6634_v16  ;;  %5291 = vmatmul.mubr.msk.bf16.gmra.mxu0 %vm119_vm2, %v6808_v37 }
 0x1c1   :  { %9515 = vst [vmem:[#allocation71_spill] sm:$0xff] %v6818_v4  ;;  %v6827_v17 = vadd.f32 %v769_v63, %v6536_v21  ;;  %5765 = vmatprep.mubr.msk.bf16.mxu1 %vm119_vm2, %v6665_v12  ;;  %2086 = vmatprep.mubr.bf16.mxu0 %v9478_v23  ;;  %v6844_v21 = vld [vmem:[%s9434_s1 + $0x118] sm:$0xff]   ;;  %v2495_v63 = vsel %vm2494_vm7, %v6528_v11, %v6552_v61 }
 0x1c2   :  { %v6832_v3 = vpop.f32.mrf.mxu1  ;;  %v771_v5 = vpop.f32.mrf.mxu0  ;;  %v597_v11 = vadd.f32 %v6604_v25, %v6293_v8  ;;  %v9549_v4 = vld [vmem:[#allocation21_spill] sm:$0xff] }
 0x1c3   :  { %9516 = vst [vmem:[#allocation72_spill] sm:$0xff] %v6827_v17  ;;  %v6837_v9 = vadd.f32 %v771_v5, %v6546_v26  ;;  %v9539_v17 = vld [vmem:[#allocation17_spill] sm:$0xff] }
 0x1c4   :  { %v6839_v16 = vpop.f32.mrf.mxu1  ;;  %v773_v58 = vpop.f32.mrf.mxu0 }
 0x1c5   :  { %9517 = vst [vmem:[#allocation73_spill] sm:$0xff] %v6837_v9  ;;  %v6847_v12 = vadd.f32 %v773_v58, %v6556_v59  ;;  %v9531_v9 = vld [vmem:[#allocation9_spill] sm:$0xff] }
 0x1c6   :  { %v6849_v22 = vpop.f32.mrf.mxu1  ;;  %v775_v19 = vpop.f32.mrf.mxu0 }
 0x1c7   :  { %9518 = vst [vmem:[#allocation74_spill] sm:$0xff] %v6847_v12  ;;  %v6852_v42 = vadd.f32 %v775_v19, %v6565_v52 }
 0x1c8   :  { %v6854_v45 = vpop.f32.mrf.mxu1  ;;  %v779_v26 = vpop.f32.mrf.mxu0  ;;  %5766 = vmatmul.mubr.msk.bf16.gmra.mxu1 %vm119_vm2, %v6696_v41  ;;  %5292 = vmatmul.mubr.msk.bf16.gmra.mxu0 %vm119_vm2, %v6844_v21 }
 0x1c9   :  { %9519 = vst [vmem:[#allocation75_spill] sm:$0xff] %v6852_v42  ;;  %v6861_v60 = vadd.f32 %v779_v26, %v6569_v50  ;;  %2096 = vmatprep.mubr.bf16.mxu0 %v9478_v23  ;;  %2169 = vmatprep.mubr.bf16.mxu1 %v9478_v23  ;;  %v6878_v50 = vld [vmem:[%s9434_s1 + $0x120] sm:$0xff]   ;;  %v2524_v26 = vsel %vm144_vm1, %v2495_v63, 0 }
 0x1ca   :  { %v6865_v59 = vpop.f32.mrf.mxu1  ;;  %v781_v52 = vpop.f32.mrf.mxu0  ;;  %v9525_v63 = vld [vmem:[#allocation54_spill] sm:$0xff] }
 0x1cb   :  { %9520 = vst [vmem:[#allocation76_spill] sm:$0xff] %v6861_v60  ;;  %v6871_v5 = vadd.f32 %v781_v52, %v6583_v43 }
 0x1cc   :  { %v6873_v41 = vpop.f32.mrf.mxu1  ;;  %v783_v58 = vpop.f32.mrf.mxu0 }
 0x1cd   :  { %9521 = vst [vmem:[#allocation77_spill] sm:$0xff] %v6871_v5  ;;  %v6881_v19 = vadd.f32 %v783_v58, %v6587_v40  ;;  %v9524_v40 = vld [vmem:[#allocation3_spill] sm:$0xff] }
 0x1ce   :  { %v6884_v60 = vpop.f32.mrf.mxu1  ;;  %v785_v42 = vpop.f32.mrf.mxu0  ;;  %v599_v58 = vadd.f32 %v9525_v63, %v9524_v40 }
 0x1cf   :  { %9522 = vst [vmem:[#allocation78_spill] sm:$0xff] %v6881_v19  ;;  %v6889_v43 = vadd.f32 %v785_v42, %v6600_v31  ;;  %v9527_v31 = vld [vmem:[#allocation5_spill] sm:$0xff] }
 0x1d0   :  { %v6891_v61 = vpop.f32.mrf.mxu1  ;;  %v1030_v52 = vpop.f32.mrf.mxu0  ;;  %5293 = vmatmul.mubr.msk.bf16.gmra.mxu0 %vm119_vm2, %v6878_v50  ;;  %5298 = vmatmul.mubr.msk.bf16.vlgmr.msra.gmra.mxu1 %vm119_vm2, %v6728_v51  ;;  %v601_v42 = vadd.f32 %v6629_v27, %v9527_v31  ;;  %v607_v27 = vadd.f32 %v6644_v18, %v9531_v9 }
 0x1d1   :  { %9523 = vst [vmem:[#allocation79_spill] sm:$0xff] %v6889_v43  ;;  %v6899_v19 = vadd.f32 %v1030_v52, %v597_v11  ;;  %2553 = vmatpush1.bf16.msra.mxu1 %v2524_v26  ;;  %2106 = vmatprep.mubr.bf16.mxu0 %v9478_v23  ;;  %v6916_v26 = vld [vmem:[%s9434_s1 + $0x128] sm:$0xff]  }
 0x1d2   :  { %v6902_v8 = vpop.f32.mrf.mxu1  ;;  %v1032_v25 = vpop.f32.mrf.mxu0  ;;  %2179 = vmatprep.mubr.bf16.mxu1 %v9478_v23  ;;  %5866 = vmatprep.subr.msk.bf16.mxu1 %vm144_vm1, %v6581_v46  ;;  %v9529_v52 = vld [vmem:[#allocation7_spill] sm:$0xff] }
 0x1d3   :  { %9526 = vst [vmem:[#allocation3_spill] sm:$0xff] %v6899_v19  ;;  %v6909_v43 = vadd.f32 %v1032_v25, %v599_v58  ;;  %v603_v40 = vadd.f32 %v6639_v33, %v9529_v52  ;;  %v9533_v33 = vld [vmem:[#allocation11_spill] sm:$0xff] }
 0x1d4   :  { %v6911_v5 = vpop.f32.mrf.mxu1  ;;  %v1034_v11 = vpop.f32.mrf.mxu0 }
 0x1d5   :  { %9528 = vst [vmem:[#allocation54_spill] sm:$0xff] %v6909_v43  ;;  %v6920_v63 = vadd.f32 %v1034_v11, %v601_v42  ;;  %v609_v42 = vadd.f32 %v6655_v36, %v9533_v33  ;;  %v6951_v36 = vld [vmem:[%s9434_s1 + $0x130] sm:$0xff]  }
 0x1d6   :  { %v6922_v19 = vpop.f32.mrf.mxu1  ;;  %v1036_v12 = vpop.f32.mrf.mxu0 }
 0x1d7   :  { %9530 = vst [vmem:[#allocation5_spill] sm:$0xff] %v6920_v63  ;;  %v6926_v58 = vadd.f32 %v1036_v12, %v603_v40  ;;  %v9535_v12 = vld [vmem:[#allocation13_spill] sm:$0xff] }
 0x1d8   :  { %v6928_v25 = vpop.f32.mrf.mxu1  ;;  %v1040_v31 = vpop.f32.mrf.mxu0  ;;  %5294 = vmatmul.mubr.msk.bf16.gmra.mxu0 %vm119_vm2, %v6916_v26  ;;  %5299 = vmatmul.mubr.msk.bf16.gmra.mxu1 %vm119_vm2, %v6774_v47  ;;  %v611_v52 = vadd.f32 %v6660_v48, %v9535_v12  ;;  %v617_v48 = vadd.f32 %v6675_v35, %v9539_v17 }
 0x1d9   :  { %9532 = vst [vmem:[#allocation7_spill] sm:$0xff] %v6926_v58  ;;  %v6936_v11 = vadd.f32 %v1040_v31, %v607_v27  ;;  %2116 = vmatprep.mubr.bf16.mxu0 %v9478_v23  ;;  %2189 = vmatprep.mubr.bf16.mxu1 %v9478_v23  ;;  %v9537_v27 = vld [vmem:[#allocation15_spill] sm:$0xff] }
 0x1da   :  { %v6940_v18 = vpop.f32.mrf.mxu1  ;;  %v1042_v9 = vpop.f32.mrf.mxu0  ;;  %v613_v31 = vadd.f32 %v6670_v20, %v9537_v27  ;;  %v9541_v20 = vld [vmem:[#allocation18_spill] sm:$0xff] }
 0x1db   :  { %9534 = vst [vmem:[#allocation9_spill] sm:$0xff] %v6936_v11  ;;  %v6944_v40 = vadd.f32 %v1042_v9, %v609_v42 }
 0x1dc   :  { %v6946_v58 = vpop.f32.mrf.mxu1  ;;  %v1044_v63 = vpop.f32.mrf.mxu0 }
 0x1dd   :  { %9536 = vst [vmem:[#allocation11_spill] sm:$0xff] %v6944_v40  ;;  %v6955_v33 = vadd.f32 %v1044_v63, %v611_v52  ;;  %v9542_v63 = vld [vmem:[#allocation64_spill] sm:$0xff] }
 0x1de   :  { %v6957_v11 = vpop.f32.mrf.mxu1  ;;  %v1046_v43 = vpop.f32.mrf.mxu0  ;;  %v619_v52 = vadd.f32 %v9542_v63, %v9541_v20 }
 0x1df   :  { %9538 = vst [vmem:[#allocation13_spill] sm:$0xff] %v6955_v33  ;;  %v6961_v42 = vadd.f32 %v1046_v43, %v613_v31  ;;  %v9545_v43 = vld [vmem:[#allocation19_spill] sm:$0xff] }
 0x1e0   :  { %v6963_v9 = vpop.f32.mrf.mxu1  ;;  %v1050_v12 = vpop.f32.mrf.mxu0  ;;  %5295 = vmatmul.mubr.msk.bf16.gmra.mxu0 %vm119_vm2, %v6951_v36  ;;  %5300 = vmatmul.mubr.msk.bf16.gmra.mxu1 %vm119_vm2, %v6808_v37  ;;  %v621_v31 = vadd.f32 %v6691_v34, %v9545_v43  ;;  %v627_v34 = vadd.f32 %v6706_v28, %v9549_v4 }
 0x1e1   :  { %9540 = vst [vmem:[#allocation15_spill] sm:$0xff] %v6961_v42  ;;  %v6971_v27 = vadd.f32 %v1050_v12, %v617_v48  ;;  %2126 = vmatprep.mubr.bf16.mxu0 %v9478_v23  ;;  %2199 = vmatprep.mubr.bf16.mxu1 %v9478_v23  ;;  %v6986_v48 = vld [vmem:[%s9434_s1 + $0x138] sm:$0xff]   ;;  %v9547_v12 = vld [vmem:[#allocation20_spill] sm:$0xff] }
 0x1e2   :  { %v6975_v35 = vpop.f32.mrf.mxu1  ;;  %v1052_v17 = vpop.f32.mrf.mxu0  ;;  %v623_v20 = vadd.f32 %v6701_v44, %v9547_v12  ;;  %v9552_v44 = vld [vmem:[#allocation22_spill] sm:$0xff] }
 0x1e3   :  { %9543 = vst [vmem:[#allocation17_spill] sm:$0xff] %v6971_v27  ;;  %9544 = vst [vmem:[#allocation18_spill] sm:$0xff] %v6975_v35  ;;  %v6979_v42 = vadd.f32 %v1052_v17, %v619_v52  ;;  %v9556_v12 = vld [vmem:[#allocation70_spill] sm:$0xff] }
 0x1e4   :  { %v6981_v33 = vpop.f32.mrf.mxu1  ;;  %v1054_v40 = vpop.f32.mrf.mxu0 }
 0x1e5   :  { %9546 = vst [vmem:[#allocation64_spill] sm:$0xff] %v6979_v42  ;;  %v6990_v63 = vadd.f32 %v1054_v40, %v621_v31  ;;  %v629_v40 = vadd.f32 %v6718_v56, %v9552_v44 }
 0x1e6   :  { %v6992_v27 = vpop.f32.mrf.mxu1  ;;  %v1056_v35 = vpop.f32.mrf.mxu0 }
 0x1e7   :  { %9548 = vst [vmem:[#allocation19_spill] sm:$0xff] %v6990_v63  ;;  %v6996_v52 = vadd.f32 %v1056_v35, %v623_v20  ;;  %v9555_v35 = vld [vmem:[#allocation23_spill] sm:$0xff] }
 0x1e8   :  { %v6998_v17 = vpop.f32.mrf.mxu1  ;;  %v1060_v43 = vpop.f32.mrf.mxu0  ;;  %5296 = vmatmul.mubr.msk.bf16.gmra.mxu0 %vm119_vm2, %v6986_v48  ;;  %5301 = vmatmul.mubr.msk.bf16.gmra.mxu1 %vm119_vm2, %v6844_v21  ;;  %v631_v20 = vadd.f32 %v9556_v12, %v9555_v35  ;;  %v9559_v35 = vld [vmem:[#allocation25_spill] sm:$0xff] }
 0x1e9   :  { %9550 = vst [vmem:[#allocation20_spill] sm:$0xff] %v6996_v52  ;;  %9551 = vst [vmem:[#allocation21_spill] sm:$0xff] %v6998_v17  ;;  %v7006_v31 = vadd.f32 %v1060_v43, %v627_v34  ;;  %2209 = vmatprep.mubr.bf16.mxu1 %v9478_v23  ;;  %5771 = vmatprep.mubr.msk.bf16.mxu0 %vm119_vm2, %v6728_v51  ;;  %v2497_v52 = vsel %vm2494_vm7, %v6554_v0, %v6579_v57  ;;  %v9558_v43 = vld [vmem:[#allocation24_spill] sm:$0xff]  ;;  %v9562_v0 = vld [vmem:[#allocation49_spill] sm:$0xff] }
 0x1ea   :  { %v7011_v28 = vpop.f32.mrf.mxu1  ;;  %v1062_v4 = vpop.f32.mrf.mxu0  ;;  %v633_v44 = vadd.f32 %v6736_v53, %v9558_v43  ;;  %v2530_v51 = vsel %vm144_vm1, %v2497_v52, 0  ;;  %v637_v12 = vadd.f32 %v6744_v49, %v9559_v35  ;;  %v9561_v57 = vld [vmem:[#allocation52_spill] sm:$0xff]  ;;  %v9563_v53 = vld [vmem:[#allocation26_spill] sm:$0xff]  ;;  %v9565_v49 = vld [vmem:[#allocation51_spill] sm:$0xff] }
 0x1eb   :  { %9553 = vst [vmem:[#allocation22_spill] sm:$0xff] %v7006_v31  ;;  %9554 = vst [vmem:[#allocation80_spill] sm:$0xff] %v7011_v28  ;;  %v7018_v63 = vadd.f32 %v1062_v4, %v629_v40  ;;  %v3030_v40 = vsel %vm3028_vm6, %v9562_v0, %v9561_v57  ;;  %v639_v52 = vadd.f32 %v6759_v30, %v9563_v53  ;;  %v9567_v30 = vld [vmem:[#allocation56_spill] sm:$0xff] }
 0x1ec   :  { %v7020_v56 = vpop.f32.mrf.mxu1  ;;  %v1064_v34 = vpop.f32.mrf.mxu0 }
 0x1ed   :  { %9557 = vst [vmem:[#allocation23_spill] sm:$0xff] %v7018_v63  ;;  %v7024_v31 = vadd.f32 %v1064_v34, %v631_v20 }
 0x1ee   :  { %v7027_v42 = vpop.f32.mrf.mxu1  ;;  %v1066_v28 = vpop.f32.mrf.mxu0 }
 0x1ef   :  { %v7031_v17 = vadd.f32 %v1066_v28, %v633_v44  ;;  %v9566_v44 = vld [vmem:[#allocation27_spill] sm:$0xff] }
 0x1f0   :  { %v1070_v4 = vpop.f32.mrf.mxu0  ;;  %v1143_v63 = vpop.f32.mrf.mxu1  ;;  %5302 = vmatmul.mubr.msk.bf16.gmra.mxu1 %vm119_vm2, %v6878_v50  ;;  %5772 = vmatmul.mubr.msk.bf16.vlgmr.msra.gmra.mxu0 %vm119_vm2, %v6774_v47  ;;  %v641_v47 = vadd.f32 %v6769_v38, %v9566_v44 }
 0x1f1   :  { %9560 = vst [vmem:[#allocation70_spill] sm:$0xff] %v7031_v17  ;;  %v7042_v20 = vadd.f32 %v1070_v4, %v637_v12  ;;  %v7045_v28 = vadd.f32 %v1143_v63, %v9565_v49  ;;  %2666 = vmatpush1.bf16.msra.mxu0 %v2530_v51  ;;  %2219 = vmatprep.mubr.bf16.mxu1 %v9478_v23  ;;  %v9568_v51 = vld [vmem:[#allocation28_spill] sm:$0xff]  ;;  %v9569_v49 = vld [vmem:[#allocation57_spill] sm:$0xff] }
 0x1f2   :  { %v1072_v34 = vpop.f32.mrf.mxu0  ;;  %v1145_v43 = vpop.f32.mrf.mxu1  ;;  %5775 = vmatprep.mubr.msk.bf16.mxu0 %vm119_vm2, %v6808_v37  ;;  %5394 = vmatprep.subr.msk.bf16.mxu0 %vm144_vm1, %v3030_v40  ;;  %v643_v4 = vadd.f32 %v6779_v13, %v9568_v51  ;;  %v9570_v17 = vld [vmem:[#allocation29_spill] sm:$0xff]  ;;  %v9573_v13 = vld [vmem:[#allocation30_spill] sm:$0xff] }
 0x1f3   :  { %9564 = vst [vmem:[#allocation24_spill] sm:$0xff] %v7042_v20  ;;  %v7053_v35 = vadd.f32 %v1072_v34, %v639_v52  ;;  %v7056_v12 = vadd.f32 %v1145_v43, %v9567_v30  ;;  %v647_v38 = vadd.f32 %v6784_v62, %v9570_v17  ;;  %v9572_v34 = vld [vmem:[#allocation58_spill] sm:$0xff] }
 0x1f4   :  { %v1074_v63 = vpop.f32.mrf.mxu0  ;;  %v1147_v57 = vpop.f32.mrf.mxu1 }
 0x1f5   :  { %v7060_v53 = vadd.f32 %v1074_v63, %v641_v47  ;;  %v7063_v20 = vadd.f32 %v1147_v57, %v9569_v49  ;;  %v649_v47 = vadd.f32 %v6796_v54, %v9573_v13  ;;  %v9575_v57 = vld [vmem:[#allocation59_spill] sm:$0xff]  ;;  %v9579_v13 = vld [vmem:[#allocation61_spill] sm:$0xff] }
 0x1f6   :  { %v1076_v37 = vpop.f32.mrf.mxu0  ;;  %v1149_v40 = vpop.f32.mrf.mxu1 }
 0x1f7   :  { %v7067_v52 = vadd.f32 %v1076_v37, %v643_v4  ;;  %v7070_v43 = vadd.f32 %v1149_v40, %v9572_v34  ;;  %v9576_v4 = vld [vmem:[#allocation31_spill] sm:$0xff]  ;;  %v9578_v34 = vld [vmem:[#allocation32_spill] sm:$0xff] }
 0x1f8   :  { %v1080_v44 = vpop.f32.mrf.mxu0  ;;  %v1153_v30 = vpop.f32.mrf.mxu1  ;;  %5303 = vmatmul.mubr.msk.bf16.gmra.mxu1 %vm119_vm2, %v6916_v26  ;;  %5776 = vmatmul.mubr.msk.bf16.gmra.mxu0 %vm119_vm2, %v6844_v21  ;;  %v651_v49 = vadd.f32 %v6803_v1, %v9576_v4  ;;  %v9577_v21 = vld [vmem:[#allocation60_spill] sm:$0xff] }
 0x1f9   :  { %9571 = vst [vmem:[#allocation25_spill] sm:$0xff] %v7067_v52  ;;  %v7078_v63 = vadd.f32 %v1080_v44, %v647_v38  ;;  %v7081_v62 = vadd.f32 %v1153_v30, %v9575_v57  ;;  %2229 = vmatprep.mubr.bf16.mxu1 %v9478_v23  ;;  %5779 = vmatprep.mubr.msk.bf16.mxu0 %vm119_vm2, %v6878_v50  ;;  %v9580_v52 = vld [vmem:[#allocation2_spill] sm:$0xff] }
 0x1fa   :  { %v1082_v17 = vpop.f32.mrf.mxu0  ;;  %v1155_v51 = vpop.f32.mrf.mxu1  ;;  %v653_v44 = vadd.f32 %v6813_v15, %v9578_v34  ;;  %v657_v1 = vadd.f32 %v6820_v6, %v9580_v52  ;;  %v9583_v15 = vld [vmem:[#allocation4_spill] sm:$0xff]  ;;  %v9586_v34 = vld [vmem:[#allocation6_spill] sm:$0xff] }
 0x1fb   :  { %9574 = vst [vmem:[#allocation52_spill] sm:$0xff] %v7078_v63  ;;  %v7088_v37 = vadd.f32 %v1082_v17, %v649_v47  ;;  %v7091_v40 = vadd.f32 %v1155_v51, %v9577_v21  ;;  %v9582_v17 = vld [vmem:[#allocation62_spill] sm:$0xff] }
 0x1fc   :  { %v1084_v54 = vpop.f32.mrf.mxu0  ;;  %v1157_v38 = vpop.f32.mrf.mxu1 }
 0x1fd   :  { %v7095_v30 = vadd.f32 %v1084_v54, %v651_v49  ;;  %v7098_v57 = vadd.f32 %v1157_v38, %v9579_v13  ;;  %v659_v49 = vadd.f32 %v6832_v3, %v9583_v15  ;;  %v9585_v38 = vld [vmem:[#allocation63_spill] sm:$0xff]  ;;  %v9589_v15 = vld [vmem:[#allocation66_spill] sm:$0xff] }
 0x1fe   :  { %v1086_v50 = vpop.f32.mrf.mxu0  ;;  %v1159_v63 = vpop.f32.mrf.mxu1 }
 0x1ff   :  { %v7102_v47 = vadd.f32 %v1086_v50, %v653_v44  ;;  %v7105_v51 = vadd.f32 %v1159_v63, %v9582_v17  ;;  %v661_v44 = vadd.f32 %v6839_v16, %v9586_v34  ;;  %v9588_v17 = vld [vmem:[#allocation8_spill] sm:$0xff] }
 0x200   :  { %v1090_v4 = vpop.f32.mrf.mxu0  ;;  %v1163_v21 = vpop.f32.mrf.mxu1  ;;  %5304 = vmatmul.mubr.msk.bf16.gmra.mxu1 %vm119_vm2, %v6951_v36  ;;  %5780 = vmatmul.mubr.msk.bf16.gmra.mxu0 %vm119_vm2, %v6916_v26  ;;  %v9587_v26 = vld [vmem:[#allocation65_spill] sm:$0xff] }
 0x201   :  { %9581 = vst [vmem:[#allocation49_spill] sm:$0xff] %v7102_v47  ;;  %v7113_v54 = vadd.f32 %v1090_v4, %v657_v1  ;;  %v7116_v6 = vadd.f32 %v1163_v21, %v9585_v38  ;;  %2239 = vmatprep.mubr.bf16.mxu1 %v9478_v23  ;;  %5783 = vmatprep.mubr.msk.bf16.mxu0 %vm119_vm2, %v6951_v36  ;;  %v9590_v47 = vld [vmem:[#allocation10_spill] sm:$0xff] }
 0x202   :  { %v1092_v52 = vpop.f32.mrf.mxu0  ;;  %v1165_v63 = vpop.f32.mrf.mxu1  ;;  %v663_v4 = vadd.f32 %v6849_v22, %v9588_v17  ;;  %v667_v16 = vadd.f32 %v6854_v45, %v9590_v47  ;;  %v9593_v22 = vld [vmem:[#allocation12_spill] sm:$0xff]  ;;  %v9596_v17 = vld [vmem:[#allocation14_spill] sm:$0xff] }
 0x203   :  { %9584 = vst [vmem:[#allocation26_spill] sm:$0xff] %v7113_v54  ;;  %v7123_v13 = vadd.f32 %v1092_v52, %v659_v49  ;;  %v7126_v50 = vadd.f32 %v1165_v63, %v9587_v26  ;;  %v9592_v52 = vld [vmem:[#allocation67_spill] sm:$0xff] }
 0x204   :  { %v1094_v3 = vpop.f32.mrf.mxu0  ;;  %v1167_v1 = vpop.f32.mrf.mxu1 }
 0x205   :  { %v7130_v21 = vadd.f32 %v1094_v3, %v661_v44  ;;  %v7133_v38 = vadd.f32 %v1167_v1, %v9589_v15  ;;  %v669_v44 = vadd.f32 %v6865_v59, %v9593_v22  ;;  %v9595_v1 = vld [vmem:[#allocation68_spill] sm:$0xff] }
 0x206   :  { %v1096_v36 = vpop.f32.mrf.mxu0  ;;  %v1169_v54 = vpop.f32.mrf.mxu1  ;;  %v9600_v22 = vld [vmem:[#allocation16_spill] sm:$0xff] }
 0x207   :  { %v7137_v49 = vadd.f32 %v1096_v36, %v663_v4  ;;  %v7140_v63 = vadd.f32 %v1169_v54, %v9592_v52  ;;  %v671_v4 = vadd.f32 %v6873_v41, %v9596_v17  ;;  %v9599_v36 = vld [vmem:[#allocation69_spill] sm:$0xff] }
 0x208   :  { %v1100_v34 = vpop.f32.mrf.mxu0  ;;  %v1173_v26 = vpop.f32.mrf.mxu1  ;;  %5305 = vmatmul.mubr.msk.bf16.gmra.mxu1 %vm119_vm2, %v6986_v48  ;;  %5784 = vmatmul.mubr.msk.bf16.gmra.mxu0 %vm119_vm2, %v6986_v48  ;;  %v9598_v48 = vld [vmem:[#allocation48_spill] sm:$0xff] }
 0x209   :  { %9591 = vst [vmem:[#allocation51_spill] sm:$0xff] %v7137_v49  ;;  %v7148_v3 = vadd.f32 %v1100_v34, %v667_v16  ;;  %v7151_v45 = vadd.f32 %v1173_v26, %v9595_v1  ;;  %2570 = vmatprep.mubr.bf16.mxu1 %v9478_v23  ;;  %2683 = vmatprep.mubr.bf16.mxu0 %v9478_v23  ;;  %v7168_v26 = vld [vmem:[%s9434_s1 + $0x140] sm:$0xff]  }
 0x20a   :  { %v1102_v47 = vpop.f32.mrf.mxu0  ;;  %v1175_v54 = vpop.f32.mrf.mxu1  ;;  %v3029_v59 = vsel %vm3028_vm6, %v9598_v48, %v9562_v0  ;;  %v673_v1 = vadd.f32 %v6884_v60, %v9600_v22 }
 0x20b   :  { %9594 = vst [vmem:[#allocation27_spill] sm:$0xff] %v7148_v3  ;;  %v7157_v15 = vadd.f32 %v1102_v47, %v669_v44  ;;  %v7163_v16 = vadd.f32 %v1175_v54, %v9599_v36  ;;  %v3025_v47 = vpop.permute.xlu1 %3024  ;;  %v3027_v0 = vpop.permute.xlu0 %3026  ;;  %v3059_v54 = vsel %vm144_vm1, %v3029_v59, 0  ;;  %v9602_v36 = vld [vmem:[#allocation33_spill] sm:$0xff] }
 0x20c   :  { %v1104_v52 = vpop.f32.mrf.mxu0  ;;  %v1177_v34 = vpop.f32.mrf.mxu1  ;;  %v9604_v59 = vld [vmem:[#allocation53_spill] sm:$0xff] }
 0x20d   :  { %9597 = vst [vmem:[#allocation56_spill] sm:$0xff] %v7157_v15  ;;  %v7172_v41 = vadd.f32 %v1104_v52, %v671_v4  ;;  %v7175_v44 = vadd.f32 %v1177_v34, %v6734_v7  ;;  %v831_v15 = vadd.f32 %v6891_v61, %v9602_v36  ;;  %v2536_v7 = vsel %vm144_vm1, %v6581_v46, 0  ;;  %v9605_v34 = vld [vmem:[#allocation34_spill] sm:$0xff]  ;;  %v9607_v46 = vld [vmem:[#allocation35_spill] sm:$0xff]  ;;  %v9609_v36 = vld [vmem:[#allocation36_spill] sm:$0xff] }
 0x20e   :  { %v1106_v17 = vpop.f32.mrf.mxu0  ;;  %v1179_v48 = vpop.f32.mrf.mxu1  ;;  %v3032_v52 = vsel %vm3028_vm6, %v9604_v59, %v3025_v47  ;;  %v7194_v61 = vsel %vm3028_vm6, %v3025_v47, %v3027_v0  ;;  %v834_v47 = vadd.f32 %v6911_v5, %v9607_v46  ;;  %v826_v5 = vadd.f32 %v6922_v19, %v9609_v36  ;;  %v9611_v59 = vld [vmem:[#allocation37_spill] sm:$0xff] }
 0x20f   :  { %9601 = vst [vmem:[#allocation28_spill] sm:$0xff] %v7172_v41  ;;  %v7180_v3 = vadd.f32 %v1106_v17, %v673_v1  ;;  %v7183_v49 = vadd.f32 %v1179_v48, %v6741_v32  ;;  %v823_v32 = vadd.f32 %v6902_v8, %v9605_v34 }
 0x210   :  { %v1183_v60 = vpop.f32.mrf.mxu1  ;;  %v5737_v4 = vpop.f32.mrf.mxu0  ;;  %5339 = vmatmul.mubr.msk.bf16.vlgmr.msra.gmra.mxu1 %vm119_vm2, %v7168_v26  ;;  %5348 = vmatmul.mubr.msk.bf16.vlgmr.msra.gmra.mxu0 %vm119_vm2, %v7168_v26 }
 0x211   :  { %9603 = vst [vmem:[#allocation57_spill] sm:$0xff] %v7180_v3  ;;  %v7199_v22 = vadd.f32 %v1183_v60, %v6757_v14  ;;  %v7201_v1 = vadd.f32 %v5737_v4, %v831_v15  ;;  %5788 = vmatpush3.bf16.msra.mxu1 %v2536_v7  ;;  %3088 = vmatpush1.bf16.msra.mxu0 %v3059_v54  ;;  %v7218_v54 = vld [vmem:[%s9434_s1 + $0x148] sm:$0xff]  }
 0x212   :  { %v1185_v17 = vpop.f32.mrf.mxu1  ;;  %v1256_v48 = vpop.f32.mrf.mxu0  ;;  %2580 = vmatprep.mubr.bf16.mxu1 %v9478_v23  ;;  %2693 = vmatprep.mubr.bf16.mxu0 %v9478_v23 }
 0x213   :  { %9606 = vst [vmem:[#allocation29_spill] sm:$0xff] %v7201_v1  ;;  %v7208_v0 = vadd.f32 %v1185_v17, %v6765_v2  ;;  %v7210_v8 = vadd.f32 %v1256_v48, %v823_v32  ;;  %5403 = vmatprep.subr.msk.bf16.mxu1 %vm144_vm1, %v3032_v52  ;;  %5867 = vmatprep.subr.msk.bf16.mxu0 %vm144_vm1, %v7194_v61 }
 0x214   :  { %v1187_v14 = vpop.f32.mrf.mxu1  ;;  %v5738_v15 = vpop.f32.mrf.mxu0  ;;  %v847_v52 = vadd.f32 %v6928_v25, %v9611_v59 }
 0x215   :  { %9608 = vst [vmem:[#allocation58_spill] sm:$0xff] %v7210_v8  ;;  %v7223_v2 = vadd.f32 %v1187_v14, %v6777_v10  ;;  %v7225_v60 = vadd.f32 %v5738_v15, %v834_v47  ;;  %v9613_v10 = vld [vmem:[#allocation38_spill] sm:$0xff]  ;;  %v9615_v14 = vld [vmem:[#allocation39_spill] sm:$0xff] }
 0x216   :  { %v1189_v4 = vpop.f32.mrf.mxu1  ;;  %v1259_v7 = vpop.f32.mrf.mxu0  ;;  %v839_v19 = vadd.f32 %v6940_v18, %v9613_v10  ;;  %v850_v15 = vadd.f32 %v6946_v58, %v9615_v14 }
 0x217   :  { %9610 = vst [vmem:[#allocation30_spill] sm:$0xff] %v7225_v60  ;;  %v7230_v34 = vadd.f32 %v1189_v4, %v6782_v29  ;;  %v7232_v32 = vadd.f32 %v1259_v7, %v826_v5  ;;  %v9617_v7 = vld [vmem:[#allocation40_spill] sm:$0xff]  ;;  %v7266_v58 = vpop.permute.xlu1 %3533  ;;  %v9635_v60 = vld [vmem:[#allocation75_spill] sm:$0xff] }
 0x218   :  { %v1193_v17 = vpop.f32.mrf.mxu1  ;;  %v5741_v48 = vpop.f32.mrf.mxu0  ;;  %5340 = vmatmul.mubr.msk.bf16.gmra.mxu1 %vm119_vm2, %v7218_v54  ;;  %5349 = vmatmul.mubr.msk.bf16.gmra.mxu0 %vm119_vm2, %v7218_v54  ;;  %v842_v59 = vadd.f32 %v6957_v11, %v9617_v7  ;;  %9619 = vst [vmem:[#allocation61_spill] sm:$0xff] %v7266_v58 }
 0x219   :  { %9612 = vst [vmem:[#allocation59_spill] sm:$0xff] %v7232_v32  ;;  %v7241_v46 = vadd.f32 %v1193_v17, %v6791_v24  ;;  %v7243_v25 = vadd.f32 %v5741_v48, %v847_v52  ;;  %2590 = vmatprep.mubr.bf16.mxu1 %v9478_v23  ;;  %2703 = vmatprep.mubr.bf16.mxu0 %v9478_v23  ;;  %v7257_v24 = vld [vmem:[%s9434_s1 + $0x150] sm:$0xff]  }
 0x21a   :  { %v1195_v29 = vpop.f32.mrf.mxu1  ;;  %v1272_v47 = vpop.f32.mrf.mxu0 }
 0x21b   :  { %9614 = vst [vmem:[#allocation31_spill] sm:$0xff] %v7243_v25  ;;  %v7250_v36 = vadd.f32 %v1195_v29, %v6801_v55  ;;  %v7252_v5 = vadd.f32 %v1272_v47, %v839_v19  ;;  %v7268_v55 = vpop.permute.xlu0 %3535  ;;  %v9620_v19 = vld [vmem:[#allocation41_spill] sm:$0xff]  ;;  %v9621_v47 = vld [vmem:[#allocation71_spill] sm:$0xff] }
 0x21c   :  { %v1197_v18 = vpop.f32.mrf.mxu1  ;;  %v5742_v4 = vpop.f32.mrf.mxu0  ;;  %v863_v29 = vadd.f32 %v6963_v9, %v9620_v19 }
 0x21d   :  { %9616 = vst [vmem:[#allocation60_spill] sm:$0xff] %v7252_v5  ;;  %v7262_v52 = vadd.f32 %v1197_v18, %v6811_v39  ;;  %v7264_v17 = vadd.f32 %v5742_v4, %v850_v15  ;;  %v9623_v39 = vld [vmem:[#allocation42_spill] sm:$0xff]  ;;  %v9625_v4 = vld [vmem:[#allocation72_spill] sm:$0xff] }
 0x21e   :  { %v1199_v48 = vpop.f32.mrf.mxu1  ;;  %v1275_v10 = vpop.f32.mrf.mxu0  ;;  %v9624_v15 = vld [vmem:[#allocation18_spill] sm:$0xff] }
 0x21f   :  { %9618 = vst [vmem:[#allocation32_spill] sm:$0xff] %v7264_v17  ;;  %v7273_v14 = vadd.f32 %v1199_v48, %v9621_v47  ;;  %v7275_v5 = vadd.f32 %v1275_v10, %v842_v59  ;;  %v855_v18 = vadd.f32 %v9624_v15, %v9623_v39  ;;  %v9627_v10 = vld [vmem:[#allocation43_spill] sm:$0xff]  ;;  %v9628_v47 = vld [vmem:[#allocation73_spill] sm:$0xff]  ;;  %v7297_v39 = vpop.permute.xlu1 %3537 }
 0x220   :  { %v1203_v11 = vpop.f32.mrf.mxu1  ;;  %v5745_v7 = vpop.f32.mrf.mxu0  ;;  %5341 = vmatmul.mubr.msk.bf16.gmra.mxu1 %vm119_vm2, %v7257_v24  ;;  %5350 = vmatmul.mubr.msk.bf16.gmra.mxu0 %vm119_vm2, %v7257_v24  ;;  %v866_v19 = vadd.f32 %v6981_v33, %v9627_v10  ;;  %v7304_v15 = vld [vmem:[%s9434_s1 + $0x158] sm:$0xff]   ;;  %v9631_v33 = vld [vmem:[#allocation74_spill] sm:$0xff] }
 0x221   :  { %9622 = vst [vmem:[#allocation2_spill] sm:$0xff] %v7275_v5  ;;  %v7284_v17 = vadd.f32 %v1203_v11, %v9625_v4  ;;  %v7286_v9 = vadd.f32 %v5745_v7, %v863_v29  ;;  %2600 = vmatprep.mubr.bf16.mxu1 %v9478_v23  ;;  %2713 = vmatprep.mubr.bf16.mxu0 %v9478_v23  ;;  %v7299_v11 = vpop.permute.xlu0 %3539  ;;  %v9630_v4 = vld [vmem:[#allocation44_spill] sm:$0xff] }
 0x222   :  { %v1205_v59 = vpop.f32.mrf.mxu1  ;;  %v1288_v48 = vpop.f32.mrf.mxu0 }
 0x223   :  { %9626 = vst [vmem:[#allocation62_spill] sm:$0xff] %v7286_v9  ;;  %v7293_v5 = vadd.f32 %v1205_v59, %v9628_v47  ;;  %v7295_v25 = vadd.f32 %v1288_v48, %v855_v18  ;;  %v858_v9 = vadd.f32 %v6992_v27, %v9630_v4  ;;  %v9633_v47 = vld [vmem:[#allocation45_spill] sm:$0xff]  ;;  %v9637_v27 = vld [vmem:[#allocation46_spill] sm:$0xff] }
 0x224   :  { %v1207_v29 = vpop.f32.mrf.mxu1  ;;  %v5746_v7 = vpop.f32.mrf.mxu0 }
 0x225   :  { %9629 = vst [vmem:[#allocation4_spill] sm:$0xff] %v7295_v25  ;;  %v7309_v10 = vadd.f32 %v1207_v29, %v9631_v33  ;;  %v7311_v59 = vadd.f32 %v5746_v7, %v866_v19  ;;  %v9634_v25 = vld [vmem:[#allocation21_spill] sm:$0xff]  ;;  %v9638_v19 = vld [vmem:[#allocation80_spill] sm:$0xff] }
 0x226   :  { %v1209_v18 = vpop.f32.mrf.mxu1  ;;  %v1291_v48 = vpop.f32.mrf.mxu0  ;;  %v879_v32 = vadd.f32 %v9634_v25, %v9633_v47  ;;  %v871_v29 = vadd.f32 %v9638_v19, %v9637_v27  ;;  %v9639_v7 = vld [vmem:[#allocation76_spill] sm:$0xff]  ;;  %v7347_v19 = vld [vmem:[%s9434_s1 + $0x160] sm:$0xff]  }
 0x227   :  { %9632 = vst [vmem:[#allocation63_spill] sm:$0xff] %v7311_v59  ;;  %v7316_v8 = vadd.f32 %v1209_v18, %v9635_v60  ;;  %v7318_v1 = vadd.f32 %v1291_v48, %v858_v9  ;;  %v7333_v60 = vpop.permute.xlu1 %3541  ;;  %v7335_v9 = vpop.permute.xlu0 %3543  ;;  %v9643_v48 = vld [vmem:[#allocation47_spill] sm:$0xff]  ;;  %v9648_v59 = vld [vmem:[#allocation78_spill] sm:$0xff] }
 0x228   :  { %v1213_v3 = vpop.f32.mrf.mxu1  ;;  %v5749_v41 = vpop.f32.mrf.mxu0  ;;  %5342 = vmatmul.mubr.msk.bf16.gmra.mxu1 %vm119_vm2, %v7304_v15  ;;  %5351 = vmatmul.mubr.msk.bf16.gmra.mxu0 %vm119_vm2, %v7304_v15  ;;  %9642 = vst [vmem:[#allocation66_spill] sm:$0xff] %v7335_v9  ;;  %v882_v47 = vadd.f32 %v7020_v56, %v9643_v48 }
 0x229   :  { %9636 = vst [vmem:[#allocation6_spill] sm:$0xff] %v7318_v1  ;;  %v7327_v4 = vadd.f32 %v1213_v3, %v9639_v7  ;;  %v7329_v25 = vadd.f32 %v5749_v41, %v879_v32  ;;  %2610 = vmatprep.mubr.bf16.mxu1 %v9478_v23  ;;  %2723 = vmatprep.mubr.bf16.mxu0 %v9478_v23  ;;  %v9644_v1 = vld [vmem:[#allocation77_spill] sm:$0xff]  ;;  %v9647_v7 = vld [vmem:[#allocation50_spill] sm:$0xff] }
 0x22a   :  { %v1215_v33 = vpop.f32.mrf.mxu1  ;;  %v1304_v18 = vpop.f32.mrf.mxu0 }
 0x22b   :  { %9640 = vst [vmem:[#allocation65_spill] sm:$0xff] %v7327_v4  ;;  %9641 = vst [vmem:[#allocation8_spill] sm:$0xff] %v7329_v25  ;;  %v7340_v27 = vadd.f32 %v1215_v33, %v9644_v1  ;;  %v7342_v3 = vadd.f32 %v1304_v18, %v871_v29  ;;  %v874_v25 = vadd.f32 %v7027_v42, %v9647_v7  ;;  %v7356_v56 = vpop.permute.xlu1 %4050  ;;  %v7358_v1 = vpop.permute.xlu0 %4052  ;;  %v9651_v18 = vld [vmem:[#allocation79_spill] sm:$0xff] }
 0x22c   :  { %v1217_v41 = vpop.f32.mrf.mxu1  ;;  %v5750_v32 = vpop.f32.mrf.mxu0  ;;  %9649 = vst [vmem:[#allocation12_spill] sm:$0xff] %v7356_v56  ;;  %9650 = vst [vmem:[#allocation68_spill] sm:$0xff] %v7358_v1  ;;  %v9653_v42 = vld [vmem:[#allocation3_spill] sm:$0xff]  ;;  %v9660_v56 = vld [vmem:[#allocation5_spill] sm:$0xff] }
 0x22d   :  { %9645 = vst [vmem:[#allocation10_spill] sm:$0xff] %v7340_v27  ;;  %9646 = vst [vmem:[#allocation67_spill] sm:$0xff] %v7342_v3  ;;  %v7352_v9 = vadd.f32 %v1217_v41, %v9648_v59  ;;  %v7354_v58 = vadd.f32 %v5750_v32, %v882_v47 }
 0x22e   :  { %v1219_v29 = vpop.f32.mrf.mxu1  ;;  %v1307_v33 = vpop.f32.mrf.mxu0 }
 0x22f   :  { %v7361_v48 = vadd.f32 %v1219_v29, %v9651_v18  ;;  %v7363_v3 = vadd.f32 %v1307_v33, %v874_v25  ;;  %v7377_v25 = vpop.permute.xlu1 %4054  ;;  %v7379_v41 = vpop.permute.xlu0 %4056 }
 0x230   :  { %v1544_v27 = vpop.f32.mrf.mxu1  ;;  %v1657_v4 = vpop.f32.mrf.mxu0  ;;  %5343 = vmatmul.mubr.msk.bf16.gmra.mxu1 %vm119_vm2, %v7347_v19  ;;  %5352 = vmatmul.mubr.msk.bf16.gmra.mxu0 %vm119_vm2, %v7347_v19  ;;  %9655 = vst [vmem:[#allocation69_spill] sm:$0xff] %v7377_v25  ;;  %9656 = vst [vmem:[#allocation16_spill] sm:$0xff] %v7379_v41  ;;  %v7384_v29 = vsel %vm4062_vm8, %v7377_v25, %v7379_v41 }
 0x231   :  { %9652 = vst [vmem:[#allocation14_spill] sm:$0xff] %v7363_v3  ;;  %v7370_v59 = vadd.f32 %v1544_v27, %v9653_v42  ;;  %v7373_v47 = vadd.f32 %v1657_v4, %v7045_v28  ;;  %2620 = vmatprep.mubr.bf16.mxu1 %v9478_v23  ;;  %2733 = vmatprep.mubr.bf16.mxu0 %v9478_v23  ;;  %9657 = vst [vmem:[#allocation33_spill] sm:$0xff] %v7384_v29  ;;  %v9658_v27 = vld [vmem:[#allocation54_spill] sm:$0xff]  ;;  %v7395_v42 = vld [vmem:[%s9434_s1 + $0x168] sm:$0xff]  }
 0x232   :  { %v1546_v32 = vpop.f32.mrf.mxu1  ;;  %v1659_v7 = vpop.f32.mrf.mxu0 }
 0x233   :  { %9654 = vst [vmem:[#allocation48_spill] sm:$0xff] %v7373_v47  ;;  %v7387_v33 = vadd.f32 %v1546_v32, %v9658_v27  ;;  %v7390_v28 = vadd.f32 %v1659_v7, %v7056_v12  ;;  %v9662_v32 = vld [vmem:[#allocation7_spill] sm:$0xff] }
 0x234   :  { %v1548_v4 = vpop.f32.mrf.mxu1  ;;  %v1661_v18 = vpop.f32.mrf.mxu0 }
 0x235   :  { %9659 = vst [vmem:[#allocation53_spill] sm:$0xff] %v7390_v28  ;;  %v7398_v47 = vadd.f32 %v1548_v4, %v9660_v56  ;;  %v7401_v1 = vadd.f32 %v1661_v18, %v7063_v20  ;;  %v9664_v56 = vld [vmem:[#allocation9_spill] sm:$0xff] }
 0x236   :  { %v1550_v29 = vpop.f32.mrf.mxu1  ;;  %v1663_v41 = vpop.f32.mrf.mxu0 }
 0x237   :  { %9661 = vst [vmem:[#allocation34_spill] sm:$0xff] %v7401_v1  ;;  %v7404_v27 = vadd.f32 %v1550_v29, %v9662_v32  ;;  %v7407_v12 = vadd.f32 %v1663_v41, %v7070_v43  ;;  %v9666_v29 = vld [vmem:[#allocation11_spill] sm:$0xff] }
 0x238   :  { %v1554_v7 = vpop.f32.mrf.mxu1  ;;  %v1667_v28 = vpop.f32.mrf.mxu0  ;;  %5344 = vmatmul.mubr.msk.bf16.gmra.mxu1 %vm119_vm2, %v7395_v42  ;;  %5353 = vmatmul.mubr.msk.bf16.gmra.mxu0 %vm119_vm2, %v7395_v42 }
 0x239   :  { %9663 = vst [vmem:[#allocation35_spill] sm:$0xff] %v7407_v12  ;;  %v7414_v4 = vadd.f32 %v1554_v7, %v9664_v56  ;;  %v7417_v20 = vadd.f32 %v1667_v28, %v7081_v62  ;;  %2630 = vmatprep.mubr.bf16.mxu1 %v9478_v23  ;;  %2743 = vmatprep.mubr.bf16.mxu0 %v9478_v23  ;;  %v7430_v7 = vld [vmem:[%s9434_s1 + $0x170] sm:$0xff]   ;;  %v9668_v62 = vld [vmem:[#allocation13_spill] sm:$0xff] }
 0x23a   :  { %v1556_v43 = vpop.f32.mrf.mxu1  ;;  %v1669_v41 = vpop.f32.mrf.mxu0 }
 0x23b   :  { %9665 = vst [vmem:[#allocation36_spill] sm:$0xff] %v7417_v20  ;;  %v7422_v18 = vadd.f32 %v1556_v43, %v9666_v29  ;;  %v7425_v32 = vadd.f32 %v1669_v41, %v7091_v40  ;;  %v9670_v43 = vld [vmem:[#allocation15_spill] sm:$0xff] }
 0x23c   :  { %v1558_v12 = vpop.f32.mrf.mxu1  ;;  %v1671_v1 = vpop.f32.mrf.mxu0 }
 0x23d   :  { %9667 = vst [vmem:[#allocation37_spill] sm:$0xff] %v7425_v32  ;;  %v7433_v28 = vadd.f32 %v1558_v12, %v9668_v62  ;;  %v7436_v56 = vadd.f32 %v1671_v1, %v7098_v57  ;;  %v9672_v12 = vld [vmem:[#allocation17_spill] sm:$0xff] }
 0x23e   :  { %v1560_v20 = vpop.f32.mrf.mxu1  ;;  %v1673_v25 = vpop.f32.mrf.mxu0 }
 0x23f   :  { %9669 = vst [vmem:[#allocation38_spill] sm:$0xff] %v7436_v56  ;;  %v7439_v29 = vadd.f32 %v1560_v20, %v9670_v43  ;;  %v7442_v40 = vadd.f32 %v1673_v25, %v7105_v51  ;;  %v9674_v25 = vld [vmem:[#allocation64_spill] sm:$0xff] }
 0x240   :  { %v1564_v41 = vpop.f32.mrf.mxu1  ;;  %v1677_v32 = vpop.f32.mrf.mxu0  ;;  %5345 = vmatmul.mubr.msk.bf16.gmra.mxu1 %vm119_vm2, %v7430_v7  ;;  %5354 = vmatmul.mubr.msk.bf16.gmra.mxu0 %vm119_vm2, %v7430_v7 }
 0x241   :  { %9671 = vst [vmem:[#allocation39_spill] sm:$0xff] %v7442_v40  ;;  %v7449_v62 = vadd.f32 %v1564_v41, %v9672_v12  ;;  %v7452_v57 = vadd.f32 %v1677_v32, %v7116_v6  ;;  %2640 = vmatprep.mubr.bf16.mxu1 %v9478_v23  ;;  %2753 = vmatprep.mubr.bf16.mxu0 %v9478_v23  ;;  %v7465_v41 = vld [vmem:[%s9434_s1 + $0x178] sm:$0xff]   ;;  %v9676_v6 = vld [vmem:[#allocation19_spill] sm:$0xff] }
 0x242   :  { %v1566_v51 = vpop.f32.mrf.mxu1  ;;  %v1679_v1 = vpop.f32.mrf.mxu0 }
 0x243   :  { %9673 = vst [vmem:[#allocation40_spill] sm:$0xff] %v7452_v57  ;;  %v7457_v20 = vadd.f32 %v1566_v51, %v9674_v25  ;;  %v7460_v43 = vadd.f32 %v1679_v1, %v7126_v50  ;;  %v9678_v51 = vld [vmem:[#allocation20_spill] sm:$0xff] }
 0x244   :  { %v1568_v40 = vpop.f32.mrf.mxu1  ;;  %v1681_v56 = vpop.f32.mrf.mxu0 }
 0x245   :  { %9675 = vst [vmem:[#allocation41_spill] sm:$0xff] %v7460_v43  ;;  %v7468_v32 = vadd.f32 %v1568_v40, %v9676_v6  ;;  %v7471_v12 = vadd.f32 %v1681_v56, %v7133_v38  ;;  %v9680_v40 = vld [vmem:[#allocation22_spill] sm:$0xff]  ;;  %v9682_v56 = vld [vmem:[#allocation23_spill] sm:$0xff] }
 0x246   :  { %v1570_v57 = vpop.f32.mrf.mxu1  ;;  %v1683_v3 = vpop.f32.mrf.mxu0 }
 0x247   :  { %9677 = vst [vmem:[#allocation71_spill] sm:$0xff] %v7471_v12  ;;  %v7474_v25 = vadd.f32 %v1570_v57, %v9678_v51  ;;  %v7477_v50 = vadd.f32 %v1683_v3, %v7140_v63 }
 0x248   :  { %v1574_v1 = vpop.f32.mrf.mxu1  ;;  %v1687_v43 = vpop.f32.mrf.mxu0  ;;  %5346 = vmatmul.mubr.msk.bf16.gmra.mxu1 %vm119_vm2, %v7465_v41  ;;  %5355 = vmatmul.mubr.msk.bf16.gmra.mxu0 %vm119_vm2, %v7465_v41 }
 0x249   :  { %9679 = vst [vmem:[#allocation42_spill] sm:$0xff] %v7477_v50  ;;  %v7484_v6 = vadd.f32 %v1574_v1, %v9680_v40  ;;  %v7487_v38 = vadd.f32 %v1687_v43, %v7151_v45  ;;  %5789 = vmatprep.mubr.msk.bf16.mxu1 %vm119_vm2, %v7168_v26  ;;  %3105 = vmatprep.mubr.bf16.mxu0 %v9478_v23  ;;  %v7501_v45 = vld [vmem:[%s9434_s1 + $0x180] sm:$0xff]   ;;  %v3071_v40 = vsel %vm144_vm1, %v7194_v61, 0  ;;  %v9686_v61 = vld [vmem:[#allocation24_spill] sm:$0xff] }
 0x24a   :  { %v1576_v63 = vpop.f32.mrf.mxu1  ;;  %v1689_v3 = vpop.f32.mrf.mxu0 }
 0x24b   :  { %9681 = vst [vmem:[#allocation18_spill] sm:$0xff] %v7487_v38  ;;  %v7493_v57 = vadd.f32 %v1576_v63, %v9682_v56  ;;  %v7496_v51 = vadd.f32 %v1689_v3, %v7163_v16  ;;  %v9684_v3 = vld [vmem:[#allocation70_spill] sm:$0xff] }
 0x24c   :  { %v1578_v50 = vpop.f32.mrf.mxu1  ;;  %v1691_v12 = vpop.f32.mrf.mxu0 }
 0x24d   :  { %9683 = vst [vmem:[#allocation72_spill] sm:$0xff] %v7496_v51  ;;  %v7504_v43 = vadd.f32 %v1578_v50, %v7024_v31  ;;  %v7507_v26 = vadd.f32 %v1691_v12, %v7175_v44  ;;  %v9685_v51 = vld [vmem:[#allocation55_spill] sm:$0xff]  ;;  %v3547_v44 = vsel %vm3545_vm9, %v7268_v55, %v7297_v39 }
 0x24e   :  { %v1693_v1 = vpop.f32.mrf.mxu0  ;;  %v1580_v16 = vpop.f32.mrf.mxu1  ;;  %v3065_v38 = vsel %vm144_vm1, %v9685_v51, 0 }
 0x24f   :  { %v7512_v63 = vadd.f32 %v1693_v1, %v7183_v49  ;;  %v7515_v56 = vadd.f32 %v1580_v16, %v9684_v3  ;;  %v3549_v49 = vsel %vm3545_vm9, %v7299_v11, %v7333_v60 }
 0x250   :  { %v1584_v31 = vpop.f32.mrf.mxu1  ;;  %v1697_v50 = vpop.f32.mrf.mxu0  ;;  %5790 = vmatmul.mubr.msk.bf16.vlgmr.msra.gmra.mxu1 %vm119_vm2, %v7218_v54  ;;  %5395 = vmatmul.mubr.msk.bf16.vlgmr.msra.gmra.mxu0 %vm119_vm2, %v7501_v45 }
 0x251   :  { %v7530_v12 = vadd.f32 %v1584_v31, %v9686_v61  ;;  %v7533_v51 = vadd.f32 %v1697_v50, %v7199_v22  ;;  %3201 = vmatpush1.bf16.msra.mxu1 %v3065_v38  ;;  %5806 = vmatpush3.bf16.msra.mxu0 %v3071_v40  ;;  %v7549_v40 = vld [vmem:[%s9434_s1 + $0x188] sm:$0xff]   ;;  %v9687_v50 = vld [vmem:[#allocation25_spill] sm:$0xff] }
 0x252   :  { %v1586_v54 = vpop.f32.mrf.mxu1  ;;  %v1699_v1 = vpop.f32.mrf.mxu0  ;;  %5793 = vmatprep.mubr.msk.bf16.mxu1 %vm119_vm2, %v7257_v24  ;;  %3115 = vmatprep.mubr.bf16.mxu0 %v9478_v23 }
 0x253   :  { %v7539_v16 = vadd.f32 %v1586_v54, %v7053_v35  ;;  %v7542_v3 = vadd.f32 %v1699_v1, %v7208_v0  ;;  %5444 = vmatprep.subr.msk.bf16.mxu1 %vm144_vm1, %v3547_v44  ;;  %5453 = vmatprep.subr.msk.bf16.mxu0 %vm144_vm1, %v3549_v49 }
 0x254   :  { %v1588_v22 = vpop.f32.mrf.mxu1  ;;  %v1701_v38 = vpop.f32.mrf.mxu0 }
 0x255   :  { %v7552_v24 = vadd.f32 %v1588_v22, %v7060_v53  ;;  %v7555_v35 = vadd.f32 %v1701_v38, %v7223_v2  ;;  %v9688_v53 = vld [vmem:[#allocation52_spill] sm:$0xff] }
 0x256   :  { %v1590_v31 = vpop.f32.mrf.mxu1  ;;  %v1703_v0 = vpop.f32.mrf.mxu0 }
 0x257   :  { %v7558_v61 = vadd.f32 %v1590_v31, %v9687_v50  ;;  %v7561_v44 = vadd.f32 %v1703_v0, %v7230_v34 }
 0x258   :  { %v1594_v49 = vpop.f32.mrf.mxu1  ;;  %v1707_v54 = vpop.f32.mrf.mxu0  ;;  %5794 = vmatmul.mubr.msk.bf16.gmra.mxu1 %vm119_vm2, %v7304_v15  ;;  %5396 = vmatmul.mubr.msk.bf16.gmra.mxu0 %vm119_vm2, %v7549_v40 }
 0x259   :  { %v7568_v1 = vadd.f32 %v1594_v49, %v9688_v53  ;;  %v7571_v2 = vadd.f32 %v1707_v54, %v7241_v46  ;;  %5797 = vmatprep.mubr.msk.bf16.mxu1 %vm119_vm2, %v7347_v19  ;;  %3125 = vmatprep.mubr.bf16.mxu0 %v9478_v23  ;;  %v7585_v46 = vld [vmem:[%s9434_s1 + $0x190] sm:$0xff]  }
 0x25a   :  { %v1596_v34 = vpop.f32.mrf.mxu1  ;;  %v1709_v22 = vpop.f32.mrf.mxu0 }
 0x25b   :  { %v7577_v38 = vadd.f32 %v1596_v34, %v7088_v37  ;;  %v7580_v15 = vadd.f32 %v1709_v22, %v7250_v36  ;;  %v9690_v37 = vld [vmem:[#allocation49_spill] sm:$0xff] }
 0x25c   :  { %v1598_v31 = vpop.f32.mrf.mxu1  ;;  %v1711_v0 = vpop.f32.mrf.mxu0 }
 0x25d   :  { %v7588_v50 = vadd.f32 %v1598_v31, %v7095_v30  ;;  %v7591_v19 = vadd.f32 %v1711_v0, %v7262_v52  ;;  %v9692_v30 = vld [vmem:[#allocation26_spill] sm:$0xff] }
 0x25e   :  { %v1600_v49 = vpop.f32.mrf.mxu1  ;;  %v1713_v54 = vpop.f32.mrf.mxu0 }
 0x25f   :  { %9689 = vst [vmem:[#allocation43_spill] sm:$0xff] %v7591_v19  ;;  %v7594_v53 = vadd.f32 %v1600_v49, %v9690_v37  ;;  %v7597_v36 = vadd.f32 %v1713_v54, %v7273_v14 }
 0x260   :  { %v1604_v34 = vpop.f32.mrf.mxu1  ;;  %v1717_v22 = vpop.f32.mrf.mxu0  ;;  %5798 = vmatmul.mubr.msk.bf16.gmra.mxu1 %vm119_vm2, %v7395_v42  ;;  %5397 = vmatmul.mubr.msk.bf16.gmra.mxu0 %vm119_vm2, %v7585_v46 }
 0x261   :  { %9691 = vst [vmem:[#allocation73_spill] sm:$0xff] %v7597_v36  ;;  %v7604_v31 = vadd.f32 %v1604_v34, %v9692_v30  ;;  %v7607_v52 = vadd.f32 %v1717_v22, %v7284_v17  ;;  %5801 = vmatprep.mubr.msk.bf16.mxu1 %vm119_vm2, %v7430_v7  ;;  %3135 = vmatprep.mubr.bf16.mxu0 %v9478_v23  ;;  %v7621_v17 = vld [vmem:[%s9434_s1 + $0x198] sm:$0xff]   ;;  %v9709_v36 = vld [vmem:[#allocation66_spill] sm:$0xff] }
 0x262   :  { %v1606_v14 = vpop.f32.mrf.mxu1  ;;  %v1719_v0 = vpop.f32.mrf.mxu0  ;;  %v7677_v19 = vsel %vm3545_vm9, %v7333_v60, %v9709_v36  ;;  %v9712_v36 = vld [vmem:[#allocation58_spill] sm:$0xff] }
 0x263   :  { %9693 = vst [vmem:[#allocation44_spill] sm:$0xff] %v7607_v52  ;;  %v7613_v49 = vadd.f32 %v1606_v14, %v7123_v13  ;;  %v7616_v42 = vadd.f32 %v1719_v0, %v7293_v5  ;;  %v9696_v13 = vld [vmem:[#allocation51_spill] sm:$0xff] }
 0x264   :  { %v1608_v54 = vpop.f32.mrf.mxu1  ;;  %v1721_v37 = vpop.f32.mrf.mxu0 }
 0x265   :  { %9694 = vst [vmem:[#allocation74_spill] sm:$0xff] %v7616_v42  ;;  %v7624_v34 = vadd.f32 %v1608_v54, %v7130_v21  ;;  %v7627_v7 = vadd.f32 %v1721_v37, %v7309_v10  ;;  %v9698_v21 = vld [vmem:[#allocation27_spill] sm:$0xff]  ;;  %v9699_v10 = vld [vmem:[#allocation65_spill] sm:$0xff] }
 0x266   :  { %v1610_v22 = vpop.f32.mrf.mxu1  ;;  %v1723_v30 = vpop.f32.mrf.mxu0 }
 0x267   :  { %9695 = vst [vmem:[#allocation45_spill] sm:$0xff] %v7627_v7  ;;  %v7630_v14 = vadd.f32 %v1610_v22, %v9696_v13  ;;  %v7633_v5 = vadd.f32 %v1723_v30, %v7316_v8  ;;  %v9701_v30 = vld [vmem:[#allocation10_spill] sm:$0xff]  ;;  %v9704_v7 = vld [vmem:[#allocation56_spill] sm:$0xff] }
 0x268   :  { %v1614_v0 = vpop.f32.mrf.mxu1  ;;  %v1727_v42 = vpop.f32.mrf.mxu0  ;;  %5802 = vmatmul.mubr.msk.bf16.gmra.mxu1 %vm119_vm2, %v7465_v41  ;;  %5398 = vmatmul.mubr.msk.bf16.gmra.mxu0 %vm119_vm2, %v7621_v17  ;;  %v9703_v41 = vld [vmem:[#allocation61_spill] sm:$0xff] }
 0x269   :  { %9697 = vst [vmem:[#allocation21_spill] sm:$0xff] %v7633_v5  ;;  %v7640_v54 = vadd.f32 %v1614_v0, %v9698_v21  ;;  %v7643_v37 = vadd.f32 %v1727_v42, %v9699_v10  ;;  %3145 = vmatprep.mubr.bf16.mxu0 %v9478_v23  ;;  %3218 = vmatprep.mubr.bf16.mxu1 %v9478_v23  ;;  %v7659_v42 = vld [vmem:[%s9434_s1 + $0x1a0] sm:$0xff]   ;;  %v9705_v10 = vld [vmem:[#allocation28_spill] sm:$0xff] }
 0x26a   :  { %v1729_v8 = vpop.f32.mrf.mxu0  ;;  %v1616_v22 = vpop.f32.mrf.mxu1  ;;  %v3546_v5 = vsel %vm3545_vm9, %v9703_v41, %v7268_v55 }
 0x26b   :  { %9700 = vst [vmem:[#allocation75_spill] sm:$0xff] %v7643_v37  ;;  %v7648_v13 = vadd.f32 %v1729_v8, %v9701_v30  ;;  %v7654_v52 = vadd.f32 %v1616_v22, %v9704_v7  ;;  %v3576_v30 = vsel %vm144_vm1, %v3546_v5, 0  ;;  %v9708_v22 = vld [vmem:[#allocation57_spill] sm:$0xff] }
 0x26c   :  { %v1618_v0 = vpop.f32.mrf.mxu1  ;;  %v1731_v21 = vpop.f32.mrf.mxu0 }
 0x26d   :  { %9702 = vst [vmem:[#allocation46_spill] sm:$0xff] %v7648_v13  ;;  %v7662_v37 = vadd.f32 %v1618_v0, %v9705_v10  ;;  %v7665_v8 = vadd.f32 %v1731_v21, %v7352_v9  ;;  %v9710_v9 = vld [vmem:[#allocation29_spill] sm:$0xff] }
 0x26e   :  { %v1733_v13 = vpop.f32.mrf.mxu0  ;;  %v1620_v55 = vpop.f32.mrf.mxu1 }
 0x26f   :  { %9706 = vst [vmem:[#allocation80_spill] sm:$0xff] %v7665_v8  ;;  %v7669_v7 = vadd.f32 %v1733_v13, %v7361_v48  ;;  %v7672_v41 = vadd.f32 %v1620_v55, %v9708_v22 }
 0x270   :  { %v5755_v0 = vpop.f32.mrf.mxu1  ;;  %v2058_v10 = vpop.f32.mrf.mxu0  ;;  %5399 = vmatmul.mubr.msk.bf16.gmra.mxu0 %vm119_vm2, %v7659_v42  ;;  %5404 = vmatmul.mubr.msk.bf16.vlgmr.msra.gmra.mxu1 %vm119_vm2, %v7501_v45 }
 0x271   :  { %9707 = vst [vmem:[#allocation76_spill] sm:$0xff] %v7669_v7  ;;  %v7684_v5 = vadd.f32 %v5755_v0, %v9710_v9  ;;  %v7687_v48 = vadd.f32 %v2058_v10, %v7370_v59  ;;  %3605 = vmatpush1.bf16.msra.mxu1 %v3576_v30  ;;  %3155 = vmatprep.mubr.bf16.mxu0 %v9478_v23  ;;  %v7702_v59 = vld [vmem:[%s9434_s1 + $0x1a8] sm:$0xff]   ;;  %v9714_v30 = vld [vmem:[#allocation30_spill] sm:$0xff] }
 0x272   :  { %v1770_v13 = vpop.f32.mrf.mxu1  ;;  %v2060_v60 = vpop.f32.mrf.mxu0  ;;  %3228 = vmatprep.mubr.bf16.mxu1 %v9478_v23  ;;  %5868 = vmatprep.subr.msk.bf16.mxu1 %vm144_vm1, %v7677_v19 }
 0x273   :  { %9711 = vst [vmem:[#allocation47_spill] sm:$0xff] %v7687_v48  ;;  %v7694_v21 = vadd.f32 %v1770_v13, %v9712_v36  ;;  %v7697_v55 = vadd.f32 %v2060_v60, %v7387_v33  ;;  %v9716_v13 = vld [vmem:[#allocation59_spill] sm:$0xff] }
 0x274   :  { %v5756_v22 = vpop.f32.mrf.mxu1  ;;  %v2062_v0 = vpop.f32.mrf.mxu0 }
 0x275   :  { %9713 = vst [vmem:[#allocation77_spill] sm:$0xff] %v7697_v55  ;;  %v7705_v10 = vadd.f32 %v5756_v22, %v9714_v30  ;;  %v7708_v9 = vadd.f32 %v2062_v0, %v7398_v47  ;;  %v9718_v22 = vld [vmem:[#allocation31_spill] sm:$0xff] }
 0x276   :  { %v1773_v48 = vpop.f32.mrf.mxu1  ;;  %v2064_v7 = vpop.f32.mrf.mxu0 }
 0x277   :  { %9715 = vst [vmem:[#allocation50_spill] sm:$0xff] %v7708_v9  ;;  %v7711_v36 = vadd.f32 %v1773_v48, %v9716_v13  ;;  %v7714_v33 = vadd.f32 %v2064_v7, %v7404_v27  ;;  %v9720_v48 = vld [vmem:[#allocation60_spill] sm:$0xff] }
 0x278   :  { %v5759_v60 = vpop.f32.mrf.mxu1  ;;  %v2068_v55 = vpop.f32.mrf.mxu0  ;;  %5400 = vmatmul.mubr.msk.bf16.gmra.mxu0 %vm119_vm2, %v7702_v59  ;;  %5405 = vmatmul.mubr.msk.bf16.gmra.mxu1 %vm119_vm2, %v7549_v40 }
 0x279   :  { %9717 = vst [vmem:[#allocation78_spill] sm:$0xff] %v7714_v33  ;;  %v7721_v30 = vadd.f32 %v5759_v60, %v9718_v22  ;;  %v7724_v47 = vadd.f32 %v2068_v55, %v7414_v4  ;;  %3165 = vmatprep.mubr.bf16.mxu0 %v9478_v23  ;;  %3238 = vmatprep.mubr.bf16.mxu1 %v9478_v23  ;;  %v7737_v60 = vld [vmem:[%s9434_s1 + $0x1b0] sm:$0xff]  }
 0x27a   :  { %v1786_v27 = vpop.f32.mrf.mxu1  ;;  %v2070_v7 = vpop.f32.mrf.mxu0  ;;  %v9722_v4 = vld [vmem:[#allocation32_spill] sm:$0xff] }
 0x27b   :  { %9719 = vst [vmem:[#allocation79_spill] sm:$0xff] %v7724_v47  ;;  %v7729_v0 = vadd.f32 %v1786_v27, %v9720_v48  ;;  %v7732_v13 = vadd.f32 %v2070_v7, %v7422_v18  ;;  %v9724_v27 = vld [vmem:[#allocation2_spill] sm:$0xff] }
 0x27c   :  { %v5760_v33 = vpop.f32.mrf.mxu1  ;;  %v2072_v9 = vpop.f32.mrf.mxu0 }
 0x27d   :  { %9721 = vst [vmem:[#allocation3_spill] sm:$0xff] %v7732_v13  ;;  %v7740_v55 = vadd.f32 %v5760_v33, %v9722_v4  ;;  %v7743_v22 = vadd.f32 %v2072_v9, %v7433_v28  ;;  %v9726_v33 = vld [vmem:[#allocation62_spill] sm:$0xff]  ;;  %v9729_v9 = vld [vmem:[#allocation4_spill] sm:$0xff] }
 0x27e   :  { %v1789_v47 = vpop.f32.mrf.mxu1  ;;  %v2074_v8 = vpop.f32.mrf.mxu0 }
 0x27f   :  { %9723 = vst [vmem:[#allocation54_spill] sm:$0xff] %v7743_v22  ;;  %v7746_v48 = vadd.f32 %v1789_v47, %v9724_v27  ;;  %v7749_v18 = vadd.f32 %v2074_v8, %v7439_v29 }
 0x280   :  { %v5763_v7 = vpop.f32.mrf.mxu1  ;;  %v2078_v13 = vpop.f32.mrf.mxu0  ;;  %5401 = vmatmul.mubr.msk.bf16.gmra.mxu0 %vm119_vm2, %v7737_v60  ;;  %5406 = vmatmul.mubr.msk.bf16.gmra.mxu1 %vm119_vm2, %v7585_v46 }
 0x281   :  { %9725 = vst [vmem:[#allocation5_spill] sm:$0xff] %v7749_v18  ;;  %v7756_v4 = vadd.f32 %v5763_v7, %v9726_v33  ;;  %v7759_v28 = vadd.f32 %v2078_v13, %v7449_v62  ;;  %3175 = vmatprep.mubr.bf16.mxu0 %v9478_v23  ;;  %3248 = vmatprep.mubr.bf16.mxu1 %v9478_v23  ;;  %v7772_v7 = vld [vmem:[%s9434_s1 + $0x1b8] sm:$0xff]   ;;  %v9731_v62 = vld [vmem:[#allocation63_spill] sm:$0xff] }
 0x282   :  { %v1802_v29 = vpop.f32.mrf.mxu1  ;;  %v2080_v8 = vpop.f32.mrf.mxu0 }
 0x283   :  { %9727 = vst [vmem:[#allocation7_spill] sm:$0xff] %v7756_v4  ;;  %9728 = vst [vmem:[#allocation9_spill] sm:$0xff] %v7759_v28  ;;  %v7764_v47 = vadd.f32 %v1802_v29, %v9729_v9  ;;  %v7767_v27 = vadd.f32 %v2080_v8, %v7457_v20  ;;  %v9733_v29 = vld [vmem:[#allocation6_spill] sm:$0xff] }
 0x284   :  { %v5764_v18 = vpop.f32.mrf.mxu1  ;;  %v2082_v22 = vpop.f32.mrf.mxu0 }
 0x285   :  { %9730 = vst [vmem:[#allocation11_spill] sm:$0xff] %v7767_v27  ;;  %v7775_v13 = vadd.f32 %v5764_v18, %v9731_v62  ;;  %v7778_v33 = vadd.f32 %v2082_v22, %v7468_v32  ;;  %v9735_v18 = vld [vmem:[#allocation8_spill] sm:$0xff] }
 0x286   :  { %v1805_v28 = vpop.f32.mrf.mxu1  ;;  %v2084_v4 = vpop.f32.mrf.mxu0 }
 0x287   :  { %9732 = vst [vmem:[#allocation13_spill] sm:$0xff] %v7778_v33  ;;  %v7781_v9 = vadd.f32 %v1805_v28, %v9733_v29  ;;  %v7784_v20 = vadd.f32 %v2084_v4, %v7474_v25  ;;  %v3548_v4 = vsel %vm3545_vm9, %v7297_v39, %v7299_v11  ;;  %v9737_v28 = vld [vmem:[#allocation67_spill] sm:$0xff]  ;;  %v9739_v11 = vld [vmem:[#allocation14_spill] sm:$0xff] }
 0x288   :  { %v5767_v8 = vpop.f32.mrf.mxu1  ;;  %v2088_v27 = vpop.f32.mrf.mxu0  ;;  %5402 = vmatmul.mubr.msk.bf16.gmra.mxu0 %vm119_vm2, %v7772_v7  ;;  %5407 = vmatmul.mubr.msk.bf16.gmra.mxu1 %vm119_vm2, %v7621_v17 }
 0x289   :  { %9734 = vst [vmem:[#allocation15_spill] sm:$0xff] %v7784_v20  ;;  %v7791_v62 = vadd.f32 %v5767_v8, %v9735_v18  ;;  %v7794_v32 = vadd.f32 %v2088_v27, %v7484_v6  ;;  %3258 = vmatprep.mubr.bf16.mxu1 %v9478_v23  ;;  %5807 = vmatprep.mubr.msk.bf16.mxu0 %vm119_vm2, %v7501_v45  ;;  %v3582_v45 = vsel %vm144_vm1, %v3548_v4, 0 }
 0x28a   :  { %v1818_v25 = vpop.f32.mrf.mxu1  ;;  %v2090_v22 = vpop.f32.mrf.mxu0 }
 0x28b   :  { %9736 = vst [vmem:[#allocation17_spill] sm:$0xff] %v7794_v32  ;;  %v7803_v29 = vadd.f32 %v1818_v25, %v9737_v28  ;;  %v7806_v8 = vadd.f32 %v2090_v22, %v7493_v57  ;;  %v9740_v57 = vld [vmem:[#allocation69_spill] sm:$0xff]  ;;  %v9741_v22 = vld [vmem:[#allocation68_spill] sm:$0xff] }
 0x28c   :  { %v5768_v18 = vpop.f32.mrf.mxu1  ;;  %v2092_v6 = vpop.f32.mrf.mxu0  ;;  %v4064_v28 = vsel %vm4062_vm8, %v9741_v22, %v9740_v57 }
 0x28d   :  { %9738 = vst [vmem:[#allocation64_spill] sm:$0xff] %v7806_v8  ;;  %v7809_v27 = vadd.f32 %v5768_v18, %v7354_v58  ;;  %v7812_v32 = vadd.f32 %v2092_v6, %v7504_v43 }
 0x28e   :  { %v2094_v20 = vpop.f32.mrf.mxu0  ;;  %v1821_v33 = vpop.f32.mrf.mxu1 }
 0x28f   :  { %v7816_v39 = vadd.f32 %v2094_v20, %v7515_v56  ;;  %v7819_v25 = vadd.f32 %v1821_v33, %v9739_v11  ;;  %v9743_v56 = vld [vmem:[#allocation48_spill] sm:$0xff] }
 0x290   :  { %v2098_v8 = vpop.f32.mrf.mxu0  ;;  %v2171_v58 = vpop.f32.mrf.mxu1  ;;  %5408 = vmatmul.mubr.msk.bf16.gmra.mxu1 %vm119_vm2, %v7659_v42  ;;  %5808 = vmatmul.mubr.msk.bf16.vlgmr.msra.gmra.mxu0 %vm119_vm2, %v7549_v40  ;;  %v9744_v40 = vld [vmem:[#allocation53_spill] sm:$0xff] }
 0x291   :  { %v7829_v43 = vadd.f32 %v2098_v8, %v7530_v12  ;;  %v7832_v20 = vadd.f32 %v2171_v58, %v9743_v56  ;;  %3718 = vmatpush1.bf16.msra.mxu0 %v3582_v45  ;;  %3268 = vmatprep.mubr.bf16.mxu1 %v9478_v23  ;;  %v9745_v45 = vld [vmem:[#allocation34_spill] sm:$0xff] }
 0x292   :  { %v2100_v33 = vpop.f32.mrf.mxu0  ;;  %v2173_v4 = vpop.f32.mrf.mxu1  ;;  %5811 = vmatprep.mubr.msk.bf16.mxu0 %vm119_vm2, %v7585_v46  ;;  %5494 = vmatprep.subr.msk.bf16.mxu0 %vm144_vm1, %v4064_v28  ;;  %v9747_v28 = vld [vmem:[#allocation35_spill] sm:$0xff] }
 0x293   :  { %9742 = vst [vmem:[#allocation19_spill] sm:$0xff] %v7829_v43  ;;  %v7839_v18 = vadd.f32 %v2100_v33, %v7539_v16  ;;  %v7842_v6 = vadd.f32 %v2173_v4, %v9744_v40  ;;  %v9749_v4 = vld [vmem:[#allocation36_spill] sm:$0xff] }
 0x294   :  { %v2102_v12 = vpop.f32.mrf.mxu0  ;;  %v2175_v8 = vpop.f32.mrf.mxu1 }
 0x295   :  { %v7845_v11 = vadd.f32 %v2102_v12, %v7552_v24  ;;  %v7848_v57 = vadd.f32 %v2175_v8, %v9745_v45  ;;  %v9750_v45 = vld [vmem:[#allocation37_spill] sm:$0xff] }
 0x296   :  { %v2104_v58 = vpop.f32.mrf.mxu0  ;;  %v2177_v56 = vpop.f32.mrf.mxu1 }
 0x297   :  { %v7851_v46 = vadd.f32 %v2104_v58, %v7558_v61  ;;  %v7854_v43 = vadd.f32 %v2177_v56, %v9747_v28  ;;  %v9751_v28 = vld [vmem:[#allocation38_spill] sm:$0xff] }
 0x298   :  { %v2108_v16 = vpop.f32.mrf.mxu0  ;;  %v2181_v33 = vpop.f32.mrf.mxu1  ;;  %5409 = vmatmul.mubr.msk.bf16.gmra.mxu1 %vm119_vm2, %v7702_v59  ;;  %5812 = vmatmul.mubr.msk.bf16.gmra.mxu0 %vm119_vm2, %v7621_v17 }
 0x299   :  { %9746 = vst [vmem:[#allocation20_spill] sm:$0xff] %v7851_v46  ;;  %v7861_v24 = vadd.f32 %v2108_v16, %v7568_v1  ;;  %v7864_v40 = vadd.f32 %v2181_v33, %v9749_v4  ;;  %3278 = vmatprep.mubr.bf16.mxu1 %v9478_v23  ;;  %5815 = vmatprep.mubr.msk.bf16.mxu0 %vm119_vm2, %v7659_v42 }
 0x29a   :  { %v2110_v61 = vpop.f32.mrf.mxu0  ;;  %v2183_v12 = vpop.f32.mrf.mxu1 }
 0x29b   :  { %9748 = vst [vmem:[#allocation22_spill] sm:$0xff] %v7861_v24  ;;  %v7870_v8 = vadd.f32 %v2110_v61, %v7577_v38  ;;  %v7873_v58 = vadd.f32 %v2183_v12, %v9750_v45  ;;  %v9753_v24 = vld [vmem:[#allocation39_spill] sm:$0xff]  ;;  %v9755_v12 = vld [vmem:[#allocation40_spill] sm:$0xff] }
 0x29c   :  { %v2112_v17 = vpop.f32.mrf.mxu0  ;;  %v2185_v56 = vpop.f32.mrf.mxu1 }
 0x29d   :  { %v7876_v1 = vadd.f32 %v2112_v17, %v7588_v50  ;;  %v7879_v16 = vadd.f32 %v2185_v56, %v9751_v28  ;;  %v9756_v56 = vld [vmem:[#allocation41_spill] sm:$0xff] }
 0x29e   :  { %v2114_v33 = vpop.f32.mrf.mxu0  ;;  %v2187_v4 = vpop.f32.mrf.mxu1 }
 0x29f   :  { %v7882_v42 = vadd.f32 %v2114_v33, %v7594_v53  ;;  %v7885_v46 = vadd.f32 %v2187_v4, %v9753_v24  ;;  %v9757_v4 = vld [vmem:[#allocation71_spill] sm:$0xff] }
 0x2a0   :  { %v2118_v38 = vpop.f32.mrf.mxu0  ;;  %v2191_v61 = vpop.f32.mrf.mxu1  ;;  %5410 = vmatmul.mubr.msk.bf16.gmra.mxu1 %vm119_vm2, %v7737_v60  ;;  %5816 = vmatmul.mubr.msk.bf16.gmra.mxu0 %vm119_vm2, %v7702_v59 }
 0x2a1   :  { %9752 = vst [vmem:[#allocation23_spill] sm:$0xff] %v7882_v42  ;;  %v7892_v50 = vadd.f32 %v2118_v38, %v7604_v31  ;;  %v7895_v45 = vadd.f32 %v2191_v61, %v9755_v12  ;;  %3288 = vmatprep.mubr.bf16.mxu1 %v9478_v23  ;;  %5819 = vmatprep.mubr.msk.bf16.mxu0 %vm119_vm2, %v7737_v60 }
 0x2a2   :  { %v2120_v53 = vpop.f32.mrf.mxu0  ;;  %v2193_v24 = vpop.f32.mrf.mxu1 }
 0x2a3   :  { %9754 = vst [vmem:[#allocation70_spill] sm:$0xff] %v7892_v50  ;;  %v7901_v17 = vadd.f32 %v2120_v53, %v7613_v49  ;;  %v7904_v28 = vadd.f32 %v2193_v24, %v9756_v56  ;;  %v9758_v50 = vld [vmem:[#allocation42_spill] sm:$0xff] }
 0x2a4   :  { %v2122_v59 = vpop.f32.mrf.mxu0  ;;  %v2195_v33 = vpop.f32.mrf.mxu1  ;;  %v9760_v24 = vld [vmem:[#allocation18_spill] sm:$0xff] }
 0x2a5   :  { %v7907_v31 = vadd.f32 %v2122_v59, %v7624_v34  ;;  %v7910_v38 = vadd.f32 %v2195_v33, %v9757_v4  ;;  %v9762_v33 = vld [vmem:[#allocation12_spill] sm:$0xff] }
 0x2a6   :  { %v2124_v61 = vpop.f32.mrf.mxu0  ;;  %v2197_v12 = vpop.f32.mrf.mxu1  ;;  %v4063_v4 = vsel %vm4062_vm8, %v9762_v33, %v9741_v22 }
 0x2a7   :  { %v7913_v60 = vadd.f32 %v2124_v61, %v7630_v14  ;;  %v7916_v42 = vadd.f32 %v2197_v12, %v9758_v50  ;;  %v4093_v22 = vsel %vm144_vm1, %v4063_v4, 0 }
 0x2a8   :  { %v2128_v49 = vpop.f32.mrf.mxu0  ;;  %v2201_v53 = vpop.f32.mrf.mxu1  ;;  %5411 = vmatmul.mubr.msk.bf16.gmra.mxu1 %vm119_vm2, %v7772_v7  ;;  %5820 = vmatmul.mubr.msk.bf16.gmra.mxu0 %vm119_vm2, %v7772_v7  ;;  %v9763_v7 = vld [vmem:[#allocation72_spill] sm:$0xff] }
 0x2a9   :  { %v7923_v34 = vadd.f32 %v2128_v49, %v7640_v54  ;;  %v7926_v56 = vadd.f32 %v2201_v53, %v9760_v24  ;;  %3622 = vmatprep.mubr.bf16.mxu1 %v9478_v23  ;;  %3735 = vmatprep.mubr.bf16.mxu0 %v9478_v23  ;;  %v7942_v49 = vld [vmem:[%s9434_s1 + $0x1c0] sm:$0xff]   ;;  %v4059_v24 = vpop.permute.xlu1 %4058 }
 0x2aa   :  { %v2130_v14 = vpop.f32.mrf.mxu0  ;;  %v2203_v50 = vpop.f32.mrf.mxu1 }
 0x2ab   :  { %9759 = vst [vmem:[#allocation55_spill] sm:$0xff] %v7923_v34  ;;  %v7931_v59 = vadd.f32 %v2130_v14, %v7654_v52  ;;  %v7937_v61 = vadd.f32 %v2203_v50, %v9763_v7  ;;  %v4061_v14 = vpop.permute.xlu0 %4060  ;;  %v3588_v34 = vsel %vm144_vm1, %v7677_v19, 0 }
 0x2ac   :  { %v2132_v54 = vpop.f32.mrf.mxu0  ;;  %v2205_v12 = vpop.f32.mrf.mxu1 }
 0x2ad   :  { %9761 = vst [vmem:[#allocation24_spill] sm:$0xff] %v7931_v59  ;;  %v7945_v53 = vadd.f32 %v2132_v54, %v7662_v37  ;;  %v7948_v52 = vadd.f32 %v2205_v12, %v7507_v26  ;;  %v9764_v26 = vld [vmem:[#allocation16_spill] sm:$0xff] }
 0x2ae   :  { %v2134_v33 = vpop.f32.mrf.mxu0  ;;  %v2207_v50 = vpop.f32.mrf.mxu1  ;;  %v4066_v4 = vsel %vm4062_vm8, %v9764_v26, %v4059_v24  ;;  %v4510_v26 = vld [vmem:[%s9435_s2] sm:$0xff] }
 0x2af   :  { %v7952_v7 = vadd.f32 %v2134_v33, %v7672_v41  ;;  %v7955_v59 = vadd.f32 %v2207_v50, %v7512_v63  ;;  %v7966_v41 = vsel %vm4062_vm8, %v4059_v24, %v4061_v14  ;;  %4528 = vperm.xlu1 %5879, %v4510_v26  }
 0x2b0   :  { %v2211_v37 = vpop.f32.mrf.mxu1  ;;  %v5773_v54 = vpop.f32.mrf.mxu0  ;;  %5445 = vmatmul.mubr.msk.bf16.vlgmr.msra.gmra.mxu1 %vm119_vm2, %v7942_v49  ;;  %5454 = vmatmul.mubr.msk.bf16.vlgmr.msra.gmra.mxu0 %vm119_vm2, %v7942_v49 }
 0x2b1   :  { %v7969_v63 = vadd.f32 %v2211_v37, %v7533_v51  ;;  %v7972_v12 = vadd.f32 %v5773_v54, %v7684_v5  ;;  %5824 = vmatpush3.bf16.msra.mxu1 %v3588_v34  ;;  %4122 = vmatpush1.bf16.msra.mxu0 %v4093_v22  ;;  %v7988_v34 = vld [vmem:[%s9434_s1 + $0x1c8] sm:$0xff]  }
 0x2b2   :  { %v2213_v19 = vpop.f32.mrf.mxu1  ;;  %v2284_v33 = vpop.f32.mrf.mxu0  ;;  %3632 = vmatprep.mubr.bf16.mxu1 %v9478_v23  ;;  %3745 = vmatprep.mubr.bf16.mxu0 %v9478_v23 }
 0x2b3   :  { %v7977_v50 = vadd.f32 %v2213_v19, %v7542_v3  ;;  %v7980_v24 = vadd.f32 %v2284_v33, %v7694_v21  ;;  %5503 = vmatprep.subr.msk.bf16.mxu1 %vm144_vm1, %v4066_v4  ;;  %5869 = vmatprep.subr.msk.bf16.mxu0 %vm144_vm1, %v7966_v41 }
 0x2b4   :  { %v2215_v51 = vpop.f32.mrf.mxu1  ;;  %v5774_v5 = vpop.f32.mrf.mxu0 }
 0x2b5   :  { %9765 = vst [vmem:[#allocation25_spill] sm:$0xff] %v7980_v24  ;;  %v7991_v14 = vadd.f32 %v2215_v51, %v7555_v35  ;;  %v7994_v3 = vadd.f32 %v5774_v5, %v7705_v10 }
 0x2b6   :  { %v2217_v21 = vpop.f32.mrf.mxu1  ;;  %v2287_v22 = vpop.f32.mrf.mxu0 }
 0x2b7   :  { %9766 = vst [vmem:[#allocation52_spill] sm:$0xff] %v7994_v3  ;;  %v7997_v37 = vadd.f32 %v2217_v21, %v7561_v44  ;;  %v8000_v54 = vadd.f32 %v2287_v22, %v7711_v36  ;;  %v8029_v21 = vld [vmem:[%s9434_s1 + $0x1d0] sm:$0xff]   ;;  %v9770_v22 = vld [vmem:[#allocation43_spill] sm:$0xff] }
 0x2b8   :  { %v2221_v4 = vpop.f32.mrf.mxu1  ;;  %v5777_v19 = vpop.f32.mrf.mxu0  ;;  %5446 = vmatmul.mubr.msk.bf16.gmra.mxu1 %vm119_vm2, %v7988_v34  ;;  %5455 = vmatmul.mubr.msk.bf16.gmra.mxu0 %vm119_vm2, %v7988_v34 }
 0x2b9   :  { %9767 = vst [vmem:[#allocation49_spill] sm:$0xff] %v8000_v54  ;;  %v8010_v35 = vadd.f32 %v2221_v4, %v7571_v2  ;;  %v8013_v44 = vadd.f32 %v5777_v19, %v7721_v30  ;;  %3642 = vmatprep.mubr.bf16.mxu1 %v9478_v23  ;;  %3755 = vmatprep.mubr.bf16.mxu0 %v9478_v23  ;;  %v4511_v2 = vld [vmem:[%s9435_s2 + $0x8] sm:$0xff]  ;;  %v9772_v19 = vld [vmem:[#allocation73_spill] sm:$0xff]  ;;  %v4514_v54 = vld [vmem:[%s9435_s2 + $0x20] sm:$0xff] }
 0x2ba   :  { %v2223_v10 = vpop.f32.mrf.mxu1  ;;  %v2300_v36 = vpop.f32.mrf.mxu0  ;;  %4533 = vperm.xlu0 %5880, %v4511_v2  }
 0x2bb   :  { %9768 = vst [vmem:[#allocation26_spill] sm:$0xff] %v8013_v44  ;;  %v8018_v33 = vadd.f32 %v2223_v10, %v7580_v15  ;;  %v8021_v51 = vadd.f32 %v2300_v36, %v7729_v0 }
 0x2bc   :  { %v2225_v5 = vpop.f32.mrf.mxu1  ;;  %v5778_v30 = vpop.f32.mrf.mxu0 }
 0x2bd   :  { %9769 = vst [vmem:[#allocation51_spill] sm:$0xff] %v8021_v51  ;;  %v8032_v26 = vadd.f32 %v2225_v5, %v9770_v22  ;;  %v8035_v15 = vadd.f32 %v5778_v30, %v7740_v55  ;;  %v4512_v51 = vld [vmem:[%s9435_s2 + $0x10] sm:$0xff]  ;;  %v9775_v30 = vld [vmem:[#allocation7_spill] sm:$0xff] }
 0x2be   :  { %v2227_v0 = vpop.f32.mrf.mxu1  ;;  %v2303_v4 = vpop.f32.mrf.mxu0  ;;  %v9774_v55 = vld [vmem:[#allocation44_spill] sm:$0xff]  ;;  %4538 = vperm.xlu1 %5879, %v4512_v51   ;;  %4548 = vperm.xlu0 %5880, %v4514_v54  }
 0x2bf   :  { %9771 = vst [vmem:[#allocation27_spill] sm:$0xff] %v8035_v15  ;;  %v8038_v10 = vadd.f32 %v2227_v0, %v9772_v19  ;;  %v8041_v36 = vadd.f32 %v2303_v4, %v7746_v48  ;;  %v9777_v4 = vld [vmem:[#allocation74_spill] sm:$0xff] }
 0x2c0   :  { %v2231_v44 = vpop.f32.mrf.mxu1  ;;  %v5781_v2 = vpop.f32.mrf.mxu0  ;;  %5447 = vmatmul.mubr.msk.bf16.gmra.mxu1 %vm119_vm2, %v8029_v21  ;;  %5456 = vmatmul.mubr.msk.bf16.gmra.mxu0 %vm119_vm2, %v8029_v21 }
 0x2c1   :  { %9773 = vst [vmem:[#allocation65_spill] sm:$0xff] %v8041_v36  ;;  %v8051_v5 = vadd.f32 %v2231_v44, %v9774_v55  ;;  %v8054_v22 = vadd.f32 %v5781_v2, %v9775_v30  ;;  %3652 = vmatprep.mubr.bf16.mxu1 %v9478_v23  ;;  %3765 = vmatprep.mubr.bf16.mxu0 %v9478_v23  ;;  %v4513_v44 = vld [vmem:[%s9435_s2 + $0x18] sm:$0xff] }
 0x2c2   :  { %v2233_v48 = vpop.f32.mrf.mxu1  ;;  %v2316_v0 = vpop.f32.mrf.mxu0  ;;  %v8070_v30 = vld [vmem:[%s9434_s1 + $0x1d8] sm:$0xff]   ;;  %4543 = vperm.xlu1 %5879, %v4513_v44  }
 0x2c3   :  { %9776 = vst [vmem:[#allocation10_spill] sm:$0xff] %v8054_v22  ;;  %v8059_v19 = vadd.f32 %v2233_v48, %v9777_v4  ;;  %v8062_v36 = vadd.f32 %v2316_v0, %v7764_v47  ;;  %v9779_v22 = vld [vmem:[#allocation45_spill] sm:$0xff] }
 0x2c4   :  { %v2235_v55 = vpop.f32.mrf.mxu1  ;;  %v5782_v2 = vpop.f32.mrf.mxu0  ;;  %v9781_v0 = vld [vmem:[#allocation21_spill] sm:$0xff] }
 0x2c5   :  { %9778 = vst [vmem:[#allocation61_spill] sm:$0xff] %v8062_v36  ;;  %v8073_v15 = vadd.f32 %v2235_v55, %v9779_v22  ;;  %v8076_v51 = vadd.f32 %v5782_v2, %v7775_v13  ;;  %v9783_v13 = vld [vmem:[#allocation75_spill] sm:$0xff]  ;;  %v9785_v2 = vld [vmem:[#allocation46_spill] sm:$0xff] }
 0x2c6   :  { %v2237_v48 = vpop.f32.mrf.mxu1  ;;  %v2319_v47 = vpop.f32.mrf.mxu0 }
 0x2c7   :  { %9780 = vst [vmem:[#allocation56_spill] sm:$0xff] %v8076_v51  ;;  %v8079_v4 = vadd.f32 %v2237_v48, %v9781_v0  ;;  %v8082_v36 = vadd.f32 %v2319_v47, %v7781_v9 }
 0x2c8   :  { %v2241_v3 = vpop.f32.mrf.mxu1  ;;  %v5785_v24 = vpop.f32.mrf.mxu0  ;;  %5448 = vmatmul.mubr.msk.bf16.gmra.mxu1 %vm119_vm2, %v8070_v30  ;;  %5457 = vmatmul.mubr.msk.bf16.gmra.mxu0 %vm119_vm2, %v8070_v30 }
 0x2c9   :  { %9782 = vst [vmem:[#allocation28_spill] sm:$0xff] %v8082_v36  ;;  %v8092_v22 = vadd.f32 %v2241_v3, %v9783_v13  ;;  %v8095_v44 = vadd.f32 %v5785_v24, %v7791_v62  ;;  %3662 = vmatprep.mubr.bf16.mxu1 %v9478_v23  ;;  %3775 = vmatprep.mubr.bf16.mxu0 %v9478_v23  ;;  %v4515_v3 = vld [vmem:[%s9435_s2 + $0x28] sm:$0xff]  ;;  %v8111_v24 = vld [vmem:[%s9434_s1 + $0x1e0] sm:$0xff]   ;;  %v9787_v13 = vld [vmem:[#allocation80_spill] sm:$0xff] }
 0x2ca   :  { %v2243_v9 = vpop.f32.mrf.mxu1  ;;  %v2332_v55 = vpop.f32.mrf.mxu0  ;;  %4553 = vperm.xlu1 %5879, %v4515_v3   ;;  %v4516_v36 = vld [vmem:[%s9435_s2 + $0x30] sm:$0xff] }
 0x2cb   :  { %9784 = vst [vmem:[#allocation57_spill] sm:$0xff] %v8095_v44  ;;  %v8100_v48 = vadd.f32 %v2243_v9, %v9785_v2  ;;  %v8103_v47 = vadd.f32 %v2332_v55, %v7803_v29  ;;  %v9789_v2 = vld [vmem:[#allocation76_spill] sm:$0xff]  ;;  %4558 = vperm.xlu0 %5880, %v4516_v36  }
 0x2cc   :  { %v2245_v0 = vpop.f32.mrf.mxu1  ;;  %v5786_v62 = vpop.f32.mrf.mxu0 }
 0x2cd   :  { %9786 = vst [vmem:[#allocation66_spill] sm:$0xff] %v8103_v47  ;;  %v8114_v54 = vadd.f32 %v2245_v0, %v9787_v13  ;;  %v8117_v9 = vadd.f32 %v5786_v62, %v7809_v27  ;;  %v9791_v27 = vld [vmem:[#allocation47_spill] sm:$0xff] }
 0x2ce   :  { %v2247_v29 = vpop.f32.mrf.mxu1  ;;  %v2335_v55 = vpop.f32.mrf.mxu0 }
 0x2cf   :  { %9788 = vst [vmem:[#allocation29_spill] sm:$0xff] %v8117_v9  ;;  %v8120_v47 = vadd.f32 %v2247_v29, %v9789_v2  ;;  %v8123_v44 = vadd.f32 %v2335_v55, %v7819_v25  ;;  %v9793_v29 = vld [vmem:[#allocation77_spill] sm:$0xff]  ;;  %v4518_v9 = vld [vmem:[%s9435_s2 + $0x40] sm:$0xff] }
 0x2d0   :  { %v2572_v51 = vpop.f32.mrf.mxu1  ;;  %v2685_v3 = vpop.f32.mrf.mxu0  ;;  %5449 = vmatmul.mubr.msk.bf16.gmra.mxu1 %vm119_vm2, %v8111_v24  ;;  %5458 = vmatmul.mubr.msk.bf16.gmra.mxu0 %vm119_vm2, %v8111_v24 }
 0x2d1   :  { %9790 = vst [vmem:[#allocation58_spill] sm:$0xff] %v8123_v44  ;;  %v8133_v0 = vadd.f32 %v2572_v51, %v9791_v27  ;;  %v8136_v62 = vadd.f32 %v2685_v3, %v7832_v20  ;;  %3672 = vmatprep.mubr.bf16.mxu1 %v9478_v23  ;;  %3785 = vmatprep.mubr.bf16.mxu0 %v9478_v23  ;;  %v4517_v51 = vld [vmem:[%s9435_s2 + $0x38] sm:$0xff]  ;;  %v8152_v3 = vld [vmem:[%s9434_s1 + $0x1e8] sm:$0xff]  }
 0x2d2   :  { %v2574_v25 = vpop.f32.mrf.mxu1  ;;  %v2687_v13 = vpop.f32.mrf.mxu0  ;;  %4563 = vperm.xlu1 %5879, %v4517_v51   ;;  %4568 = vperm.xlu0 %5880, %v4518_v9  }
 0x2d3   :  { %9792 = vst [vmem:[#allocation30_spill] sm:$0xff] %v8136_v62  ;;  %v8141_v55 = vadd.f32 %v2574_v25, %v9793_v29  ;;  %v8144_v2 = vadd.f32 %v2687_v13, %v7842_v6  ;;  %v9796_v62 = vld [vmem:[#allocation50_spill] sm:$0xff] }
 0x2d4   :  { %v2576_v27 = vpop.f32.mrf.mxu1  ;;  %v2689_v20 = vpop.f32.mrf.mxu0  ;;  %v9798_v29 = vld [vmem:[#allocation78_spill] sm:$0xff] }
 0x2d5   :  { %9794 = vst [vmem:[#allocation59_spill] sm:$0xff] %v8141_v55  ;;  %9795 = vst [vmem:[#allocation31_spill] sm:$0xff] %v8144_v2  ;;  %v8155_v36 = vadd.f32 %v2576_v27, %v9796_v62  ;;  %v8158_v25 = vadd.f32 %v2689_v20, %v7848_v57  ;;  %v9800_v57 = vld [vmem:[#allocation79_spill] sm:$0xff] }
 0x2d6   :  { %v2578_v6 = vpop.f32.mrf.mxu1  ;;  %v2691_v13 = vpop.f32.mrf.mxu0 }
 0x2d7   :  { %9797 = vst [vmem:[#allocation60_spill] sm:$0xff] %v8158_v25  ;;  %v8161_v2 = vadd.f32 %v2578_v6, %v9798_v29  ;;  %v8164_v44 = vadd.f32 %v2691_v13, %v7854_v43  ;;  %v9802_v6 = vld [vmem:[#allocation3_spill] sm:$0xff]  ;;  %v4520_v25 = vld [vmem:[%s9435_s2 + $0x50] sm:$0xff] }
 0x2d8   :  { %v2582_v55 = vpop.f32.mrf.mxu1  ;;  %v2695_v51 = vpop.f32.mrf.mxu0  ;;  %5450 = vmatmul.mubr.msk.bf16.gmra.mxu1 %vm119_vm2, %v8152_v3  ;;  %5459 = vmatmul.mubr.msk.bf16.gmra.mxu0 %vm119_vm2, %v8152_v3 }
 0x2d9   :  { %9799 = vst [vmem:[#allocation32_spill] sm:$0xff] %v8164_v44  ;;  %v8174_v62 = vadd.f32 %v2582_v55, %v9800_v57  ;;  %v8177_v27 = vadd.f32 %v2695_v51, %v7864_v40  ;;  %3682 = vmatprep.mubr.bf16.mxu1 %v9478_v23  ;;  %3795 = vmatprep.mubr.bf16.mxu0 %v9478_v23  ;;  %v4519_v55 = vld [vmem:[%s9435_s2 + $0x48] sm:$0xff]  ;;  %v8193_v51 = vld [vmem:[%s9434_s1 + $0x1f0] sm:$0xff]  }
 0x2da   :  { %v2584_v43 = vpop.f32.mrf.mxu1  ;;  %v2697_v20 = vpop.f32.mrf.mxu0  ;;  %4573 = vperm.xlu1 %5879, %v4519_v55   ;;  %4578 = vperm.xlu0 %5880, %v4520_v25  }
 0x2db   :  { %9801 = vst [vmem:[#allocation2_spill] sm:$0xff] %v8177_v27  ;;  %v8182_v13 = vadd.f32 %v2584_v43, %v9802_v6  ;;  %v8185_v29 = vadd.f32 %v2697_v20, %v7873_v58  ;;  %v9805_v27 = vld [vmem:[#allocation54_spill] sm:$0xff]  ;;  %v9807_v6 = vld [vmem:[#allocation5_spill] sm:$0xff] }
 0x2dc   :  { %v2586_v57 = vpop.f32.mrf.mxu1  ;;  %v2699_v40 = vpop.f32.mrf.mxu0 }
 0x2dd   :  { %9803 = vst [vmem:[#allocation62_spill] sm:$0xff] %v8182_v13  ;;  %9804 = vst [vmem:[#allocation4_spill] sm:$0xff] %v8185_v29  ;;  %v8196_v9 = vadd.f32 %v2586_v57, %v9805_v27  ;;  %v8199_v43 = vadd.f32 %v2699_v40, %v7879_v16  ;;  %v9809_v16 = vld [vmem:[#allocation9_spill] sm:$0xff] }
 0x2de   :  { %v2588_v58 = vpop.f32.mrf.mxu1  ;;  %v2701_v20 = vpop.f32.mrf.mxu0 }
 0x2df   :  { %9806 = vst [vmem:[#allocation63_spill] sm:$0xff] %v8199_v43  ;;  %v8202_v29 = vadd.f32 %v2588_v58, %v9807_v6  ;;  %v8205_v44 = vadd.f32 %v2701_v20, %v7885_v46  ;;  %v9811_v58 = vld [vmem:[#allocation11_spill] sm:$0xff]  ;;  %v4522_v43 = vld [vmem:[%s9435_s2 + $0x60] sm:$0xff] }
 0x2e0   :  { %v2592_v13 = vpop.f32.mrf.mxu1  ;;  %v2705_v55 = vpop.f32.mrf.mxu0  ;;  %5451 = vmatmul.mubr.msk.bf16.gmra.mxu1 %vm119_vm2, %v8193_v51  ;;  %5460 = vmatmul.mubr.msk.bf16.gmra.mxu0 %vm119_vm2, %v8193_v51 }
 0x2e1   :  { %9808 = vst [vmem:[#allocation6_spill] sm:$0xff] %v8205_v44  ;;  %v8215_v27 = vadd.f32 %v2592_v13, %v9809_v16  ;;  %v8218_v57 = vadd.f32 %v2705_v55, %v7895_v45  ;;  %3692 = vmatprep.mubr.bf16.mxu1 %v9478_v23  ;;  %3805 = vmatprep.mubr.bf16.mxu0 %v9478_v23  ;;  %v4521_v13 = vld [vmem:[%s9435_s2 + $0x58] sm:$0xff] }
 0x2e2   :  { %v2594_v46 = vpop.f32.mrf.mxu1  ;;  %v2707_v40 = vpop.f32.mrf.mxu0  ;;  %v8234_v55 = vld [vmem:[%s9434_s1 + $0x1f8] sm:$0xff]   ;;  %4583 = vperm.xlu1 %5879, %v4521_v13   ;;  %4588 = vperm.xlu0 %5880, %v4522_v43  }
 0x2e3   :  { %9810 = vst [vmem:[#allocation8_spill] sm:$0xff] %v8218_v57  ;;  %v8223_v20 = vadd.f32 %v2594_v46, %v9811_v58  ;;  %v8226_v6 = vadd.f32 %v2707_v40, %v7904_v28  ;;  %v9814_v57 = vld [vmem:[#allocation13_spill] sm:$0xff]  ;;  %v9815_v58 = vld [vmem:[#allocation15_spill] sm:$0xff] }
 0x2e4   :  { %v2596_v16 = vpop.f32.mrf.mxu1  ;;  %v2709_v45 = vpop.f32.mrf.mxu0 }
 0x2e5   :  { %9812 = vst [vmem:[#allocation67_spill] sm:$0xff] %v8223_v20  ;;  %9813 = vst [vmem:[#allocation14_spill] sm:$0xff] %v8226_v6  ;;  %v8237_v25 = vadd.f32 %v2596_v16, %v9814_v57  ;;  %v8240_v46 = vadd.f32 %v2709_v45, %v7910_v38  ;;  %v9817_v38 = vld [vmem:[#allocation17_spill] sm:$0xff] }
 0x2e6   :  { %v2598_v28 = vpop.f32.mrf.mxu1  ;;  %v2711_v40 = vpop.f32.mrf.mxu0 }
 0x2e7   :  { %v8243_v6 = vadd.f32 %v2598_v28, %v9815_v58  ;;  %v8246_v44 = vadd.f32 %v2711_v40, %v7916_v42  ;;  %v9819_v28 = vld [vmem:[#allocation64_spill] sm:$0xff] }
 0x2e8   :  { %v2602_v20 = vpop.f32.mrf.mxu1  ;;  %v2715_v13 = vpop.f32.mrf.mxu0  ;;  %5452 = vmatmul.mubr.msk.bf16.gmra.mxu1 %vm119_vm2, %v8234_v55  ;;  %5461 = vmatmul.mubr.msk.bf16.gmra.mxu0 %vm119_vm2, %v8234_v55 }
 0x2e9   :  { %9816 = vst [vmem:[#allocation69_spill] sm:$0xff] %v8246_v44  ;;  %v8256_v57 = vadd.f32 %v2602_v20, %v9817_v38  ;;  %v8259_v16 = vadd.f32 %v2715_v13, %v7926_v56  ;;  %5825 = vmatprep.mubr.msk.bf16.mxu1 %vm119_vm2, %v7942_v49  ;;  %4139 = vmatprep.mubr.bf16.mxu0 %v9478_v23  ;;  %v4523_v20 = vld [vmem:[%s9435_s2 + $0x68] sm:$0xff]  ;;  %v8276_v49 = vld [vmem:[%s9434_s1 + $0x200] sm:$0xff]  }
 0x2ea   :  { %v2604_v42 = vpop.f32.mrf.mxu1  ;;  %v2717_v45 = vpop.f32.mrf.mxu0  ;;  %4593 = vperm.xlu1 %5879, %v4523_v20  }
 0x2eb   :  { %9818 = vst [vmem:[#allocation68_spill] sm:$0xff] %v8259_v16  ;;  %v8265_v40 = vadd.f32 %v2604_v42, %v9819_v28  ;;  %v8268_v58 = vadd.f32 %v2717_v45, %v7937_v61  ;;  %v4105_v42 = vsel %vm144_vm1, %v7966_v41, 0  ;;  %v9821_v16 = vld [vmem:[#allocation33_spill] sm:$0xff] }
 0x2ec   :  { %v2606_v56 = vpop.f32.mrf.mxu1  ;;  %v2719_v13 = vpop.f32.mrf.mxu0  ;;  %v4099_v20 = vsel %vm144_vm1, %v9821_v16, 0 }
 0x2ed   :  { %9820 = vst [vmem:[#allocation48_spill] sm:$0xff] %v8268_v58  ;;  %v8279_v43 = vadd.f32 %v2606_v56, %v7812_v32  ;;  %v8282_v38 = vadd.f32 %v2719_v13, %v7948_v52  ;;  %v4524_v52 = vld [vmem:[%s9435_s2 + $0x70] sm:$0xff] }
 0x2ee   :  { %v2721_v61 = vpop.f32.mrf.mxu0  ;;  %v2608_v45 = vpop.f32.mrf.mxu1  ;;  %4598 = vperm.xlu0 %5880, %v4524_v52  }
 0x2ef   :  { %v8287_v28 = vadd.f32 %v2721_v61, %v7955_v59  ;;  %v8290_v58 = vadd.f32 %v2608_v45, %v7816_v39  ;;  %v9822_v59 = vld [vmem:[#allocation19_spill] sm:$0xff] }
 0x2f0   :  { %v2612_v44 = vpop.f32.mrf.mxu1  ;;  %v2725_v32 = vpop.f32.mrf.mxu0  ;;  %5826 = vmatmul.mubr.msk.bf16.vlgmr.msra.gmra.mxu1 %vm119_vm2, %v7988_v34  ;;  %5495 = vmatmul.mubr.msk.bf16.vlgmr.msra.gmra.mxu0 %vm119_vm2, %v8276_v49 }
 0x2f1   :  { %v8302_v41 = vadd.f32 %v2612_v44, %v9822_v59  ;;  %v8305_v39 = vadd.f32 %v2725_v32, %v7969_v63  ;;  %4235 = vmatpush1.bf16.msra.mxu1 %v4099_v20  ;;  %5842 = vmatpush3.bf16.msra.mxu0 %v4105_v42  ;;  %v4525_v63 = vld [vmem:[%s9435_s2 + $0x78] sm:$0xff]  ;;  %v8322_v42 = vld [vmem:[%s9434_s1 + $0x208] sm:$0xff]   ;;  %v9823_v20 = vld [vmem:[#allocation20_spill] sm:$0xff] }
 0x2f2   :  { %v2614_v16 = vpop.f32.mrf.mxu1  ;;  %v2727_v56 = vpop.f32.mrf.mxu0  ;;  %5829 = vmatprep.mubr.msk.bf16.mxu1 %vm119_vm2, %v8029_v21  ;;  %4149 = vmatprep.mubr.bf16.mxu0 %v9478_v23 }
 0x2f3   :  { %v8311_v34 = vadd.f32 %v2614_v16, %v7839_v18  ;;  %v8314_v13 = vadd.f32 %v2727_v56, %v7977_v50  ;;  %4603 = vperm.xlu1 %5879, %v4525_v63  }
 0x2f4   :  { %v2616_v44 = vpop.f32.mrf.mxu1  ;;  %v2729_v61 = vpop.f32.mrf.mxu0 }
 0x2f5   :  { %v8325_v21 = vadd.f32 %v2616_v44, %v7845_v11  ;;  %v8328_v18 = vadd.f32 %v2729_v61, %v7991_v14  ;;  %v9824_v11 = vld [vmem:[#allocation22_spill] sm:$0xff] }
 0x2f6   :  { %v2618_v50 = vpop.f32.mrf.mxu1  ;;  %v2731_v45 = vpop.f32.mrf.mxu0 }
 0x2f7   :  { %v8331_v32 = vadd.f32 %v2618_v50, %v9823_v20  ;;  %v8334_v52 = vadd.f32 %v2731_v45, %v7997_v37 }
 0x2f8   :  { %v2622_v59 = vpop.f32.mrf.mxu1  ;;  %v2735_v16 = vpop.f32.mrf.mxu0  ;;  %5830 = vmatmul.mubr.msk.bf16.gmra.mxu1 %vm119_vm2, %v8070_v30  ;;  %5496 = vmatmul.mubr.msk.bf16.gmra.mxu0 %vm119_vm2, %v8322_v42 }
 0x2f9   :  { %v8341_v56 = vadd.f32 %v2622_v59, %v9824_v11  ;;  %v8344_v14 = vadd.f32 %v2735_v16, %v8010_v35  ;;  %5833 = vmatprep.mubr.msk.bf16.mxu1 %vm119_vm2, %v8111_v24  ;;  %4159 = vmatprep.mubr.bf16.mxu0 %v9478_v23  ;;  %v8358_v35 = vld [vmem:[%s9434_s1 + $0x210] sm:$0xff]  }
 0x2fa   :  { %v2624_v37 = vpop.f32.mrf.mxu1  ;;  %v2737_v63 = vpop.f32.mrf.mxu0 }
 0x2fb   :  { %v8350_v44 = vadd.f32 %v2624_v37, %v7870_v8  ;;  %v8353_v30 = vadd.f32 %v2737_v63, %v8018_v33  ;;  %v9825_v8 = vld [vmem:[#allocation23_spill] sm:$0xff] }
 0x2fc   :  { %v2626_v61 = vpop.f32.mrf.mxu1  ;;  %v2739_v50 = vpop.f32.mrf.mxu0 }
 0x2fd   :  { %v8361_v45 = vadd.f32 %v2626_v61, %v7876_v1  ;;  %v8364_v24 = vadd.f32 %v2739_v50, %v8032_v26  ;;  %v9826_v1 = vld [vmem:[#allocation70_spill] sm:$0xff] }
 0x2fe   :  { %v2628_v20 = vpop.f32.mrf.mxu1  ;;  %v2741_v59 = vpop.f32.mrf.mxu0 }
 0x2ff   :  { %v8367_v16 = vadd.f32 %v2628_v20, %v9825_v8  ;;  %v8370_v33 = vadd.f32 %v2741_v59, %v8038_v10 }
 0x300   :  { %v2632_v11 = vpop.f32.mrf.mxu1  ;;  %v2745_v37 = vpop.f32.mrf.mxu0  ;;  %5834 = vmatmul.mubr.msk.bf16.gmra.mxu1 %vm119_vm2, %v8152_v3  ;;  %5497 = vmatmul.mubr.msk.bf16.gmra.mxu0 %vm119_vm2, %v8358_v35 }
 0x301   :  { %v8377_v63 = vadd.f32 %v2632_v11, %v9826_v1  ;;  %v8380_v26 = vadd.f32 %v2745_v37, %v8051_v5  ;;  %5837 = vmatprep.mubr.msk.bf16.mxu1 %vm119_vm2, %v8193_v51  ;;  %4169 = vmatprep.mubr.bf16.mxu0 %v9478_v23  ;;  %v8394_v5 = vld [vmem:[%s9434_s1 + $0x218] sm:$0xff]  }
 0x302   :  { %v2634_v10 = vpop.f32.mrf.mxu1  ;;  %v2747_v61 = vpop.f32.mrf.mxu0 }
 0x303   :  { %v8386_v50 = vadd.f32 %v2634_v10, %v7901_v17  ;;  %v8389_v3 = vadd.f32 %v2747_v61, %v8059_v19 }
 0x304   :  { %v2636_v20 = vpop.f32.mrf.mxu1  ;;  %v2749_v59 = vpop.f32.mrf.mxu0 }
 0x305   :  { %9827 = vst [vmem:[#allocation53_spill] sm:$0xff] %v8389_v3  ;;  %v8397_v8 = vadd.f32 %v2636_v20, %v7907_v31  ;;  %v8400_v51 = vadd.f32 %v2749_v59, %v8073_v15  ;;  %v9830_v31 = vld [vmem:[#allocation55_spill] sm:$0xff]  ;;  %v9832_v20 = vld [vmem:[#allocation24_spill] sm:$0xff] }
 0x306   :  { %v2638_v11 = vpop.f32.mrf.mxu1  ;;  %v2751_v37 = vpop.f32.mrf.mxu0 }
 0x307   :  { %9828 = vst [vmem:[#allocation34_spill] sm:$0xff] %v8400_v51  ;;  %v8403_v17 = vadd.f32 %v2638_v11, %v7913_v60  ;;  %v8406_v19 = vadd.f32 %v2751_v37, %v8079_v4 }
 0x308   :  { %v2642_v1 = vpop.f32.mrf.mxu1  ;;  %v2755_v10 = vpop.f32.mrf.mxu0  ;;  %5838 = vmatmul.mubr.msk.bf16.gmra.mxu1 %vm119_vm2, %v8234_v55  ;;  %5498 = vmatmul.mubr.msk.bf16.gmra.mxu0 %vm119_vm2, %v8394_v5 }
 0x309   :  { %9829 = vst [vmem:[#allocation35_spill] sm:$0xff] %v8406_v19  ;;  %v8413_v61 = vadd.f32 %v2642_v1, %v9830_v31  ;;  %v8416_v15 = vadd.f32 %v2755_v10, %v8092_v22  ;;  %4179 = vmatprep.mubr.bf16.mxu0 %v9478_v23  ;;  %4252 = vmatprep.mubr.bf16.mxu1 %v9478_v23  ;;  %v8429_v1 = vld [vmem:[%s9434_s1 + $0x220] sm:$0xff]  }
 0x30a   :  { %v2644_v60 = vpop.f32.mrf.mxu1  ;;  %v2757_v4 = vpop.f32.mrf.mxu0 }
 0x30b   :  { %9831 = vst [vmem:[#allocation36_spill] sm:$0xff] %v8416_v15  ;;  %v8421_v59 = vadd.f32 %v2644_v60, %v9832_v20  ;;  %v8424_v55 = vadd.f32 %v2757_v4, %v8100_v48 }
 0x30c   :  { %v2646_v11 = vpop.f32.mrf.mxu1  ;;  %v2759_v37 = vpop.f32.mrf.mxu0 }
 0x30d   :  { %9833 = vst [vmem:[#allocation37_spill] sm:$0xff] %v8424_v55  ;;  %v8432_v22 = vadd.f32 %v2646_v11, %v7945_v53  ;;  %v8435_v10 = vadd.f32 %v2759_v37, %v8114_v54  ;;  %v9838_v37 = vld [vmem:[#allocation59_spill] sm:$0xff] }
 0x30e   :  { %v2648_v31 = vpop.f32.mrf.mxu1  ;;  %v2761_v15 = vpop.f32.mrf.mxu0 }
 0x30f   :  { %9834 = vst [vmem:[#allocation38_spill] sm:$0xff] %v8435_v10  ;;  %v8438_v60 = vadd.f32 %v2648_v31, %v7952_v7  ;;  %v8441_v48 = vadd.f32 %v2761_v15, %v8120_v47  ;;  %v9837_v15 = vld [vmem:[#allocation25_spill] sm:$0xff] }
 0x310   :  { %v5791_v4 = vpop.f32.mrf.mxu1  ;;  %v3107_v20 = vpop.f32.mrf.mxu0  ;;  %5499 = vmatmul.mubr.msk.bf16.gmra.mxu0 %vm119_vm2, %v8429_v1  ;;  %5504 = vmatmul.mubr.msk.bf16.vlgmr.msra.gmra.mxu1 %vm119_vm2, %v8276_v49 }
 0x311   :  { %9835 = vst [vmem:[#allocation39_spill] sm:$0xff] %v8441_v48  ;;  %v8448_v53 = vadd.f32 %v5791_v4, %v7972_v12  ;;  %v8451_v54 = vadd.f32 %v3107_v20, %v8133_v0  ;;  %4189 = vmatprep.mubr.bf16.mxu0 %v9478_v23  ;;  %4262 = vmatprep.mubr.bf16.mxu1 %v9478_v23  ;;  %v8464_v12 = vld [vmem:[%s9434_s1 + $0x228] sm:$0xff]   ;;  %v9840_v0 = vld [vmem:[#allocation52_spill] sm:$0xff] }
 0x312   :  { %v2798_v7 = vpop.f32.mrf.mxu1  ;;  %v3109_v47 = vpop.f32.mrf.mxu0 }
 0x313   :  { %9836 = vst [vmem:[#allocation40_spill] sm:$0xff] %v8451_v54  ;;  %v8456_v11 = vadd.f32 %v2798_v7, %v9837_v15  ;;  %v8459_v31 = vadd.f32 %v3109_v47, %v9838_v37  ;;  %v9842_v7 = vld [vmem:[#allocation49_spill] sm:$0xff] }
 0x314   :  { %v5792_v48 = vpop.f32.mrf.mxu1  ;;  %v3111_v10 = vpop.f32.mrf.mxu0 }
 0x315   :  { %9839 = vst [vmem:[#allocation41_spill] sm:$0xff] %v8459_v31  ;;  %v8467_v4 = vadd.f32 %v5792_v48, %v9840_v0  ;;  %v8470_v20 = vadd.f32 %v3111_v10, %v8155_v36  ;;  %v9844_v48 = vld [vmem:[#allocation26_spill] sm:$0xff]  ;;  %v9846_v10 = vld [vmem:[#allocation51_spill] sm:$0xff] }
 0x316   :  { %v2801_v54 = vpop.f32.mrf.mxu1  ;;  %v3113_v55 = vpop.f32.mrf.mxu0 }
 0x317   :  { %9841 = vst [vmem:[#allocation71_spill] sm:$0xff] %v8470_v20  ;;  %v8473_v15 = vadd.f32 %v2801_v54, %v9842_v7  ;;  %v8476_v47 = vadd.f32 %v3113_v55, %v8161_v2  ;;  %v9847_v7 = vld [vmem:[#allocation62_spill] sm:$0xff] }
 0x318   :  { %v5795_v37 = vpop.f32.mrf.mxu1  ;;  %v3117_v31 = vpop.f32.mrf.mxu0  ;;  %5500 = vmatmul.mubr.msk.bf16.gmra.mxu0 %vm119_vm2, %v8464_v12  ;;  %5505 = vmatmul.mubr.msk.bf16.gmra.mxu1 %vm119_vm2, %v8322_v42 }
 0x319   :  { %9843 = vst [vmem:[#allocation42_spill] sm:$0xff] %v8476_v47  ;;  %v8483_v0 = vadd.f32 %v5795_v37, %v9844_v48  ;;  %v8486_v36 = vadd.f32 %v3117_v31, %v8174_v62  ;;  %4199 = vmatprep.mubr.bf16.mxu0 %v9478_v23  ;;  %4272 = vmatprep.mubr.bf16.mxu1 %v9478_v23  ;;  %v8499_v37 = vld [vmem:[%s9434_s1 + $0x230] sm:$0xff]   ;;  %v9849_v62 = vld [vmem:[#allocation27_spill] sm:$0xff] }
 0x31a   :  { %v2814_v2 = vpop.f32.mrf.mxu1  ;;  %v3119_v55 = vpop.f32.mrf.mxu0 }
 0x31b   :  { %9845 = vst [vmem:[#allocation18_spill] sm:$0xff] %v8486_v36  ;;  %v8491_v54 = vadd.f32 %v2814_v2, %v9846_v10  ;;  %v8494_v47 = vadd.f32 %v3119_v55, %v9847_v7  ;;  %v9851_v2 = vld [vmem:[#allocation65_spill] sm:$0xff] }
 0x31c   :  { %v5796_v20 = vpop.f32.mrf.mxu1  ;;  %v3121_v19 = vpop.f32.mrf.mxu0 }
 0x31d   :  { %9848 = vst [vmem:[#allocation12_spill] sm:$0xff] %v8494_v47  ;;  %v8502_v31 = vadd.f32 %v5796_v20, %v9849_v62  ;;  %v8505_v48 = vadd.f32 %v3121_v19, %v8196_v9  ;;  %v9853_v20 = vld [vmem:[#allocation10_spill] sm:$0xff]  ;;  %v9856_v19 = vld [vmem:[#allocation61_spill] sm:$0xff] }
 0x31e   :  { %v2817_v36 = vpop.f32.mrf.mxu1  ;;  %v3123_v51 = vpop.f32.mrf.mxu0 }
 0x31f   :  { %9850 = vst [vmem:[#allocation72_spill] sm:$0xff] %v8505_v48  ;;  %v8508_v10 = vadd.f32 %v2817_v36, %v9851_v2  ;;  %v8511_v55 = vadd.f32 %v3123_v51, %v8202_v29  ;;  %v9857_v2 = vld [vmem:[#allocation67_spill] sm:$0xff] }
 0x320   :  { %v5799_v7 = vpop.f32.mrf.mxu1  ;;  %v3127_v47 = vpop.f32.mrf.mxu0  ;;  %5501 = vmatmul.mubr.msk.bf16.gmra.mxu0 %vm119_vm2, %v8499_v37  ;;  %5506 = vmatmul.mubr.msk.bf16.gmra.mxu1 %vm119_vm2, %v8358_v35 }
 0x321   :  { %9852 = vst [vmem:[#allocation16_spill] sm:$0xff] %v8511_v55  ;;  %v8518_v62 = vadd.f32 %v5799_v7, %v9853_v20  ;;  %v8521_v9 = vadd.f32 %v3127_v47, %v8215_v27  ;;  %4209 = vmatprep.mubr.bf16.mxu0 %v9478_v23  ;;  %4282 = vmatprep.mubr.bf16.mxu1 %v9478_v23  ;;  %v8534_v7 = vld [vmem:[%s9434_s1 + $0x238] sm:$0xff]   ;;  %v9859_v27 = vld [vmem:[#allocation56_spill] sm:$0xff] }
 0x322   :  { %v2830_v29 = vpop.f32.mrf.mxu1  ;;  %v3129_v51 = vpop.f32.mrf.mxu0 }
 0x323   :  { %9854 = vst [vmem:[#allocation43_spill] sm:$0xff] %v8518_v62  ;;  %9855 = vst [vmem:[#allocation73_spill] sm:$0xff] %v8521_v9  ;;  %v8526_v36 = vadd.f32 %v2830_v29, %v9856_v19  ;;  %v8529_v55 = vadd.f32 %v3129_v51, %v9857_v2  ;;  %v9861_v29 = vld [vmem:[#allocation28_spill] sm:$0xff] }
 0x324   :  { %v5800_v48 = vpop.f32.mrf.mxu1  ;;  %v3131_v3 = vpop.f32.mrf.mxu0 }
 0x325   :  { %9858 = vst [vmem:[#allocation44_spill] sm:$0xff] %v8529_v55  ;;  %v8537_v47 = vadd.f32 %v5800_v48, %v9859_v27  ;;  %v8540_v20 = vadd.f32 %v3131_v3, %v8237_v25  ;;  %v9864_v48 = vld [vmem:[#allocation57_spill] sm:$0xff] }
 0x326   :  { %v2833_v9 = vpop.f32.mrf.mxu1  ;;  %v3133_v62 = vpop.f32.mrf.mxu0 }
 0x327   :  { %9860 = vst [vmem:[#allocation7_spill] sm:$0xff] %v8540_v20  ;;  %v8543_v19 = vadd.f32 %v2833_v9, %v9861_v29  ;;  %v8546_v51 = vadd.f32 %v3133_v62, %v8243_v6  ;;  %v9867_v62 = vld [vmem:[#allocation66_spill] sm:$0xff] }
 0x328   :  { %v5803_v2 = vpop.f32.mrf.mxu1  ;;  %v3137_v55 = vpop.f32.mrf.mxu0  ;;  %5502 = vmatmul.mubr.msk.bf16.gmra.mxu0 %vm119_vm2, %v8534_v7  ;;  %5507 = vmatmul.mubr.msk.bf16.gmra.mxu1 %vm119_vm2, %v8394_v5 }
 0x329   :  { %9862 = vst [vmem:[#allocation74_spill] sm:$0xff] %v8543_v19  ;;  %9863 = vst [vmem:[#allocation45_spill] sm:$0xff] %v8546_v51  ;;  %v8553_v27 = vadd.f32 %v5803_v2, %v9864_v48  ;;  %v8556_v25 = vadd.f32 %v3137_v55, %v8256_v57  ;;  %4292 = vmatprep.mubr.bf16.mxu1 %v9478_v23  ;;  %5843 = vmatprep.mubr.msk.bf16.mxu0 %vm119_vm2, %v8276_v49  ;;  %v9869_v2 = vld [vmem:[#allocation29_spill] sm:$0xff] }
 0x32a   :  { %v2846_v6 = vpop.f32.mrf.mxu1  ;;  %v3139_v3 = vpop.f32.mrf.mxu0 }
 0x32b   :  { %9865 = vst [vmem:[#allocation21_spill] sm:$0xff] %v8553_v27  ;;  %9866 = vst [vmem:[#allocation75_spill] sm:$0xff] %v8556_v25  ;;  %v8562_v9 = vadd.f32 %v2846_v6, %v9867_v62  ;;  %v8565_v29 = vadd.f32 %v3139_v3, %v8265_v40  ;;  %v9870_v27 = vld [vmem:[#allocation58_spill] sm:$0xff] }
 0x32c   :  { %v5804_v51 = vpop.f32.mrf.mxu1  ;;  %v3141_v20 = vpop.f32.mrf.mxu0 }
 0x32d   :  { %9868 = vst [vmem:[#allocation46_spill] sm:$0xff] %v8565_v29  ;;  %v8568_v48 = vadd.f32 %v5804_v51, %v9869_v2  ;;  %v8571_v57 = vadd.f32 %v3141_v20, %v8279_v43  ;;  %v9872_v43 = vld [vmem:[#allocation30_spill] sm:$0xff] }
 0x32e   :  { %v2849_v55 = vpop.f32.mrf.mxu1  ;;  %v3143_v25 = vpop.f32.mrf.mxu0 }
 0x32f   :  { %v8574_v49 = vadd.f32 %v2849_v55, %v9870_v27  ;;  %v8577_v19 = vadd.f32 %v3143_v25, %v8290_v58  ;;  %v9874_v25 = vld [vmem:[#allocation31_spill] sm:$0xff]  ;;  %v9875_v55 = vld [vmem:[#allocation60_spill] sm:$0xff] }
 0x330   :  { %v3147_v6 = vpop.f32.mrf.mxu0  ;;  %v3220_v62 = vpop.f32.mrf.mxu1  ;;  %5508 = vmatmul.mubr.msk.bf16.gmra.mxu1 %vm119_vm2, %v8429_v1  ;;  %5844 = vmatmul.mubr.msk.bf16.vlgmr.msra.gmra.mxu0 %vm119_vm2, %v8322_v42 }
 0x331   :  { %9871 = vst [vmem:[#allocation80_spill] sm:$0xff] %v8577_v19  ;;  %v8584_v40 = vadd.f32 %v3147_v6, %v8302_v41  ;;  %v8587_v20 = vadd.f32 %v3220_v62, %v9872_v43  ;;  %4302 = vmatprep.mubr.bf16.mxu1 %v9478_v23  ;;  %5847 = vmatprep.mubr.msk.bf16.mxu0 %vm119_vm2, %v8358_v35  ;;  %v9877_v19 = vld [vmem:[#allocation32_spill] sm:$0xff] }
 0x332   :  { %v3149_v58 = vpop.f32.mrf.mxu0  ;;  %v3222_v51 = vpop.f32.mrf.mxu1 }
 0x333   :  { %v8593_v27 = vadd.f32 %v3149_v58, %v8311_v34  ;;  %v8596_v3 = vadd.f32 %v3222_v51, %v9874_v25  ;;  %v9878_v51 = vld [vmem:[#allocation2_spill] sm:$0xff] }
 0x334   :  { %v3151_v42 = vpop.f32.mrf.mxu0  ;;  %v3224_v2 = vpop.f32.mrf.mxu1 }
 0x335   :  { %9873 = vst [vmem:[#allocation76_spill] sm:$0xff] %v8593_v27  ;;  %v8599_v41 = vadd.f32 %v3151_v42, %v8325_v21  ;;  %v8602_v6 = vadd.f32 %v3224_v2, %v9875_v55  ;;  %v9879_v2 = vld [vmem:[#allocation4_spill] sm:$0xff] }
 0x336   :  { %v3153_v62 = vpop.f32.mrf.mxu0  ;;  %v3226_v43 = vpop.f32.mrf.mxu1 }
 0x337   :  { %v8605_v35 = vadd.f32 %v3153_v62, %v8331_v32  ;;  %v8608_v29 = vadd.f32 %v3226_v43, %v9877_v19  ;;  %v9880_v43 = vld [vmem:[#allocation63_spill] sm:$0xff] }
 0x338   :  { %v3157_v34 = vpop.f32.mrf.mxu0  ;;  %v3230_v58 = vpop.f32.mrf.mxu1  ;;  %5509 = vmatmul.mubr.msk.bf16.gmra.mxu1 %vm119_vm2, %v8464_v12  ;;  %5848 = vmatmul.mubr.msk.bf16.gmra.mxu0 %vm119_vm2, %v8394_v5 }
 0x339   :  { %9876 = vst [vmem:[#allocation47_spill] sm:$0xff] %v8605_v35  ;;  %v8615_v21 = vadd.f32 %v3157_v34, %v8341_v56  ;;  %v8618_v25 = vadd.f32 %v3230_v58, %v9878_v51  ;;  %4312 = vmatprep.mubr.bf16.mxu1 %v9478_v23  ;;  %5851 = vmatprep.mubr.msk.bf16.mxu0 %vm119_vm2, %v8429_v1  ;;  %v9881_v35 = vld [vmem:[#allocation6_spill] sm:$0xff] }
 0x33a   :  { %v3159_v32 = vpop.f32.mrf.mxu0  ;;  %v3232_v19 = vpop.f32.mrf.mxu1 }
 0x33b   :  { %v8624_v42 = vadd.f32 %v3159_v32, %v8350_v44  ;;  %v8627_v55 = vadd.f32 %v3232_v19, %v9879_v2  ;;  %v9882_v19 = vld [vmem:[#allocation8_spill] sm:$0xff] }
 0x33c   :  { %v3161_v5 = vpop.f32.mrf.mxu0  ;;  %v3234_v62 = vpop.f32.mrf.mxu1 }
 0x33d   :  { %v8630_v56 = vadd.f32 %v3161_v5, %v8361_v45  ;;  %v8633_v34 = vadd.f32 %v3234_v62, %v9880_v43  ;;  %v9884_v62 = vld [vmem:[#allocation14_spill] sm:$0xff] }
 0x33e   :  { %v3163_v58 = vpop.f32.mrf.mxu0  ;;  %v3236_v51 = vpop.f32.mrf.mxu1 }
 0x33f   :  { %v8636_v1 = vadd.f32 %v3163_v58, %v8367_v16  ;;  %v8639_v27 = vadd.f32 %v3236_v51, %v9881_v35 }
 0x340   :  { %v3167_v44 = vpop.f32.mrf.mxu0  ;;  %v3240_v32 = vpop.f32.mrf.mxu1  ;;  %5510 = vmatmul.mubr.msk.bf16.gmra.mxu1 %vm119_vm2, %v8499_v37  ;;  %5852 = vmatmul.mubr.msk.bf16.gmra.mxu0 %vm119_vm2, %v8464_v12 }
 0x341   :  { %v8646_v45 = vadd.f32 %v3167_v44, %v8377_v63  ;;  %v8649_v2 = vadd.f32 %v3240_v32, %v9882_v19  ;;  %4322 = vmatprep.mubr.bf16.mxu1 %v9478_v23  ;;  %5855 = vmatprep.mubr.msk.bf16.mxu0 %vm119_vm2, %v8499_v37  ;;  %v9886_v32 = vld [vmem:[#allocation69_spill] sm:$0xff] }
 0x342   :  { %v3169_v16 = vpop.f32.mrf.mxu0  ;;  %v3242_v35 = vpop.f32.mrf.mxu1 }
 0x343   :  { %v8655_v5 = vadd.f32 %v3169_v16, %v8386_v50  ;;  %v8658_v43 = vadd.f32 %v3242_v35, %v9884_v62 }
 0x344   :  { %v3171_v12 = vpop.f32.mrf.mxu0  ;;  %v3244_v58 = vpop.f32.mrf.mxu1 }
 0x345   :  { %9883 = vst [vmem:[#allocation77_spill] sm:$0xff] %v8655_v5  ;;  %v8661_v63 = vadd.f32 %v3171_v12, %v8397_v8  ;;  %v8664_v51 = vadd.f32 %v3244_v58, %v8240_v46  ;;  %v9887_v46 = vld [vmem:[#allocation68_spill] sm:$0xff] }
 0x346   :  { %v3173_v23 = vpop.f32.mrf.mxu0  ;;  %v3246_v44 = vpop.f32.mrf.mxu1  ;;  %v9889_v58 = vld [vmem:[#allocation48_spill] sm:$0xff] }
 0x347   :  { %v8667_v37 = vadd.f32 %v3173_v23, %v8403_v17  ;;  %v8670_v19 = vadd.f32 %v3246_v44, %v9886_v32 }
 0x348   :  { %v3177_v50 = vpop.f32.mrf.mxu0  ;;  %v3250_v16 = vpop.f32.mrf.mxu1  ;;  %5511 = vmatmul.mubr.msk.bf16.gmra.mxu1 %vm119_vm2, %v8534_v7  ;;  %5856 = vmatmul.mubr.msk.bf16.gmra.mxu0 %vm119_vm2, %v8534_v7 }
 0x349   :  { %9885 = vst [vmem:[#allocation50_spill] sm:$0xff] %v8667_v37  ;;  %v8677_v8 = vadd.f32 %v3177_v50, %v8413_v61  ;;  %v8680_v35 = vadd.f32 %v3250_v16, %v9887_v46 }
 0x34a   :  { %v3179_v62 = vpop.f32.mrf.mxu0  ;;  %v3252_v17 = vpop.f32.mrf.mxu1 }
 0x34b   :  { %v8683_v12 = vadd.f32 %v3179_v62, %v8421_v59  ;;  %v8686_v23 = vadd.f32 %v3252_v17, %v9889_v58 }
 0x34c   :  { %v3181_v44 = vpop.f32.mrf.mxu0  ;;  %v3254_v32 = vpop.f32.mrf.mxu1 }
 0x34d   :  { %9888 = vst [vmem:[#allocation78_spill] sm:$0xff] %v8683_v12  ;;  %v8689_v37 = vadd.f32 %v3181_v44, %v8432_v22  ;;  %v8692_v7 = vadd.f32 %v3254_v32, %v8282_v38 }
 0x34e   :  { %v3183_v61 = vpop.f32.mrf.mxu0  ;;  %v3256_v50 = vpop.f32.mrf.mxu1 }
 0x34f   :  { %v8695_v16 = vadd.f32 %v3183_v61, %v8438_v60  ;;  %v8698_v46 = vadd.f32 %v3256_v50, %v8287_v28 }
 0x350   :  { %v3260_v59 = vpop.f32.mrf.mxu1  ;;  %v5809_v62 = vpop.f32.mrf.mxu0 }
 0x351   :  { %9890 = vst [vmem:[#allocation79_spill] sm:$0xff] %v8695_v16  ;;  %v8701_v17 = vadd.f32 %v3260_v59, %v8305_v39  ;;  %v8704_v58 = vadd.f32 %v5809_v62, %v8448_v53  ;;  %v9923_v16 = vld [vmem:[#allocation73_spill] sm:$0xff] }
 0x352   :  { %v3262_v22 = vpop.f32.mrf.mxu1  ;;  %v3333_v44 = vpop.f32.mrf.mxu0 }
 0x353   :  { %9891 = vst [vmem:[#allocation3_spill] sm:$0xff] %v8704_v58  ;;  %v8707_v38 = vadd.f32 %v3262_v22, %v8314_v13  ;;  %v8710_v32 = vadd.f32 %v3333_v44, %v8456_v11 }
 0x354   :  { %v3264_v60 = vpop.f32.mrf.mxu1  ;;  %v5810_v61 = vpop.f32.mrf.mxu0 }
 0x355   :  { %9892 = vst [vmem:[#allocation54_spill] sm:$0xff] %v8710_v32  ;;  %v8713_v28 = vadd.f32 %v3264_v60, %v8328_v18  ;;  %v8716_v50 = vadd.f32 %v5810_v61, %v8467_v4  ;;  %v9920_v32 = vld [vmem:[#allocation72_spill] sm:$0xff] }
 0x356   :  { %v3266_v39 = vpop.f32.mrf.mxu1  ;;  %v3336_v59 = vpop.f32.mrf.mxu0 }
 0x357   :  { %9893 = vst [vmem:[#allocation5_spill] sm:$0xff] %v8716_v50  ;;  %v8719_v53 = vadd.f32 %v3266_v39, %v8334_v52  ;;  %v8722_v62 = vadd.f32 %v3336_v59, %v8473_v15 }
 0x358   :  { %v3270_v13 = vpop.f32.mrf.mxu1  ;;  %v5813_v22 = vpop.f32.mrf.mxu0 }
 0x359   :  { %9894 = vst [vmem:[#allocation9_spill] sm:$0xff] %v8722_v62  ;;  %v8725_v11 = vadd.f32 %v3270_v13, %v8344_v14  ;;  %v8728_v44 = vadd.f32 %v5813_v22, %v8483_v0 }
 0x35a   :  { %v3272_v18 = vpop.f32.mrf.mxu1  ;;  %v3349_v60 = vpop.f32.mrf.mxu0 }
 0x35b   :  { %9895 = vst [vmem:[#allocation11_spill] sm:$0xff] %v8728_v44  ;;  %v8731_v4 = vadd.f32 %v3272_v18, %v8353_v30  ;;  %v8734_v61 = vadd.f32 %v3349_v60, %v8491_v54  ;;  %v9899_v60 = vld [vmem:[#allocation43_spill] sm:$0xff] }
 0x35c   :  { %v3274_v52 = vpop.f32.mrf.mxu1  ;;  %v5814_v39 = vpop.f32.mrf.mxu0 }
 0x35d   :  { %9896 = vst [vmem:[#allocation13_spill] sm:$0xff] %v8734_v61  ;;  %v8737_v15 = vadd.f32 %v3274_v52, %v8364_v24  ;;  %v8740_v59 = vadd.f32 %v5814_v39, %v8502_v31  ;;  %v9901_v31 = vld [vmem:[#allocation53_spill] sm:$0xff] }
 0x35e   :  { %v3276_v14 = vpop.f32.mrf.mxu1  ;;  %v3352_v13 = vpop.f32.mrf.mxu0 }
 0x35f   :  { %9897 = vst [vmem:[#allocation15_spill] sm:$0xff] %v8740_v59  ;;  %v8743_v0 = vadd.f32 %v3276_v14, %v8370_v33  ;;  %v8746_v22 = vadd.f32 %v3352_v13, %v8508_v10  ;;  %v9903_v10 = vld [vmem:[#allocation34_spill] sm:$0xff] }
 0x360   :  { %v3280_v30 = vpop.f32.mrf.mxu1  ;;  %v5817_v18 = vpop.f32.mrf.mxu0 }
 0x361   :  { %9898 = vst [vmem:[#allocation17_spill] sm:$0xff] %v8746_v22  ;;  %v8749_v54 = vadd.f32 %v3280_v30, %v8380_v26  ;;  %v8752_v61 = vadd.f32 %v5817_v18, %v9899_v60  ;;  %v9905_v18 = vld [vmem:[#allocation35_spill] sm:$0xff] }
 0x362   :  { %v3282_v24 = vpop.f32.mrf.mxu1  ;;  %v3365_v52 = vpop.f32.mrf.mxu0 }
 0x363   :  { %9900 = vst [vmem:[#allocation64_spill] sm:$0xff] %v8752_v61  ;;  %v8755_v39 = vadd.f32 %v3282_v24, %v9901_v31  ;;  %v8758_v59 = vadd.f32 %v3365_v52, %v8526_v36  ;;  %v9906_v61 = vld [vmem:[#allocation74_spill] sm:$0xff]  ;;  %v9908_v36 = vld [vmem:[#allocation36_spill] sm:$0xff] }
 0x364   :  { %v3284_v33 = vpop.f32.mrf.mxu1  ;;  %v5818_v14 = vpop.f32.mrf.mxu0 }
 0x365   :  { %9902 = vst [vmem:[#allocation33_spill] sm:$0xff] %v8758_v59  ;;  %v8761_v13 = vadd.f32 %v3284_v33, %v9903_v10  ;;  %v8764_v22 = vadd.f32 %v5818_v14, %v8537_v47  ;;  %v9909_v59 = vld [vmem:[#allocation21_spill] sm:$0xff] }
 0x366   :  { %v3286_v26 = vpop.f32.mrf.mxu1  ;;  %v3368_v30 = vpop.f32.mrf.mxu0  ;;  %v9911_v47 = vld [vmem:[#allocation37_spill] sm:$0xff] }
 0x367   :  { %9904 = vst [vmem:[#allocation19_spill] sm:$0xff] %v8764_v22  ;;  %v8767_v60 = vadd.f32 %v3286_v26, %v9905_v18  ;;  %v8770_v44 = vadd.f32 %v3368_v30, %v9906_v61  ;;  %v9913_v61 = vld [vmem:[#allocation38_spill] sm:$0xff] }
 0x368   :  { %v3290_v24 = vpop.f32.mrf.mxu1  ;;  %v5821_v31 = vpop.f32.mrf.mxu0 }
 0x369   :  { %9907 = vst [vmem:[#allocation20_spill] sm:$0xff] %v8770_v44  ;;  %v8773_v52 = vadd.f32 %v3290_v24, %v9908_v36  ;;  %v8776_v62 = vadd.f32 %v5821_v31, %v9909_v59  ;;  %v9915_v59 = vld [vmem:[#allocation39_spill] sm:$0xff] }
 0x36a   :  { %v3292_v33 = vpop.f32.mrf.mxu1  ;;  %v3381_v10 = vpop.f32.mrf.mxu0 }
 0x36b   :  { %9910 = vst [vmem:[#allocation22_spill] sm:$0xff] %v8776_v62  ;;  %v8779_v14 = vadd.f32 %v3292_v33, %v9911_v47  ;;  %v8782_v22 = vadd.f32 %v3381_v10, %v8562_v9  ;;  %v9917_v9 = vld [vmem:[#allocation40_spill] sm:$0xff] }
 0x36c   :  { %v3294_v26 = vpop.f32.mrf.mxu1  ;;  %v5822_v18 = vpop.f32.mrf.mxu0 }
 0x36d   :  { %9912 = vst [vmem:[#allocation23_spill] sm:$0xff] %v8782_v22  ;;  %v8785_v30 = vadd.f32 %v3294_v26, %v9913_v61  ;;  %v8788_v44 = vadd.f32 %v5822_v18, %v8568_v48 }
 0x36e   :  { %v3296_v24 = vpop.f32.mrf.mxu1  ;;  %v3384_v36 = vpop.f32.mrf.mxu0 }
 0x36f   :  { %9914 = vst [vmem:[#allocation70_spill] sm:$0xff] %v8788_v44  ;;  %v8791_v31 = vadd.f32 %v3296_v24, %v9915_v59  ;;  %v8794_v62 = vadd.f32 %v3384_v36, %v8574_v49  ;;  %v9918_v59 = vld [vmem:[#allocation71_spill] sm:$0xff] }
 0x370   :  { %v3624_v33 = vpop.f32.mrf.mxu1  ;;  %v3737_v47 = vpop.f32.mrf.mxu0 }
 0x371   :  { %9916 = vst [vmem:[#allocation55_spill] sm:$0xff] %v8794_v62  ;;  %v8797_v10 = vadd.f32 %v3624_v33, %v9917_v9  ;;  %v8800_v22 = vadd.f32 %v3737_v47, %v8587_v20  ;;  %v9919_v62 = vld [vmem:[#allocation18_spill] sm:$0xff] }
 0x372   :  { %v8802_v26 = vpop.f32.mrf.mxu1  ;;  %v3739_v48 = vpop.f32.mrf.mxu0 }
 0x373   :  { %v8805_v18 = vadd.f32 %v3739_v48, %v8596_v3 }
 0x374   :  { %v3628_v61 = vpop.f32.mrf.mxu1  ;;  %v3741_v24 = vpop.f32.mrf.mxu0 }
 0x375   :  { %v8808_v44 = vadd.f32 %v3628_v61, %v9918_v59  ;;  %v8811_v49 = vadd.f32 %v3741_v24, %v8602_v6 }
 0x376   :  { %v8813_v36 = vpop.f32.mrf.mxu1  ;;  %v3743_v33 = vpop.f32.mrf.mxu0 }
 0x377   :  { %v8816_v20 = vadd.f32 %v3743_v33, %v8608_v29 }
 0x378   :  { %v3634_v47 = vpop.f32.mrf.mxu1  ;;  %v3747_v9 = vpop.f32.mrf.mxu0 }
 0x379   :  { %v8819_v50 = vadd.f32 %v3634_v47, %v9919_v62  ;;  %v8822_v3 = vadd.f32 %v3747_v9, %v8618_v25 }
 0x37a   :  { %v8824_v48 = vpop.f32.mrf.mxu1  ;;  %v3749_v61 = vpop.f32.mrf.mxu0 }
 0x37b   :  { %v8827_v6 = vadd.f32 %v3749_v61, %v8627_v55 }
 0x37c   :  { %v3638_v24 = vpop.f32.mrf.mxu1  ;;  %v3751_v59 = vpop.f32.mrf.mxu0 }
 0x37d   :  { %v8830_v58 = vadd.f32 %v3638_v24, %v9920_v32  ;;  %v8833_v29 = vadd.f32 %v3751_v59, %v8633_v34 }
 0x37e   :  { %v8835_v33 = vpop.f32.mrf.mxu1  ;;  %v3753_v62 = vpop.f32.mrf.mxu0 }
 0x37f   :  { %9921 = vst [vmem:[#allocation24_spill] sm:$0xff] %v8833_v29  ;;  %v8838_v25 = vadd.f32 %v3753_v62, %v8639_v27  ;;  %v9925_v29 = vld [vmem:[#allocation7_spill] sm:$0xff] }
 0x380   :  { %v3644_v47 = vpop.f32.mrf.mxu1  ;;  %v3757_v9 = vpop.f32.mrf.mxu0 }
 0x381   :  { %9922 = vst [vmem:[#allocation25_spill] sm:$0xff] %v8838_v25  ;;  %v8841_v12 = vadd.f32 %v3644_v47, %v9923_v16  ;;  %v8844_v55 = vadd.f32 %v3757_v9, %v8649_v2 }
 0x382   :  { %v8846_v61 = vpop.f32.mrf.mxu1  ;;  %v3759_v32 = vpop.f32.mrf.mxu0 }
 0x383   :  { %9924 = vst [vmem:[#allocation59_spill] sm:$0xff] %v8844_v55  ;;  %v8849_v34 = vadd.f32 %v3759_v32, %v8658_v43  ;;  %v9927_v55 = vld [vmem:[#allocation75_spill] sm:$0xff] }
 0x384   :  { %v3648_v24 = vpop.f32.mrf.mxu1  ;;  %v3761_v59 = vpop.f32.mrf.mxu0 }
 0x385   :  { %v8852_v5 = vadd.f32 %v3648_v24, %v9925_v29  ;;  %v8855_v27 = vadd.f32 %v3761_v59, %v8664_v51 }
 0x386   :  { %v8857_v62 = vpop.f32.mrf.mxu1  ;;  %v3763_v16 = vpop.f32.mrf.mxu0 }
 0x387   :  { %9926 = vst [vmem:[#allocation52_spill] sm:$0xff] %v8855_v27  ;;  %v8860_v2 = vadd.f32 %v3763_v16, %v8670_v19 }
 0x388   :  { %v3654_v47 = vpop.f32.mrf.mxu1  ;;  %v3767_v9 = vpop.f32.mrf.mxu0 }
 0x389   :  { %v8863_v25 = vadd.f32 %v3654_v47, %v9927_v55  ;;  %v8866_v43 = vadd.f32 %v3767_v9, %v8680_v35 }
 0x38a   :  { %v8868_v32 = vpop.f32.mrf.mxu1  ;;  %v3769_v29 = vpop.f32.mrf.mxu0 }
 0x38b   :  { %9928 = vst [vmem:[#allocation49_spill] sm:$0xff] %v8866_v43  ;;  %v8871_v51 = vadd.f32 %v3769_v29, %v8686_v23 }
 0x38c   :  { %v3658_v24 = vpop.f32.mrf.mxu1  ;;  %v3771_v59 = vpop.f32.mrf.mxu0 }
 0x38d   :  { %v8874_v27 = vadd.f32 %v3658_v24, %v8571_v57  ;;  %v8877_v19 = vadd.f32 %v3771_v59, %v8692_v7 }
 0x38e   :  { %v8879_v16 = vpop.f32.mrf.mxu1  ;;  %v3773_v55 = vpop.f32.mrf.mxu0 }
 0x38f   :  { %9929 = vst [vmem:[#allocation26_spill] sm:$0xff] %v8877_v19  ;;  %v8882_v35 = vadd.f32 %v3773_v55, %v8698_v46 }
 0x390   :  { %v3664_v47 = vpop.f32.mrf.mxu1  ;;  %v3777_v9 = vpop.f32.mrf.mxu0 }
 0x391   :  { %9930 = vst [vmem:[#allocation51_spill] sm:$0xff] %v8882_v35  ;;  %v8885_v43 = vadd.f32 %v3664_v47, %v8584_v40  ;;  %v8888_v23 = vadd.f32 %v3777_v9, %v8701_v17 }
 0x392   :  { %v8890_v29 = vpop.f32.mrf.mxu1  ;;  %v3779_v57 = vpop.f32.mrf.mxu0 }
 0x393   :  { %9931 = vst [vmem:[#allocation62_spill] sm:$0xff] %v8888_v23  ;;  %v8893_v7 = vadd.f32 %v3779_v57, %v8707_v38 }
 0x394   :  { %v3668_v24 = vpop.f32.mrf.mxu1  ;;  %v3781_v59 = vpop.f32.mrf.mxu0 }
 0x395   :  { %9932 = vst [vmem:[#allocation27_spill] sm:$0xff] %v8893_v7  ;;  %v8896_v19 = vadd.f32 %v3668_v24, %v8599_v41  ;;  %v8899_v46 = vadd.f32 %v3781_v59, %v8713_v28  ;;  %v9950_v7 = vld [vmem:[#allocation12_spill] sm:$0xff] }
 0x396   :  { %v8901_v55 = vpop.f32.mrf.mxu1  ;;  %v3783_v40 = vpop.f32.mrf.mxu0 }
 0x397   :  { %9933 = vst [vmem:[#allocation65_spill] sm:$0xff] %v8899_v46  ;;  %v8904_v17 = vadd.f32 %v3783_v40, %v8719_v53 }
 0x398   :  { %v3674_v47 = vpop.f32.mrf.mxu1  ;;  %v3787_v9 = vpop.f32.mrf.mxu0 }
 0x399   :  { %9934 = vst [vmem:[#allocation10_spill] sm:$0xff] %v8904_v17  ;;  %v8907_v23 = vadd.f32 %v3674_v47, %v8615_v21  ;;  %v8910_v38 = vadd.f32 %v3787_v9, %v8725_v11 }
 0x39a   :  { %v8912_v57 = vpop.f32.mrf.mxu1  ;;  %v3789_v41 = vpop.f32.mrf.mxu0 }
 0x39b   :  { %9935 = vst [vmem:[#allocation61_spill] sm:$0xff] %v8910_v38  ;;  %v8915_v28 = vadd.f32 %v3789_v41, %v8731_v4 }
 0x39c   :  { %v3678_v24 = vpop.f32.mrf.mxu1  ;;  %v3791_v59 = vpop.f32.mrf.mxu0 }
 0x39d   :  { %9936 = vst [vmem:[#allocation67_spill] sm:$0xff] %v8915_v28  ;;  %v8918_v46 = vadd.f32 %v3678_v24, %v8630_v56  ;;  %v8921_v53 = vadd.f32 %v3791_v59, %v8737_v15 }
 0x39e   :  { %v8923_v40 = vpop.f32.mrf.mxu1  ;;  %v3793_v21 = vpop.f32.mrf.mxu0 }
 0x39f   :  { %9937 = vst [vmem:[#allocation56_spill] sm:$0xff] %v8921_v53  ;;  %v8926_v11 = vadd.f32 %v3793_v21, %v8743_v0 }
 0x3a0   :  { %v3684_v47 = vpop.f32.mrf.mxu1  ;;  %v3797_v9 = vpop.f32.mrf.mxu0 }
 0x3a1   :  { %9938 = vst [vmem:[#allocation28_spill] sm:$0xff] %v8926_v11  ;;  %v8929_v38 = vadd.f32 %v3684_v47, %v8646_v45  ;;  %v8932_v4 = vadd.f32 %v3797_v9, %v8749_v54 }
 0x3a2   :  { %v8934_v41 = vpop.f32.mrf.mxu1  ;;  %v3799_v56 = vpop.f32.mrf.mxu0 }
 0x3a3   :  { %9939 = vst [vmem:[#allocation57_spill] sm:$0xff] %v8932_v4  ;;  %v8937_v15 = vadd.f32 %v3799_v56, %v8755_v39 }
 0x3a4   :  { %v3688_v24 = vpop.f32.mrf.mxu1  ;;  %v3801_v59 = vpop.f32.mrf.mxu0 }
 0x3a5   :  { %9940 = vst [vmem:[#allocation66_spill] sm:$0xff] %v8937_v15  ;;  %v8940_v53 = vadd.f32 %v3688_v24, %v8661_v63  ;;  %v8943_v0 = vadd.f32 %v3801_v59, %v8761_v13 }
 0x3a6   :  { %v8945_v21 = vpop.f32.mrf.mxu1  ;;  %v3803_v45 = vpop.f32.mrf.mxu0 }
 0x3a7   :  { %9941 = vst [vmem:[#allocation29_spill] sm:$0xff] %v8943_v0  ;;  %v8948_v54 = vadd.f32 %v3803_v45, %v8767_v60 }
 0x3a8   :  { %v3694_v47 = vpop.f32.mrf.mxu1  ;;  %v3807_v9 = vpop.f32.mrf.mxu0 }
 0x3a9   :  { %9942 = vst [vmem:[#allocation58_spill] sm:$0xff] %v8948_v54  ;;  %v8951_v4 = vadd.f32 %v3694_v47, %v8677_v8  ;;  %v8954_v39 = vadd.f32 %v3807_v9, %v8773_v52  ;;  %v8972_v47 = vpop.permute.xlu1 %4528 }
 0x3aa   :  { %v8956_v56 = vpop.f32.mrf.mxu1  ;;  %v3809_v63 = vpop.f32.mrf.mxu0 }
 0x3ab   :  { %9943 = vst [vmem:[#allocation30_spill] sm:$0xff] %v8954_v39  ;;  %v8959_v13 = vadd.f32 %v3809_v63, %v8779_v14  ;;  %v9948_v63 = vld [vmem:[#allocation41_spill] sm:$0xff]  ;;  %v8982_v39 = vpop.permute.xlu0 %4533 }
 0x3ac   :  { %v3698_v24 = vpop.f32.mrf.mxu1  ;;  %v3811_v59 = vpop.f32.mrf.mxu0 }
 0x3ad   :  { %9944 = vst [vmem:[#allocation31_spill] sm:$0xff] %v8959_v13  ;;  %v8962_v0 = vadd.f32 %v3698_v24, %v8689_v37  ;;  %v8965_v60 = vadd.f32 %v3811_v59, %v8785_v30  ;;  %v3914_v13 = vadd.f32 %v8802_v26, %v9948_v63  ;;  %v8990_v63 = vpop.permute.xlu1 %4538 }
 0x3ae   :  { %v8967_v45 = vpop.f32.mrf.mxu1  ;;  %v3813_v8 = vpop.f32.mrf.mxu0 }
 0x3af   :  { %9945 = vst [vmem:[#allocation60_spill] sm:$0xff] %v8962_v0  ;;  %9946 = vst [vmem:[#allocation32_spill] sm:$0xff] %v8965_v60  ;;  %v8970_v52 = vadd.f32 %v3813_v8, %v8791_v31 }
 0x3b0   :  { %v8974_v9 = vpop.f32.mrf.mxu1  ;;  %v4141_v14 = vpop.f32.mrf.mxu0 }
 0x3b1   :  { %9947 = vst [vmem:[#allocation2_spill] sm:$0xff] %v8970_v52  ;;  %v4430_v37 = vadd.f32 %v4141_v14, %v8797_v10  ;;  %v9949_v52 = vld [vmem:[#allocation42_spill] sm:$0xff] }
 0x3b2   :  { %v8979_v24 = vpop.f32.mrf.mxu1  ;;  %v4143_v30 = vpop.f32.mrf.mxu0  ;;  %v3919_v54 = vadd.f32 %v8813_v36, %v9949_v52  ;;  %v3924_v36 = vadd.f32 %v8824_v48, %v9950_v7 }
 0x3b3   :  { %v4431_v59 = vadd.f32 %v4143_v30, %v3914_v13  ;;  %v4606_v60 = vadd.f32 %v8972_v47, %v4430_v37 }
 0x3b4   :  { %v8984_v31 = vpop.f32.mrf.mxu1  ;;  %v4145_v8 = vpop.f32.mrf.mxu0 }
 0x3b5   :  { %v4607_v15 = vadd.f32 %v8972_v47, %v4431_v59  ;;  %v4435_v26 = vadd.f32 %v4145_v8, %v8808_v44  ;;  %v4686_v13 = vmax.f32 %v4606_v60, 0.0 }
 0x3b6   :  { %v4147_v10 = vpop.f32.mrf.mxu0  ;;  %v8992_v14 = vpop.f32.mrf.mxu1 }
 0x3b7   :  { %v4687_v30 = vmax.f32 %v4607_v15, 0.0  ;;  %v4436_v37 = vadd.f32 %v4147_v10, %v3919_v54  ;;  %v4611_v11 = vadd.f32 %v8982_v39, %v4435_v26  ;;  %v9006_v26 = vpop.permute.xlu1 %4543 }
 0x3b8   :  { %v8995_v28 = vpop.f32.mrf.mxu1  ;;  %v4151_v17 = vpop.f32.mrf.mxu0 }
 0x3b9   :  { %v5568_v52 = vpack.c.bf16 %v4687_v30, %v4686_v13  ;;  %v4612_v59 = vadd.f32 %v8982_v39, %v4436_v37  ;;  %v4440_v44 = vadd.f32 %v4151_v17, %v8819_v50  ;;  %v4691_v15 = vmax.f32 %v4611_v11, 0.0  ;;  %v9951_v13 = vld [vmem:[#allocation16_spill] sm:$0xff] }
 0x3ba   :  { %v9001_v8 = vpop.f32.mrf.mxu1  ;;  %v4153_v35 = vpop.f32.mrf.mxu0  ;;  %v3929_v50 = vadd.f32 %v8835_v33, %v9951_v13 }
 0x3bb   :  { %5022 = vst [vmem:[%s9436_s3] sm:$0xff] %v5568_v52  ;;  %v4692_v54 = vmax.f32 %v4612_v59, 0.0  ;;  %v4441_v60 = vadd.f32 %v4153_v35, %v3924_v36  ;;  %v4616_v10 = vadd.f32 %v8990_v63, %v4440_v44 }
 0x3bc   :  { %v9009_v48 = vpop.f32.mrf.mxu1  ;;  %v4155_v7 = vpop.f32.mrf.mxu0 }
 0x3bd   :  { %v5571_v17 = vpack.c.bf16 %v4692_v54, %v4691_v15  ;;  %v4617_v30 = vadd.f32 %v8990_v63, %v4441_v60  ;;  %v4445_v37 = vadd.f32 %v4155_v7, %v8830_v58  ;;  %v4696_v35 = vmax.f32 %v4616_v10, 0.0  ;;  %v9953_v15 = vld [vmem:[#allocation44_spill] sm:$0xff]  ;;  %v9026_v7 = vpop.permute.xlu0 %4548 }
 0x3be   :  { %v9015_v0 = vpop.f32.mrf.mxu1  ;;  %v4157_v11 = vpop.f32.mrf.mxu0  ;;  %v3934_v54 = vadd.f32 %v8846_v61, %v9953_v15 }
 0x3bf   :  { %9952 = vst [vmem:[#allocation4_spill] sm:$0xff] %v9015_v0  ;;  %5026 = vst [vmem:[%s9436_s3 + $0x14] sm:$0xff] %v5571_v17  ;;  %v4697_v36 = vmax.f32 %v4617_v30, 0.0  ;;  %v4446_v52 = vadd.f32 %v4157_v11, %v3929_v50  ;;  %v4621_v59 = vadd.f32 %v9006_v26, %v4445_v37  ;;  %v9034_v37 = vpop.permute.xlu1 %4553 }
 0x3c0   :  { %v9021_v44 = vpop.f32.mrf.mxu1  ;;  %v4161_v33 = vpop.f32.mrf.mxu0 }
 0x3c1   :  { %v5574_v60 = vpack.c.bf16 %v4697_v36, %v4696_v35  ;;  %v4622_v58 = vadd.f32 %v9006_v26, %v4446_v52  ;;  %v4450_v13 = vadd.f32 %v4161_v33, %v8841_v12  ;;  %v4701_v10 = vmax.f32 %v4621_v59, 0.0  ;;  %v9955_v36 = vld [vmem:[#allocation45_spill] sm:$0xff] }
 0x3c2   :  { %v4163_v0 = vpop.f32.mrf.mxu0  ;;  %v9029_v17 = vpop.f32.mrf.mxu1  ;;  %v3939_v12 = vadd.f32 %v8857_v62, %v9955_v36 }
 0x3c3   :  { %9954 = vst [vmem:[#allocation63_spill] sm:$0xff] %v9029_v17  ;;  %5029 = vst [vmem:[%s9436_s3 + $0x28] sm:$0xff] %v5574_v60  ;;  %v4702_v50 = vmax.f32 %v4622_v58, 0.0  ;;  %v4451_v30 = vadd.f32 %v4163_v0, %v3934_v54  ;;  %v4626_v61 = vadd.f32 %v9026_v7, %v4450_v13 }
 0x3c4   :  { %v9037_v11 = vpop.f32.mrf.mxu1  ;;  %v4165_v35 = vpop.f32.mrf.mxu0 }
 0x3c5   :  { %v5577_v52 = vpack.c.bf16 %v4702_v50, %v4701_v10  ;;  %v4627_v33 = vadd.f32 %v9026_v7, %v4451_v30  ;;  %v4455_v15 = vadd.f32 %v4165_v35, %v8852_v5  ;;  %v4706_v0 = vmax.f32 %v4626_v61, 0.0  ;;  %v9957_v10 = vld [vmem:[#allocation46_spill] sm:$0xff]  ;;  %v9054_v35 = vpop.permute.xlu0 %4558 }
 0x3c6   :  { %v9043_v17 = vpop.f32.mrf.mxu1  ;;  %v4167_v59 = vpop.f32.mrf.mxu0  ;;  %v3944_v50 = vadd.f32 %v8868_v32, %v9957_v10 }
 0x3c7   :  { %9956 = vst [vmem:[#allocation6_spill] sm:$0xff] %v9043_v17  ;;  %5032 = vst [vmem:[%s9436_s3 + $0x3c] sm:$0xff] %v5577_v52  ;;  %v4707_v54 = vmax.f32 %v4627_v33, 0.0  ;;  %v4456_v60 = vadd.f32 %v4167_v59, %v3939_v12  ;;  %v4631_v58 = vadd.f32 %v9034_v37, %v4455_v15  ;;  %v9062_v15 = vpop.permute.xlu1 %4563 }
 0x3c8   :  { %v9049_v13 = vpop.f32.mrf.mxu1  ;;  %v4171_v62 = vpop.f32.mrf.mxu0 }
 0x3c9   :  { %v5580_v30 = vpack.c.bf16 %v4707_v54, %v4706_v0  ;;  %v4632_v5 = vadd.f32 %v9034_v37, %v4456_v60  ;;  %v4460_v36 = vadd.f32 %v4171_v62, %v8863_v25  ;;  %v4711_v61 = vmax.f32 %v4631_v58, 0.0  ;;  %v9959_v54 = vld [vmem:[#allocation80_spill] sm:$0xff] }
 0x3ca   :  { %v4173_v17 = vpop.f32.mrf.mxu0  ;;  %v9057_v52 = vpop.f32.mrf.mxu1  ;;  %v3949_v25 = vadd.f32 %v8879_v16, %v9959_v54 }
 0x3cb   :  { %9958 = vst [vmem:[#allocation8_spill] sm:$0xff] %v9057_v52  ;;  %5035 = vst [vmem:[%s9436_s3 + $0x50] sm:$0xff] %v5580_v30  ;;  %v4712_v12 = vmax.f32 %v4632_v5, 0.0  ;;  %v4461_v33 = vadd.f32 %v4173_v17, %v3944_v50  ;;  %v4636_v32 = vadd.f32 %v9054_v35, %v4460_v36  ;;  %v9077_v36 = vpop.permute.xlu0 %4568 }
 0x3cc   :  { %v9065_v59 = vpop.f32.mrf.mxu1  ;;  %v4175_v0 = vpop.f32.mrf.mxu0 }
 0x3cd   :  { %v5583_v60 = vpack.c.bf16 %v4712_v12, %v4711_v61  ;;  %v4637_v62 = vadd.f32 %v9054_v35, %v4461_v33  ;;  %v4465_v10 = vadd.f32 %v4175_v0, %v8874_v27  ;;  %v4716_v17 = vmax.f32 %v4636_v32, 0.0  ;;  %v9961_v12 = vld [vmem:[#allocation76_spill] sm:$0xff] }
 0x3ce   :  { %v9071_v52 = vpop.f32.mrf.mxu1  ;;  %v4177_v58 = vpop.f32.mrf.mxu0  ;;  %v3954_v33 = vadd.f32 %v8890_v29, %v9961_v12 }
 0x3cf   :  { %9960 = vst [vmem:[#allocation14_spill] sm:$0xff] %v9071_v52  ;;  %5038 = vst [vmem:[%s9436_s3 + $0x64] sm:$0xff] %v5583_v60  ;;  %v4717_v50 = vmax.f32 %v4637_v62, 0.0  ;;  %v4466_v30 = vadd.f32 %v4177_v58, %v3949_v25  ;;  %v4641_v5 = vadd.f32 %v9062_v15, %v4465_v10  ;;  %v9094_v12 = vpop.permute.xlu1 %4573 }
 0x3d0   :  { %v4181_v16 = vpop.f32.mrf.mxu0  ;;  %v4254_v61 = vpop.f32.mrf.mxu1 }
 0x3d1   :  { %v5586_v27 = vpack.c.bf16 %v4717_v50, %v4716_v17  ;;  %v4642_v0 = vadd.f32 %v9062_v15, %v4466_v30  ;;  %v4470_v54 = vadd.f32 %v4181_v16, %v8885_v43  ;;  %v4721_v52 = vmax.f32 %v4641_v5, 0.0  ;;  %v9962_v43 = vld [vmem:[#allocation47_spill] sm:$0xff] }
 0x3d2   :  { %v4432_v60 = vadd.f32 %v4254_v61, %v8800_v22  ;;  %v4183_v32 = vpop.f32.mrf.mxu0  ;;  %v4256_v62 = vpop.f32.mrf.mxu1  ;;  %v3959_v5 = vadd.f32 %v8901_v55, %v9962_v43 }
 0x3d3   :  { %5041 = vst [vmem:[%s9436_s3 + $0x78] sm:$0xff] %v5586_v27  ;;  %v4722_v25 = vmax.f32 %v4642_v0, 0.0  ;;  %v4471_v10 = vadd.f32 %v4183_v32, %v3954_v33  ;;  %v4646_v58 = vadd.f32 %v9077_v36, %v4470_v54  ;;  %v4433_v29 = vadd.f32 %v4256_v62, %v8805_v18 }
 0x3d4   :  { %v4608_v17 = vadd.f32 %v8972_v47, %v4432_v60  ;;  %v4185_v50 = vpop.f32.mrf.mxu0  ;;  %v4258_v30 = vpop.f32.mrf.mxu1 }
 0x3d5   :  { %v5589_v22 = vpack.c.bf16 %v4722_v25, %v4721_v52  ;;  %v4647_v16 = vadd.f32 %v9077_v36, %v4471_v10  ;;  %v4609_v61 = vadd.f32 %v8972_v47, %v4433_v29  ;;  %v4726_v33 = vmax.f32 %v4646_v58, 0.0 }
 0x3d6   :  { %v4688_v27 = vmax.f32 %v4608_v17, 0.0  ;;  %v4475_v0 = vadd.f32 %v4185_v50, %v8896_v19  ;;  %v4437_v18 = vadd.f32 %v4258_v30, %v8811_v49  ;;  %v4187_v54 = vpop.f32.mrf.mxu0  ;;  %v4260_v60 = vpop.f32.mrf.mxu1  ;;  %v3964_v25 = vadd.f32 %v8912_v57, %v8624_v42 }
 0x3d7   :  { %5044 = vst [vmem:[%s9436_s3 + $0x8c] sm:$0xff] %v5589_v22  ;;  %v4727_v55 = vmax.f32 %v4647_v16, 0.0  ;;  %v4689_v52 = vmax.f32 %v4609_v61, 0.0  ;;  %v4476_v32 = vadd.f32 %v4187_v54, %v3959_v5  ;;  %v4438_v62 = vadd.f32 %v4260_v60, %v8816_v20  ;;  %v9110_v5 = vpop.permute.xlu0 %4578 }
 0x3d8   :  { %v3969_v10 = vadd.f32 %v8923_v40, %v8636_v1  ;;  %v4613_v19 = vadd.f32 %v8982_v39, %v4437_v18  ;;  %v4651_v49 = vadd.f32 %v9094_v12, %v4475_v0  ;;  %v4191_v58 = vpop.f32.mrf.mxu0  ;;  %v4264_v29 = vpop.f32.mrf.mxu1  ;;  %v9963_v0 = vld [vmem:[#allocation77_spill] sm:$0xff]  ;;  %v9964_v18 = vld [vmem:[#allocation50_spill] sm:$0xff] }
 0x3d9   :  { %v5592_v17 = vpack.c.bf16 %v4727_v55, %v4726_v33  ;;  %v5569_v50 = vpack.c.bf16 %v4689_v52, %v4688_v27  ;;  %v4652_v30 = vadd.f32 %v9094_v12, %v4476_v32  ;;  %v4614_v43 = vadd.f32 %v8982_v39, %v4438_v62 }
 0x3da   :  { %v4693_v20 = vmax.f32 %v4613_v19, 0.0  ;;  %v4731_v22 = vmax.f32 %v4651_v49, 0.0  ;;  %v4480_v42 = vadd.f32 %v4191_v58, %v8907_v23  ;;  %v4442_v1 = vadd.f32 %v4264_v29, %v8822_v3  ;;  %v4193_v57 = vpop.f32.mrf.mxu0  ;;  %v4266_v40 = vpop.f32.mrf.mxu1 }
 0x3db   :  { %5047 = vst [vmem:[%s9436_s3 + $0xa0] sm:$0xff] %v5592_v17  ;;  %5023 = vst [vmem:[%s9436_s3 + $0x8] sm:$0xff] %v5569_v50  ;;  %v4732_v16 = vmax.f32 %v4652_v30, 0.0  ;;  %v4694_v61 = vmax.f32 %v4614_v43, 0.0  ;;  %v4481_v27 = vadd.f32 %v4193_v57, %v3964_v25  ;;  %v4443_v33 = vadd.f32 %v4266_v40, %v8827_v6  ;;  %v9131_v6 = vpop.permute.xlu1 %4583  ;;  %v9968_v57 = vld [vmem:[#allocation79_spill] sm:$0xff] }
 0x3dc   :  { %v3974_v23 = vadd.f32 %v8934_v41, %v9963_v0  ;;  %v9125_v3 = vadd.f32 %v8945_v21, %v9964_v18  ;;  %v4618_v54 = vadd.f32 %v8990_v63, %v4442_v1  ;;  %v4656_v60 = vadd.f32 %v9110_v5, %v4480_v42  ;;  %v4195_v55 = vpop.f32.mrf.mxu0  ;;  %v4268_v52 = vpop.f32.mrf.mxu1  ;;  %v9965_v21 = vld [vmem:[#allocation24_spill] sm:$0xff]  ;;  %v9967_v1 = vld [vmem:[#allocation78_spill] sm:$0xff] }
 0x3dd   :  { %v5595_v32 = vpack.c.bf16 %v4732_v16, %v4731_v22  ;;  %v5572_v62 = vpack.c.bf16 %v4694_v61, %v4693_v20  ;;  %v4657_v19 = vadd.f32 %v9110_v5, %v4481_v27  ;;  %v4619_v25 = vadd.f32 %v8990_v63, %v4443_v33  ;;  %v9966_v22 = vld [vmem:[#allocation25_spill] sm:$0xff] }
 0x3de   :  { %v4698_v49 = vmax.f32 %v4618_v54, 0.0  ;;  %v4736_v41 = vmax.f32 %v4656_v60, 0.0  ;;  %v4485_v58 = vadd.f32 %v4195_v55, %v8918_v46  ;;  %v4447_v29 = vadd.f32 %v4268_v52, %v9965_v21  ;;  %v4197_v17 = vpop.f32.mrf.mxu0  ;;  %v4270_v50 = vpop.f32.mrf.mxu1  ;;  %v9970_v21 = vld [vmem:[#allocation3_spill] sm:$0xff] }
 0x3df   :  { %5050 = vst [vmem:[%s9436_s3 + $0xb4] sm:$0xff] %v5595_v32  ;;  %5027 = vst [vmem:[%s9436_s3 + $0x1c] sm:$0xff] %v5572_v62  ;;  %v4737_v30 = vmax.f32 %v4657_v19, 0.0  ;;  %v4699_v43 = vmax.f32 %v4619_v25, 0.0  ;;  %v4486_v20 = vadd.f32 %v4197_v17, %v3969_v10  ;;  %v4448_v42 = vadd.f32 %v4270_v50, %v9966_v22  ;;  %v9154_v60 = vpop.permute.xlu0 %4588 }
 0x3e0   :  { %v9144_v46 = vadd.f32 %v8956_v56, %v9967_v1  ;;  %v9148_v40 = vadd.f32 %v8967_v45, %v9968_v57  ;;  %v4623_v16 = vadd.f32 %v9006_v26, %v4447_v29  ;;  %v4661_v61 = vadd.f32 %v9131_v6, %v4485_v58  ;;  %v4201_v27 = vpop.f32.mrf.mxu0  ;;  %v4274_v33 = vpop.f32.mrf.mxu1  ;;  %v9969_v45 = vld [vmem:[#allocation59_spill] sm:$0xff]  ;;  %v9971_v29 = vld [vmem:[#allocation54_spill] sm:$0xff] }
 0x3e1   :  { %v5598_v0 = vpack.c.bf16 %v4737_v30, %v4736_v41  ;;  %v5575_v18 = vpack.c.bf16 %v4699_v43, %v4698_v49  ;;  %v4662_v10 = vadd.f32 %v9131_v6, %v4486_v20  ;;  %v4624_v54 = vadd.f32 %v9006_v26, %v4448_v42  ;;  %v9177_v1 = vpop.permute.xlu1 %4593 }
 0x3e2   :  { %v4703_v56 = vmax.f32 %v4623_v16, 0.0  ;;  %v4741_v55 = vmax.f32 %v4661_v61, 0.0  ;;  %v4490_v52 = vadd.f32 %v4201_v27, %v8929_v38  ;;  %v4452_v32 = vadd.f32 %v4274_v33, %v9969_v45  ;;  %v4203_v62 = vpop.f32.mrf.mxu0  ;;  %v4276_v19 = vpop.f32.mrf.mxu1 }
 0x3e3   :  { %5053 = vst [vmem:[%s9436_s3 + $0xc8] sm:$0xff] %v5598_v0  ;;  %5030 = vst [vmem:[%s9436_s3 + $0x30] sm:$0xff] %v5575_v18  ;;  %v4742_v25 = vmax.f32 %v4662_v10, 0.0  ;;  %v4704_v49 = vmax.f32 %v4624_v54, 0.0  ;;  %v4491_v41 = vadd.f32 %v4203_v62, %v3974_v23  ;;  %v4453_v58 = vadd.f32 %v4276_v19, %v8849_v34 }
 0x3e4   :  { %v9167_v38 = vadd.f32 %v8974_v9, %v9970_v21  ;;  %v9171_v17 = vadd.f32 %v8979_v24, %v9971_v29  ;;  %v4628_v50 = vadd.f32 %v9026_v7, %v4452_v32  ;;  %v4666_v30 = vadd.f32 %v9154_v60, %v4490_v52  ;;  %v4205_v43 = vpop.f32.mrf.mxu0  ;;  %v4278_v20 = vpop.f32.mrf.mxu1  ;;  %v9972_v24 = vld [vmem:[#allocation52_spill] sm:$0xff] }
 0x3e5   :  { %v5601_v22 = vpack.c.bf16 %v4742_v25, %v4741_v55  ;;  %v5578_v42 = vpack.c.bf16 %v4704_v49, %v4703_v56  ;;  %v4667_v23 = vadd.f32 %v9154_v60, %v4491_v41  ;;  %v4629_v34 = vadd.f32 %v9026_v7, %v4453_v58  ;;  %v9973_v56 = vld [vmem:[#allocation5_spill] sm:$0xff]  ;;  %v9201_v41 = vpop.permute.xlu0 %4598 }
 0x3e6   :  { %v4708_v9 = vmax.f32 %v4628_v50, 0.0  ;;  %v4746_v57 = vmax.f32 %v4666_v30, 0.0  ;;  %v4495_v16 = vadd.f32 %v4205_v43, %v8940_v53  ;;  %v4457_v61 = vadd.f32 %v4278_v20, %v9972_v24  ;;  %v4207_v27 = vpop.f32.mrf.mxu0  ;;  %v4280_v33 = vpop.f32.mrf.mxu1  ;;  %v9974_v55 = vld [vmem:[#allocation9_spill] sm:$0xff] }
 0x3e7   :  { %5056 = vst [vmem:[%s9436_s3 + $0xdc] sm:$0xff] %v5601_v22  ;;  %5033 = vst [vmem:[%s9436_s3 + $0x44] sm:$0xff] %v5578_v42  ;;  %v4747_v0 = vmax.f32 %v4667_v23, 0.0  ;;  %v4709_v18 = vmax.f32 %v4629_v34, 0.0  ;;  %v4496_v10 = vadd.f32 %v4207_v27, %v9125_v3  ;;  %v4458_v54 = vadd.f32 %v4280_v33, %v8860_v2  ;;  %v9976_v23 = vld [vmem:[#allocation11_spill] sm:$0xff]  ;;  %v9977_v34 = vld [vmem:[#allocation13_spill] sm:$0xff] }
 0x3e8   :  { %v9191_v53 = vadd.f32 %v8984_v31, %v9973_v56  ;;  %v9195_v52 = vadd.f32 %v8992_v14, %v9974_v55  ;;  %v4633_v45 = vadd.f32 %v9034_v37, %v4457_v61  ;;  %v4671_v32 = vadd.f32 %v9177_v1, %v4495_v16  ;;  %v4211_v62 = vpop.f32.mrf.mxu0  ;;  %v4284_v19 = vpop.f32.mrf.mxu1  ;;  %v9975_v14 = vld [vmem:[#allocation49_spill] sm:$0xff] }
 0x3e9   :  { %v5604_v25 = vpack.c.bf16 %v4747_v0, %v4746_v57  ;;  %v5581_v49 = vpack.c.bf16 %v4709_v18, %v4708_v9  ;;  %v4672_v3 = vadd.f32 %v9177_v1, %v4496_v10  ;;  %v4634_v2 = vadd.f32 %v9034_v37, %v4458_v54  ;;  %v9225_v0 = vpop.permute.xlu1 %4603  ;;  %v9978_v10 = vld [vmem:[#allocation60_spill] sm:$0xff] }
 0x3ea   :  { %v4713_v31 = vmax.f32 %v4633_v45, 0.0  ;;  %v4751_v58 = vmax.f32 %v4671_v32, 0.0  ;;  %v4500_v21 = vadd.f32 %v4211_v62, %v8951_v4  ;;  %v4462_v29 = vadd.f32 %v4284_v19, %v9975_v14  ;;  %v4213_v50 = vpop.f32.mrf.mxu0  ;;  %v4286_v30 = vpop.f32.mrf.mxu1 }
 0x3eb   :  { %5059 = vst [vmem:[%s9436_s3 + $0xf0] sm:$0xff] %v5604_v25  ;;  %5036 = vst [vmem:[%s9436_s3 + $0x58] sm:$0xff] %v5581_v49  ;;  %v4752_v43 = vmax.f32 %v4672_v3, 0.0  ;;  %v4714_v20 = vmax.f32 %v4634_v2, 0.0  ;;  %v4501_v22 = vadd.f32 %v4213_v50, %v9144_v46  ;;  %v4463_v42 = vadd.f32 %v4286_v30, %v8871_v51  ;;  %v9980_v25 = vld [vmem:[#allocation51_spill] sm:$0xff] }
 0x3ec   :  { %v9215_v4 = vadd.f32 %v8995_v28, %v9976_v23  ;;  %v9219_v9 = vadd.f32 %v9001_v8, %v9977_v34  ;;  %v4638_v57 = vadd.f32 %v9054_v35, %v4462_v29  ;;  %v4676_v16 = vadd.f32 %v9201_v41, %v4500_v21  ;;  %v4215_v24 = vpop.f32.mrf.mxu0  ;;  %v4288_v61 = vpop.f32.mrf.mxu1  ;;  %v9979_v8 = vld [vmem:[#allocation26_spill] sm:$0xff]  ;;  %v9981_v3 = vld [vmem:[#allocation15_spill] sm:$0xff] }
 0x3ed   :  { %v5607_v27 = vpack.c.bf16 %v4752_v43, %v4751_v58  ;;  %v5584_v33 = vpack.c.bf16 %v4714_v20, %v4713_v31  ;;  %v4677_v46 = vadd.f32 %v9201_v41, %v4501_v22  ;;  %v4639_v51 = vadd.f32 %v9054_v35, %v4463_v42  ;;  %v9982_v31 = vld [vmem:[#allocation17_spill] sm:$0xff]  ;;  %v9983_v58 = vld [vmem:[#allocation4_spill] sm:$0xff] }
 0x3ee   :  { %v4718_v28 = vmax.f32 %v4638_v57, 0.0  ;;  %v4756_v18 = vmax.f32 %v4676_v16, 0.0  ;;  %v4505_v54 = vadd.f32 %v4215_v24, %v9978_v10  ;;  %v4467_v56 = vadd.f32 %v4288_v61, %v9979_v8  ;;  %v4217_v55 = vpop.f32.mrf.mxu0  ;;  %v4290_v45 = vpop.f32.mrf.mxu1  ;;  %v9988_v10 = vld [vmem:[#allocation63_spill] sm:$0xff] }
 0x3ef   :  { %5062 = vst [vmem:[%s9436_s3 + $0x104] sm:$0xff] %v5607_v27  ;;  %5039 = vst [vmem:[%s9436_s3 + $0x6c] sm:$0xff] %v5584_v33  ;;  %v4757_v32 = vmax.f32 %v4677_v46, 0.0  ;;  %v4719_v62 = vmax.f32 %v4639_v51, 0.0  ;;  %v4506_v19 = vadd.f32 %v4217_v55, %v9148_v40  ;;  %v4468_v49 = vadd.f32 %v4290_v45, %v9980_v25  ;;  %v9985_v33 = vld [vmem:[#allocation27_spill] sm:$0xff] }
 0x3f0   :  { %v9239_v2 = vadd.f32 %v9009_v48, %v9981_v3  ;;  %v9243_v21 = vadd.f32 %v9983_v58, %v9982_v31  ;;  %v4643_v14 = vadd.f32 %v9062_v15, %v4467_v56  ;;  %v4681_v29 = vadd.f32 %v9225_v0, %v4505_v54  ;;  %v4294_v50 = vpop.f32.mrf.mxu1  ;;  %v5845_v30 = vpop.f32.mrf.mxu0  ;;  %v9984_v48 = vld [vmem:[#allocation62_spill] sm:$0xff] }
 0x3f1   :  { %v5610_v43 = vpack.c.bf16 %v4757_v32, %v4756_v18  ;;  %v5587_v20 = vpack.c.bf16 %v4719_v62, %v4718_v28  ;;  %v4682_v40 = vadd.f32 %v9225_v0, %v4506_v19  ;;  %v4644_v22 = vadd.f32 %v9062_v15, %v4468_v49  ;;  %v9986_v28 = vld [vmem:[#allocation64_spill] sm:$0xff] }
 0x3f2   :  { %v4723_v42 = vmax.f32 %v4643_v14, 0.0  ;;  %v4761_v23 = vmax.f32 %v4681_v29, 0.0  ;;  %v4472_v34 = vadd.f32 %v4294_v50, %v9984_v48  ;;  %v4444_v57 = vadd.f32 %v5845_v30, %v9167_v38  ;;  %v4296_v16 = vpop.f32.mrf.mxu1  ;;  %v4367_v24 = vpop.f32.mrf.mxu0  ;;  %v9987_v38 = vld [vmem:[#allocation33_spill] sm:$0xff]  ;;  %v9990_v50 = vld [vmem:[#allocation10_spill] sm:$0xff] }
 0x3f3   :  { %5065 = vst [vmem:[%s9436_s3 + $0x118] sm:$0xff] %v5610_v43  ;;  %5042 = vst [vmem:[%s9436_s3 + $0x80] sm:$0xff] %v5587_v20  ;;  %v4762_v61 = vmax.f32 %v4682_v40, 0.0  ;;  %v4724_v27 = vmax.f32 %v4644_v22, 0.0  ;;  %v4473_v46 = vadd.f32 %v4296_v16, %v9985_v33  ;;  %v4434_v51 = vadd.f32 %v4367_v24, %v9171_v17  ;;  %v9991_v43 = vld [vmem:[#allocation19_spill] sm:$0xff]  ;;  %v9992_v24 = vld [vmem:[#allocation61_spill] sm:$0xff] }
 0x3f4   :  { %v9261_v18 = vadd.f32 %v9021_v44, %v9986_v28  ;;  %v9265_v54 = vadd.f32 %v9988_v10, %v9987_v38  ;;  %v4648_v8 = vadd.f32 %v9077_v36, %v4472_v34  ;;  %v4620_v56 = vadd.f32 %v8990_v63, %v4444_v57  ;;  %v4298_v55 = vpop.f32.mrf.mxu1  ;;  %v5846_v45 = vpop.f32.mrf.mxu0  ;;  %v9989_v44 = vld [vmem:[#allocation65_spill] sm:$0xff]  ;;  %v9994_v10 = vld [vmem:[#allocation20_spill] sm:$0xff] }
 0x3f5   :  { %v5613_v32 = vpack.c.bf16 %v4762_v61, %v4761_v23  ;;  %v5590_v62 = vpack.c.bf16 %v4724_v27, %v4723_v42  ;;  %v4649_v19 = vadd.f32 %v9077_v36, %v4473_v46  ;;  %v4610_v17 = vadd.f32 %v8972_v47, %v4434_v51  ;;  %v9993_v51 = vld [vmem:[#allocation67_spill] sm:$0xff] }
 0x3f6   :  { %v4728_v25 = vmax.f32 %v4648_v8, 0.0  ;;  %v4700_v49 = vmax.f32 %v4620_v56, 0.0  ;;  %v4477_v3 = vadd.f32 %v4298_v55, %v9989_v44  ;;  %v4449_v31 = vadd.f32 %v5846_v45, %v9191_v53  ;;  %v4300_v58 = vpop.f32.mrf.mxu1  ;;  %v4370_v14 = vpop.f32.mrf.mxu0  ;;  %v9995_v8 = vld [vmem:[#allocation6_spill] sm:$0xff] }
 0x3f7   :  { %5068 = vst [vmem:[%s9436_s3 + $0x12c] sm:$0xff] %v5613_v32  ;;  %5045 = vst [vmem:[%s9436_s3 + $0x94] sm:$0xff] %v5590_v62  ;;  %v4729_v63 = vmax.f32 %v4649_v19, 0.0  ;;  %v4690_v29 = vmax.f32 %v4610_v17, 0.0  ;;  %v4478_v47 = vadd.f32 %v4300_v58, %v9990_v50  ;;  %v4439_v30 = vadd.f32 %v4370_v14, %v9195_v52 }
 0x3f8   :  { %v9283_v20 = vadd.f32 %v9037_v11, %v9991_v43  ;;  %v5576_v53 = vpack.c.bf16 %v4700_v49, %v4700_v49  ;;  %v4653_v40 = vadd.f32 %v9094_v12, %v4477_v3  ;;  %v4625_v22 = vadd.f32 %v9006_v26, %v4449_v31  ;;  %v4304_v42 = vpop.f32.mrf.mxu1  ;;  %v5849_v23 = vpop.f32.mrf.mxu0  ;;  %v9996_v3 = vld [vmem:[#allocation56_spill] sm:$0xff] }
 0x3f9   :  { %v5593_v48 = vpack.c.bf16 %v4729_v63, %v4728_v25  ;;  %v5570_v34 = vpack.c.bf16 %v4690_v29, %v4690_v29  ;;  %v4654_v57 = vadd.f32 %v9094_v12, %v4478_v47  ;;  %v4615_v16 = vadd.f32 %v8982_v39, %v4439_v30  ;;  %v9997_v29 = vld [vmem:[#allocation28_spill] sm:$0xff]  ;;  %v9998_v30 = vld [vmem:[#allocation22_spill] sm:$0xff] }
 0x3fa   :  { %5031 = vst.msk [vmem:[%s9436_s3 + $0x38] sm:$0xf] %vm5024_vm10, %v5576_v53  ;;  %v4733_v11 = vmax.f32 %v4653_v40, 0.0  ;;  %v4705_v52 = vmax.f32 %v4625_v22, 0.0  ;;  %v4482_v61 = vadd.f32 %v4304_v42, %v9992_v24  ;;  %v4464_v27 = vadd.f32 %v5849_v23, %v9215_v4  ;;  %v4306_v26 = vpop.f32.mrf.mxu1  ;;  %v4383_v33 = vpop.f32.mrf.mxu0 }
 0x3fb   :  { %5048 = vst [vmem:[%s9436_s3 + $0xa8] sm:$0xff] %v5593_v48  ;;  %5025 = vst.msk [vmem:[%s9436_s3 + $0x10] sm:$0xf] %vm5024_vm10, %v5570_v34  ;;  %v4734_v39 = vmax.f32 %v4654_v57, 0.0  ;;  %v4695_v46 = vmax.f32 %v4615_v16, 0.0  ;;  %v4483_v28 = vadd.f32 %v4306_v26, %v9993_v51  ;;  %v4454_v38 = vadd.f32 %v4383_v33, %v9219_v9  ;;  %v9999_v16 = vld [vmem:[#allocation57_spill] sm:$0xff] }
 0x3fc   :  { %v9306_v4 = vadd.f32 %v9995_v8, %v9994_v10  ;;  %v5579_v56 = vpack.c.bf16 %v4705_v52, %v4705_v52  ;;  %v4658_v55 = vadd.f32 %v9110_v5, %v4482_v61  ;;  %v4640_v45 = vadd.f32 %v9054_v35, %v4464_v27  ;;  %v4308_v32 = vpop.f32.mrf.mxu1  ;;  %v5850_v62 = vpop.f32.mrf.mxu0  ;;  %v10000_v27 = vld [vmem:[#allocation66_spill] sm:$0xff] }
 0x3fd   :  { %v5596_v19 = vpack.c.bf16 %v4734_v39, %v4733_v11  ;;  %v5573_v17 = vpack.c.bf16 %v4695_v46, %v4695_v46  ;;  %v4659_v25 = vadd.f32 %v9110_v5, %v4483_v28  ;;  %v4630_v49 = vadd.f32 %v9026_v7, %v4454_v38  ;;  %v10001_v39 = vld [vmem:[#allocation23_spill] sm:$0xff]  ;;  %v10002_v46 = vld [vmem:[#allocation8_spill] sm:$0xff] }
 0x3fe   :  { %5034 = vst.msk [vmem:[%s9436_s3 + $0x4c] sm:$0xf] %vm5024_vm10, %v5579_v56  ;;  %v4738_v9 = vmax.f32 %v4658_v55, 0.0  ;;  %v4720_v44 = vmax.f32 %v4640_v45, 0.0  ;;  %v4487_v31 = vadd.f32 %v4308_v32, %v9996_v3  ;;  %v4469_v58 = vadd.f32 %v5850_v62, %v9239_v2  ;;  %v4310_v35 = vpop.f32.mrf.mxu1  ;;  %v4386_v14 = vpop.f32.mrf.mxu0 }
 0x3ff   :  { %5051 = vst [vmem:[%s9436_s3 + $0xbc] sm:$0xff] %v5596_v19  ;;  %5028 = vst.msk [vmem:[%s9436_s3 + $0x24] sm:$0xf] %vm5024_vm10, %v5573_v17  ;;  %v4739_v7 = vmax.f32 %v4659_v25, 0.0  ;;  %v4710_v63 = vmax.f32 %v4630_v49, 0.0  ;;  %v4488_v50 = vadd.f32 %v4310_v35, %v9997_v29  ;;  %v4459_v47 = vadd.f32 %v4386_v14, %v9243_v21  ;;  %v10003_v19 = vld [vmem:[#allocation29_spill] sm:$0xff] }
 0x400   :  { %v3987_v2 = vadd.f32 %v9049_v13, %v9998_v30  ;;  %v5588_v43 = vpack.c.bf16 %v4720_v44, %v4720_v44  ;;  %v4663_v53 = vadd.f32 %v9131_v6, %v4487_v31  ;;  %v4645_v40 = vadd.f32 %v9062_v15, %v4469_v58  ;;  %v4314_v22 = vpop.f32.mrf.mxu1  ;;  %v5853_v42 = vpop.f32.mrf.mxu0  ;;  %v10004_v44 = vld [vmem:[#allocation58_spill] sm:$0xff] }
 0x401   :  { %v5599_v23 = vpack.c.bf16 %v4739_v7, %v4738_v9  ;;  %v5582_v48 = vpack.c.bf16 %v4710_v63, %v4710_v63  ;;  %v4664_v34 = vadd.f32 %v9131_v6, %v4488_v50  ;;  %v4635_v57 = vadd.f32 %v9034_v37, %v4459_v47  ;;  %v10005_v58 = vld [vmem:[#allocation70_spill] sm:$0xff] }
 0x402   :  { %5043 = vst.msk [vmem:[%s9436_s3 + $0x88] sm:$0xf] %vm5024_vm10, %v5588_v43  ;;  %v4743_v21 = vmax.f32 %v4663_v53, 0.0  ;;  %v4725_v13 = vmax.f32 %v4645_v40, 0.0  ;;  %v4492_v11 = vadd.f32 %v4314_v22, %v9999_v16  ;;  %v4484_v52 = vadd.f32 %v5853_v42, %v9261_v18  ;;  %v4316_v15 = vpop.f32.mrf.mxu1  ;;  %v4399_v24 = vpop.f32.mrf.mxu0  ;;  %v10006_v53 = vld [vmem:[#allocation30_spill] sm:$0xff] }
 0x403   :  { %5054 = vst [vmem:[%s9436_s3 + $0xd0] sm:$0xff] %v5599_v23  ;;  %5037 = vst.msk [vmem:[%s9436_s3 + $0x60] sm:$0xf] %vm5024_vm10, %v5582_v48  ;;  %v4744_v37 = vmax.f32 %v4664_v34, 0.0  ;;  %v4715_v61 = vmax.f32 %v4635_v57, 0.0  ;;  %v4493_v26 = vadd.f32 %v4316_v15, %v10000_v27  ;;  %v4474_v33 = vadd.f32 %v4399_v24, %v9265_v54  ;;  %v10007_v48 = vld [vmem:[#allocation31_spill] sm:$0xff] }
 0x404   :  { %v3977_v18 = vadd.f32 %v10002_v46, %v10001_v39  ;;  %v5591_v51 = vpack.c.bf16 %v4725_v13, %v4725_v13  ;;  %v4668_v28 = vadd.f32 %v9154_v60, %v4492_v11  ;;  %v4660_v38 = vadd.f32 %v9110_v5, %v4484_v52  ;;  %v4318_v10 = vpop.f32.mrf.mxu1  ;;  %v5854_v8 = vpop.f32.mrf.mxu0  ;;  %v10009_v13 = vld [vmem:[#allocation14_spill] sm:$0xff]  ;;  %v10010_v46 = vld [vmem:[#allocation32_spill] sm:$0xff] }
 0x405   :  { %v5602_v56 = vpack.c.bf16 %v4744_v37, %v4743_v21  ;;  %v5585_v55 = vpack.c.bf16 %v4715_v61, %v4715_v61  ;;  %v4669_v45 = vadd.f32 %v9154_v60, %v4493_v26  ;;  %v4650_v32 = vadd.f32 %v9077_v36, %v4474_v33  ;;  %v10008_v21 = vld [vmem:[#allocation55_spill] sm:$0xff] }
 0x406   :  { %5046 = vst.msk [vmem:[%s9436_s3 + $0x9c] sm:$0xf] %vm5024_vm10, %v5591_v51  ;;  %v4748_v54 = vmax.f32 %v4668_v28, 0.0  ;;  %v4740_v62 = vmax.f32 %v4660_v38, 0.0  ;;  %v4497_v17 = vadd.f32 %v4318_v10, %v10003_v19  ;;  %v4489_v25 = vadd.f32 %v5854_v8, %v9283_v20  ;;  %v4320_v5 = vpop.f32.mrf.mxu1  ;;  %v4402_v49 = vpop.f32.mrf.mxu0  ;;  %v10011_v10 = vld [vmem:[#allocation2_spill] sm:$0xff] }
 0x407   :  { %5057 = vst [vmem:[%s9436_s3 + $0xe4] sm:$0xff] %v5602_v56  ;;  %5040 = vst.msk [vmem:[%s9436_s3 + $0x74] sm:$0xf] %vm5024_vm10, %v5585_v55  ;;  %v4749_v36 = vmax.f32 %v4669_v45, 0.0  ;;  %v4730_v9 = vmax.f32 %v4650_v32, 0.0  ;;  %v4498_v3 = vadd.f32 %v4320_v5, %v10004_v44  ;;  %v4479_v31 = vadd.f32 %v4402_v49, %v9306_v4 }
 0x408   :  { %v3992_v20 = vadd.f32 %v9065_v59, %v10005_v58  ;;  %v5600_v35 = vpack.c.bf16 %v4740_v62, %v4740_v62  ;;  %v4673_v14 = vadd.f32 %v9177_v1, %v4497_v17  ;;  %v4665_v7 = vadd.f32 %v9131_v6, %v4489_v25  ;;  %v4324_v63 = vpop.f32.mrf.mxu1  ;;  %v5857_v29 = vpop.f32.mrf.mxu0 }
 0x409   :  { %v5605_v50 = vpack.c.bf16 %v4749_v36, %v4748_v54  ;;  %v5594_v47 = vpack.c.bf16 %v4730_v9, %v4730_v9  ;;  %v4674_v30 = vadd.f32 %v9177_v1, %v4498_v3  ;;  %v4655_v43 = vadd.f32 %v9094_v12, %v4479_v31 }
 0x40a   :  { %5055 = vst.msk [vmem:[%s9436_s3 + $0xd8] sm:$0xf] %vm5024_vm10, %v5600_v35  ;;  %v4753_v4 = vmax.f32 %v4673_v14, 0.0  ;;  %v4745_v59 = vmax.f32 %v4665_v7, 0.0  ;;  %v4502_v40 = vadd.f32 %v4324_v63, %v10006_v53  ;;  %v4504_v22 = vadd.f32 %v5857_v29, %v3987_v2  ;;  %v4326_v42 = vpop.f32.mrf.mxu1  ;;  %v4415_v6 = vpop.f32.mrf.mxu0 }
 0x40b   :  { %5060 = vst [vmem:[%s9436_s3 + $0xf8] sm:$0xff] %v5605_v50  ;;  %5049 = vst.msk [vmem:[%s9436_s3 + $0xb0] sm:$0xf] %vm5024_vm10, %v5594_v47  ;;  %v4754_v12 = vmax.f32 %v4674_v30, 0.0  ;;  %v4735_v23 = vmax.f32 %v4655_v43, 0.0  ;;  %v4503_v34 = vadd.f32 %v4326_v42, %v10007_v48  ;;  %v4494_v57 = vadd.f32 %v4415_v6, %v3977_v18 }
 0x40c   :  { %v3982_v16 = vadd.f32 %v10009_v13, %v10008_v21  ;;  %v5603_v2 = vpack.c.bf16 %v4745_v59, %v4745_v59  ;;  %v4678_v11 = vadd.f32 %v9201_v41, %v4502_v40  ;;  %v4680_v52 = vadd.f32 %v9201_v41, %v4504_v22  ;;  %v4328_v15 = vpop.f32.mrf.mxu1  ;;  %v5858_v24 = vpop.f32.mrf.mxu0 }
 0x40d   :  { %v5608_v37 = vpack.c.bf16 %v4754_v12, %v4753_v4  ;;  %v5597_v61 = vpack.c.bf16 %v4735_v23, %v4735_v23  ;;  %v4679_v27 = vadd.f32 %v9201_v41, %v4503_v34  ;;  %v4670_v26 = vadd.f32 %v9154_v60, %v4494_v57 }
 0x40e   :  { %5058 = vst.msk [vmem:[%s9436_s3 + $0xec] sm:$0xf] %vm5024_vm10, %v5603_v2  ;;  %v4758_v33 = vmax.f32 %v4678_v11, 0.0  ;;  %v4760_v39 = vmax.f32 %v4680_v52, 0.0  ;;  %v4507_v18 = vadd.f32 %v4328_v15, %v10010_v46  ;;  %v4509_v51 = vadd.f32 %v5858_v24, %v3992_v20  ;;  %v4330_v28 = vpop.f32.mrf.mxu1  ;;  %v4418_v38 = vpop.f32.mrf.mxu0 }
 0x40f   :  { %5063 = vst [vmem:[%s9436_s3 + $0x10c] sm:$0xff] %v5608_v37  ;;  %5052 = vst.msk [vmem:[%s9436_s3 + $0xc4] sm:$0xf] %vm5024_vm10, %v5597_v61  ;;  %v4759_v60 = vmax.f32 %v4679_v27, 0.0  ;;  %v4750_v41 = vmax.f32 %v4670_v26, 0.0  ;;  %v4508_v8 = vadd.f32 %v4330_v28, %v10011_v10  ;;  %v4499_v56 = vadd.f32 %v4418_v38, %v3982_v16 }
 0x410   :  { %v5612_v55 = vpack.c.bf16 %v4760_v39, %v4760_v39  ;;  %v4683_v45 = vadd.f32 %v9225_v0, %v4507_v18  ;;  %v4685_v32 = vadd.f32 %v9225_v0, %v4509_v51 }
 0x411   :  { %v5611_v54 = vpack.c.bf16 %v4759_v60, %v4758_v33  ;;  %v5606_v62 = vpack.c.bf16 %v4750_v41, %v4750_v41  ;;  %v4684_v19 = vadd.f32 %v9225_v0, %v4508_v8  ;;  %v4675_v17 = vadd.f32 %v9177_v1, %v4499_v56 }
 0x412   :  { %5067 = vst.msk [vmem:[%s9436_s3 + $0x128] sm:$0xf] %vm5024_vm10, %v5612_v55  ;;  %v4765_v25 = vmax.f32 %v4685_v32, 0.0  ;;  %v4763_v5 = vmax.f32 %v4683_v45, 0.0 }
 0x413   :  { %5066 = vst [vmem:[%s9436_s3 + $0x120] sm:$0xff] %v5611_v54  ;;  %5061 = vst.msk [vmem:[%s9436_s3 + $0x100] sm:$0xf] %vm5024_vm10, %v5606_v62  ;;  %v4764_v49 = vmax.f32 %v4684_v19, 0.0  ;;  %v4755_v0 = vmax.f32 %v4675_v17, 0.0 }
 0x414   :  { %v5615_v36 = vpack.c.bf16 %v4765_v25, %v4765_v25 }
 0x415   :  { %v5614_v1 = vpack.c.bf16 %v4764_v49, %v4763_v5  ;;  %v5609_v9 = vpack.c.bf16 %v4755_v0, %v4755_v0 }
 0x416   :  { %5070 = vst.msk [vmem:[%s9436_s3 + $0x13c] sm:$0xf] %vm5024_vm10, %v5615_v36 }
 0x417   :  { %5069 = vst [vmem:[%s9436_s3 + $0x134] sm:$0xff] %v5614_v1  ;;  %5064 = vst.msk [vmem:[%s9436_s3 + $0x114] sm:$0xf] %vm5024_vm10, %v5609_v9 }

</bundles_post_ra>
